<compile_context>
chip_gen: v5e
topology: v5e:2x2
jax: 0.10.0
libtpu: 0.0.40
codegen_flags: <defaults>
</compile_context>

<pallas_src>
import jax
import jax.numpy as jnp
from jax.experimental import pallas as pl
from jax.experimental.pallas import tpu as pltpu

EPS = 1e-5  # nn.BatchNorm1d default


# ---------------------------------------------------------------------------
# Kernel
# ---------------------------------------------------------------------------
def _projection_kernel(x_ref, w1_ref, gb1_ref, w2_ref, gb2_ref, o_ref):
    j = pl.program_id(0)

    # ---- Linear1 column tile: (B, F) bf16 @ (F, TN) bf16 -> (B, TN) f32 on the MXU ----
    # Linear1 bias omitted: train-mode BatchNorm subtracts the batch mean, which cancels
    # any per-feature constant added by the preceding Linear.
    h = jnp.dot(x_ref[...], w1_ref[...], preferred_element_type=jnp.float32)

    # ---- BatchNorm1d(n_features) on this feature tile: batch stats, centered variance ----
    mu = jnp.mean(h, axis=0, keepdims=True)
    d = h - mu
    var = jnp.mean(d * d, axis=0, keepdims=True)
    scale = gb1_ref[0:1, :] * jax.lax.rsqrt(var + EPS)   # fold gamma into the rsqrt scale
    h = d * scale + gb1_ref[1:2, :]

    # ---- ReLU ----
    h = jnp.maximum(h, 0.0)

    # ---- Linear2 partial product: (B, TN) @ (TN, P), accumulated directly into the ----
    # ---- resident f32 output block (no separate accumulator scratch).              ----
    part = jnp.dot(h.astype(jnp.bfloat16), w2_ref[...],
                   preferred_element_type=jnp.float32)

    @pl.when(j == 0)
    def _first():
        o_ref[...] = part

    @pl.when(j != 0)
    def _accumulate():
        o_ref[...] += part

    # ---- Finalize: BatchNorm1d(projection_dim) in place, last K step only ----
    @pl.when(j == pl.num_programs(0) - 1)
    def _done():
        z = o_ref[...]
        mu2 = jnp.mean(z, axis=0, keepdims=True)
        d2 = z - mu2
        var2 = jnp.mean(d2 * d2, axis=0, keepdims=True)
        scale2 = gb2_ref[0:1, :] * jax.lax.rsqrt(var2 + EPS)
        o_ref[...] = (d2 * scale2 + gb2_ref[1:2, :]).astype(o_ref.dtype)


# ---------------------------------------------------------------------------
# Tiling / VMEM planning
# ---------------------------------------------------------------------------
def _vmem_plan():
    """Returns (working_set_budget_bytes, vmem_limit_bytes) derived from the real device.
    Fallback (query unavailable) assumes the smallest per-core VMEM (v7x, 64 MiB)."""
    cap = 64 * 1024 * 1024
    try:
        cap = int(getattr(pltpu.get_tpu_info(), "vmem_capacity_bytes", cap))
    except Exception:  # pragma: no cover - CPU / interpret fallbacks
        pass
    budget = int(cap * 0.45)  # leave headroom for Mosaic internal scratch & spills
    limit = int(min(cap - 8 * 1024 * 1024, budget + 16 * 1024 * 1024))
    return budget, limit


def _resident_bytes(B, F, P, tn):
    """Full pipeline-resident VMEM for one feature tile of width tn (2 buffers per block)."""
    return (2 * B * F * 2        # x, bf16 (constant index; 2nd buffer idle but allocated)
            + 2 * F * tn * 2     # w1 column tile, bf16, double-buffered
            + 2 * 2 * tn * 4     # [gamma1; beta1] tile, f32
            + 2 * tn * P * 2     # w2 row tile, bf16, double-buffered
            + 2 * 2 * P * 4      # [gamma2; beta2], f32
            + 2 * B * P * 4)     # f32 output / accumulator


def _pick_feature_tile(B, F, P, budget_bytes):
    # Single step (all weights resident) whenever it fits: no K loop, no accumulator RMW,
    # no ~0.35 us/step grid overhead -- this is the right regime for the F=512 default.
    if _resident_bytes(B, F, P, F) <= budget_bytes:
        return F
    # Otherwise the largest 128-aligned divisor of F whose working set fits the budget;
    # >= 2 steps so the contiguous w1-tile DMA pipelines behind the previous tile's compute.
    best = 128
    for tn in range(128, F, 128):
        if F % tn == 0 and _resident_bytes(B, F, P, tn) <= budget_bytes:
            best = max(best, tn)
    return best


def _tile_w1(w1, tile_n):
    """(F, F) -> (n_steps, F, tile_n) with each column tile contiguous in HBM, so the per-step
    weight DMA is one dense read instead of F strided rows of tile_n*2 bytes."""
    F = w1.shape[0]
    n_steps = F // tile_n
    return w1.reshape(F, n_steps, tile_n).transpose(1, 0, 2)


# ---------------------------------------------------------------------------
# Wrapper
# ---------------------------------------------------------------------------
def simclr_projection(x, params, *, tile_n=None):
    """x: (B, n_features) embedding (f32 or bf16). Returns (B, projection_dim) f32.
    For best v6e/v7x MXU utilization prefer B a multiple of 256 (SimCLR's 2N views)."""
    B, F = x.shape
    P = params["w2"].shape[1]
    budget, vmem_limit = _vmem_plan()
    if tile_n is None:
        tile_n = _pick_feature_tile(B, F, P, budget)
    assert F % tile_n == 0, "feature tile must divide F"
    n_steps = F // tile_n
    if n_steps > 1:
        assert tile_n % 128 == 0, "multi-step tiles must be 128-aligned"

    x_bf16 = x.astype(jnp.bfloat16)  # halve the x DMA; matmuls use the bf16 MXU path
    # TODO(synk): in a real training loop, pre-tile w1 once outside the step; here it is a
    #             single small XLA copy per call (and a no-op reshape when n_steps == 1).
    w1_tiled = _tile_w1(params["w1"], tile_n)

    grid_spec = pltpu.PrefetchScalarGridSpec(
        num_scalar_prefetch=0,
        grid=(n_steps,),
        in_specs=[
            # Constant-index blocks: DMA'd once, stay resident across the K grid.
            pl.BlockSpec((B, F), lambda j: (0, 0)),                 # x
            # Contiguous pre-tiled w1: leading dim squeezed, kernel sees (F, tile_n).
            pl.BlockSpec((None, F, tile_n), lambda j: (j, 0, 0)),
            pl.BlockSpec((2, tile_n), lambda j: (0, j)),            # [gamma1; beta1] tile
            pl.BlockSpec((tile_n, P), lambda j: (j, 0)),            # w2 row tile (contiguous)
            pl.BlockSpec((2, P), lambda j: (0, 0)),                 # [gamma2; beta2]
        ],
        out_specs=pl.BlockSpec((B, P), lambda j: (0, 0)),           # resident f32 out/accumulator
    )
    return pl.pallas_call(
        _projection_kernel,
        out_shape=jax.ShapeDtypeStruct((B, P), jnp.float32),
        grid_spec=grid_spec,
        compiler_params=pltpu.CompilerParams(
            dimension_semantics=("arbitrary",),        # K-reduction axis
            vmem_limit_bytes=vmem_limit),
    )(x_bf16, w1_tiled, params["gb1"], params["w2"], params["gb2"])


# ---------------------------------------------------------------------------
# Params / reference
# ---------------------------------------------------------------------------
def init_params(key, n_features, projection_dim):
    """Mirrors nn.Linear init (U(-1/sqrt(fan_in), 1/sqrt(fan_in))) and nn.BatchNorm1d
    (gamma=1, beta=0). Weights stored bf16 for the MXU; gamma/beta packed as (2,F)/(2,P).
    Linear biases kept (f32) only for the reference -- train-mode BatchNorm cancels them."""
    k1, k2, k3, k4 = jax.random.split(key, 4)
    lim = 1.0 / jnp.sqrt(n_features)
    w1 = jax.random.uniform(k1, (n_features, n_features), jnp.float32, -lim, lim)
    b1 = jax.random.uniform(k2, (n_features,), jnp.float32, -lim, lim)
    w2 = jax.random.uniform(k3, (n_features, projection_dim), jnp.float32, -lim, lim)
    b2 = jax.random.uniform(k4, (projection_dim,), jnp.float32, -lim, lim)
    return {
        "w1": w1.astype(jnp.bfloat16),
        "w2": w2.astype(jnp.bfloat16),
        "gb1": jnp.stack([jnp.ones(n_features, jnp.float32),
                          jnp.zeros(n_features, jnp.float32)]),
        "gb2": jnp.stack([jnp.ones(projection_dim, jnp.float32),
                          jnp.zeros(projection_dim, jnp.float32)]),
        "b1": b1,
        "b2": b2,
    }


def _reference(x, p):
    """Full PyTorch train()-mode semantics (including Linear biases, centered batch variance),
    evaluated at the same bf16 matmul-operand precision as the kernel."""
    xb = x.astype(jnp.bfloat16).astype(jnp.float32)
    w1 = p["w1"].astype(jnp.float32)
    w2 = p["w2"].astype(jnp.float32)
    g1, be1 = p["gb1"][0], p["gb1"][1]
    g2, be2 = p["gb2"][0], p["gb2"][1]

    h = xb @ w1 + p["b1"]
    mu = h.mean(0, keepdims=True)
    var = ((h - mu) ** 2).mean(0, keepdims=True)
    h = (h - mu) / jnp.sqrt(var + EPS) * g1 + be1
    h = jnp.maximum(h, 0.0)

    z = h.astype(jnp.bfloat16).astype(jnp.float32) @ w2 + p["b2"]
    mu2 = z.mean(0, keepdims=True)
    var2 = ((z - mu2) ** 2).mean(0, keepdims=True)
    return (z - mu2) / jnp.sqrt(var2 + EPS) * g2 + be2


if __name__ == "__main__":
    # SimCLR trains on 2N views per step; B=256 fills the 256-row MXU on v6e/v7x while
    # staying small.  F/P are the module defaults (n_features=512, projection_dim=128).
    B, N_FEATURES, PROJECTION_DIM = 256, 512, 128

    key = jax.random.PRNGKey(0)
    kx, kp = jax.random.split(key)
    x = jax.random.normal(kx, (B, N_FEATURES), jnp.float32)  # embedding from encoder
    params = init_params(kp, N_FEATURES, PROJECTION_DIM)

    out = jax.block_until_ready(simclr_projection(x, params))
    ref = _reference(x, params)

    assert out.shape == (B, PROJECTION_DIM)
    assert bool(jnp.allclose(out, ref, atol=5e-3, rtol=5e-3)), "mismatch vs JAX reference"

    print("KERNEL_OK")
</pallas_src>

<mosaic_0001>
module attributes {stable_mosaic.version = 11 : i64} {
  func.func @_projection_kernel(%arg0: i32, %arg1: memref<256x512xbf16, #tpu.memory_space<vmem>>, %arg2: memref<1x512x512xbf16, #tpu.memory_space<vmem>>, %arg3: memref<2x512xf32, #tpu.memory_space<vmem>>, %arg4: memref<512x128xbf16, #tpu.memory_space<vmem>>, %arg5: memref<2x128xf32, #tpu.memory_space<vmem>>, %arg6: memref<256x128xf32, #tpu.memory_space<vmem>>) attributes {dimension_semantics = [#tpu.dimension_semantics<arbitrary>], iteration_bounds = array<i64: 1>, scalar_prefetch = 0 : i64, scratch_operands = 0 : i64, tpu.core_type = #tpu.core_type<tc>, window_params = [{pipeline_mode = #tpu.pipeline_mode<synchronous>, transform_indices = @transform_0, window_bounds = array<i64: 256, 512>}, {transform_indices = @transform_1, window_bounds = array<i64: 1, 512, 512>}, {transform_indices = @transform_2, window_bounds = array<i64: 2, 512>}, {transform_indices = @transform_3, window_bounds = array<i64: 512, 128>}, {pipeline_mode = #tpu.pipeline_mode<synchronous>, transform_indices = @transform_4, window_bounds = array<i64: 2, 128>}, {pipeline_mode = #tpu.pipeline_mode<synchronous>, transform_indices = @transform_5, window_bounds = array<i64: 256, 128>}]} {
    %c0 = arith.constant 0 : index
    %c0_0 = arith.constant 0 : index
    %0 = vector.load %arg1[%c0, %c0_0] : memref<256x512xbf16, #tpu.memory_space<vmem>>, vector<256x512xbf16>
    %c0_1 = arith.constant 0 : index
    %c0_2 = arith.constant 0 : index
    %c0_3 = arith.constant 0 : index
    %1 = vector.load %arg2[%c0_1, %c0_2, %c0_3] : memref<1x512x512xbf16, #tpu.memory_space<vmem>>, vector<1x512x512xbf16>
    %2 = vector.shape_cast %1 : vector<1x512x512xbf16> to vector<512x512xbf16>
    %cst = arith.constant dense<0.000000e+00> : vector<256x512xf32>
    %3 = tpu.matmul %0, %2, %cst {dimension_numbers = #tpu.dot_dimension_numbers<[1], [0], [0], [1], [0, 0, 1, 1], [], []>} : vector<256x512xbf16>, vector<512x512xbf16>, vector<256x512xf32> -> vector<256x512xf32>
    %cst_4 = arith.constant dense<0.000000e+00> : vector<512xf32>
    %4 = vector.multi_reduction <add>, %3, %cst_4 [0] : vector<256x512xf32> to vector<512xf32>
    %5 = vector.shape_cast %4 : vector<512xf32> to vector<1x512xf32>
    %cst_5 = arith.constant 2.560000e+02 : f32
    %6 = vector.broadcast %cst_5 : f32 to vector<1x512xf32>
    %7 = arith.divf %5, %6 : vector<1x512xf32>
    %8 = vector.broadcast %7 : vector<1x512xf32> to vector<256x512xf32>
    %9 = arith.subf %3, %8 : vector<256x512xf32>
    %10 = arith.mulf %9, %9 : vector<256x512xf32>
    %cst_6 = arith.constant dense<0.000000e+00> : vector<512xf32>
    %11 = vector.multi_reduction <add>, %10, %cst_6 [0] : vector<256x512xf32> to vector<512xf32>
    %12 = vector.shape_cast %11 : vector<512xf32> to vector<1x512xf32>
    %cst_7 = arith.constant 2.560000e+02 : f32
    %13 = vector.broadcast %cst_7 : f32 to vector<1x512xf32>
    %14 = arith.divf %12, %13 : vector<1x512xf32>
    %c0_8 = arith.constant 0 : index
    %c0_9 = arith.constant 0 : index
    %15 = vector.load %arg3[%c0_8, %c0_9] : memref<2x512xf32, #tpu.memory_space<vmem>>, vector<1x512xf32>
    %cst_10 = arith.constant 9.99999974E-6 : f32
    %16 = vector.broadcast %cst_10 : f32 to vector<1x512xf32>
    %17 = arith.addf %14, %16 : vector<1x512xf32>
    %18 = math.rsqrt %17 : vector<1x512xf32>
    %19 = arith.mulf %15, %18 : vector<1x512xf32>
    %20 = vector.broadcast %19 : vector<1x512xf32> to vector<256x512xf32>
    %21 = arith.mulf %9, %20 : vector<256x512xf32>
    %c1 = arith.constant 1 : index
    %c0_11 = arith.constant 0 : index
    %22 = vector.load %arg3[%c1, %c0_11] : memref<2x512xf32, #tpu.memory_space<vmem>>, vector<1x512xf32>
    %23 = vector.broadcast %22 : vector<1x512xf32> to vector<256x512xf32>
    %24 = arith.addf %21, %23 : vector<256x512xf32>
    %cst_12 = arith.constant 0.000000e+00 : f32
    %25 = vector.broadcast %cst_12 : f32 to vector<256x512xf32>
    %26 = arith.maximumf %24, %25 : vector<256x512xf32>
    %27 = arith.truncf %26 : vector<256x512xf32> to vector<256x512xbf16>
    %c0_13 = arith.constant 0 : index
    %c0_14 = arith.constant 0 : index
    %28 = vector.load %arg4[%c0_13, %c0_14] : memref<512x128xbf16, #tpu.memory_space<vmem>>, vector<512x128xbf16>
    %cst_15 = arith.constant dense<0.000000e+00> : vector<256x128xf32>
    %29 = tpu.matmul %27, %28, %cst_15 {dimension_numbers = #tpu.dot_dimension_numbers<[1], [0], [0], [1], [0, 0, 1, 1], [], []>} : vector<256x512xbf16>, vector<512x128xbf16>, vector<256x128xf32> -> vector<256x128xf32>
    %c0_i32 = arith.constant 0 : i32
    %30 = arith.cmpi eq, %arg0, %c0_i32 : i32
    %31 = arith.extui %30 : i1 to i32
    %c0_i32_16 = arith.constant 0 : i32
    %32 = arith.cmpi ne, %31, %c0_i32_16 : i32
    scf.if %32 {
      %c0_21 = arith.constant 0 : index
      %c0_22 = arith.constant 0 : index
      %39 = vector.load %arg6[%c0_21, %c0_22] : memref<256x128xf32, #tpu.memory_space<vmem>>, vector<256x128xf32>
      tpu.vector_store %arg6[%c0_21, %c0_22], %29 {strides = array<i32>} : memref<256x128xf32, #tpu.memory_space<vmem>>, vector<256x128xf32>,
    } else {
    }
    %c0_i32_17 = arith.constant 0 : i32
    %33 = arith.cmpi ne, %arg0, %c0_i32_17 : i32
    %34 = arith.extui %33 : i1 to i32
    %c0_i32_18 = arith.constant 0 : i32
    %35 = arith.cmpi ne, %34, %c0_i32_18 : i32
    scf.if %35 {
      %c0_21 = arith.constant 0 : index
      %c0_22 = arith.constant 0 : index
      %39 = vector.load %arg6[%c0_21, %c0_22] : memref<256x128xf32, #tpu.memory_space<vmem>>, vector<256x128xf32>
      %40 = arith.addf %39, %29 : vector<256x128xf32>
      %c0_23 = arith.constant 0 : index
      %c0_24 = arith.constant 0 : index
      %41 = vector.load %arg6[%c0_23, %c0_24] : memref<256x128xf32, #tpu.memory_space<vmem>>, vector<256x128xf32>
      tpu.vector_store %arg6[%c0_23, %c0_24], %40 {strides = array<i32>} : memref<256x128xf32, #tpu.memory_space<vmem>>, vector<256x128xf32>,
    } else {
    }
    %c0_i32_19 = arith.constant 0 : i32
    %36 = arith.cmpi eq, %arg0, %c0_i32_19 : i32
    %37 = arith.extui %36 : i1 to i32
    %c0_i32_20 = arith.constant 0 : i32
    %38 = arith.cmpi ne, %37, %c0_i32_20 : i32
    scf.if %38 {
      %c0_21 = arith.constant 0 : index
      %c0_22 = arith.constant 0 : index
      %39 = vector.load %arg6[%c0_21, %c0_22] : memref<256x128xf32, #tpu.memory_space<vmem>>, vector<256x128xf32>
      %cst_23 = arith.constant dense<0.000000e+00> : vector<128xf32>
      %40 = vector.multi_reduction <add>, %39, %cst_23 [0] : vector<256x128xf32> to vector<128xf32>
      %41 = vector.shape_cast %40 : vector<128xf32> to vector<1x128xf32>
      %cst_24 = arith.constant 2.560000e+02 : f32
      %42 = vector.broadcast %cst_24 : f32 to vector<1x128xf32>
      %43 = arith.divf %41, %42 : vector<1x128xf32>
      %44 = vector.broadcast %43 : vector<1x128xf32> to vector<256x128xf32>
      %45 = arith.subf %39, %44 : vector<256x128xf32>
      %46 = arith.mulf %45, %45 : vector<256x128xf32>
      %cst_25 = arith.constant dense<0.000000e+00> : vector<128xf32>
      %47 = vector.multi_reduction <add>, %46, %cst_25 [0] : vector<256x128xf32> to vector<128xf32>
      %48 = vector.shape_cast %47 : vector<128xf32> to vector<1x128xf32>
      %cst_26 = arith.constant 2.560000e+02 : f32
      %49 = vector.broadcast %cst_26 : f32 to vector<1x128xf32>
      %50 = arith.divf %48, %49 : vector<1x128xf32>
      %c0_27 = arith.constant 0 : index
      %c0_28 = arith.constant 0 : index
      %51 = vector.load %arg5[%c0_27, %c0_28] : memref<2x128xf32, #tpu.memory_space<vmem>>, vector<1x128xf32>
      %cst_29 = arith.constant 9.99999974E-6 : f32
      %52 = vector.broadcast %cst_29 : f32 to vector<1x128xf32>
      %53 = arith.addf %50, %52 : vector<1x128xf32>
      %54 = math.rsqrt %53 : vector<1x128xf32>
      %55 = arith.mulf %51, %54 : vector<1x128xf32>
      %56 = vector.broadcast %55 : vector<1x128xf32> to vector<256x128xf32>
      %57 = arith.mulf %45, %56 : vector<256x128xf32>
      %c1_30 = arith.constant 1 : index
      %c0_31 = arith.constant 0 : index
      %58 = vector.load %arg5[%c1_30, %c0_31] : memref<2x128xf32, #tpu.memory_space<vmem>>, vector<1x128xf32>
      %59 = vector.broadcast %58 : vector<1x128xf32> to vector<256x128xf32>
      %60 = arith.addf %57, %59 : vector<256x128xf32>
      %c0_32 = arith.constant 0 : index
      %c0_33 = arith.constant 0 : index
      %61 = vector.load %arg6[%c0_32, %c0_33] : memref<256x128xf32, #tpu.memory_space<vmem>>, vector<256x128xf32>
      tpu.vector_store %arg6[%c0_32, %c0_33], %60 {strides = array<i32>} : memref<256x128xf32, #tpu.memory_space<vmem>>, vector<256x128xf32>,
    } else {
    }
    return
  }
  func.func @transform_0(%arg0: i32) -> (i32, i32) {
    %c0_i32 = arith.constant 0 : i32
    %c0_i32_0 = arith.constant 0 : i32
    %c0_i32_1 = arith.constant 0 : i32
    return %c0_i32, %c0_i32_0 : i32, i32
  }
  func.func @transform_1(%arg0: i32) -> (i32, i32, i32) {
    %c0_i32 = arith.constant 0 : i32
    %c0_i32_0 = arith.constant 0 : i32
    %c0_i32_1 = arith.constant 0 : i32
    return %arg0, %c0_i32, %c0_i32_0 : i32, i32, i32
  }
  func.func @transform_2(%arg0: i32) -> (i32, i32) {
    %c0_i32 = arith.constant 0 : i32
    %c0_i32_0 = arith.constant 0 : i32
    return %c0_i32, %arg0 : i32, i32
  }
  func.func @transform_3(%arg0: i32) -> (i32, i32) {
    %c0_i32 = arith.constant 0 : i32
    %c0_i32_0 = arith.constant 0 : i32
    return %arg0, %c0_i32 : i32, i32
  }
  func.func @transform_4(%arg0: i32) -> (i32, i32) {
    %c0_i32 = arith.constant 0 : i32
    %c0_i32_0 = arith.constant 0 : i32
    %c0_i32_1 = arith.constant 0 : i32
    return %c0_i32, %c0_i32_0 : i32, i32
  }
  func.func @transform_5(%arg0: i32) -> (i32, i32) {
    %c0_i32 = arith.constant 0 : i32
    %c0_i32_0 = arith.constant 0 : i32
    %c0_i32_1 = arith.constant 0 : i32
    return %c0_i32, %c0_i32_0 : i32, i32
  }
}

</mosaic_0001>

<bundles_post_ra>
// kernel: tpu_custom_call.1
= control target key start
LH: loop header
LB: loop body
LE: loop exit
PB: predicated region body
PF: predicated region fallthrough
CT: control target
= control target key end

     0   :  { %10 = vsyncpa [#allocation3], 0  ;;  %s8673_s0 = inlined_call_operand.hbm [shape: bf16[256,512], index: 0, kind: input, shape index: {}]   ;;  %s8674_s1 = inlined_call_operand.hbm [shape: bf16[1,512,512], index: 1, kind: input, shape index: {}]   ;;  %s8675_s2 = inlined_call_operand.hbm [shape: f32[2,512], index: 2, kind: input, shape index: {}]   ;;  %s8676_s3 = inlined_call_operand.hbm [shape: bf16[512,128], index: 3, kind: input, shape index: {}]   ;;  %s8677_s4 = inlined_call_operand.vmem [shape: f32[2,128], index: 4, kind: input, shape index: {}]   ;;  %s8678_s5 = inlined_call_operand.hbm [shape: f32[256,128], index: 5, kind: output, shape index: {}]  }
   0x1   :  { %11 = vsyncpa [#allocation6], 0 }
   0x2   :  { %12 = vsyncpa [#allocation9], 0 }
   0x3   :  { %13 = vsyncpa [#allocation4], 0  ;;  %s31_s20 = sshll.u32 %s8674_s1, 4  ;;  %s6082_s21 = smov [#allocation5]   ;;  %s32_s20 = int_to_ptr.hbm [resolvable:$true] %s31_s20 }
   0x4   :  { %s33_s22 = sshll.u32 %s6082_s21, 4  ;;  %s18_s25 = sshll.u32 %s8673_s0, 4  ;;  %s34_s22 = int_to_ptr.vmem [resolvable:$true] %s33_s22  ;;  %s19_s25 = int_to_ptr.hbm [resolvable:$true] %s18_s25 }
   0x5   :  { %s6083_s26 = smov 256   ;;  %s6084_s27 = smov 16  }
   0x6   :  { %39 = dma.hbm_to_vmem [thread:$0]  %s32_s20, 16384, %s34_s22, [#allocation6], %s6083_s26, %s6083_s26, %s6084_s27  }
   0x7   :  { %s6085_s28 = smov [#allocation2]   ;;  %s45_s7 = sshll.u32 %s8675_s2, 4  ;;  %s46_s7 = int_to_ptr.hbm [resolvable:$true] %s45_s7 }
   0x8   :  { %s20_s29 = sshll.u32 %s6085_s28, 4  ;;  %s55_s9 = sshll.u32 %s8676_s3, 4  ;;  %s21_s29 = int_to_ptr.vmem [resolvable:$true] %s20_s29  ;;  %s56_s9 = int_to_ptr.hbm [resolvable:$true] %s55_s9 }
   0x9   :  { %26 = dma.hbm_to_vmem [thread:$0]  %s19_s25, 8192, %s21_s29, [#allocation3], %s6083_s26, %s6083_s26, %s6084_s27  }
   0xa   :  { %s6086_s10 = smov [#allocation7]   ;;  %s6087_s0 = smov [#allocation8]  }
   0xb   :  { %s47_s11 = sshll.u32 %s6086_s10, 4  ;;  %s57_s12 = sshll.u32 %s6087_s0, 4  ;;  %s48_s11 = int_to_ptr.vmem [resolvable:$true] %s47_s11  ;;  %s58_s12 = int_to_ptr.vmem [resolvable:$true] %s57_s12 }
   0xc   :  { %50 = dma.hbm_to_vmem [thread:$0]  %s46_s7, 128, %s48_s11, [#allocation6]  }
   0xd   :  { %s6088_s13 = smov 64   ;;  %s6089_s14 = smov 4  }
   0xe   :  { %63 = dma.hbm_to_vmem [thread:$0]  %s56_s9, 4096, %s58_s12, [#allocation9], %s6088_s13, %s6088_s13, %s6089_s14  }
   0xf   :  { %6074 = dma.done.wait [#allocation3], 8192  }
  0x10   :  { %6075 = vsyncadd [#allocation3], 4294959104 }
  0x11   :  { %6076 = dma.done.wait [#allocation6], 16512  }
  0x12   :  { %6077 = vsyncadd [#allocation6], 4294950784 }
  0x13   :  { %6078 = dma.done.wait [#allocation9], 4096  }
  0x14   :  { %6079 = vsyncadd [#allocation9], 4294963200  ;;  %v5179_v0 = vld [vmem:[#allocation5 + $0xe0] sm:$0xf]  ;;  %v5799_v1 = vld [vmem:[#allocation5 + $0xec] sm:$0xf0] }
  0x15   :  { %v5307_v2 = vld [vmem:[#allocation5 + $0x1e0] sm:$0xf]  ;;  %v5180_v3 = vor.u32 %v5799_v1, %v5179_v0  ;;  %v5831_v4 = vld [vmem:[#allocation5 + $0x1ec] sm:$0xf0]  ;;  %vm3279_vm11 = vcmask 1042434   ;;  %vm3277_vm13 = vcmask 1040384  }
  0x16   :  { %v5435_v5 = vld [vmem:[#allocation5 + $0x2e0] sm:$0xf]  ;;  %v5863_v6 = vld [vmem:[#allocation5 + $0x2ec] sm:$0xf0]  ;;  %v5308_v7 = vor.u32 %v5831_v4, %v5307_v2  ;;  %vm3281_vm15 = vcmask 1041408   ;;  %s4794_s20 = sshll.u32 %s8678_s5, 4  ;;  %s4795_s20 = int_to_ptr.hbm [resolvable:$true] %s4794_s20 }
  0x17   :  { %v5436_v8 = vor.u32 %v5863_v6, %v5435_v5  ;;  %v5563_v9 = vld [vmem:[#allocation5 + $0x3e0] sm:$0xf]  ;;  %v5895_v10 = vld [vmem:[#allocation5 + $0x3ec] sm:$0xf0]  ;;  %1234 = vmatpush.bf16.msra.mxu0 %v5180_v3  ;;  %s6092_s21 = smov 128   ;;  %s6093_s22 = smov 8  }
  0x18   :  { %v5163_v11 = vld [vmem:[#allocation5 + $0xc0] sm:$0xf]  ;;  %v5564_v12 = vor.u32 %v5895_v10, %v5563_v9  ;;  %v5795_v13 = vld [vmem:[#allocation5 + $0xcc] sm:$0xf0]  ;;  %1323 = vmatpush.bf16.msra.mxu1 %v5308_v7 }
  0x19   :  { %v5291_v14 = vld [vmem:[#allocation5 + $0x1c0] sm:$0xf]  ;;  %v5827_v15 = vld [vmem:[#allocation5 + $0x1cc] sm:$0xf0]  ;;  %1412 = vmatpush.bf16.msra.mxu2 %v5436_v8  ;;  %v5164_v16 = vor.u32 %v5795_v13, %v5163_v11 }
  0x1a   :  { %v5292_v17 = vor.u32 %v5827_v15, %v5291_v14  ;;  %v5419_v18 = vld [vmem:[#allocation5 + $0x2c0] sm:$0xf]  ;;  %v5859_v19 = vld [vmem:[#allocation5 + $0x2cc] sm:$0xf0]  ;;  %1501 = vmatpush.bf16.msra.mxu3 %v5564_v12 }
  0x1b   :  { %v5547_v20 = vld [vmem:[#allocation5 + $0x3c0] sm:$0xf]  ;;  %v5420_v21 = vor.u32 %v5859_v19, %v5419_v18  ;;  %v5891_v22 = vld [vmem:[#allocation5 + $0x3cc] sm:$0xf0]  ;;  %1235 = vmatpush.bf16.msra.mxu0 %v5164_v16 }
  0x1c   :  { %v5147_v23 = vld [vmem:[#allocation5 + $0xa0] sm:$0xf]  ;;  %v5791_v24 = vld [vmem:[#allocation5 + $0xac] sm:$0xf0]  ;;  %v5548_v25 = vor.u32 %v5891_v22, %v5547_v20  ;;  %1324 = vmatpush.bf16.msra.mxu1 %v5292_v17 }
  0x1d   :  { %v5275_v26 = vld [vmem:[#allocation5 + $0x1a0] sm:$0xf]  ;;  %v5823_v27 = vld [vmem:[#allocation5 + $0x1ac] sm:$0xf0]  ;;  %v5148_v29 = vor.u32 %v5791_v24, %v5147_v23  ;;  %1413 = vmatpush.bf16.msra.mxu2 %v5420_v21 }
  0x1e   :  { %v5403_v28 = vld [vmem:[#allocation5 + $0x2a0] sm:$0xf]  ;;  %v5855_v30 = vld [vmem:[#allocation5 + $0x2ac] sm:$0xf0]  ;;  %v5276_v33 = vor.u32 %v5823_v27, %v5275_v26  ;;  %1502 = vmatpush.bf16.msra.mxu3 %v5548_v25 }
  0x1f   :  { %v5531_v31 = vld [vmem:[#allocation5 + $0x3a0] sm:$0xf]  ;;  %v5887_v32 = vld [vmem:[#allocation5 + $0x3ac] sm:$0xf0]  ;;  %v5404_v34 = vor.u32 %v5855_v30, %v5403_v28  ;;  %1236 = vmatpush.bf16.msra.mxu0 %v5148_v29  ;;  %v5705_v30 = vld [vmem:[#allocation2 + $0x4] sm:$0xf] }
  0x20   :  { %v5131_v35 = vld [vmem:[#allocation5 + $0x80] sm:$0xf]  ;;  %v5787_v36 = vld [vmem:[#allocation5 + $0x8c] sm:$0xf0]  ;;  %v5532_v38 = vor.u32 %v5887_v32, %v5531_v31  ;;  %1325 = vmatpush.bf16.msra.mxu1 %v5276_v33  ;;  %v5861_v31 = vld [vmem:[#allocation5 + $0x2e4] sm:$0xf] }
  0x21   :  { %v5259_v37 = vld [vmem:[#allocation5 + $0x180] sm:$0xf]  ;;  %v5819_v39 = vld [vmem:[#allocation5 + $0x18c] sm:$0xf0]  ;;  %v5132_v44 = vor.u32 %v5787_v36, %v5131_v35  ;;  %1414 = vmatpush.bf16.msra.mxu2 %v5404_v34  ;;  %v5437_v32 = vld [vmem:[#allocation5 + $0x2f0] sm:$0xf0] }
  0x22   :  { %v5387_v40 = vld [vmem:[#allocation5 + $0x280] sm:$0xf]  ;;  %v5851_v41 = vld [vmem:[#allocation5 + $0x28c] sm:$0xf0]  ;;  %v5260_v45 = vor.u32 %v5819_v39, %v5259_v37  ;;  %1503 = vmatpush.bf16.msra.mxu3 %v5532_v38  ;;  %v4813_v34 = vld [vmem:[#allocation2 + $0x10] sm:$0xf0] }
  0x23   :  { %v5515_v42 = vld [vmem:[#allocation5 + $0x380] sm:$0xf]  ;;  %v5883_v43 = vld [vmem:[#allocation5 + $0x38c] sm:$0xf0]  ;;  %v5388_v46 = vor.u32 %v5851_v41, %v5387_v40  ;;  %1237 = vmatpush.bf16.msra.mxu0 %v5132_v44  ;;  %v5893_v35 = vld [vmem:[#allocation5 + $0x3e4] sm:$0xf]  ;;  %v5440_v44 = vor.u32 %v5861_v31, %v5437_v32 }
  0x24   :  { %v5115_v47 = vld [vmem:[#allocation5 + $0x60] sm:$0xf]  ;;  %v5783_v48 = vld [vmem:[#allocation5 + $0x6c] sm:$0xf0]  ;;  %v5516_v50 = vor.u32 %v5883_v43, %v5515_v42  ;;  %1326 = vmatpush.bf16.msra.mxu1 %v5260_v45  ;;  %v5565_v36 = vld [vmem:[#allocation5 + $0x3f0] sm:$0xf0] }
  0x25   :  { %v5243_v49 = vld [vmem:[#allocation5 + $0x160] sm:$0xf]  ;;  %v5815_v51 = vld [vmem:[#allocation5 + $0x16c] sm:$0xf0]  ;;  %v5116_v56 = vor.u32 %v5783_v48, %v5115_v47  ;;  %1415 = vmatpush.bf16.msra.mxu2 %v5388_v46  ;;  %v4819_v39 = vld [vmem:[#allocation2 + $0x8] sm:$0xf]  ;;  %v5568_v48 = vor.u32 %v5893_v35, %v5565_v36 }
  0x26   :  { %v5371_v52 = vld [vmem:[#allocation5 + $0x260] sm:$0xf]  ;;  %v5847_v53 = vld [vmem:[#allocation5 + $0x26c] sm:$0xf0]  ;;  %v5244_v57 = vor.u32 %v5815_v51, %v5243_v49  ;;  %1504 = vmatpush.bf16.msra.mxu3 %v5516_v50  ;;  %v5708_v40 = vld [vmem:[#allocation2 + $0x14] sm:$0xf0]  ;;  %v6138_v51 = vor.u32 %v5705_v30, %v4813_v34 }
  0x27   :  { %v5499_v54 = vld [vmem:[#allocation5 + $0x360] sm:$0xf]  ;;  %v5879_v55 = vld [vmem:[#allocation5 + $0x36c] sm:$0xf0]  ;;  %v5372_v58 = vor.u32 %v5847_v53, %v5371_v52  ;;  %1238 = vmatpush.bf16.msra.mxu0 %v5116_v56  ;;  %v5706_v41 = vld [vmem:[#allocation2 + $0xc] sm:$0xf]  ;;  %v6140_v52 = vor.u32 %v5708_v40, %v4819_v39 }
  0x28   :  { %v5099_v59 = vld [vmem:[#allocation5 + $0x40] sm:$0xf]  ;;  %v5779_v60 = vld [vmem:[#allocation5 + $0x4c] sm:$0xf0]  ;;  %v5500_v62 = vor.u32 %v5879_v55, %v5499_v54  ;;  %1327 = vmatpush.bf16.msra.mxu1 %v5244_v57  ;;  %v4821_v43 = vld [vmem:[#allocation2 + $0x18] sm:$0xf0] }
  0x29   :  { %v5227_v61 = vld [vmem:[#allocation5 + $0x140] sm:$0xf]  ;;  %v5811_v63 = vld [vmem:[#allocation5 + $0x14c] sm:$0xf0]  ;;  %v5100_v4 = vor.u32 %v5779_v60, %v5099_v59  ;;  %1416 = vmatpush.bf16.msra.mxu2 %v5372_v58  ;;  %v5797_v45 = vld [vmem:[#allocation5 + $0xe4] sm:$0xf]  ;;  %v6142_v53 = vor.u32 %v5706_v41, %v4821_v43 }
  0x2a   :  { %v5355_v0 = vld [vmem:[#allocation5 + $0x240] sm:$0xf]  ;;  %v5843_v1 = vld [vmem:[#allocation5 + $0x24c] sm:$0xf0]  ;;  %v5228_v5 = vor.u32 %v5811_v63, %v5227_v61  ;;  %1505 = vmatpush.bf16.msra.mxu3 %v5500_v62  ;;  %v5181_v46 = vld [vmem:[#allocation5 + $0xf0] sm:$0xf0] }
  0x2b   :  { %v5483_v2 = vld [vmem:[#allocation5 + $0x340] sm:$0xf]  ;;  %v5875_v3 = vld [vmem:[#allocation5 + $0x34c] sm:$0xf0]  ;;  %v5356_v6 = vor.u32 %v5843_v1, %v5355_v0  ;;  %1239 = vmatpush.bf16.msra.mxu0 %v5100_v4  ;;  %v5829_v49 = vld [vmem:[#allocation5 + $0x1e4] sm:$0xf]  ;;  %v5184_v54 = vor.u32 %v5797_v45, %v5181_v46 }
  0x2c   :  { %v5083_v7 = vld [vmem:[#allocation5 + $0x20] sm:$0xf]  ;;  %v5775_v8 = vld [vmem:[#allocation5 + $0x2c] sm:$0xf0]  ;;  %v5484_v10 = vor.u32 %v5875_v3, %v5483_v2  ;;  %1328 = vmatpush.bf16.msra.mxu1 %v5228_v5  ;;  %v5309_v50 = vld [vmem:[#allocation5 + $0x1f0] sm:$0xf0] }
  0x2d   :  { %v5211_v9 = vld [vmem:[#allocation5 + $0x120] sm:$0xf]  ;;  %v5807_v11 = vld [vmem:[#allocation5 + $0x12c] sm:$0xf0]  ;;  %v5084_v17 = vor.u32 %v5775_v8, %v5083_v7  ;;  %1417 = vmatpush.bf16.msra.mxu2 %v5356_v6  ;;  %8950 = vst [vmem:[#allocation16_spill] sm:$0xff] %v6138_v51  ;;  %v5312_v55 = vor.u32 %v5829_v49, %v5309_v50 }
  0x2e   :  { %v5339_v12 = vld [vmem:[#allocation5 + $0x220] sm:$0xf]  ;;  %v5839_v13 = vld [vmem:[#allocation5 + $0x22c] sm:$0xf0]  ;;  %v5212_v21 = vor.u32 %v5807_v11, %v5211_v9  ;;  %1506 = vmatpush.bf16.msra.mxu3 %v5484_v10  ;;  %8951 = vst [vmem:[#allocation17_spill] sm:$0xff] %v6140_v52 }
  0x2f   :  { %v5467_v14 = vld [vmem:[#allocation5 + $0x320] sm:$0xf]  ;;  %v5871_v15 = vld [vmem:[#allocation5 + $0x32c] sm:$0xf0]  ;;  %v5340_v22 = vor.u32 %v5839_v13, %v5339_v12  ;;  %1240 = vmatpush.bf16.msra.mxu0 %v5084_v17  ;;  %8952 = vst [vmem:[#allocation18_spill] sm:$0xff] %v6142_v53 }
  0x30   :  { %v5067_v16 = vld [vmem:[#allocation5] sm:$0xf]  ;;  %v5771_v18 = vld [vmem:[#allocation5 + $0xc] sm:$0xf0]  ;;  %v5468_v26 = vor.u32 %v5871_v15, %v5467_v14  ;;  %1329 = vmatpush.bf16.msra.mxu1 %v5212_v21  ;;  %v5857_v56 = vld [vmem:[#allocation5 + $0x2c4] sm:$0xf] }
  0x31   :  { %v5195_v19 = vld [vmem:[#allocation5 + $0x100] sm:$0xf]  ;;  %v5803_v20 = vld [vmem:[#allocation5 + $0x10c] sm:$0xf0]  ;;  %v5068_v33 = vor.u32 %v5771_v18, %v5067_v16  ;;  %1418 = vmatpush.bf16.msra.mxu2 %v5340_v22  ;;  %v5421_v57 = vld [vmem:[#allocation5 + $0x2d0] sm:$0xf0] }
  0x32   :  { %v5323_v23 = vld [vmem:[#allocation5 + $0x200] sm:$0xf]  ;;  %v5835_v24 = vld [vmem:[#allocation5 + $0x20c] sm:$0xf0]  ;;  %v5196_v37 = vor.u32 %v5803_v20, %v5195_v19  ;;  %1507 = vmatpush.bf16.msra.mxu3 %v5468_v26  ;;  %v5889_v58 = vld [vmem:[#allocation5 + $0x3c4] sm:$0xf]  ;;  %v5424_v59 = vor.u32 %v5857_v56, %v5421_v57 }
  0x33   :  { %v5451_v25 = vld [vmem:[#allocation5 + $0x300] sm:$0xf]  ;;  %v5867_v27 = vld [vmem:[#allocation5 + $0x30c] sm:$0xf0]  ;;  %v5324_v38 = vor.u32 %v5835_v24, %v5323_v23  ;;  %1241 = vmatpush.bf16.msra.mxu0 %v5068_v33  ;;  %v5549_v60 = vld [vmem:[#allocation5 + $0x3d0] sm:$0xf0] }
  0x34   :  { %v4811_v28 = vld [vmem:[#allocation2] sm:$0xf]  ;;  %v5707_v29 = vld [vmem:[#allocation2 + $0xc] sm:$0xf0]  ;;  %v5452_v42 = vor.u32 %v5867_v27, %v5451_v25  ;;  %1330 = vmatpush.bf16.msra.mxu1 %v5196_v37  ;;  %v5793_v61 = vld [vmem:[#allocation5 + $0xc4] sm:$0xf]  ;;  %v5552_v63 = vor.u32 %v5889_v58, %v5549_v60 }
  0x35   :  { %v6136_v47 = vor.u32 %v5707_v29, %v4811_v28  ;;  %1419 = vmatpush.bf16.msra.mxu2 %v5324_v38  ;;  %v5165_v62 = vld [vmem:[#allocation5 + $0xd0] sm:$0xf0]  ;;  %v5825_v1 = vld [vmem:[#allocation5 + $0x1c4] sm:$0xf]  ;;  %v4827_v4 = vld [vmem:[#allocation2 + $0x20] sm:$0xf] }
  0x36   :  { %1508 = vmatpush.bf16.msra.mxu3 %v5452_v42  ;;  %v5168_v0 = vor.u32 %v5793_v61, %v5165_v62  ;;  %v5293_v2 = vld [vmem:[#allocation5 + $0x1d0] sm:$0xf0]  ;;  %v5711_v5 = vld [vmem:[#allocation2 + $0x2c] sm:$0xf0]  ;;  %v5709_v6 = vld [vmem:[#allocation2 + $0x24] sm:$0xf] }
  0x37   :  { %8949 = vst [vmem:[#allocation15_spill] sm:$0xff] %v6136_v47  ;;  %1242 = vmatmul.bf16.vlgmr.msra.gmra.mxu0 %v6136_v47  ;;  %1331 = vmatmul.bf16.vlgmr.msra.gmra.mxu1 %v6138_v51  ;;  %v5296_v3 = vor.u32 %v5825_v1, %v5293_v2  ;;  %v4829_v7 = vld [vmem:[#allocation2 + $0x30] sm:$0xf0]  ;;  %v4835_v8 = vld [vmem:[#allocation2 + $0x28] sm:$0xf]  ;;  %v6148_v12 = vor.u32 %v5711_v5, %v4827_v4 }
  0x38   :  { %1420 = vmatmul.bf16.vlgmr.msra.gmra.mxu2 %v6140_v52  ;;  %1590 = vmatpush.bf16.msrb.mxu0 %v5184_v54  ;;  %v5712_v9 = vld [vmem:[#allocation2 + $0x34] sm:$0xf0]  ;;  %v5710_v10 = vld [vmem:[#allocation2 + $0x2c] sm:$0xf]  ;;  %v4837_v11 = vld [vmem:[#allocation2 + $0x38] sm:$0xf0]  ;;  %v6150_v13 = vor.u32 %v5709_v6, %v4829_v7 }
  0x39   :  { %1768 = vmatpush.bf16.msrb.mxu2 %v5440_v44  ;;  %1509 = vmatmul.bf16.vlgmr.msra.gmra.mxu3 %v6142_v53  ;;  %v6152_v14 = vor.u32 %v5712_v9, %v4835_v8  ;;  %v6154_v15 = vor.u32 %v5710_v10, %v4837_v11  ;;  %v4843_v16 = vld [vmem:[#allocation2 + $0x40] sm:$0xf]  ;;  %v5715_v17 = vld [vmem:[#allocation2 + $0x4c] sm:$0xf0]  ;;  %v5713_v18 = vld [vmem:[#allocation2 + $0x44] sm:$0xf] }
  0x3a   :  { %1857 = vmatpush.bf16.msrb.mxu3 %v5568_v48  ;;  %1679 = vmatpush.bf16.msrb.mxu1 %v5312_v55  ;;  %8953 = vst [vmem:[#allocation19_spill] sm:$0xff] %v6150_v13  ;;  %v4845_v19 = vld [vmem:[#allocation2 + $0x50] sm:$0xf0]  ;;  %v4851_v20 = vld [vmem:[#allocation2 + $0x48] sm:$0xf]  ;;  %v6160_v24 = vor.u32 %v5715_v17, %v4843_v16 }
  0x3b   :  { %8954 = vst [vmem:[#allocation20_spill] sm:$0xff] %v6152_v14  ;;  %v5716_v21 = vld [vmem:[#allocation2 + $0x54] sm:$0xf0]  ;;  %v5714_v22 = vld [vmem:[#allocation2 + $0x4c] sm:$0xf]  ;;  %v6162_v25 = vor.u32 %v5713_v18, %v4845_v19 }
  0x3c   :  { %1591 = vmatpush.bf16.msrb.mxu0 %v5168_v0  ;;  %8955 = vst [vmem:[#allocation21_spill] sm:$0xff] %v6154_v15  ;;  %v4853_v23 = vld [vmem:[#allocation2 + $0x58] sm:$0xf0]  ;;  %v6164_v26 = vor.u32 %v5716_v21, %v4851_v20  ;;  %v5853_v28 = vld [vmem:[#allocation5 + $0x2a4] sm:$0xf] }
  0x3d   :  { %1769 = vmatpush.bf16.msrb.mxu2 %v5424_v59  ;;  %8956 = vst [vmem:[#allocation22_spill] sm:$0xff] %v6160_v24  ;;  %v6166_v27 = vor.u32 %v5714_v22, %v4853_v23  ;;  %v5405_v29 = vld [vmem:[#allocation5 + $0x2b0] sm:$0xf0]  ;;  %v5885_v30 = vld [vmem:[#allocation5 + $0x3a4] sm:$0xf] }
  0x3e   :  { %1858 = vmatpush.bf16.msrb.mxu3 %v5552_v63  ;;  %1680 = vmatpush.bf16.msrb.mxu1 %v5296_v3  ;;  %8957 = vst [vmem:[#allocation23_spill] sm:$0xff] %v6162_v25  ;;  %v5408_v31 = vor.u32 %v5853_v28, %v5405_v29  ;;  %v5533_v32 = vld [vmem:[#allocation5 + $0x3b0] sm:$0xf0]  ;;  %v5789_v33 = vld [vmem:[#allocation5 + $0xa4] sm:$0xf] }
  0x3f   :  { %8958 = vst [vmem:[#allocation24_spill] sm:$0xff] %v6164_v26  ;;  %v5149_v34 = vld [vmem:[#allocation5 + $0xb0] sm:$0xf0]  ;;  %v5536_v35 = vor.u32 %v5885_v30, %v5533_v32  ;;  %v5821_v37 = vld [vmem:[#allocation5 + $0x1a4] sm:$0xf] }
  0x40   :  { %8959 = vst [vmem:[#allocation25_spill] sm:$0xff] %v6166_v27  ;;  %v5152_v36 = vor.u32 %v5789_v33, %v5149_v34  ;;  %v5277_v38 = vld [vmem:[#allocation5 + $0x1b0] sm:$0xf0]  ;;  %v4859_v40 = vld [vmem:[#allocation2 + $0x60] sm:$0xf] }
  0x41   :  { %1770 = vmatpush.bf16.msrb.mxu2 %v5408_v31  ;;  %v5280_v39 = vor.u32 %v5821_v37, %v5277_v38  ;;  %v5719_v41 = vld [vmem:[#allocation2 + $0x6c] sm:$0xf0]  ;;  %v5717_v42 = vld [vmem:[#allocation2 + $0x64] sm:$0xf]  ;;  %v4861_v43 = vld [vmem:[#allocation2 + $0x70] sm:$0xf0] }
  0x42   :  { %1859 = vmatpush.bf16.msrb.mxu3 %v5536_v35  ;;  %1592 = vmatpush.bf16.msrb.mxu0 %v5152_v36  ;;  %v4867_v44 = vld [vmem:[#allocation2 + $0x68] sm:$0xf]  ;;  %v5720_v45 = vld [vmem:[#allocation2 + $0x74] sm:$0xf0]  ;;  %v5718_v46 = vld [vmem:[#allocation2 + $0x6c] sm:$0xf]  ;;  %v6172_v49 = vor.u32 %v5719_v41, %v4859_v40  ;;  %v6174_v50 = vor.u32 %v5717_v42, %v4861_v43 }
  0x43   :  { %1681 = vmatpush.bf16.msrb.mxu1 %v5280_v39  ;;  %v4869_v48 = vld [vmem:[#allocation2 + $0x78] sm:$0xf0]  ;;  %v6176_v54 = vor.u32 %v5720_v45, %v4867_v44  ;;  %v4875_v56 = vld [vmem:[#allocation2 + $0x80] sm:$0xf]  ;;  %v5723_v57 = vld [vmem:[#allocation2 + $0x8c] sm:$0xf0] }
  0x44   :  { %v6178_v55 = vor.u32 %v5718_v46, %v4869_v48  ;;  %v5721_v58 = vld [vmem:[#allocation2 + $0x84] sm:$0xf]  ;;  %v4877_v59 = vld [vmem:[#allocation2 + $0x90] sm:$0xf0]  ;;  %v4883_v60 = vld [vmem:[#allocation2 + $0x88] sm:$0xf]  ;;  %v6184_v0 = vor.u32 %v5723_v57, %v4875_v56 }
  0x45   :  { %v5724_v61 = vld [vmem:[#allocation2 + $0x94] sm:$0xf0]  ;;  %v5722_v62 = vld [vmem:[#allocation2 + $0x8c] sm:$0xf]  ;;  %v4885_v63 = vld [vmem:[#allocation2 + $0x98] sm:$0xf0]  ;;  %v6186_v1 = vor.u32 %v5721_v58, %v4877_v59 }
  0x46   :  { %v6188_v2 = vor.u32 %v5724_v61, %v4883_v60  ;;  %v6190_v3 = vor.u32 %v5722_v62, %v4885_v63  ;;  %v5849_v4 = vld [vmem:[#allocation5 + $0x284] sm:$0xf]  ;;  %v5389_v5 = vld [vmem:[#allocation5 + $0x290] sm:$0xf0]  ;;  %v4891_v20 = vld [vmem:[#allocation2 + $0xa0] sm:$0xf] }
  0x47   :  { %1247 = vmatmul.bf16.gmra.mxu0 %v6148_v12  ;;  %1336 = vmatmul.bf16.gmra.mxu1 %v6150_v13  ;;  %v5881_v6 = vld [vmem:[#allocation5 + $0x384] sm:$0xf]  ;;  %v5392_v7 = vor.u32 %v5849_v4, %v5389_v5  ;;  %v5517_v8 = vld [vmem:[#allocation5 + $0x390] sm:$0xf0]  ;;  %v5727_v21 = vld [vmem:[#allocation2 + $0xac] sm:$0xf0] }
  0x48   :  { %1425 = vmatmul.bf16.gmra.mxu2 %v6152_v14  ;;  %v5785_v9 = vld [vmem:[#allocation5 + $0x84] sm:$0xf]  ;;  %v5133_v10 = vld [vmem:[#allocation5 + $0x90] sm:$0xf0]  ;;  %v5520_v11 = vor.u32 %v5881_v6, %v5517_v8  ;;  %v4899_v28 = vld [vmem:[#allocation2 + $0xa8] sm:$0xf]  ;;  %v6196_v32 = vor.u32 %v5727_v21, %v4891_v20 }
  0x49   :  { %1514 = vmatmul.bf16.gmra.mxu3 %v6154_v15  ;;  %v5136_v16 = vor.u32 %v5785_v9, %v5133_v10  ;;  %v5817_v17 = vld [vmem:[#allocation5 + $0x184] sm:$0xf]  ;;  %v5261_v18 = vld [vmem:[#allocation5 + $0x190] sm:$0xf0]  ;;  %1771 = vmatpush.bf16.msrb.mxu2 %v5392_v7  ;;  %v5728_v29 = vld [vmem:[#allocation2 + $0xb4] sm:$0xf0] }
  0x4a   :  { %v5264_v19 = vor.u32 %v5817_v17, %v5261_v18  ;;  %1860 = vmatpush.bf16.msrb.mxu3 %v5520_v11  ;;  %v5725_v22 = vld [vmem:[#allocation2 + $0xa4] sm:$0xf]  ;;  %v4893_v23 = vld [vmem:[#allocation2 + $0xb0] sm:$0xf0]  ;;  %v5726_v30 = vld [vmem:[#allocation2 + $0xac] sm:$0xf]  ;;  %v6200_v34 = vor.u32 %v5728_v29, %v4899_v28 }
  0x4b   :  { %1593 = vmatpush.bf16.msrb.mxu0 %v5136_v16  ;;  %v4901_v31 = vld [vmem:[#allocation2 + $0xb8] sm:$0xf0]  ;;  %v6198_v33 = vor.u32 %v5725_v22, %v4893_v23  ;;  %v4907_v36 = vld [vmem:[#allocation2 + $0xc0] sm:$0xf]  ;;  %v5731_v37 = vld [vmem:[#allocation2 + $0xcc] sm:$0xf0] }
  0x4c   :  { %1682 = vmatpush.bf16.msrb.mxu1 %v5264_v19  ;;  %v6202_v35 = vor.u32 %v5726_v30, %v4901_v31  ;;  %v5729_v38 = vld [vmem:[#allocation2 + $0xc4] sm:$0xf]  ;;  %v4909_v39 = vld [vmem:[#allocation2 + $0xd0] sm:$0xf0]  ;;  %v4915_v40 = vld [vmem:[#allocation2 + $0xc8] sm:$0xf]  ;;  %v6208_v44 = vor.u32 %v5731_v37, %v4907_v36 }
  0x4d   :  { %v5732_v41 = vld [vmem:[#allocation2 + $0xd4] sm:$0xf0]  ;;  %v5730_v42 = vld [vmem:[#allocation2 + $0xcc] sm:$0xf]  ;;  %v4917_v43 = vld [vmem:[#allocation2 + $0xd8] sm:$0xf0]  ;;  %v6210_v45 = vor.u32 %v5729_v38, %v4909_v39 }
  0x4e   :  { %v6212_v46 = vor.u32 %v5732_v41, %v4915_v40  ;;  %v6214_v48 = vor.u32 %v5730_v42, %v4917_v43  ;;  %v5845_v56 = vld [vmem:[#allocation5 + $0x264] sm:$0xf]  ;;  %v5373_v57 = vld [vmem:[#allocation5 + $0x270] sm:$0xf0]  ;;  %v4923_v63 = vld [vmem:[#allocation2 + $0xe0] sm:$0xf] }
  0x4f   :  { %v5877_v58 = vld [vmem:[#allocation5 + $0x364] sm:$0xf]  ;;  %v5376_v59 = vor.u32 %v5845_v56, %v5373_v57  ;;  %v5501_v60 = vld [vmem:[#allocation5 + $0x370] sm:$0xf0]  ;;  %v5735_v6 = vld [vmem:[#allocation2 + $0xec] sm:$0xf0] }
  0x50   :  { %8960 = vst [vmem:[#allocation26_spill] sm:$0xff] %v6214_v48  ;;  %v5504_v61 = vor.u32 %v5877_v58, %v5501_v60  ;;  %v5781_v62 = vld [vmem:[#allocation5 + $0x64] sm:$0xf]  ;;  %v5117_v4 = vld [vmem:[#allocation5 + $0x70] sm:$0xf0]  ;;  %v6220_v20 = vor.u32 %v5735_v6, %v4923_v63 }
  0x51   :  { %1772 = vmatpush.bf16.msrb.mxu2 %v5376_v59  ;;  %v5813_v5 = vld [vmem:[#allocation5 + $0x164] sm:$0xf]  ;;  %v5120_v8 = vor.u32 %v5781_v62, %v5117_v4  ;;  %v5245_v9 = vld [vmem:[#allocation5 + $0x170] sm:$0xf0]  ;;  %v4931_v11 = vld [vmem:[#allocation2 + $0xe8] sm:$0xf] }
  0x52   :  { %1861 = vmatpush.bf16.msrb.mxu3 %v5504_v61  ;;  %v5733_v7 = vld [vmem:[#allocation2 + $0xe4] sm:$0xf]  ;;  %v4925_v10 = vld [vmem:[#allocation2 + $0xf0] sm:$0xf0]  ;;  %v5736_v16 = vld [vmem:[#allocation2 + $0xf4] sm:$0xf0]  ;;  %v5248_v17 = vor.u32 %v5813_v5, %v5245_v9 }
  0x53   :  { %v5734_v18 = vld [vmem:[#allocation2 + $0xec] sm:$0xf]  ;;  %v4933_v19 = vld [vmem:[#allocation2 + $0xf8] sm:$0xf0]  ;;  %1594 = vmatpush.bf16.msrb.mxu0 %v5120_v8  ;;  %8961 = vst [vmem:[#allocation27_spill] sm:$0xff] %v6220_v20  ;;  %v6222_v21 = vor.u32 %v5733_v7, %v4925_v10  ;;  %v6224_v22 = vor.u32 %v5736_v16, %v4931_v11 }
  0x54   :  { %1683 = vmatpush.bf16.msrb.mxu1 %v5248_v17  ;;  %v6226_v23 = vor.u32 %v5734_v18, %v4933_v19  ;;  %v4939_v28 = vld [vmem:[#allocation2 + $0x100] sm:$0xf]  ;;  %v5739_v29 = vld [vmem:[#allocation2 + $0x10c] sm:$0xf0]  ;;  %v5737_v30 = vld [vmem:[#allocation2 + $0x104] sm:$0xf] }
  0x55   :  { %8962 = vst [vmem:[#allocation28_spill] sm:$0xff] %v6222_v21  ;;  %v4941_v31 = vld [vmem:[#allocation2 + $0x110] sm:$0xf0]  ;;  %v4947_v36 = vld [vmem:[#allocation2 + $0x108] sm:$0xf]  ;;  %v6232_v40 = vor.u32 %v5739_v29, %v4939_v28 }
  0x56   :  { %8963 = vst [vmem:[#allocation29_spill] sm:$0xff] %v6224_v22  ;;  %v5740_v37 = vld [vmem:[#allocation2 + $0x114] sm:$0xf0]  ;;  %v5738_v38 = vld [vmem:[#allocation2 + $0x10c] sm:$0xf]  ;;  %v6234_v42 = vor.u32 %v5737_v30, %v4941_v31 }
  0x57   :  { %1252 = vmatmul.bf16.gmra.mxu0 %v6160_v24  ;;  %1341 = vmatmul.bf16.gmra.mxu1 %v6162_v25  ;;  %8964 = vst [vmem:[#allocation30_spill] sm:$0xff] %v6226_v23  ;;  %v4949_v39 = vld [vmem:[#allocation2 + $0x118] sm:$0xf0]  ;;  %v6236_v43 = vor.u32 %v5740_v37, %v4947_v36  ;;  %v5841_v59 = vld [vmem:[#allocation5 + $0x244] sm:$0xf] }
  0x58   :  { %1430 = vmatmul.bf16.gmra.mxu2 %v6164_v26  ;;  %8965 = vst [vmem:[#allocation31_spill] sm:$0xff] %v6232_v40  ;;  %v6238_v57 = vor.u32 %v5738_v38, %v4949_v39  ;;  %v5357_v60 = vld [vmem:[#allocation5 + $0x250] sm:$0xf0]  ;;  %v5873_v61 = vld [vmem:[#allocation5 + $0x344] sm:$0xf] }
  0x59   :  { %1519 = vmatmul.bf16.gmra.mxu3 %v6166_v27  ;;  %8966 = vst [vmem:[#allocation32_spill] sm:$0xff] %v6234_v42  ;;  %v5360_v62 = vor.u32 %v5841_v59, %v5357_v60  ;;  %v5485_v63 = vld [vmem:[#allocation5 + $0x350] sm:$0xf0]  ;;  %v4955_v16 = vld [vmem:[#allocation2 + $0x120] sm:$0xf] }
  0x5a   :  { %8967 = vst [vmem:[#allocation33_spill] sm:$0xff] %v6236_v43  ;;  %v5488_v5 = vor.u32 %v5873_v61, %v5485_v63  ;;  %v5743_v17 = vld [vmem:[#allocation2 + $0x12c] sm:$0xf0]  ;;  %v5741_v18 = vld [vmem:[#allocation2 + $0x124] sm:$0xf] }
  0x5b   :  { %8968 = vst [vmem:[#allocation34_spill] sm:$0xff] %v6238_v57  ;;  %1773 = vmatpush.bf16.msrb.mxu2 %v5360_v62  ;;  %v4957_v19 = vld [vmem:[#allocation2 + $0x130] sm:$0xf0]  ;;  %v5777_v28 = vld [vmem:[#allocation5 + $0x44] sm:$0xf]  ;;  %v6246_v59 = vor.u32 %v5743_v17, %v4955_v16 }
  0x5c   :  { %1862 = vmatpush.bf16.msrb.mxu3 %v5488_v5  ;;  %v5101_v29 = vld [vmem:[#allocation5 + $0x50] sm:$0xf0]  ;;  %v5809_v30 = vld [vmem:[#allocation5 + $0x144] sm:$0xf]  ;;  %v4963_v31 = vld [vmem:[#allocation2 + $0x128] sm:$0xf]  ;;  %v6248_v63 = vor.u32 %v5741_v18, %v4957_v19 }
  0x5d   :  { %v5744_v36 = vld [vmem:[#allocation2 + $0x134] sm:$0xf0]  ;;  %v5104_v37 = vor.u32 %v5777_v28, %v5101_v29  ;;  %v5229_v38 = vld [vmem:[#allocation5 + $0x150] sm:$0xf0]  ;;  %v5742_v39 = vld [vmem:[#allocation2 + $0x12c] sm:$0xf] }
  0x5e   :  { %8970 = vst [vmem:[#allocation36_spill] sm:$0xff] %v6246_v59  ;;  %v4971_v29 = vld [vmem:[#allocation2 + $0x140] sm:$0xf] }
  0x5f   :  { %1595 = vmatpush.bf16.msrb.mxu0 %v5104_v37  ;;  %8971 = vst [vmem:[#allocation37_spill] sm:$0xff] %v6248_v63  ;;  %v4979_v37 = vld [vmem:[#allocation2 + $0x148] sm:$0xf] }
  0x67   :  { %1257 = vmatmul.bf16.gmra.mxu0 %v6172_v49  ;;  %1346 = vmatmul.bf16.gmra.mxu1 %v6174_v50 }
  0x68   :  { %1435 = vmatmul.bf16.gmra.mxu2 %v6176_v54 }
  0x69   :  { %1524 = vmatmul.bf16.gmra.mxu3 %v6178_v55 }
  0x77   :  { %1262 = vmatmul.bf16.gmra.mxu0 %v6184_v0  ;;  %1351 = vmatmul.bf16.gmra.mxu1 %v6186_v1 }
  0x78   :  { %1440 = vmatmul.bf16.gmra.mxu2 %v6188_v2 }
  0x79   :  { %1529 = vmatmul.bf16.gmra.mxu3 %v6190_v3 }
  0x87   :  { %1267 = vmatmul.bf16.gmra.mxu0 %v6196_v32  ;;  %1356 = vmatmul.bf16.gmra.mxu1 %v6198_v33 }
  0x88   :  { %1445 = vmatmul.bf16.gmra.mxu2 %v6200_v34 }
  0x89   :  { %1534 = vmatmul.bf16.gmra.mxu3 %v6202_v35 }
  0x97   :  { %1272 = vmatmul.bf16.gmra.mxu0 %v6208_v44  ;;  %1361 = vmatmul.bf16.gmra.mxu1 %v6210_v45 }
  0x98   :  { %1450 = vmatmul.bf16.gmra.mxu2 %v6212_v46 }
  0x99   :  { %1539 = vmatmul.bf16.gmra.mxu3 %v6214_v48 }
  0xa7   :  { %1277 = vmatmul.bf16.gmra.mxu0 %v6220_v20  ;;  %1366 = vmatmul.bf16.gmra.mxu1 %v6222_v21 }
  0xa8   :  { %1455 = vmatmul.bf16.gmra.mxu2 %v6224_v22 }
  0xa9   :  { %1544 = vmatmul.bf16.gmra.mxu3 %v6226_v23 }
  0xb4   :  { %v1243_v41 = vpop.f32.mrf.mxu0  ;;  %v1332_v56 = vpop.f32.mrf.mxu1 }
  0xb5   :  { %v1333_v58 = vadd.f32 %v1332_v56, %v1243_v41  ;;  %v4965_v41 = vld [vmem:[#allocation2 + $0x138] sm:$0xf0]  ;;  %v5232_v56 = vor.u32 %v5809_v30, %v5229_v38  ;;  %v5747_v30 = vld [vmem:[#allocation2 + $0x14c] sm:$0xf0]  ;;  %v5748_v38 = vld [vmem:[#allocation2 + $0x154] sm:$0xf0] }
  0xb7   :  { %1282 = vmatmul.bf16.gmra.mxu0 %v6232_v40  ;;  %1371 = vmatmul.bf16.gmra.mxu1 %v6234_v42 }
  0xb8   :  { %1460 = vmatmul.bf16.gmra.mxu2 %v6236_v43  ;;  %1684 = vmatpush.bf16.msrb.mxu1 %v5232_v56 }
  0xb9   :  { %1549 = vmatmul.bf16.gmra.mxu3 %v6238_v57 }
  0xbb   :  { %v1421_v4 = vpop.f32.mrf.mxu2 }
  0xbc   :  { %v1422_v6 = vadd.f32 %v1421_v4, %v1333_v58  ;;  %v1510_v7 = vpop.f32.mrf.mxu3  ;;  %v1245_v8 = vpop.f32.mrf.mxu0  ;;  %v6250_v4 = vor.u32 %v5744_v36, %v4963_v31  ;;  %v5745_v31 = vld [vmem:[#allocation2 + $0x144] sm:$0xf]  ;;  %v4973_v36 = vld [vmem:[#allocation2 + $0x150] sm:$0xf0] }
  0xbd   :  { %v1334_v9 = vpop.f32.mrf.mxu1 }
  0xbe   :  { %v6244_v10 = vadd.f32 %v1510_v7, %v1422_v6  ;;  %v1335_v11 = vadd.f32 %v1334_v9, %v1245_v8  ;;  %8972 = vst [vmem:[#allocation38_spill] sm:$0xff] %v6250_v4  ;;  %v6252_v6 = vor.u32 %v5742_v39, %v4965_v41  ;;  %v5746_v39 = vld [vmem:[#allocation2 + $0x14c] sm:$0xf]  ;;  %v4981_v41 = vld [vmem:[#allocation2 + $0x158] sm:$0xf0] }
  0xc0   :  { %8969 = vst [vmem:[#allocation35_spill] sm:$0xff] %v6244_v10 }
  0xc1   :  { %8973 = vst [vmem:[#allocation39_spill] sm:$0xff] %v6252_v6 }
  0xc3   :  { %v1423_v58 = vpop.f32.mrf.mxu2 }
  0xc4   :  { %v1424_v60 = vadd.f32 %v1423_v58, %v1335_v11  ;;  %v1512_v61 = vpop.f32.mrf.mxu3  ;;  %v1248_v62 = vpop.f32.mrf.mxu0  ;;  %v6262_v58 = vor.u32 %v5747_v30, %v4971_v29  ;;  %v5869_v29 = vld [vmem:[#allocation5 + $0x324] sm:$0xf] }
  0xc5   :  { %v1337_v5 = vpop.f32.mrf.mxu1 }
  0xc6   :  { %v6254_v7 = vadd.f32 %v1512_v61, %v1424_v60  ;;  %v1338_v8 = vadd.f32 %v1337_v5, %v1248_v62  ;;  %8976 = vst [vmem:[#allocation42_spill] sm:$0xff] %v6262_v58  ;;  %v6264_v5 = vor.u32 %v5745_v31, %v4973_v36  ;;  %v5469_v31 = vld [vmem:[#allocation5 + $0x330] sm:$0xf0] }
  0xc7   :  { %1287 = vmatmul.bf16.gmra.mxu0 %v6246_v59  ;;  %1376 = vmatmul.bf16.gmra.mxu1 %v6248_v63 }
  0xc8   :  { %8974 = vst [vmem:[#allocation40_spill] sm:$0xff] %v6254_v7  ;;  %1465 = vmatmul.bf16.gmra.mxu2 %v6250_v4 }
  0xc9   :  { %1554 = vmatmul.bf16.gmra.mxu3 %v6252_v6  ;;  %8977 = vst [vmem:[#allocation43_spill] sm:$0xff] %v6264_v5  ;;  %v5805_v6 = vld [vmem:[#allocation5 + $0x124] sm:$0xf] }
  0xcb   :  { %v1426_v9 = vpop.f32.mrf.mxu2 }
  0xcc   :  { %v1427_v11 = vadd.f32 %v1426_v9, %v1338_v8  ;;  %v1515_v16 = vpop.f32.mrf.mxu3  ;;  %v1250_v17 = vpop.f32.mrf.mxu0  ;;  %v6266_v8 = vor.u32 %v5748_v38, %v4979_v37  ;;  %v5472_v37 = vor.u32 %v5869_v29, %v5469_v31  ;;  %v5213_v29 = vld [vmem:[#allocation5 + $0x130] sm:$0xf0]  ;;  %v4997_v31 = vld [vmem:[#allocation2 + $0x178] sm:$0xf0] }
  0xcd   :  { %v1339_v18 = vpop.f32.mrf.mxu1 }
  0xce   :  { %v6260_v19 = vadd.f32 %v1515_v16, %v1427_v11  ;;  %v1340_v28 = vadd.f32 %v1339_v18, %v1250_v17  ;;  %8978 = vst [vmem:[#allocation44_spill] sm:$0xff] %v6266_v8  ;;  %v6268_v11 = vor.u32 %v5746_v39, %v4981_v41  ;;  %v5837_v18 = vld [vmem:[#allocation5 + $0x224] sm:$0xf]  ;;  %1863 = vmatpush.bf16.msrb.mxu3 %v5472_v37 }
  0xd0   :  { %8975 = vst [vmem:[#allocation41_spill] sm:$0xff] %v6260_v19 }
  0xd1   :  { %8979 = vst [vmem:[#allocation45_spill] sm:$0xff] %v6268_v11 }
  0xd3   :  { %v1428_v56 = vpop.f32.mrf.mxu2 }
  0xd4   :  { %v1429_v60 = vadd.f32 %v1428_v56, %v1340_v28  ;;  %v1517_v61 = vpop.f32.mrf.mxu3  ;;  %v1253_v62 = vpop.f32.mrf.mxu0  ;;  %v5341_v28 = vld [vmem:[#allocation5 + $0x230] sm:$0xf0] }
  0xd5   :  { %v1342_v9 = vpop.f32.mrf.mxu1  ;;  %v5344_v30 = vor.u32 %v5837_v18, %v5341_v28  ;;  %v4995_v18 = vld [vmem:[#allocation2 + $0x168] sm:$0xf]  ;;  %v5752_v28 = vld [vmem:[#allocation2 + $0x174] sm:$0xf0] }
  0xd6   :  { %v6270_v16 = vadd.f32 %v1517_v61, %v1429_v60  ;;  %v1343_v17 = vadd.f32 %v1342_v9, %v1253_v62  ;;  %v4987_v62 = vld [vmem:[#allocation2 + $0x160] sm:$0xf]  ;;  %v5751_v9 = vld [vmem:[#allocation2 + $0x16c] sm:$0xf0] }
  0xd7   :  { %1292 = vmatmul.bf16.gmra.mxu0 %v6262_v58  ;;  %1381 = vmatmul.bf16.gmra.mxu1 %v6264_v5  ;;  %v5773_v5 = vld [vmem:[#allocation5 + $0x24] sm:$0xf]  ;;  %v5085_v58 = vld [vmem:[#allocation5 + $0x30] sm:$0xf0]  ;;  %v6278_v63 = vor.u32 %v5751_v9, %v4987_v62 }
  0xd8   :  { %8980 = vst [vmem:[#allocation46_spill] sm:$0xff] %v6270_v16  ;;  %1470 = vmatmul.bf16.gmra.mxu2 %v6266_v8  ;;  %v5749_v8 = vld [vmem:[#allocation2 + $0x164] sm:$0xf]  ;;  %v5088_v4 = vor.u32 %v5773_v5, %v5085_v58 }
  0xd9   :  { %1559 = vmatmul.bf16.gmra.mxu3 %v6268_v11  ;;  %1774 = vmatpush.bf16.msrb.mxu2 %v5344_v30  ;;  %v4989_v11 = vld [vmem:[#allocation2 + $0x170] sm:$0xf0]  ;;  %8982 = vst [vmem:[#allocation48_spill] sm:$0xff] %v6278_v63 }
  0xda   :  { %1596 = vmatpush.bf16.msrb.mxu0 %v5088_v4 }
  0xdb   :  { %v1431_v36 = vpop.f32.mrf.mxu2 }
  0xdc   :  { %v1432_v38 = vadd.f32 %v1431_v36, %v1343_v17  ;;  %v1520_v39 = vpop.f32.mrf.mxu3  ;;  %v1255_v41 = vpop.f32.mrf.mxu0  ;;  %v5750_v17 = vld [vmem:[#allocation2 + $0x16c] sm:$0xf]  ;;  %v5216_v36 = vor.u32 %v5805_v6, %v5213_v29  ;;  %v5753_v29 = vld [vmem:[#allocation2 + $0x184] sm:$0xf] }
  0xdd   :  { %v1344_v56 = vpop.f32.mrf.mxu1  ;;  %v6284_v57 = vor.u32 %v5750_v17, %v4997_v31  ;;  %v5011_v17 = vld [vmem:[#allocation2 + $0x188] sm:$0xf]  ;;  %v5756_v31 = vld [vmem:[#allocation2 + $0x194] sm:$0xf0] }
  0xde   :  { %v6276_v60 = vadd.f32 %v1520_v39, %v1432_v38  ;;  %v1345_v61 = vadd.f32 %v1344_v56, %v1255_v41  ;;  %v6280_v41 = vor.u32 %v5749_v8, %v4989_v11  ;;  %v6282_v56 = vor.u32 %v5752_v28, %v4995_v18  ;;  %1685 = vmatpush.bf16.msrb.mxu1 %v5216_v36  ;;  %v5003_v18 = vld [vmem:[#allocation2 + $0x180] sm:$0xf]  ;;  %v5755_v28 = vld [vmem:[#allocation2 + $0x18c] sm:$0xf0]  ;;  %v5754_v36 = vld [vmem:[#allocation2 + $0x18c] sm:$0xf] }
  0xdf   :  { %8985 = vst [vmem:[#allocation51_spill] sm:$0xff] %v6284_v57 }
  0xe0   :  { %8981 = vst [vmem:[#allocation47_spill] sm:$0xff] %v6276_v60 }
  0xe1   :  { %8983 = vst [vmem:[#allocation49_spill] sm:$0xff] %v6280_v41 }
  0xe2   :  { %8984 = vst [vmem:[#allocation50_spill] sm:$0xff] %v6282_v56 }
  0xe3   :  { %v1433_v30 = vpop.f32.mrf.mxu2 }
  0xe4   :  { %v1434_v37 = vadd.f32 %v1433_v30, %v1345_v61  ;;  %v1522_v38 = vpop.f32.mrf.mxu3  ;;  %v1258_v39 = vpop.f32.mrf.mxu0  ;;  %v5013_v30 = vld [vmem:[#allocation2 + $0x198] sm:$0xf0] }
  0xe5   :  { %v1347_v59 = vpop.f32.mrf.mxu1 }
  0xe6   :  { %v6286_v58 = vadd.f32 %v1522_v38, %v1434_v37  ;;  %v1348_v5 = vadd.f32 %v1347_v59, %v1258_v39  ;;  %v5005_v59 = vld [vmem:[#allocation2 + $0x190] sm:$0xf0]  ;;  %v6294_v38 = vor.u32 %v5755_v28, %v5003_v18  ;;  %v5865_v28 = vld [vmem:[#allocation5 + $0x304] sm:$0xf] }
  0xe7   :  { %1297 = vmatmul.bf16.gmra.mxu0 %v6278_v63  ;;  %1386 = vmatmul.bf16.gmra.mxu1 %v6280_v41  ;;  %v5325_v18 = vld [vmem:[#allocation5 + $0x210] sm:$0xf0]  ;;  %v5801_v63 = vld [vmem:[#allocation5 + $0x104] sm:$0xf] }
  0xe8   :  { %8986 = vst [vmem:[#allocation52_spill] sm:$0xff] %v6286_v58  ;;  %1475 = vmatmul.bf16.gmra.mxu2 %v6282_v56  ;;  %v6298_v56 = vor.u32 %v5756_v31, %v5011_v17  ;;  %v5069_v41 = vld [vmem:[#allocation5 + $0x10] sm:$0xf0] }
  0xe9   :  { %1564 = vmatmul.bf16.gmra.mxu3 %v6284_v57  ;;  %8988 = vst [vmem:[#allocation54_spill] sm:$0xff] %v6294_v38 }
  0xea   :  { %8990 = vst [vmem:[#allocation56_spill] sm:$0xff] %v6298_v56 }
  0xeb   :  { %v1436_v4 = vpop.f32.mrf.mxu2 }
  0xec   :  { %v1437_v6 = vadd.f32 %v1436_v4, %v1348_v5  ;;  %v1525_v8 = vpop.f32.mrf.mxu3  ;;  %v1260_v11 = vpop.f32.mrf.mxu0  ;;  %v6296_v4 = vor.u32 %v5753_v29, %v5005_v59  ;;  %v5453_v59 = vld [vmem:[#allocation5 + $0x310] sm:$0xf0] }
  0xed   :  { %v1349_v61 = vpop.f32.mrf.mxu1  ;;  %v5456_v31 = vor.u32 %v5865_v28, %v5453_v59  ;;  %v5197_v28 = vld [vmem:[#allocation5 + $0x110] sm:$0xf0]  ;;  %v5029_v59 = vld [vmem:[#allocation2 + $0x1b8] sm:$0xf0] }
  0xee   :  { %v6292_v62 = vadd.f32 %v1525_v8, %v1437_v6  ;;  %v1350_v9 = vadd.f32 %v1349_v61, %v1260_v11  ;;  %8989 = vst [vmem:[#allocation55_spill] sm:$0xff] %v6296_v4  ;;  %v6300_v8 = vor.u32 %v5754_v36, %v5013_v30 }
  0xef   :  { %1864 = vmatpush.bf16.msrb.mxu3 %v5456_v31 }
  0xf0   :  { %8987 = vst [vmem:[#allocation53_spill] sm:$0xff] %v6292_v62 }
  0xf1   :  { %8991 = vst [vmem:[#allocation57_spill] sm:$0xff] %v6300_v8 }
  0xf3   :  { %v1438_v37 = vpop.f32.mrf.mxu2 }
  0xf4   :  { %v1439_v39 = vadd.f32 %v1438_v37, %v1350_v9  ;;  %v1527_v57 = vpop.f32.mrf.mxu3  ;;  %v1263_v5 = vpop.f32.mrf.mxu0  ;;  %v5833_v9 = vld [vmem:[#allocation5 + $0x204] sm:$0xf] }
  0xf5   :  { %v1352_v6 = vpop.f32.mrf.mxu1  ;;  %v5328_v29 = vor.u32 %v5833_v9, %v5325_v18  ;;  %v5027_v9 = vld [vmem:[#allocation2 + $0x1a8] sm:$0xf]  ;;  %v5760_v18 = vld [vmem:[#allocation2 + $0x1b4] sm:$0xf0] }
  0xf6   :  { %v6302_v11 = vadd.f32 %v1527_v57, %v1439_v39  ;;  %v1353_v61 = vadd.f32 %v1352_v6, %v1263_v5  ;;  %v5019_v6 = vld [vmem:[#allocation2 + $0x1a0] sm:$0xf] }
  0xf7   :  { %1302 = vmatmul.bf16.gmra.mxu0 %v6294_v38  ;;  %1391 = vmatmul.bf16.gmra.mxu1 %v6296_v4  ;;  %v5757_v4 = vld [vmem:[#allocation2 + $0x1a4] sm:$0xf] }
  0xf8   :  { %8992 = vst [vmem:[#allocation58_spill] sm:$0xff] %v6302_v11  ;;  %1480 = vmatmul.bf16.gmra.mxu2 %v6298_v56  ;;  %v5759_v56 = vld [vmem:[#allocation2 + $0x1ac] sm:$0xf0]  ;;  %v5769_v38 = vld [vmem:[#allocation5 + $0x4] sm:$0xf] }
  0xf9   :  { %1569 = vmatmul.bf16.gmra.mxu3 %v6300_v8  ;;  %1775 = vmatpush.bf16.msrb.mxu2 %v5328_v29  ;;  %v5021_v8 = vld [vmem:[#allocation2 + $0x1b0] sm:$0xf0]  ;;  %v5072_v43 = vor.u32 %v5769_v38, %v5069_v41  ;;  %v6310_v42 = vor.u32 %v5759_v56, %v5019_v6 }
  0xfb   :  { %v1441_v17 = vpop.f32.mrf.mxu2  ;;  %8994 = vst [vmem:[#allocation60_spill] sm:$0xff] %v6310_v42  ;;  %1597 = vmatpush.bf16.msrb.mxu0 %v5072_v43 }
  0xfc   :  { %v1442_v36 = vadd.f32 %v1441_v17, %v1353_v61  ;;  %v1530_v30 = vpop.f32.mrf.mxu3  ;;  %v1265_v57 = vpop.f32.mrf.mxu0  ;;  %v5758_v61 = vld [vmem:[#allocation2 + $0x1ac] sm:$0xf]  ;;  %v5200_v17 = vor.u32 %v5801_v63, %v5197_v28  ;;  %v5761_v28 = vld [vmem:[#allocation2 + $0x1c4] sm:$0xf] }
  0xfd   :  { %v1354_v37 = vpop.f32.mrf.mxu1  ;;  %v6316_v23 = vor.u32 %v5758_v61, %v5029_v59  ;;  %v5043_v61 = vld [vmem:[#allocation2 + $0x1c8] sm:$0xf]  ;;  %v5764_v59 = vld [vmem:[#allocation2 + $0x1d4] sm:$0xf0] }
  0xfe   :  { %v6308_v39 = vadd.f32 %v1530_v30, %v1442_v36  ;;  %v1355_v5 = vadd.f32 %v1354_v37, %v1265_v57  ;;  %v6312_v57 = vor.u32 %v5757_v4, %v5021_v8  ;;  %v6314_v37 = vor.u32 %v5760_v18, %v5027_v9  ;;  %1686 = vmatpush.bf16.msrb.mxu1 %v5200_v17  ;;  %v5035_v9 = vld [vmem:[#allocation2 + $0x1c0] sm:$0xf]  ;;  %v5763_v18 = vld [vmem:[#allocation2 + $0x1cc] sm:$0xf0]  ;;  %v5762_v17 = vld [vmem:[#allocation2 + $0x1cc] sm:$0xf] }
  0xff   :  { %8997 = vst [vmem:[#allocation63_spill] sm:$0xff] %v6316_v23 }
 0x100   :  { %8993 = vst [vmem:[#allocation59_spill] sm:$0xff] %v6308_v39 }
 0x101   :  { %8995 = vst [vmem:[#allocation61_spill] sm:$0xff] %v6312_v57 }
 0x102   :  { %8996 = vst [vmem:[#allocation62_spill] sm:$0xff] %v6314_v37 }
 0x103   :  { %v1443_v29 = vpop.f32.mrf.mxu2 }
 0x104   :  { %v1444_v31 = vadd.f32 %v1443_v29, %v1355_v5  ;;  %v1532_v36 = vpop.f32.mrf.mxu3  ;;  %v1268_v30 = vpop.f32.mrf.mxu0  ;;  %v5045_v29 = vld [vmem:[#allocation2 + $0x1d8] sm:$0xf0] }
 0x105   :  { %v1357_v40 = vpop.f32.mrf.mxu1 }
 0x106   :  { %v6318_v41 = vadd.f32 %v1532_v36, %v1444_v31  ;;  %v1358_v38 = vadd.f32 %v1357_v40, %v1268_v30  ;;  %v5037_v40 = vld [vmem:[#allocation2 + $0x1d0] sm:$0xf0]  ;;  %v6326_v36 = vor.u32 %v5763_v18, %v5035_v9  ;;  %v5864_v9 = vld [vmem:[#allocation5 + $0x2f4] sm:$0xf0]  ;;  %v5571_v18 = vld [vmem:[#allocation5 + $0x3e8] sm:$0xf] }
 0x107   :  { %1307 = vmatmul.bf16.gmra.mxu0 %v6310_v42  ;;  %1396 = vmatmul.bf16.gmra.mxu1 %v6312_v57  ;;  %v5800_v57 = vld [vmem:[#allocation5 + $0xf4] sm:$0xf0]  ;;  %v5315_v42 = vld [vmem:[#allocation5 + $0x1e8] sm:$0xf] }
 0x108   :  { %8998 = vst [vmem:[#allocation64_spill] sm:$0xff] %v6318_v41  ;;  %1485 = vmatmul.bf16.gmra.mxu2 %v6314_v37  ;;  %v6330_v37 = vor.u32 %v5764_v59, %v5043_v61 }
 0x109   :  { %1574 = vmatmul.bf16.gmra.mxu3 %v6316_v23  ;;  %9000 = vst [vmem:[#allocation66_spill] sm:$0xff] %v6326_v36 }
 0x10a   :  { %9002 = vst [vmem:[#allocation68_spill] sm:$0xff] %v6330_v37 }
 0x10b   :  { %v1446_v43 = vpop.f32.mrf.mxu2 }
 0x10c   :  { %v1447_v63 = vadd.f32 %v1446_v43, %v1358_v38  ;;  %v1535_v56 = vpop.f32.mrf.mxu3  ;;  %v1270_v4 = vpop.f32.mrf.mxu0  ;;  %v6328_v43 = vor.u32 %v5761_v28, %v5037_v40  ;;  %v5896_v40 = vld [vmem:[#allocation5 + $0x3f4] sm:$0xf0] }
 0x10d   :  { %v1359_v8 = vpop.f32.mrf.mxu1  ;;  %v5572_v59 = vor.u32 %v5896_v40, %v5571_v18  ;;  %v5832_v18 = vld [vmem:[#allocation5 + $0x1f4] sm:$0xf0]  ;;  %v5061_v40 = vld [vmem:[#allocation2 + $0x1f8] sm:$0xf0] }
 0x10e   :  { %v6324_v5 = vadd.f32 %v1535_v56, %v1447_v63  ;;  %v1360_v6 = vadd.f32 %v1359_v8, %v1270_v4  ;;  %9001 = vst [vmem:[#allocation67_spill] sm:$0xff] %v6328_v43  ;;  %v6332_v56 = vor.u32 %v5762_v17, %v5045_v29 }
 0x10f   :  { %2213 = vmatpush.bf16.msra.mxu3 %v5572_v59 }
 0x110   :  { %8999 = vst [vmem:[#allocation65_spill] sm:$0xff] %v6324_v5 }
 0x111   :  { %9003 = vst [vmem:[#allocation69_spill] sm:$0xff] %v6332_v56 }
 0x113   :  { %v1448_v31 = vpop.f32.mrf.mxu2 }
 0x114   :  { %v1449_v30 = vadd.f32 %v1448_v31, %v1360_v6  ;;  %v1537_v23 = vpop.f32.mrf.mxu3  ;;  %v1273_v38 = vpop.f32.mrf.mxu0  ;;  %v5443_v6 = vld [vmem:[#allocation5 + $0x2e8] sm:$0xf] }
 0x115   :  { %v1362_v63 = vpop.f32.mrf.mxu1  ;;  %v5444_v28 = vor.u32 %v5864_v9, %v5443_v6  ;;  %v5059_v6 = vld [vmem:[#allocation2 + $0x1e8] sm:$0xf]  ;;  %v5768_v9 = vld [vmem:[#allocation2 + $0x1f4] sm:$0xf0] }
 0x116   :  { %v6334_v4 = vadd.f32 %v1537_v23, %v1449_v30  ;;  %v1363_v8 = vadd.f32 %v1362_v63, %v1273_v38  ;;  %v5051_v63 = vld [vmem:[#allocation2 + $0x1e0] sm:$0xf] }
 0x117   :  { %1312 = vmatmul.bf16.gmra.mxu0 %v6326_v36  ;;  %1401 = vmatmul.bf16.gmra.mxu1 %v6328_v43  ;;  %v5765_v43 = vld [vmem:[#allocation2 + $0x1e4] sm:$0xf]  ;;  %v5187_v36 = vld [vmem:[#allocation5 + $0xe8] sm:$0xf] }
 0x118   :  { %9004 = vst [vmem:[#allocation70_spill] sm:$0xff] %v6334_v4  ;;  %1490 = vmatmul.bf16.gmra.mxu2 %v6330_v37  ;;  %v5767_v37 = vld [vmem:[#allocation2 + $0x1ec] sm:$0xf0]  ;;  %v5188_v22 = vor.u32 %v5800_v57, %v5187_v36 }
 0x119   :  { %1579 = vmatmul.bf16.gmra.mxu3 %v6332_v56  ;;  %2124 = vmatpush.bf16.msra.mxu2 %v5444_v28  ;;  %v5053_v56 = vld [vmem:[#allocation2 + $0x1f0] sm:$0xf0]  ;;  %v6342_v21 = vor.u32 %v5767_v37, %v5051_v63 }
 0x11a   :  { %1946 = vmatpush.bf16.msra.mxu0 %v5188_v22 }
 0x11b   :  { %v1451_v61 = vpop.f32.mrf.mxu2 }
 0x11c   :  { %v1452_v17 = vadd.f32 %v1451_v61, %v1363_v8  ;;  %v1540_v29 = vpop.f32.mrf.mxu3  ;;  %v1275_v23 = vpop.f32.mrf.mxu0  ;;  %v5766_v8 = vld [vmem:[#allocation2 + $0x1ec] sm:$0xf]  ;;  %v5316_v61 = vor.u32 %v5832_v18, %v5315_v42 }
 0x11d   :  { %v1364_v31 = vpop.f32.mrf.mxu1  ;;  %v6348_v48 = vor.u32 %v5766_v8, %v5061_v40 }
 0x11e   :  { %v6340_v30 = vadd.f32 %v1540_v29, %v1452_v17  ;;  %v1365_v38 = vadd.f32 %v1364_v31, %v1275_v23  ;;  %v6344_v23 = vor.u32 %v5765_v43, %v5053_v56  ;;  %v6346_v31 = vor.u32 %v5768_v9, %v5059_v6  ;;  %2035 = vmatpush.bf16.msra.mxu1 %v5316_v61 }
 0x120   :  { %9005 = vst [vmem:[#allocation71_spill] sm:$0xff] %v6340_v30 }
 0x123   :  { %v1453_v28 = vpop.f32.mrf.mxu2 }
 0x124   :  { %v1454_v59 = vadd.f32 %v1453_v28, %v1365_v38  ;;  %v1542_v17 = vpop.f32.mrf.mxu3  ;;  %v1278_v29 = vpop.f32.mrf.mxu0  ;;  %v5427_v28 = vld [vmem:[#allocation5 + $0x2c8] sm:$0xf] }
 0x125   :  { %v1367_v20 = vpop.f32.mrf.mxu1 }
 0x126   :  { %v6350_v57 = vadd.f32 %v1542_v17, %v1454_v59  ;;  %v1368_v36 = vadd.f32 %v1367_v20, %v1278_v29  ;;  %v5860_v59 = vld [vmem:[#allocation5 + $0x2d4] sm:$0xf0]  ;;  %v5555_v17 = vld [vmem:[#allocation5 + $0x3c8] sm:$0xf] }
 0x127   :  { %1317 = vmatmul.bf16.gmra.mxu0 %v6342_v21  ;;  %1406 = vmatmul.bf16.gmra.mxu1 %v6344_v23  ;;  %v5428_v29 = vor.u32 %v5860_v59, %v5427_v28 }
 0x128   :  { %9006 = vst [vmem:[#allocation72_spill] sm:$0xff] %v6350_v57  ;;  %1495 = vmatmul.bf16.gmra.mxu2 %v6346_v31 }
 0x129   :  { %1584 = vmatmul.bf16.gmra.mxu3 %v6348_v48  ;;  %2125 = vmatpush.bf16.msra.mxu2 %v5428_v29 }
 0x12b   :  { %v1456_v22 = vpop.f32.mrf.mxu2 }
 0x12c   :  { %v1457_v42 = vadd.f32 %v1456_v22, %v1368_v36  ;;  %v1545_v37 = vpop.f32.mrf.mxu3  ;;  %v1280_v43 = vpop.f32.mrf.mxu0  ;;  %v5892_v36 = vld [vmem:[#allocation5 + $0x3d4] sm:$0xf0] }
 0x12d   :  { %v1369_v56 = vpop.f32.mrf.mxu1 }
 0x12e   :  { %v6356_v38 = vadd.f32 %v1545_v37, %v1457_v42  ;;  %v1370_v63 = vadd.f32 %v1369_v56, %v1280_v43  ;;  %v5556_v42 = vor.u32 %v5892_v36, %v5555_v17 }
 0x130   :  { %9007 = vst [vmem:[#allocation73_spill] sm:$0xff] %v6356_v38  ;;  %2214 = vmatpush.bf16.msra.mxu3 %v5556_v42 }
 0x133   :  { %v1458_v6 = vpop.f32.mrf.mxu2 }
 0x134   :  { %v1459_v9 = vadd.f32 %v1458_v6, %v1370_v63  ;;  %v1547_v18 = vpop.f32.mrf.mxu3  ;;  %v1283_v20 = vpop.f32.mrf.mxu0 }
 0x135   :  { %v1372_v8 = vpop.f32.mrf.mxu1 }
 0x136   :  { %v6358_v40 = vadd.f32 %v1547_v18, %v1459_v9  ;;  %v1373_v61 = vadd.f32 %v1372_v8, %v1283_v20  ;;  %v5171_v18 = vld [vmem:[#allocation5 + $0xc8] sm:$0xf]  ;;  %v5796_v20 = vld [vmem:[#allocation5 + $0xd4] sm:$0xf0] }
 0x137   :  { %1598 = vmatmul.bf16.vlgmr.msrb.gmra.mxu0 %v6136_v47  ;;  %1687 = vmatmul.bf16.vlgmr.msrb.gmra.mxu1 %v6138_v51  ;;  %v5299_v8 = vld [vmem:[#allocation5 + $0x1c8] sm:$0xf] }
 0x138   :  { %9008 = vst [vmem:[#allocation74_spill] sm:$0xff] %v6358_v40  ;;  %1776 = vmatmul.bf16.vlgmr.msrb.gmra.mxu2 %v6140_v52  ;;  %v5828_v52 = vld [vmem:[#allocation5 + $0x1d4] sm:$0xf0] }
 0x139   :  { %1865 = vmatmul.bf16.vlgmr.msrb.gmra.mxu3 %v6142_v53  ;;  %v5172_v53 = vor.u32 %v5796_v20, %v5171_v18  ;;  %v5300_v51 = vor.u32 %v5828_v52, %v5299_v8 }
 0x13b   :  { %v1461_v22 = vpop.f32.mrf.mxu2  ;;  %1947 = vmatpush.bf16.msra.mxu0 %v5172_v53  ;;  %2036 = vmatpush.bf16.msra.mxu1 %v5300_v51 }
 0x13c   :  { %v1462_v37 = vadd.f32 %v1461_v22, %v1373_v61  ;;  %v1550_v43 = vpop.f32.mrf.mxu3  ;;  %v1285_v56 = vpop.f32.mrf.mxu0 }
 0x13d   :  { %v1374_v63 = vpop.f32.mrf.mxu1 }
 0x13e   :  { %v6364_v6 = vadd.f32 %v1550_v43, %v1462_v37  ;;  %v1375_v9 = vadd.f32 %v1374_v63, %v1285_v56 }
 0x140   :  { %9009 = vst [vmem:[#allocation75_spill] sm:$0xff] %v6364_v6 }
 0x143   :  { %v1463_v47 = vpop.f32.mrf.mxu2 }
 0x144   :  { %v1464_v28 = vadd.f32 %v1463_v47, %v1375_v9  ;;  %v1552_v59 = vpop.f32.mrf.mxu3  ;;  %v1288_v17 = vpop.f32.mrf.mxu0 }
 0x145   :  { %v1377_v61 = vpop.f32.mrf.mxu1 }
 0x146   :  { %v6366_v36 = vadd.f32 %v1552_v59, %v1464_v28  ;;  %v1378_v29 = vadd.f32 %v1377_v61, %v1288_v17  ;;  %v5411_v28 = vld [vmem:[#allocation5 + $0x2a8] sm:$0xf]  ;;  %v5856_v59 = vld [vmem:[#allocation5 + $0x2b4] sm:$0xf0] }
 0x147   :  { %1603 = vmatmul.bf16.gmra.mxu0 %v6148_v12  ;;  %1692 = vmatmul.bf16.gmra.mxu1 %v6150_v13  ;;  %v5539_v17 = vld [vmem:[#allocation5 + $0x3a8] sm:$0xf]  ;;  %v5412_v61 = vor.u32 %v5856_v59, %v5411_v28  ;;  %v2658_v28 = vadd.f32 %v6254_v7, %v6244_v10 }
 0x148   :  { %9010 = vst [vmem:[#allocation76_spill] sm:$0xff] %v6366_v36  ;;  %1781 = vmatmul.bf16.gmra.mxu2 %v6152_v14 }
 0x149   :  { %1870 = vmatmul.bf16.gmra.mxu3 %v6154_v15  ;;  %2126 = vmatpush.bf16.msra.mxu2 %v5412_v61 }
 0x14b   :  { %v1466_v22 = vpop.f32.mrf.mxu2 }
 0x14c   :  { %v1467_v52 = vadd.f32 %v1466_v22, %v1378_v29  ;;  %v1555_v42 = vpop.f32.mrf.mxu3  ;;  %v1290_v53 = vpop.f32.mrf.mxu0  ;;  %v5888_v29 = vld [vmem:[#allocation5 + $0x3b4] sm:$0xf0] }
 0x14d   :  { %v1379_v47 = vpop.f32.mrf.mxu1 }
 0x14e   :  { %v6372_v37 = vadd.f32 %v1555_v42, %v1467_v52  ;;  %v1380_v51 = vadd.f32 %v1379_v47, %v1290_v53  ;;  %v5540_v52 = vor.u32 %v5888_v29, %v5539_v17  ;;  %v2659_v29 = vadd.f32 %v2658_v28, %v6260_v19 }
 0x150   :  { %9011 = vst [vmem:[#allocation77_spill] sm:$0xff] %v6372_v37  ;;  %2215 = vmatpush.bf16.msra.mxu3 %v5540_v52 }
 0x153   :  { %v1468_v43 = vpop.f32.mrf.mxu2 }
 0x154   :  { %v1469_v56 = vadd.f32 %v1468_v43, %v1380_v51  ;;  %v1557_v63 = vpop.f32.mrf.mxu3  ;;  %v1293_v9 = vpop.f32.mrf.mxu0 }
 0x155   :  { %v1382_v18 = vpop.f32.mrf.mxu1 }
 0x156   :  { %v6374_v20 = vadd.f32 %v1557_v63, %v1469_v56  ;;  %v1383_v8 = vadd.f32 %v1382_v18, %v1293_v9  ;;  %v5155_v63 = vld [vmem:[#allocation5 + $0xa8] sm:$0xf]  ;;  %v5792_v9 = vld [vmem:[#allocation5 + $0xb4] sm:$0xf0] }
 0x157   :  { %1608 = vmatmul.bf16.gmra.mxu0 %v6160_v24  ;;  %1697 = vmatmul.bf16.gmra.mxu1 %v6162_v25  ;;  %v5283_v18 = vld [vmem:[#allocation5 + $0x1a8] sm:$0xf] }
 0x158   :  { %9012 = vst [vmem:[#allocation78_spill] sm:$0xff] %v6374_v20  ;;  %1786 = vmatmul.bf16.gmra.mxu2 %v6164_v26  ;;  %v5824_v26 = vld [vmem:[#allocation5 + $0x1b4] sm:$0xf0] }
 0x159   :  { %1875 = vmatmul.bf16.gmra.mxu3 %v6166_v27  ;;  %v5156_v27 = vor.u32 %v5792_v9, %v5155_v63  ;;  %v5284_v25 = vor.u32 %v5824_v26, %v5283_v18 }
 0x15b   :  { %v1471_v22 = vpop.f32.mrf.mxu2  ;;  %1948 = vmatpush.bf16.msra.mxu0 %v5156_v27  ;;  %2037 = vmatpush.bf16.msra.mxu1 %v5284_v25 }
 0x15c   :  { %v1472_v42 = vadd.f32 %v1471_v22, %v1383_v8  ;;  %v1560_v53 = vpop.f32.mrf.mxu3  ;;  %v1295_v47 = vpop.f32.mrf.mxu0 }
 0x15d   :  { %v1384_v51 = vpop.f32.mrf.mxu1 }
 0x15e   :  { %v6380_v43 = vadd.f32 %v1560_v53, %v1472_v42  ;;  %v1385_v56 = vadd.f32 %v1384_v51, %v1295_v47  ;;  %v2660_v42 = vadd.f32 %v2659_v29, %v6270_v16 }
 0x160   :  { %9013 = vst [vmem:[#allocation79_spill] sm:$0xff] %v6380_v43 }
 0x163   :  { %v1473_v24 = vpop.f32.mrf.mxu2 }
 0x164   :  { %v1474_v8 = vadd.f32 %v1473_v24, %v1385_v56  ;;  %v1562_v59 = vpop.f32.mrf.mxu3  ;;  %v1298_v17 = vpop.f32.mrf.mxu0  ;;  %v2661_v24 = vadd.f32 %v2660_v42, %v6276_v60 }
 0x165   :  { %v1387_v61 = vpop.f32.mrf.mxu1 }
 0x166   :  { %v6385_v22 = vadd.f32 %v1562_v59, %v1474_v8  ;;  %v1388_v52 = vadd.f32 %v1387_v61, %v1298_v17  ;;  %v2662_v25 = vadd.f32 %v2661_v24, %v6286_v58 }
 0x167   :  { %1613 = vmatmul.bf16.gmra.mxu0 %v6172_v49  ;;  %1702 = vmatmul.bf16.gmra.mxu1 %v6174_v50 }
 0x168   :  { %9014 = vst [vmem:[#allocation80_spill] sm:$0xff] %v6385_v22  ;;  %1791 = vmatmul.bf16.gmra.mxu2 %v6176_v54  ;;  %v2663_v56 = vadd.f32 %v2662_v25, %v6292_v62 }
 0x169   :  { %1880 = vmatmul.bf16.gmra.mxu3 %v6178_v55 }
 0x16a   :  { %v2664_v18 = vadd.f32 %v2663_v56, %v6302_v11 }
 0x16b   :  { %v1476_v26 = vpop.f32.mrf.mxu2 }
 0x16c   :  { %v1477_v27 = vadd.f32 %v1476_v26, %v1388_v52  ;;  %v1565_v53 = vpop.f32.mrf.mxu3  ;;  %v1300_v47 = vpop.f32.mrf.mxu0  ;;  %v2665_v28 = vadd.f32 %v2664_v18, %v6308_v39 }
 0x16d   :  { %v1389_v51 = vpop.f32.mrf.mxu1 }
 0x16e   :  { %v6395_v63 = vadd.f32 %v1565_v53, %v1477_v27  ;;  %v1390_v9 = vadd.f32 %v1389_v51, %v1300_v47  ;;  %v2666_v59 = vadd.f32 %v2665_v28, %v6318_v41  ;;  %v5395_v27 = vld [vmem:[#allocation5 + $0x288] sm:$0xf]  ;;  %v5852_v53 = vld [vmem:[#allocation5 + $0x294] sm:$0xf0] }
 0x16f   :  { %v5523_v47 = vld [vmem:[#allocation5 + $0x388] sm:$0xf]  ;;  %v5396_v56 = vor.u32 %v5852_v53, %v5395_v27  ;;  %v5788_v27 = vld [vmem:[#allocation5 + $0x94] sm:$0xf0] }
 0x170   :  { %9015 = vst [vmem:[#allocation81_spill] sm:$0xff] %v6395_v63  ;;  %v2667_v52 = vadd.f32 %v2666_v59, %v6324_v5  ;;  %v5267_v53 = vld [vmem:[#allocation5 + $0x188] sm:$0xf] }
 0x171   :  { %2127 = vmatpush.bf16.msra.mxu2 %v5396_v56 }
 0x172   :  { %v2668_v25 = vadd.f32 %v2667_v52, %v6334_v4 }
 0x173   :  { %v1478_v8 = vpop.f32.mrf.mxu2 }
 0x174   :  { %v1479_v17 = vadd.f32 %v1478_v8, %v1390_v9  ;;  %v1567_v61 = vpop.f32.mrf.mxu3  ;;  %v1303_v29 = vpop.f32.mrf.mxu0  ;;  %v2669_v51 = vadd.f32 %v2668_v25, %v6340_v30  ;;  %v5884_v9 = vld [vmem:[#allocation5 + $0x394] sm:$0xf0]  ;;  %v5139_v25 = vld [vmem:[#allocation5 + $0x88] sm:$0xf] }
 0x175   :  { %v1392_v42 = vpop.f32.mrf.mxu1  ;;  %v5524_v28 = vor.u32 %v5884_v9, %v5523_v47  ;;  %v5140_v30 = vor.u32 %v5788_v27, %v5139_v25  ;;  %v5820_v47 = vld [vmem:[#allocation5 + $0x194] sm:$0xf0] }
 0x176   :  { %v6401_v24 = vadd.f32 %v1567_v61, %v1479_v17  ;;  %v1393_v26 = vadd.f32 %v1392_v42, %v1303_v29  ;;  %v2670_v8 = vadd.f32 %v2669_v51, %v6350_v57  ;;  %v9026_v57 = vld [vmem:[#allocation33_spill] sm:$0xff] }
 0x177   :  { %1618 = vmatmul.bf16.gmra.mxu0 %v6184_v0  ;;  %1707 = vmatmul.bf16.gmra.mxu1 %v6186_v1 }
 0x178   :  { %9016 = vst [vmem:[#allocation82_spill] sm:$0xff] %v6401_v24  ;;  %1796 = vmatmul.bf16.gmra.mxu2 %v6188_v2  ;;  %2216 = vmatpush.bf16.msra.mxu3 %v5524_v28  ;;  %v2671_v42 = vadd.f32 %v2670_v8, %v6356_v38  ;;  %v9024_v38 = vld [vmem:[#allocation31_spill] sm:$0xff] }
 0x179   :  { %1885 = vmatmul.bf16.gmra.mxu3 %v6190_v3  ;;  %1949 = vmatpush.bf16.msra.mxu0 %v5140_v30 }
 0x17a   :  { %v2672_v5 = vadd.f32 %v2671_v42, %v6358_v40 }
 0x17b   :  { %v1481_v18 = vpop.f32.mrf.mxu2 }
 0x17c   :  { %v1482_v59 = vadd.f32 %v1481_v18, %v1393_v26  ;;  %v1570_v17 = vpop.f32.mrf.mxu3  ;;  %v1305_v61 = vpop.f32.mrf.mxu0  ;;  %v2673_v51 = vadd.f32 %v2672_v5, %v6364_v6  ;;  %v5268_v26 = vor.u32 %v5820_v47, %v5267_v53 }
 0x17d   :  { %v1394_v29 = vpop.f32.mrf.mxu1 }
 0x17e   :  { %v6411_v52 = vadd.f32 %v1570_v17, %v1482_v59  ;;  %v1395_v4 = vadd.f32 %v1394_v29, %v1305_v61  ;;  %v2674_v56 = vadd.f32 %v2673_v51, %v6366_v36  ;;  %2038 = vmatpush.bf16.msra.mxu1 %v5268_v26 }
 0x180   :  { %9017 = vst [vmem:[#allocation83_spill] sm:$0xff] %v6411_v52  ;;  %v2675_v17 = vadd.f32 %v2674_v56, %v6372_v37 }
 0x182   :  { %v2676_v42 = vadd.f32 %v2675_v17, %v6374_v20 }
 0x183   :  { %v1483_v9 = vpop.f32.mrf.mxu2 }
 0x184   :  { %v1484_v18 = vadd.f32 %v1483_v9, %v1395_v4  ;;  %v1572_v28 = vpop.f32.mrf.mxu3  ;;  %v1308_v8 = vpop.f32.mrf.mxu0  ;;  %v2677_v5 = vadd.f32 %v2676_v42, %v6380_v43 }
 0x185   :  { %v1397_v59 = vpop.f32.mrf.mxu1 }
 0x186   :  { %v6417_v61 = vadd.f32 %v1572_v28, %v1484_v18  ;;  %v1398_v29 = vadd.f32 %v1397_v59, %v1308_v8  ;;  %v2678_v30 = vadd.f32 %v2677_v5, %v6385_v22 }
 0x187   :  { %1623 = vmatmul.bf16.gmra.mxu0 %v6196_v32  ;;  %1712 = vmatmul.bf16.gmra.mxu1 %v6198_v33 }
 0x188   :  { %9018 = vst [vmem:[#allocation84_spill] sm:$0xff] %v6417_v61  ;;  %1801 = vmatmul.bf16.gmra.mxu2 %v6200_v34  ;;  %v2679_v51 = vadd.f32 %v2678_v30, %v6395_v63 }
 0x189   :  { %1890 = vmatmul.bf16.gmra.mxu3 %v6202_v35 }
 0x18a   :  { %v2680_v56 = vadd.f32 %v2679_v51, %v6401_v24  ;;  %v9022_v24 = vld [vmem:[#allocation29_spill] sm:$0xff] }
 0x18b   :  { %v1486_v4 = vpop.f32.mrf.mxu2 }
 0x18c   :  { %v1487_v25 = vadd.f32 %v1486_v4, %v1398_v29  ;;  %v1575_v27 = vpop.f32.mrf.mxu3  ;;  %v1310_v53 = vpop.f32.mrf.mxu0  ;;  %v2681_v18 = vadd.f32 %v2680_v56, %v6411_v52  ;;  %v9020_v52 = vld [vmem:[#allocation27_spill] sm:$0xff] }
 0x18d   :  { %v1399_v47 = vpop.f32.mrf.mxu1 }
 0x18e   :  { %v6427_v26 = vadd.f32 %v1575_v27, %v1487_v25  ;;  %v1400_v9 = vadd.f32 %v1399_v47, %v1310_v53  ;;  %v2682_v8 = vadd.f32 %v2681_v18, %v6417_v61  ;;  %v9019_v25 = vld [vmem:[#allocation26_spill] sm:$0xff] }
 0x190   :  { %v2683_v29 = vadd.f32 %v2682_v8, %v6427_v26 }
 0x193   :  { %v1488_v28 = vpop.f32.mrf.mxu2 }
 0x194   :  { %v1489_v59 = vadd.f32 %v1488_v28, %v1400_v9  ;;  %v1577_v17 = vpop.f32.mrf.mxu3  ;;  %v1313_v42 = vpop.f32.mrf.mxu0 }
 0x195   :  { %v1402_v5 = vpop.f32.mrf.mxu1 }
 0x196   :  { %v6433_v4 = vadd.f32 %v1577_v17, %v1489_v59  ;;  %v1403_v22 = vadd.f32 %v1402_v5, %v1313_v42 }
 0x197   :  { %1628 = vmatmul.bf16.gmra.mxu0 %v6208_v44  ;;  %1717 = vmatmul.bf16.gmra.mxu1 %v6210_v45 }
 0x198   :  { %v2684_v30 = vadd.f32 %v2683_v29, %v6433_v4  ;;  %1806 = vmatmul.bf16.gmra.mxu2 %v6212_v46 }
 0x199   :  { %1895 = vmatmul.bf16.gmra.mxu3 %v9019_v25 }
 0x19b   :  { %v1491_v27 = vpop.f32.mrf.mxu2 }
 0x19c   :  { %v1492_v53 = vadd.f32 %v1491_v27, %v1403_v22  ;;  %v1580_v47 = vpop.f32.mrf.mxu3  ;;  %v1315_v51 = vpop.f32.mrf.mxu0  ;;  %v9021_v27 = vld [vmem:[#allocation28_spill] sm:$0xff] }
 0x19d   :  { %v1404_v9 = vpop.f32.mrf.mxu1 }
 0x19e   :  { %v6440_v56 = vadd.f32 %v1580_v47, %v1492_v53  ;;  %v1405_v18 = vadd.f32 %v1404_v9, %v1315_v51  ;;  %v9023_v53 = vld [vmem:[#allocation30_spill] sm:$0xff] }
 0x1a0   :  { %v2685_v28 = vadd.f32 %v2684_v30, %v6440_v56 }
 0x1a3   :  { %v1493_v8 = vpop.f32.mrf.mxu2 }
 0x1a4   :  { %v1494_v59 = vadd.f32 %v1493_v8, %v1405_v18  ;;  %v1582_v17 = vpop.f32.mrf.mxu3  ;;  %v1318_v42 = vpop.f32.mrf.mxu0 }
 0x1a5   :  { %v1407_v5 = vpop.f32.mrf.mxu1 }
 0x1a6   :  { %v6443_v29 = vadd.f32 %v1582_v17, %v1494_v59  ;;  %v1408_v61 = vadd.f32 %v1407_v5, %v1318_v42  ;;  %v6090_v59 = vmov 256.0  }
 0x1a7   :  { %1633 = vmatmul.bf16.gmra.mxu0 %v9020_v52  ;;  %1722 = vmatmul.bf16.gmra.mxu1 %v9021_v27  ;;  %5942 = vrcp.f32 %v6090_v59 }
 0x1a8   :  { %v2686_v22 = vadd.f32 %v2685_v28, %v6443_v29  ;;  %1811 = vmatmul.bf16.gmra.mxu2 %v9022_v24 }
 0x1a9   :  { %1900 = vmatmul.bf16.gmra.mxu3 %v9023_v53  ;;  %v5203_v53 = vld [vmem:[#allocation5 + $0x108] sm:$0xf] }
 0x1ab   :  { %v1496_v47 = vpop.f32.mrf.mxu2 }
 0x1ac   :  { %v1497_v30 = vadd.f32 %v1496_v47, %v1408_v61  ;;  %v1585_v51 = vpop.f32.mrf.mxu3  ;;  %v1320_v9 = vpop.f32.mrf.mxu0  ;;  %v9025_v47 = vld [vmem:[#allocation32_spill] sm:$0xff] }
 0x1ad   :  { %v1409_v18 = vpop.f32.mrf.mxu1  ;;  %v5943_v5 = vpop.eup %5942 }
 0x1ae   :  { %v1586_v8 = vadd.f32 %v1585_v51, %v1497_v30  ;;  %v1410_v63 = vadd.f32 %v1409_v18, %v1320_v9  ;;  %v2807_v40 = vmul.f32 256.0, %v5943_v5  ;;  %v9027_v30 = vld [vmem:[#allocation34_spill] sm:$0xff]  ;;  %vm2811_vm0 = vweird.f32 %v5943_v5 }
 0x1b0   :  { %v2687_v17 = vadd.f32 %v2686_v22, %v1586_v8  ;;  %v2808_v22 = vsub.f32 1.0, %v2807_v40 }
 0x1b3   :  { %v1498_v42 = vpop.f32.mrf.mxu2 }
 0x1b4   :  { %v1499_v43 = vadd.f32 %v1498_v42, %v1410_v63  ;;  %v1587_v28 = vpop.f32.mrf.mxu3  ;;  %v1599_v20 = vpop.f32.mrf.mxu0 }
 0x1b5   :  { %v1688_v37 = vpop.f32.mrf.mxu1 }
 0x1b6   :  { %v1588_v36 = vadd.f32 %v1587_v28, %v1499_v43  ;;  %v1689_v6 = vadd.f32 %v1688_v37, %v1599_v20  ;;  %v2809_v28 = vmul.f32 %v5943_v5, %v2808_v22 }
 0x1b7   :  { %1638 = vmatmul.bf16.gmra.mxu0 %v9024_v38  ;;  %1727 = vmatmul.bf16.gmra.mxu1 %v9025_v47  ;;  %v5836_v47 = vld [vmem:[#allocation5 + $0x214] sm:$0xf0] }
 0x1b8   :  { %v2688_v61 = vadd.f32 %v2687_v17, %v1588_v36  ;;  %1816 = vmatmul.bf16.gmra.mxu2 %v9026_v57  ;;  %v2810_v11 = vadd.f32 %v5943_v5, %v2809_v28  ;;  %v9068_v57 = vld [vmem:[#allocation66_spill] sm:$0xff] }
 0x1b9   :  { %1905 = vmatmul.bf16.gmra.mxu3 %v9027_v30  ;;  %v5491_v30 = vld [vmem:[#allocation5 + $0x348] sm:$0xf] }
 0x1ba   :  { %v2689_v51 = vrot.slane %v2688_v61, 4 }
 0x1bb   :  { %v1777_v9 = vpop.f32.mrf.mxu2 }
 0x1bc   :  { %v2690_v18 = vadd.f32 %v2689_v51, %v2688_v61  ;;  %v1778_v63 = vadd.f32 %v1777_v9, %v1689_v6  ;;  %v1866_v59 = vpop.f32.mrf.mxu3  ;;  %v1601_v42 = vpop.f32.mrf.mxu0  ;;  %v6458_v51 = vsel %vm2811_vm0, %v5943_v5, %v2810_v11  ;;  %v9031_v9 = vld [vmem:[#allocation36_spill] sm:$0xff] }
 0x1bd   :  { %v1690_v41 = vpop.f32.mrf.mxu1  ;;  %9030 = vst [vmem:[#allocation28_spill] sm:$0xff] %v6458_v51 }
 0x1be   :  { %v2691_v43 = vrot.slane %v2690_v18, 2  ;;  %v6454_v37 = vadd.f32 %v1866_v59, %v1778_v63  ;;  %v1691_v20 = vadd.f32 %v1690_v41, %v1601_v42  ;;  %v9032_v63 = vld [vmem:[#allocation37_spill] sm:$0xff]  ;;  %v9033_v41 = vld [vmem:[#allocation38_spill] sm:$0xff] }
 0x1c0   :  { %9028 = vst [vmem:[#allocation26_spill] sm:$0xff] %v6454_v37  ;;  %v2692_v17 = vadd.f32 %v2691_v43, %v2690_v18  ;;  %v9035_v18 = vld [vmem:[#allocation39_spill] sm:$0xff] }
 0x1c2   :  { %v2693_v39 = vrot.slane %v2692_v17, 1 }
 0x1c3   :  { %v1779_v62 = vpop.f32.mrf.mxu2 }
 0x1c4   :  { %v1780_v58 = vadd.f32 %v1779_v62, %v1691_v20  ;;  %v1868_v60 = vpop.f32.mrf.mxu3  ;;  %v1604_v16 = vpop.f32.mrf.mxu0  ;;  %v2694_v19 = vadd.f32 %v2693_v39, %v2692_v17 }
 0x1c5   :  { %v1693_v40 = vpop.f32.mrf.mxu1 }
 0x1c6   :  { %v6456_v61 = vadd.f32 %v1868_v60, %v1780_v58  ;;  %v1694_v6 = vadd.f32 %v1693_v40, %v1604_v16  ;;  %v6464_v22 = vmul.f32 %v6458_v51, %v2694_v19 }
 0x1c7   :  { %1643 = vmatmul.bf16.gmra.mxu0 %v9031_v9  ;;  %1732 = vmatmul.bf16.gmra.mxu1 %v9032_v63 }
 0x1c8   :  { %9029 = vst [vmem:[#allocation27_spill] sm:$0xff] %v6456_v61  ;;  %1821 = vmatmul.bf16.gmra.mxu2 %v9033_v41  ;;  %v6469_v16 = vsub.f32 %v6427_v26, %v6464_v22  ;;  %v6473_v60 = vsub.f32 %v6433_v4, %v6464_v22  ;;  %v6477_v58 = vsub.f32 %v6440_v56, %v6464_v22  ;;  %v9042_v4 = vld [vmem:[#allocation42_spill] sm:$0xff]  ;;  %v9043_v56 = vld [vmem:[#allocation43_spill] sm:$0xff] }
 0x1c9   :  { %9034 = vst [vmem:[#allocation85_spill] sm:$0xff] %v6464_v22  ;;  %1910 = vmatmul.bf16.gmra.mxu3 %v9035_v18  ;;  %v6481_v19 = vsub.f32 %v6443_v29, %v6464_v22  ;;  %v6484_v11 = vsub.f32 %v1586_v8, %v6464_v22  ;;  %v6487_v5 = vsub.f32 %v1588_v36, %v6464_v22  ;;  %v5123_v18 = vld [vmem:[#allocation5 + $0x68] sm:$0xf] }
 0x1ca   :  { %9036 = vst [vmem:[#allocation86_spill] sm:$0xff] %v6469_v16 }
 0x1cb   :  { %v1782_v62 = vpop.f32.mrf.mxu2  ;;  %9037 = vst [vmem:[#allocation87_spill] sm:$0xff] %v6473_v60  ;;  %v9044_v60 = vld [vmem:[#allocation44_spill] sm:$0xff] }
 0x1cc   :  { %v1871_v59 = vpop.f32.mrf.mxu3  ;;  %v1606_v42 = vpop.f32.mrf.mxu0  ;;  %9038 = vst [vmem:[#allocation88_spill] sm:$0xff] %v6477_v58  ;;  %v1783_v17 = vadd.f32 %v1782_v62, %v1694_v6 }
 0x1cd   :  { %v1695_v39 = vpop.f32.mrf.mxu1  ;;  %9039 = vst [vmem:[#allocation89_spill] sm:$0xff] %v6481_v19 }
 0x1ce   :  { %9040 = vst [vmem:[#allocation90_spill] sm:$0xff] %v6484_v11  ;;  %v1696_v40 = vadd.f32 %v1695_v39, %v1606_v42  ;;  %v6492_v29 = vadd.f32 %v1871_v59, %v1783_v17  ;;  %v9046_v11 = vld [vmem:[#allocation45_spill] sm:$0xff]  ;;  %v9050_v17 = vld [vmem:[#allocation48_spill] sm:$0xff] }
 0x1cf   :  { %9041 = vst [vmem:[#allocation91_spill] sm:$0xff] %v6487_v5 }
 0x1d0   :  { %9045 = vst [vmem:[#allocation92_spill] sm:$0xff] %v6492_v29 }
 0x1d3   :  { %v1784_v26 = vpop.f32.mrf.mxu2 }
 0x1d4   :  { %v1873_v43 = vpop.f32.mrf.mxu3  ;;  %v1609_v20 = vpop.f32.mrf.mxu0  ;;  %v1785_v8 = vadd.f32 %v1784_v26, %v1696_v40  ;;  %v9051_v40 = vld [vmem:[#allocation49_spill] sm:$0xff] }
 0x1d5   :  { %v1698_v28 = vpop.f32.mrf.mxu1 }
 0x1d6   :  { %v1699_v58 = vadd.f32 %v1698_v28, %v1609_v20  ;;  %v6495_v5 = vadd.f32 %v1873_v43, %v1785_v8  ;;  %v9052_v43 = vld [vmem:[#allocation50_spill] sm:$0xff] }
 0x1d7   :  { %1648 = vmatmul.bf16.gmra.mxu0 %v9042_v4  ;;  %1737 = vmatmul.bf16.gmra.mxu1 %v9043_v56  ;;  %v9062_v56 = vld [vmem:[#allocation60_spill] sm:$0xff]  ;;  %v5379_v4 = vld [vmem:[#allocation5 + $0x268] sm:$0xf] }
 0x1d8   :  { %1826 = vmatmul.bf16.gmra.mxu2 %v9044_v60  ;;  %9047 = vst [vmem:[#allocation93_spill] sm:$0xff] %v6495_v5 }
 0x1d9   :  { %1915 = vmatmul.bf16.gmra.mxu3 %v9046_v11  ;;  %v9056_v11 = vld [vmem:[#allocation54_spill] sm:$0xff] }
 0x1db   :  { %v1787_v36 = vpop.f32.mrf.mxu2 }
 0x1dc   :  { %v1788_v19 = vadd.f32 %v1787_v36, %v1699_v58  ;;  %v1876_v16 = vpop.f32.mrf.mxu3  ;;  %v1611_v7 = vpop.f32.mrf.mxu0  ;;  %v9053_v58 = vld [vmem:[#allocation51_spill] sm:$0xff] }
 0x1dd   :  { %v1700_v10 = vpop.f32.mrf.mxu1 }
 0x1de   :  { %v6497_v22 = vadd.f32 %v1876_v16, %v1788_v19  ;;  %v1701_v6 = vadd.f32 %v1700_v10, %v1611_v7 }
 0x1e0   :  { %9048 = vst [vmem:[#allocation94_spill] sm:$0xff] %v6497_v22 }
 0x1e3   :  { %v1789_v62 = vpop.f32.mrf.mxu2 }
 0x1e4   :  { %v1790_v42 = vadd.f32 %v1789_v62, %v1701_v6  ;;  %v1878_v39 = vpop.f32.mrf.mxu3  ;;  %v1614_v20 = vpop.f32.mrf.mxu0 }
 0x1e5   :  { %v1703_v28 = vpop.f32.mrf.mxu1 }
 0x1e6   :  { %v6499_v59 = vadd.f32 %v1878_v39, %v1790_v42  ;;  %v1704_v26 = vadd.f32 %v1703_v28, %v1614_v20 }
 0x1e7   :  { %1653 = vmatmul.bf16.gmra.mxu0 %v9050_v17  ;;  %1742 = vmatmul.bf16.gmra.mxu1 %v9051_v40 }
 0x1e8   :  { %9049 = vst [vmem:[#allocation95_spill] sm:$0xff] %v6499_v59  ;;  %1831 = vmatmul.bf16.gmra.mxu2 %v9052_v43  ;;  %v9057_v43 = vld [vmem:[#allocation55_spill] sm:$0xff] }
 0x1e9   :  { %1920 = vmatmul.bf16.gmra.mxu3 %v9053_v58  ;;  %v9058_v58 = vld [vmem:[#allocation56_spill] sm:$0xff] }
 0x1eb   :  { %v1792_v8 = vpop.f32.mrf.mxu2 }
 0x1ec   :  { %v1793_v16 = vadd.f32 %v1792_v8, %v1704_v26  ;;  %v1881_v19 = vpop.f32.mrf.mxu3  ;;  %v1616_v10 = vpop.f32.mrf.mxu0  ;;  %v9059_v26 = vld [vmem:[#allocation57_spill] sm:$0xff] }
 0x1ed   :  { %v1705_v7 = vpop.f32.mrf.mxu1 }
 0x1ee   :  { %v6505_v36 = vadd.f32 %v1881_v19, %v1793_v16  ;;  %v1706_v6 = vadd.f32 %v1705_v7, %v1616_v10 }
 0x1f0   :  { %9054 = vst [vmem:[#allocation96_spill] sm:$0xff] %v6505_v36 }
 0x1f3   :  { %v1794_v62 = vpop.f32.mrf.mxu2 }
 0x1f4   :  { %v1795_v42 = vadd.f32 %v1794_v62, %v1706_v6  ;;  %v1883_v39 = vpop.f32.mrf.mxu3  ;;  %v1619_v20 = vpop.f32.mrf.mxu0 }
 0x1f5   :  { %v1708_v28 = vpop.f32.mrf.mxu1 }
 0x1f6   :  { %v6507_v17 = vadd.f32 %v1883_v39, %v1795_v42  ;;  %v1709_v40 = vadd.f32 %v1708_v28, %v1619_v20 }
 0x1f7   :  { %1658 = vmatmul.bf16.gmra.mxu0 %v9056_v11  ;;  %1747 = vmatmul.bf16.gmra.mxu1 %v9057_v43 }
 0x1f8   :  { %9055 = vst [vmem:[#allocation97_spill] sm:$0xff] %v6507_v17  ;;  %1836 = vmatmul.bf16.gmra.mxu2 %v9058_v58  ;;  %v9063_v58 = vld [vmem:[#allocation61_spill] sm:$0xff] }
 0x1f9   :  { %1925 = vmatmul.bf16.gmra.mxu3 %v9059_v26  ;;  %v9064_v26 = vld [vmem:[#allocation62_spill] sm:$0xff] }
 0x1fb   :  { %v1797_v8 = vpop.f32.mrf.mxu2 }
 0x1fc   :  { %v1798_v16 = vadd.f32 %v1797_v8, %v1709_v40  ;;  %v1886_v19 = vpop.f32.mrf.mxu3  ;;  %v1621_v10 = vpop.f32.mrf.mxu0  ;;  %v9065_v40 = vld [vmem:[#allocation63_spill] sm:$0xff] }
 0x1fd   :  { %v1710_v7 = vpop.f32.mrf.mxu1 }
 0x1fe   :  { %v6513_v6 = vadd.f32 %v1886_v19, %v1798_v16  ;;  %v1711_v62 = vadd.f32 %v1710_v7, %v1621_v10 }
 0x200   :  { %9060 = vst [vmem:[#allocation98_spill] sm:$0xff] %v6513_v6 }
 0x203   :  { %v1799_v60 = vpop.f32.mrf.mxu2 }
 0x204   :  { %v1800_v42 = vadd.f32 %v1799_v60, %v1711_v62  ;;  %v1888_v39 = vpop.f32.mrf.mxu3  ;;  %v1624_v20 = vpop.f32.mrf.mxu0 }
 0x205   :  { %v1713_v28 = vpop.f32.mrf.mxu1 }
 0x206   :  { %v6515_v11 = vadd.f32 %v1888_v39, %v1800_v42  ;;  %v1714_v43 = vadd.f32 %v1713_v28, %v1624_v20  ;;  %v5848_v42 = vld [vmem:[#allocation5 + $0x274] sm:$0xf0]  ;;  %v5507_v39 = vld [vmem:[#allocation5 + $0x368] sm:$0xf] }
 0x207   :  { %1663 = vmatmul.bf16.gmra.mxu0 %v9062_v56  ;;  %1752 = vmatmul.bf16.gmra.mxu1 %v9063_v58  ;;  %v5380_v28 = vor.u32 %v5848_v42, %v5379_v4  ;;  %v5880_v56 = vld [vmem:[#allocation5 + $0x374] sm:$0xf0] }
 0x208   :  { %9061 = vst [vmem:[#allocation99_spill] sm:$0xff] %v6515_v11  ;;  %1841 = vmatmul.bf16.gmra.mxu2 %v9064_v26  ;;  %v5784_v58 = vld [vmem:[#allocation5 + $0x74] sm:$0xf0] }
 0x209   :  { %1930 = vmatmul.bf16.gmra.mxu3 %v9065_v40  ;;  %v5508_v40 = vor.u32 %v5880_v56, %v5507_v39  ;;  %v5124_v63 = vor.u32 %v5784_v58, %v5123_v18  ;;  %2128 = vmatpush.bf16.msra.mxu2 %v5380_v28  ;;  %v5844_v4 = vld [vmem:[#allocation5 + $0x254] sm:$0xf0]  ;;  %v5235_v58 = vld [vmem:[#allocation5 + $0x148] sm:$0xf] }
 0x20a   :  { %v5780_v56 = vld [vmem:[#allocation5 + $0x54] sm:$0xf0]  ;;  %v9069_v28 = vld [vmem:[#allocation67_spill] sm:$0xff] }
 0x20b   :  { %v1802_v8 = vpop.f32.mrf.mxu2  ;;  %2217 = vmatpush.bf16.msra.mxu3 %v5508_v40  ;;  %1950 = vmatpush.bf16.msra.mxu0 %v5124_v63  ;;  %v5812_v39 = vld [vmem:[#allocation5 + $0x154] sm:$0xf0] }
 0x20c   :  { %v1803_v16 = vadd.f32 %v1802_v8, %v1714_v43  ;;  %v1891_v19 = vpop.f32.mrf.mxu3  ;;  %v1626_v10 = vpop.f32.mrf.mxu0  ;;  %v5251_v43 = vld [vmem:[#allocation5 + $0x168] sm:$0xf]  ;;  %v5816_v8 = vld [vmem:[#allocation5 + $0x174] sm:$0xf0]  ;;  %v5236_v63 = vor.u32 %v5812_v39, %v5235_v58 }
 0x20d   :  { %v1715_v7 = vpop.f32.mrf.mxu1  ;;  %v9071_v40 = vld [vmem:[#allocation69_spill] sm:$0xff]  ;;  %v5331_v39 = vld [vmem:[#allocation5 + $0x208] sm:$0xf] }
 0x20e   :  { %v6521_v60 = vadd.f32 %v1891_v19, %v1803_v16  ;;  %v1716_v62 = vadd.f32 %v1715_v7, %v1626_v10  ;;  %v5252_v16 = vor.u32 %v5816_v8, %v5251_v43  ;;  %v5363_v7 = vld [vmem:[#allocation5 + $0x248] sm:$0xf] }
 0x20f   :  { %v5364_v42 = vor.u32 %v5844_v4, %v5363_v7  ;;  %v5475_v8 = vld [vmem:[#allocation5 + $0x328] sm:$0xf] }
 0x210   :  { %9066 = vst [vmem:[#allocation100_spill] sm:$0xff] %v6521_v60  ;;  %2039 = vmatpush.bf16.msra.mxu1 %v5252_v16  ;;  %v5872_v16 = vld [vmem:[#allocation5 + $0x334] sm:$0xf0]  ;;  %v5091_v7 = vld [vmem:[#allocation5 + $0x28] sm:$0xf] }
 0x211   :  { %2129 = vmatpush.bf16.msra.mxu2 %v5364_v42  ;;  %v5476_v4 = vor.u32 %v5872_v16, %v5475_v8  ;;  %v5772_v16 = vld [vmem:[#allocation5 + $0x14] sm:$0xf0] }
 0x213   :  { %v1804_v20 = vpop.f32.mrf.mxu2 }
 0x214   :  { %v1805_v51 = vadd.f32 %v1804_v20, %v1716_v62  ;;  %v1893_v26 = vpop.f32.mrf.mxu3  ;;  %v1629_v41 = vpop.f32.mrf.mxu0  ;;  %v5876_v62 = vld [vmem:[#allocation5 + $0x354] sm:$0xf0]  ;;  %v5107_v20 = vld [vmem:[#allocation5 + $0x48] sm:$0xf]  ;;  %2040 = vmatpush.bf16.msra.mxu1 %v5236_v63 }
 0x215   :  { %v1718_v9 = vpop.f32.mrf.mxu1  ;;  %v5492_v18 = vor.u32 %v5876_v62, %v5491_v30  ;;  %v5776_v62 = vld [vmem:[#allocation5 + $0x34] sm:$0xf0] }
 0x216   :  { %v6523_v19 = vadd.f32 %v1893_v26, %v1805_v51  ;;  %v1719_v10 = vadd.f32 %v1718_v9, %v1629_v41  ;;  %v9070_v51 = vld [vmem:[#allocation68_spill] sm:$0xff]  ;;  %v5108_v9 = vor.u32 %v5780_v56, %v5107_v20  ;;  %v5347_v41 = vld [vmem:[#allocation5 + $0x228] sm:$0xf]  ;;  %v5840_v26 = vld [vmem:[#allocation5 + $0x234] sm:$0xf0]  ;;  %v5092_v56 = vor.u32 %v5776_v62, %v5091_v7 }
 0x217   :  { %1668 = vmatmul.bf16.gmra.mxu0 %v9068_v57  ;;  %1757 = vmatmul.bf16.gmra.mxu1 %v9069_v28  ;;  %v5348_v43 = vor.u32 %v5840_v26, %v5347_v41  ;;  %v5219_v28 = vld [vmem:[#allocation5 + $0x128] sm:$0xf]  ;;  %v5808_v57 = vld [vmem:[#allocation5 + $0x134] sm:$0xf0]  ;;  %v5332_v41 = vor.u32 %v5836_v47, %v5331_v39  ;;  %v5798_v47 = vld [vmem:[#allocation5 + $0xec] sm:$0xf] }
 0x218   :  { %9067 = vst [vmem:[#allocation101_spill] sm:$0xff] %v6523_v19  ;;  %1846 = vmatmul.bf16.gmra.mxu2 %v9070_v51  ;;  %2218 = vmatpush.bf16.msra.mxu3 %v5492_v18  ;;  %v5220_v58 = vor.u32 %v5808_v57, %v5219_v28  ;;  %v5868_v26 = vld [vmem:[#allocation5 + $0x314] sm:$0xf0]  ;;  %v5862_v57 = vld [vmem:[#allocation5 + $0x2ec] sm:$0xf] }
 0x219   :  { %1935 = vmatmul.bf16.gmra.mxu3 %v9071_v40  ;;  %1951 = vmatpush.bf16.msra.mxu0 %v5108_v9  ;;  %v5459_v40 = vld [vmem:[#allocation5 + $0x308] sm:$0xf]  ;;  %v5445_v28 = vld [vmem:[#allocation5 + $0x2f8] sm:$0xf0] }
 0x21a   :  { %2130 = vmatpush.bf16.msra.mxu2 %v5348_v43  ;;  %v5075_v9 = vld [vmem:[#allocation5 + $0x8] sm:$0xf]  ;;  %v5460_v8 = vor.u32 %v5868_v26, %v5459_v40  ;;  %2041 = vmatpush.bf16.msra.mxu1 %v5220_v58  ;;  %v5448_v24 = vor.u32 %v5862_v57, %v5445_v28  ;;  %v5573_v43 = vld [vmem:[#allocation5 + $0x3f8] sm:$0xf0] }
 0x21b   :  { %v1807_v30 = vpop.f32.mrf.mxu2  ;;  %v5076_v7 = vor.u32 %v5772_v16, %v5075_v9  ;;  %v5189_v39 = vld [vmem:[#allocation5 + $0xf8] sm:$0xf0] }
 0x21c   :  { %v1808_v51 = vadd.f32 %v1807_v30, %v1719_v10  ;;  %v1896_v42 = vpop.f32.mrf.mxu3  ;;  %v1631_v20 = vpop.f32.mrf.mxu0  ;;  %2219 = vmatpush.bf16.msra.mxu3 %v5476_v4  ;;  %v5804_v10 = vld [vmem:[#allocation5 + $0x114] sm:$0xf0]  ;;  %v5894_v30 = vld [vmem:[#allocation5 + $0x3ec] sm:$0xf]  ;;  %v5317_v4 = vld [vmem:[#allocation5 + $0x1f8] sm:$0xf0] }
 0x21d   :  { %v1720_v18 = vpop.f32.mrf.mxu1  ;;  %1952 = vmatpush.bf16.msra.mxu0 %v5092_v56  ;;  %v5204_v62 = vor.u32 %v5804_v10, %v5203_v53 }
 0x21e   :  { %v6529_v38 = vadd.f32 %v1896_v42, %v1808_v51  ;;  %v1721_v63 = vadd.f32 %v1720_v18, %v1631_v20  ;;  %2131 = vmatpush.bf16.msra.mxu2 %v5332_v41  ;;  %v5576_v51 = vor.u32 %v5894_v30, %v5573_v43  ;;  %v5192_v42 = vor.u32 %v5798_v47, %v5189_v39  ;;  %v5830_v20 = vld [vmem:[#allocation5 + $0x1ec] sm:$0xf] }
 0x21f   :  { %v5320_v18 = vor.u32 %v5830_v20, %v5317_v4  ;;  %2042 = vmatpush.bf16.msra.mxu1 %v5204_v62  ;;  %v9077_v20 = vld [vmem:[#allocation16_spill] sm:$0xff]  ;;  %v9078_v4 = vld [vmem:[#allocation17_spill] sm:$0xff] }
 0x220   :  { %9072 = vst [vmem:[#allocation102_spill] sm:$0xff] %v6529_v38  ;;  %2220 = vmatpush.bf16.msra.mxu3 %v5460_v8 }
 0x221   :  { %1953 = vmatpush.bf16.msra.mxu0 %v5076_v7 }
 0x222   :  { %2480 = vmatpush.bf16.msrb.mxu2 %v5448_v24 }
 0x223   :  { %v1809_v40 = vpop.f32.mrf.mxu2  ;;  %2391 = vmatpush.bf16.msrb.mxu1 %v5320_v18  ;;  %v5858_v18 = vld [vmem:[#allocation5 + $0x2cc] sm:$0xf] }
 0x224   :  { %v1810_v56 = vadd.f32 %v1809_v40, %v1721_v63  ;;  %v1898_v58 = vpop.f32.mrf.mxu3  ;;  %v1634_v26 = vpop.f32.mrf.mxu0  ;;  %2569 = vmatpush.bf16.msrb.mxu3 %v5576_v51  ;;  %v9079_v40 = vld [vmem:[#allocation18_spill] sm:$0xff] }
 0x225   :  { %v1723_v9 = vpop.f32.mrf.mxu1  ;;  %2302 = vmatpush.bf16.msrb.mxu0 %v5192_v42  ;;  %v9076_v42 = vld [vmem:[#allocation15_spill] sm:$0xff] }
 0x226   :  { %v6531_v53 = vadd.f32 %v1898_v58, %v1810_v56  ;;  %v1724_v16 = vadd.f32 %v1723_v9, %v1634_v26  ;;  %v5429_v56 = vld [vmem:[#allocation5 + $0x2d8] sm:$0xf0]  ;;  %v5890_v58 = vld [vmem:[#allocation5 + $0x3cc] sm:$0xf] }
 0x227   :  { %1673 = vmatmul.bf16.gmra.mxu0 %v6342_v21  ;;  %1762 = vmatmul.bf16.gmra.mxu1 %v6344_v23  ;;  %v5432_v9 = vor.u32 %v5858_v18, %v5429_v56 }
 0x228   :  { %9073 = vst [vmem:[#allocation103_spill] sm:$0xff] %v6531_v53  ;;  %1851 = vmatmul.bf16.gmra.mxu2 %v6346_v31 }
 0x229   :  { %1940 = vmatmul.bf16.gmra.mxu3 %v6348_v48  ;;  %2481 = vmatpush.bf16.msrb.mxu2 %v5432_v9 }
 0x22b   :  { %v1812_v24 = vpop.f32.mrf.mxu2 }
 0x22c   :  { %v1813_v41 = vadd.f32 %v1812_v24, %v1724_v16  ;;  %v1901_v63 = vpop.f32.mrf.mxu3  ;;  %v1636_v8 = vpop.f32.mrf.mxu0  ;;  %v5557_v16 = vld [vmem:[#allocation5 + $0x3d8] sm:$0xf0] }
 0x22d   :  { %v1725_v10 = vpop.f32.mrf.mxu1 }
 0x22e   :  { %v6537_v7 = vadd.f32 %v1901_v63, %v1813_v41  ;;  %v1726_v57 = vadd.f32 %v1725_v10, %v1636_v8  ;;  %v5560_v8 = vor.u32 %v5890_v58, %v5557_v16 }
 0x230   :  { %9074 = vst [vmem:[#allocation104_spill] sm:$0xff] %v6537_v7  ;;  %2570 = vmatpush.bf16.msrb.mxu3 %v5560_v8 }
 0x233   :  { %v1814_v28 = vpop.f32.mrf.mxu2 }
 0x234   :  { %v1815_v30 = vadd.f32 %v1814_v28, %v1726_v57  ;;  %v1903_v62 = vpop.f32.mrf.mxu3  ;;  %v1639_v43 = vpop.f32.mrf.mxu0 }
 0x235   :  { %v1728_v47 = vpop.f32.mrf.mxu1 }
 0x236   :  { %v6539_v39 = vadd.f32 %v1903_v62, %v1815_v30  ;;  %v1729_v51 = vadd.f32 %v1728_v47, %v1639_v43  ;;  %v5794_v30 = vld [vmem:[#allocation5 + $0xcc] sm:$0xf]  ;;  %v5173_v62 = vld [vmem:[#allocation5 + $0xd8] sm:$0xf0] }
 0x237   :  { %1954 = vmatmul.bf16.vlgmr.msra.gmra.mxu0 %v9076_v42  ;;  %2043 = vmatmul.bf16.vlgmr.msra.gmra.mxu1 %v9077_v20  ;;  %v5826_v43 = vld [vmem:[#allocation5 + $0x1cc] sm:$0xf]  ;;  %v5176_v47 = vor.u32 %v5794_v30, %v5173_v62 }
 0x238   :  { %9075 = vst [vmem:[#allocation105_spill] sm:$0xff] %v6539_v39  ;;  %2132 = vmatmul.bf16.vlgmr.msra.gmra.mxu2 %v9078_v4 }
 0x239   :  { %2221 = vmatmul.bf16.vlgmr.msra.gmra.mxu3 %v9079_v40  ;;  %v5301_v40 = vld [vmem:[#allocation5 + $0x1d8] sm:$0xf0]  ;;  %2303 = vmatpush.bf16.msrb.mxu0 %v5176_v47  ;;  %v9085_v47 = vld [vmem:[#allocation23_spill] sm:$0xff] }
 0x23a   :  { %v5304_v20 = vor.u32 %v5826_v43, %v5301_v40  ;;  %v9084_v43 = vld [vmem:[#allocation22_spill] sm:$0xff] }
 0x23b   :  { %v1817_v26 = vpop.f32.mrf.mxu2 }
 0x23c   :  { %v1818_v24 = vadd.f32 %v1817_v26, %v1729_v51  ;;  %v1906_v41 = vpop.f32.mrf.mxu3  ;;  %v1641_v63 = vpop.f32.mrf.mxu0  ;;  %2392 = vmatpush.bf16.msrb.mxu1 %v5304_v20 }
 0x23d   :  { %v1730_v10 = vpop.f32.mrf.mxu1 }
 0x23e   :  { %v6545_v57 = vadd.f32 %v1906_v41, %v1818_v24  ;;  %v1731_v28 = vadd.f32 %v1730_v10, %v1641_v63 }
 0x240   :  { %9080 = vst [vmem:[#allocation106_spill] sm:$0xff] %v6545_v57 }
 0x243   :  { %v1819_v4 = vpop.f32.mrf.mxu2 }
 0x244   :  { %v1820_v42 = vadd.f32 %v1819_v4, %v1731_v28  ;;  %v1908_v18 = vpop.f32.mrf.mxu3  ;;  %v1644_v56 = vpop.f32.mrf.mxu0 }
 0x245   :  { %v1733_v51 = vpop.f32.mrf.mxu1 }
 0x246   :  { %v6547_v58 = vadd.f32 %v1908_v18, %v1820_v42  ;;  %v1734_v26 = vadd.f32 %v1733_v51, %v1644_v56  ;;  %v9086_v18 = vld [vmem:[#allocation24_spill] sm:$0xff]  ;;  %v9087_v56 = vld [vmem:[#allocation25_spill] sm:$0xff]  ;;  %v5854_v51 = vld [vmem:[#allocation5 + $0x2ac] sm:$0xf] }
 0x247   :  { %1959 = vmatmul.bf16.gmra.mxu0 %v6148_v12  ;;  %2048 = vmatmul.bf16.gmra.mxu1 %v6150_v13 }
 0x248   :  { %9081 = vst [vmem:[#allocation107_spill] sm:$0xff] %v6547_v58  ;;  %2137 = vmatmul.bf16.gmra.mxu2 %v6152_v14 }
 0x249   :  { %2226 = vmatmul.bf16.gmra.mxu3 %v6154_v15  ;;  %v5285_v15 = vld [vmem:[#allocation5 + $0x1b8] sm:$0xf0] }
 0x24b   :  { %v1822_v9 = vpop.f32.mrf.mxu2 }
 0x24c   :  { %v1646_v16 = vpop.f32.mrf.mxu0  ;;  %v1823_v40 = vadd.f32 %v1822_v9, %v1734_v26  ;;  %v1911_v4 = vpop.f32.mrf.mxu3  ;;  %v5413_v26 = vld [vmem:[#allocation5 + $0x2b8] sm:$0xf0]  ;;  %v5886_v9 = vld [vmem:[#allocation5 + $0x3ac] sm:$0xf] }
 0x24d   :  { %v1735_v24 = vpop.f32.mrf.mxu1 }
 0x24e   :  { %v1736_v41 = vadd.f32 %v1735_v24, %v1646_v16  ;;  %v6553_v63 = vadd.f32 %v1911_v4, %v1823_v40  ;;  %v5416_v16 = vor.u32 %v5854_v51, %v5413_v26  ;;  %v5541_v40 = vld [vmem:[#allocation5 + $0x3b8] sm:$0xf0]  ;;  %v2695_v26 = vadd.f32 %v6456_v61, %v6454_v37 }
 0x250   :  { %9082 = vst [vmem:[#allocation108_spill] sm:$0xff] %v6553_v63  ;;  %2482 = vmatpush.bf16.msrb.mxu2 %v5416_v16 }
 0x253   :  { %v1824_v20 = vpop.f32.mrf.mxu2 }
 0x254   :  { %v1649_v42 = vpop.f32.mrf.mxu0  ;;  %v1825_v8 = vadd.f32 %v1824_v20, %v1736_v41  ;;  %v1913_v10 = vpop.f32.mrf.mxu3  ;;  %v5544_v41 = vor.u32 %v5886_v9, %v5541_v40 }
 0x255   :  { %v1738_v28 = vpop.f32.mrf.mxu1 }
 0x256   :  { %v1739_v30 = vadd.f32 %v1738_v28, %v1649_v42  ;;  %v6555_v62 = vadd.f32 %v1913_v10, %v1825_v8  ;;  %2571 = vmatpush.bf16.msrb.mxu3 %v5544_v41 }
 0x257   :  { %1964 = vmatmul.bf16.gmra.mxu0 %v9084_v43  ;;  %2053 = vmatmul.bf16.gmra.mxu1 %v9085_v47  ;;  %v5790_v47 = vld [vmem:[#allocation5 + $0xac] sm:$0xf] }
 0x258   :  { %9083 = vst [vmem:[#allocation109_spill] sm:$0xff] %v6555_v62  ;;  %2142 = vmatmul.bf16.gmra.mxu2 %v9086_v18  ;;  %v5157_v18 = vld [vmem:[#allocation5 + $0xb8] sm:$0xf0]  ;;  %v5822_v43 = vld [vmem:[#allocation5 + $0x1ac] sm:$0xf] }
 0x259   :  { %2231 = vmatmul.bf16.gmra.mxu3 %v9087_v56  ;;  %v5160_v56 = vor.u32 %v5790_v47, %v5157_v18  ;;  %v5288_v14 = vor.u32 %v5822_v43, %v5285_v15 }
 0x25b   :  { %v1827_v4 = vpop.f32.mrf.mxu2  ;;  %2304 = vmatpush.bf16.msrb.mxu0 %v5160_v56  ;;  %2393 = vmatpush.bf16.msrb.mxu1 %v5288_v14 }
 0x25c   :  { %v1651_v24 = vpop.f32.mrf.mxu0  ;;  %v1828_v20 = vadd.f32 %v1827_v4, %v1739_v30  ;;  %v1916_v42 = vpop.f32.mrf.mxu3  ;;  %v2696_v4 = vadd.f32 %v2695_v26, %v6492_v29 }
 0x25d   :  { %v1740_v8 = vpop.f32.mrf.mxu1 }
 0x25e   :  { %v1741_v10 = vadd.f32 %v1740_v8, %v1651_v24  ;;  %v6561_v28 = vadd.f32 %v1916_v42, %v1828_v20  ;;  %v2697_v47 = vadd.f32 %v2696_v4, %v6495_v5 }
 0x260   :  { %9088 = vst [vmem:[#allocation110_spill] sm:$0xff] %v6561_v28 }
 0x263   :  { %v1829_v13 = vpop.f32.mrf.mxu2 }
 0x264   :  { %v1654_v51 = vpop.f32.mrf.mxu0  ;;  %v1830_v30 = vadd.f32 %v1829_v13, %v1741_v10  ;;  %v1918_v9 = vpop.f32.mrf.mxu3  ;;  %v2698_v13 = vadd.f32 %v2697_v47, %v6497_v22 }
 0x265   :  { %v1743_v40 = vpop.f32.mrf.mxu1 }
 0x266   :  { %v1744_v16 = vadd.f32 %v1743_v40, %v1654_v51  ;;  %v6566_v24 = vadd.f32 %v1918_v9, %v1830_v30  ;;  %v2699_v14 = vadd.f32 %v2698_v13, %v6499_v59 }
 0x267   :  { %1969 = vmatmul.bf16.gmra.mxu0 %v6172_v49  ;;  %2058 = vmatmul.bf16.gmra.mxu1 %v6174_v50 }
 0x268   :  { %9089 = vst [vmem:[#allocation111_spill] sm:$0xff] %v6566_v24  ;;  %2147 = vmatmul.bf16.gmra.mxu2 %v6176_v54  ;;  %v2700_v42 = vadd.f32 %v2699_v14, %v6505_v36  ;;  %v5850_v14 = vld [vmem:[#allocation5 + $0x28c] sm:$0xf] }
 0x269   :  { %2236 = vmatmul.bf16.gmra.mxu3 %v6178_v55  ;;  %v9113_v36 = vld [vmem:[#allocation43_spill] sm:$0xff] }
 0x26a   :  { %v2701_v10 = vadd.f32 %v2700_v42, %v6507_v17  ;;  %v5525_v42 = vld [vmem:[#allocation5 + $0x398] sm:$0xf0] }
 0x26b   :  { %v1832_v15 = vpop.f32.mrf.mxu2 }
 0x26c   :  { %v1656_v43 = vpop.f32.mrf.mxu0  ;;  %v1833_v18 = vadd.f32 %v1832_v15, %v1744_v16  ;;  %v1921_v56 = vpop.f32.mrf.mxu3  ;;  %v2702_v51 = vadd.f32 %v2701_v10, %v6513_v6 }
 0x26d   :  { %v1745_v41 = vpop.f32.mrf.mxu1 }
 0x26e   :  { %v1746_v20 = vadd.f32 %v1745_v41, %v1656_v43  ;;  %v6576_v8 = vadd.f32 %v1921_v56, %v1833_v18  ;;  %v2703_v9 = vadd.f32 %v2702_v51, %v6515_v11  ;;  %v5397_v18 = vld [vmem:[#allocation5 + $0x298] sm:$0xf0]  ;;  %v5882_v56 = vld [vmem:[#allocation5 + $0x38c] sm:$0xf] }
 0x26f   :  { %v5269_v11 = vld [vmem:[#allocation5 + $0x198] sm:$0xf0] }
 0x270   :  { %9090 = vst [vmem:[#allocation112_spill] sm:$0xff] %v6576_v8  ;;  %v2704_v16 = vadd.f32 %v2703_v9, %v6521_v60 }
 0x272   :  { %v2705_v43 = vadd.f32 %v2704_v16, %v6523_v19 }
 0x273   :  { %v1834_v26 = vpop.f32.mrf.mxu2 }
 0x274   :  { %v1659_v30 = vpop.f32.mrf.mxu0  ;;  %v1835_v40 = vadd.f32 %v1834_v26, %v1746_v20  ;;  %v1923_v4 = vpop.f32.mrf.mxu3  ;;  %v2706_v41 = vadd.f32 %v2705_v43, %v6529_v38  ;;  %v5400_v20 = vor.u32 %v5850_v14, %v5397_v18  ;;  %v5528_v26 = vor.u32 %v5882_v56, %v5525_v42  ;;  %v5786_v43 = vld [vmem:[#allocation5 + $0x8c] sm:$0xf]  ;;  %v5141_v14 = vld [vmem:[#allocation5 + $0x98] sm:$0xf0] }
 0x275   :  { %v1748_v47 = vpop.f32.mrf.mxu1  ;;  %v5818_v18 = vld [vmem:[#allocation5 + $0x18c] sm:$0xf]  ;;  %v5144_v38 = vor.u32 %v5786_v43, %v5141_v14 }
 0x276   :  { %v1749_v13 = vadd.f32 %v1748_v47, %v1659_v30  ;;  %v6582_v15 = vadd.f32 %v1923_v4, %v1835_v40  ;;  %v2707_v30 = vadd.f32 %v2706_v41, %v6531_v53  ;;  %2483 = vmatpush.bf16.msrb.mxu2 %v5400_v20  ;;  %2572 = vmatpush.bf16.msrb.mxu3 %v5528_v26 }
 0x277   :  { %1974 = vmatmul.bf16.gmra.mxu0 %v6184_v0  ;;  %2063 = vmatmul.bf16.gmra.mxu1 %v6186_v1  ;;  %v5272_v41 = vor.u32 %v5818_v18, %v5269_v11 }
 0x278   :  { %9091 = vst [vmem:[#allocation113_spill] sm:$0xff] %v6582_v15  ;;  %2152 = vmatmul.bf16.gmra.mxu2 %v6188_v2  ;;  %v2708_v16 = vadd.f32 %v2707_v30, %v6537_v7  ;;  %2305 = vmatpush.bf16.msrb.mxu0 %v5144_v38 }
 0x279   :  { %2241 = vmatmul.bf16.gmra.mxu3 %v6190_v3  ;;  %2394 = vmatpush.bf16.msrb.mxu1 %v5272_v41 }
 0x27a   :  { %v2709_v60 = vadd.f32 %v2708_v16, %v6539_v39 }
 0x27b   :  { %v1837_v10 = vpop.f32.mrf.mxu2 }
 0x27c   :  { %v1661_v51 = vpop.f32.mrf.mxu0  ;;  %v1838_v9 = vadd.f32 %v1837_v10, %v1749_v13  ;;  %v1926_v40 = vpop.f32.mrf.mxu3  ;;  %v2710_v56 = vadd.f32 %v2709_v60, %v6545_v57 }
 0x27d   :  { %v1750_v4 = vpop.f32.mrf.mxu1 }
 0x27e   :  { %v1751_v47 = vadd.f32 %v1750_v4, %v1661_v51  ;;  %v6592_v19 = vadd.f32 %v1926_v40, %v1838_v9  ;;  %v2711_v20 = vadd.f32 %v2710_v56, %v6547_v58 }
 0x280   :  { %9092 = vst [vmem:[#allocation114_spill] sm:$0xff] %v6592_v19  ;;  %v2712_v9 = vadd.f32 %v2711_v20, %v6553_v63  ;;  %v9098_v63 = vld [vmem:[#allocation33_spill] sm:$0xff] }
 0x282   :  { %v2713_v4 = vadd.f32 %v2712_v9, %v6555_v62  ;;  %v9097_v62 = vld [vmem:[#allocation32_spill] sm:$0xff] }
 0x283   :  { %v1839_v13 = vpop.f32.mrf.mxu2 }
 0x284   :  { %v1664_v42 = vpop.f32.mrf.mxu0  ;;  %v1840_v10 = vadd.f32 %v1839_v13, %v1751_v47  ;;  %v1928_v51 = vpop.f32.mrf.mxu3  ;;  %v2714_v38 = vadd.f32 %v2713_v4, %v6561_v28 }
 0x285   :  { %v1753_v26 = vpop.f32.mrf.mxu1 }
 0x286   :  { %v1754_v30 = vadd.f32 %v1753_v26, %v1664_v42  ;;  %v6598_v40 = vadd.f32 %v1928_v51, %v1840_v10  ;;  %v2715_v47 = vadd.f32 %v2714_v38, %v6566_v24  ;;  %v9096_v24 = vld [vmem:[#allocation31_spill] sm:$0xff] }
 0x287   :  { %1979 = vmatmul.bf16.gmra.mxu0 %v6196_v32  ;;  %2068 = vmatmul.bf16.gmra.mxu1 %v6198_v33 }
 0x288   :  { %9093 = vst [vmem:[#allocation115_spill] sm:$0xff] %v6598_v40  ;;  %2157 = vmatmul.bf16.gmra.mxu2 %v6200_v34  ;;  %v2716_v56 = vadd.f32 %v2715_v47, %v6576_v8 }
 0x289   :  { %2246 = vmatmul.bf16.gmra.mxu3 %v6202_v35 }
 0x28a   :  { %v2717_v13 = vadd.f32 %v2716_v56, %v6582_v15 }
 0x28b   :  { %v1842_v11 = vpop.f32.mrf.mxu2 }
 0x28c   :  { %v1666_v60 = vpop.f32.mrf.mxu0  ;;  %v1843_v16 = vadd.f32 %v1842_v11, %v1754_v30  ;;  %v1931_v43 = vpop.f32.mrf.mxu3  ;;  %v2718_v42 = vadd.f32 %v2717_v13, %v6592_v19 }
 0x28d   :  { %v1755_v14 = vpop.f32.mrf.mxu1 }
 0x28e   :  { %v1756_v18 = vadd.f32 %v1755_v14, %v1666_v60  ;;  %v6608_v41 = vadd.f32 %v1931_v43, %v1843_v16  ;;  %v2719_v10 = vadd.f32 %v2718_v42, %v6598_v40 }
 0x290   :  { %v2720_v30 = vadd.f32 %v2719_v10, %v6608_v41 }
 0x293   :  { %v1844_v20 = vpop.f32.mrf.mxu2 }
 0x294   :  { %v1845_v51 = vadd.f32 %v1844_v20, %v1756_v18  ;;  %v1933_v26 = vpop.f32.mrf.mxu3  ;;  %v1669_v9 = vpop.f32.mrf.mxu0 }
 0x295   :  { %v1758_v4 = vpop.f32.mrf.mxu1 }
 0x296   :  { %v6614_v38 = vadd.f32 %v1933_v26, %v1845_v51  ;;  %v1759_v11 = vadd.f32 %v1758_v4, %v1669_v9 }
 0x297   :  { %1984 = vmatmul.bf16.gmra.mxu0 %v6208_v44  ;;  %2073 = vmatmul.bf16.gmra.mxu1 %v6210_v45 }
 0x298   :  { %v2721_v60 = vadd.f32 %v2720_v30, %v6614_v38  ;;  %2162 = vmatmul.bf16.gmra.mxu2 %v6212_v46 }
 0x299   :  { %2251 = vmatmul.bf16.gmra.mxu3 %v9019_v25 }
 0x29b   :  { %v1847_v47 = vpop.f32.mrf.mxu2 }
 0x29c   :  { %v1848_v16 = vadd.f32 %v1847_v47, %v1759_v11  ;;  %v1936_v43 = vpop.f32.mrf.mxu3  ;;  %v1671_v14 = vpop.f32.mrf.mxu0  ;;  %v9094_v11 = vld [vmem:[#allocation29_spill] sm:$0xff]  ;;  %v9095_v47 = vld [vmem:[#allocation30_spill] sm:$0xff] }
 0x29d   :  { %v1760_v18 = vpop.f32.mrf.mxu1 }
 0x29e   :  { %v6621_v56 = vadd.f32 %v1936_v43, %v1848_v16  ;;  %v1761_v13 = vadd.f32 %v1760_v18, %v1671_v14 }
 0x2a0   :  { %v2722_v42 = vadd.f32 %v2721_v60, %v6621_v56 }
 0x2a3   :  { %v1849_v20 = vpop.f32.mrf.mxu2 }
 0x2a4   :  { %v1850_v10 = vadd.f32 %v1849_v20, %v1761_v13  ;;  %v1938_v51 = vpop.f32.mrf.mxu3  ;;  %v1674_v26 = vpop.f32.mrf.mxu0 }
 0x2a5   :  { %v1763_v9 = vpop.f32.mrf.mxu1 }
 0x2a6   :  { %v1939_v4 = vadd.f32 %v1938_v51, %v1850_v10  ;;  %v1764_v30 = vadd.f32 %v1763_v9, %v1674_v26 }
 0x2a7   :  { %1989 = vmatmul.bf16.gmra.mxu0 %v9020_v52  ;;  %2078 = vmatmul.bf16.gmra.mxu1 %v9021_v27 }
 0x2a8   :  { %v2723_v40 = vadd.f32 %v2722_v42, %v1939_v4  ;;  %2167 = vmatmul.bf16.gmra.mxu2 %v9094_v11 }
 0x2a9   :  { %2256 = vmatmul.bf16.gmra.mxu3 %v9095_v47 }
 0x2ab   :  { %v1852_v16 = vpop.f32.mrf.mxu2 }
 0x2ac   :  { %v1853_v43 = vadd.f32 %v1852_v16, %v1764_v30  ;;  %v1941_v14 = vpop.f32.mrf.mxu3  ;;  %v1676_v60 = vpop.f32.mrf.mxu0  ;;  %v9099_v30 = vld [vmem:[#allocation34_spill] sm:$0xff] }
 0x2ad   :  { %v1765_v18 = vpop.f32.mrf.mxu1 }
 0x2ae   :  { %v1942_v13 = vadd.f32 %v1941_v14, %v1853_v43  ;;  %v1766_v20 = vadd.f32 %v1765_v18, %v1676_v60 }
 0x2b0   :  { %v2724_v19 = vadd.f32 %v2723_v40, %v1942_v13 }
 0x2b3   :  { %v1854_v15 = vpop.f32.mrf.mxu2 }
 0x2b4   :  { %v1855_v10 = vadd.f32 %v1854_v15, %v1766_v20  ;;  %v1943_v51 = vpop.f32.mrf.mxu3  ;;  %v1955_v26 = vpop.f32.mrf.mxu0 }
 0x2b5   :  { %v2044_v9 = vpop.f32.mrf.mxu1 }
 0x2b6   :  { %v1944_v42 = vadd.f32 %v1943_v51, %v1855_v10  ;;  %v2045_v8 = vadd.f32 %v2044_v9, %v1955_v26 }
 0x2b7   :  { %1994 = vmatmul.bf16.gmra.mxu0 %v9096_v24  ;;  %2083 = vmatmul.bf16.gmra.mxu1 %v9097_v62 }
 0x2b8   :  { %v2725_v28 = vadd.f32 %v2724_v19, %v1944_v42  ;;  %2172 = vmatmul.bf16.gmra.mxu2 %v9098_v63 }
 0x2b9   :  { %2261 = vmatmul.bf16.gmra.mxu3 %v9099_v30  ;;  %v5221_v30 = vld [vmem:[#allocation5 + $0x138] sm:$0xf0] }
 0x2ba   :  { %v2726_v16 = vrot.slane %v2725_v28, 4 }
 0x2bb   :  { %v2133_v43 = vpop.f32.mrf.mxu2 }
 0x2bc   :  { %v2727_v14 = vadd.f32 %v2726_v16, %v2725_v28  ;;  %v2134_v40 = vadd.f32 %v2133_v43, %v2045_v8  ;;  %v2222_v60 = vpop.f32.mrf.mxu3  ;;  %v1957_v15 = vpop.f32.mrf.mxu0  ;;  %v9100_v28 = vld [vmem:[#allocation36_spill] sm:$0xff]  ;;  %v9101_v8 = vld [vmem:[#allocation37_spill] sm:$0xff]  ;;  %v9102_v16 = vld [vmem:[#allocation38_spill] sm:$0xff] }
 0x2bd   :  { %v2046_v18 = vpop.f32.mrf.mxu1  ;;  %v9103_v43 = vld [vmem:[#allocation28_spill] sm:$0xff] }
 0x2be   :  { %v2728_v20 = vrot.slane %v2727_v14, 2  ;;  %v6632_v58 = vadd.f32 %v2222_v60, %v2134_v40  ;;  %v2047_v10 = vadd.f32 %v2046_v18, %v1957_v15 }
 0x2c0   :  { %v2729_v51 = vadd.f32 %v2728_v20, %v2727_v14  ;;  %v9105_v14 = vld [vmem:[#allocation39_spill] sm:$0xff] }
 0x2c2   :  { %v2730_v26 = vrot.slane %v2729_v51, 1 }
 0x2c3   :  { %v2135_v19 = vpop.f32.mrf.mxu2 }
 0x2c4   :  { %v2136_v9 = vadd.f32 %v2135_v19, %v2047_v10  ;;  %v2224_v57 = vpop.f32.mrf.mxu3  ;;  %v1960_v39 = vpop.f32.mrf.mxu0  ;;  %v2731_v53 = vadd.f32 %v2730_v26, %v2729_v51 }
 0x2c5   :  { %v2049_v7 = vpop.f32.mrf.mxu1 }
 0x2c6   :  { %v6634_v6 = vadd.f32 %v2224_v57, %v2136_v9  ;;  %v2050_v17 = vadd.f32 %v2049_v7, %v1960_v39  ;;  %v6640_v40 = vmul.f32 %v9103_v43, %v2731_v53  ;;  %v5814_v43 = vld [vmem:[#allocation5 + $0x16c] sm:$0xf] }
 0x2c7   :  { %1999 = vmatmul.bf16.gmra.mxu0 %v9100_v28  ;;  %2088 = vmatmul.bf16.gmra.mxu1 %v9101_v8  ;;  %v5477_v8 = vld [vmem:[#allocation5 + $0x338] sm:$0xf0]  ;;  %v5774_v28 = vld [vmem:[#allocation5 + $0x2c] sm:$0xf] }
 0x2c8   :  { %2177 = vmatmul.bf16.gmra.mxu2 %v9102_v16  ;;  %9104 = vst [vmem:[#allocation29_spill] sm:$0xff] %v6640_v40  ;;  %v6645_v57 = vsub.f32 %v6608_v41, %v6640_v40  ;;  %v6649_v7 = vsub.f32 %v6614_v38, %v6640_v40  ;;  %v6653_v39 = vsub.f32 %v6621_v56, %v6640_v40  ;;  %v5870_v16 = vld [vmem:[#allocation5 + $0x32c] sm:$0xf] }
 0x2c9   :  { %2266 = vmatmul.bf16.gmra.mxu3 %v9105_v14  ;;  %v6656_v53 = vsub.f32 %v1939_v4, %v6640_v40  ;;  %v6659_v10 = vsub.f32 %v1942_v13, %v6640_v40  ;;  %v6662_v51 = vsub.f32 %v1944_v42, %v6640_v40  ;;  %v9122_v40 = vld [vmem:[#allocation54_spill] sm:$0xff]  ;;  %v5125_v14 = vld [vmem:[#allocation5 + $0x78] sm:$0xf0] }
 0x2ca   :  { %9106 = vst [vmem:[#allocation30_spill] sm:$0xff] %v6645_v57  ;;  %v9112_v57 = vld [vmem:[#allocation42_spill] sm:$0xff] }
 0x2cb   :  { %v2138_v60 = vpop.f32.mrf.mxu2  ;;  %9107 = vst [vmem:[#allocation31_spill] sm:$0xff] %v6649_v7 }
 0x2cc   :  { %v2227_v15 = vpop.f32.mrf.mxu3  ;;  %v1962_v18 = vpop.f32.mrf.mxu0  ;;  %9108 = vst [vmem:[#allocation32_spill] sm:$0xff] %v6653_v39  ;;  %v2139_v38 = vadd.f32 %v2138_v60, %v2050_v17  ;;  %v9114_v39 = vld [vmem:[#allocation44_spill] sm:$0xff] }
 0x2cd   :  { %v2051_v20 = vpop.f32.mrf.mxu1  ;;  %9109 = vst [vmem:[#allocation116_spill] sm:$0xff] %v6656_v53 }
 0x2ce   :  { %9110 = vst [vmem:[#allocation117_spill] sm:$0xff] %v6659_v10  ;;  %v2052_v7 = vadd.f32 %v2051_v20, %v1962_v18  ;;  %v6667_v4 = vadd.f32 %v2227_v15, %v2139_v38  ;;  %v9115_v10 = vld [vmem:[#allocation45_spill] sm:$0xff] }
 0x2cf   :  { %9111 = vst [vmem:[#allocation118_spill] sm:$0xff] %v6662_v51  ;;  %v9117_v38 = vld [vmem:[#allocation49_spill] sm:$0xff] }
 0x2d3   :  { %v2140_v26 = vpop.f32.mrf.mxu2 }
 0x2d4   :  { %v2229_v41 = vpop.f32.mrf.mxu3  ;;  %v1965_v19 = vpop.f32.mrf.mxu0  ;;  %v2141_v13 = vadd.f32 %v2140_v26, %v2052_v7  ;;  %v9116_v26 = vld [vmem:[#allocation48_spill] sm:$0xff] }
 0x2d5   :  { %v2054_v9 = vpop.f32.mrf.mxu1 }
 0x2d6   :  { %v2055_v56 = vadd.f32 %v2054_v9, %v1965_v19  ;;  %v6670_v51 = vadd.f32 %v2229_v41, %v2141_v13  ;;  %v9118_v41 = vld [vmem:[#allocation50_spill] sm:$0xff] }
 0x2d7   :  { %2004 = vmatmul.bf16.gmra.mxu0 %v9112_v57  ;;  %2093 = vmatmul.bf16.gmra.mxu1 %v9113_v36  ;;  %v5782_v57 = vld [vmem:[#allocation5 + $0x6c] sm:$0xf] }
 0x2d8   :  { %2182 = vmatmul.bf16.gmra.mxu2 %v9114_v39  ;;  %v5878_v39 = vld [vmem:[#allocation5 + $0x36c] sm:$0xf] }
 0x2d9   :  { %2271 = vmatmul.bf16.gmra.mxu3 %v9115_v10 }
 0x2db   :  { %v2143_v42 = vpop.f32.mrf.mxu2 }
 0x2dc   :  { %v2144_v53 = vadd.f32 %v2143_v42, %v2055_v56  ;;  %v2232_v59 = vpop.f32.mrf.mxu3  ;;  %v1967_v22 = vpop.f32.mrf.mxu0  ;;  %v9119_v56 = vld [vmem:[#allocation51_spill] sm:$0xff] }
 0x2dd   :  { %v2056_v5 = vpop.f32.mrf.mxu1 }
 0x2de   :  { %v6672_v29 = vadd.f32 %v2232_v59, %v2144_v53  ;;  %v2057_v17 = vadd.f32 %v2056_v5, %v1967_v22 }
 0x2e3   :  { %v2145_v60 = vpop.f32.mrf.mxu2 }
 0x2e4   :  { %v2146_v18 = vadd.f32 %v2145_v60, %v2057_v17  ;;  %v2234_v20 = vpop.f32.mrf.mxu3  ;;  %v1970_v19 = vpop.f32.mrf.mxu0 }
 0x2e5   :  { %v2059_v9 = vpop.f32.mrf.mxu1 }
 0x2e6   :  { %v6674_v15 = vadd.f32 %v2234_v20, %v2146_v18  ;;  %v2060_v7 = vadd.f32 %v2059_v9, %v1970_v19 }
 0x2e7   :  { %2009 = vmatmul.bf16.gmra.mxu0 %v9116_v26  ;;  %2098 = vmatmul.bf16.gmra.mxu1 %v9117_v38  ;;  %v9128_v26 = vld [vmem:[#allocation60_spill] sm:$0xff] }
 0x2e8   :  { %2187 = vmatmul.bf16.gmra.mxu2 %v9118_v41  ;;  %v9123_v41 = vld [vmem:[#allocation55_spill] sm:$0xff] }
 0x2e9   :  { %2276 = vmatmul.bf16.gmra.mxu3 %v9119_v56  ;;  %v9124_v56 = vld [vmem:[#allocation56_spill] sm:$0xff] }
 0x2eb   :  { %v2148_v13 = vpop.f32.mrf.mxu2 }
 0x2ec   :  { %v2149_v59 = vadd.f32 %v2148_v13, %v2060_v7  ;;  %v2237_v53 = vpop.f32.mrf.mxu3  ;;  %v1972_v22 = vpop.f32.mrf.mxu0  ;;  %v9125_v7 = vld [vmem:[#allocation57_spill] sm:$0xff] }
 0x2ed   :  { %v2061_v5 = vpop.f32.mrf.mxu1 }
 0x2ee   :  { %v6680_v42 = vadd.f32 %v2237_v53, %v2149_v59  ;;  %v2062_v17 = vadd.f32 %v2061_v5, %v1972_v22 }
 0x2f0   :  { %9120 = vst [vmem:[#allocation119_spill] sm:$0xff] %v6680_v42 }
 0x2f3   :  { %v2150_v60 = vpop.f32.mrf.mxu2 }
 0x2f4   :  { %v2151_v18 = vadd.f32 %v2150_v60, %v2062_v17  ;;  %v2239_v20 = vpop.f32.mrf.mxu3  ;;  %v1975_v19 = vpop.f32.mrf.mxu0 }
 0x2f5   :  { %v2064_v9 = vpop.f32.mrf.mxu1 }
 0x2f6   :  { %v6682_v61 = vadd.f32 %v2239_v20, %v2151_v18  ;;  %v2065_v37 = vadd.f32 %v2064_v9, %v1975_v19 }
 0x2f7   :  { %2014 = vmatmul.bf16.gmra.mxu0 %v9122_v40  ;;  %2103 = vmatmul.bf16.gmra.mxu1 %v9123_v41 }
 0x2f8   :  { %9121 = vst [vmem:[#allocation120_spill] sm:$0xff] %v6682_v61  ;;  %2192 = vmatmul.bf16.gmra.mxu2 %v9124_v56  ;;  %v9129_v56 = vld [vmem:[#allocation61_spill] sm:$0xff] }
 0x2f9   :  { %2281 = vmatmul.bf16.gmra.mxu3 %v9125_v7  ;;  %v9130_v7 = vld [vmem:[#allocation62_spill] sm:$0xff] }
 0x2fb   :  { %v2153_v13 = vpop.f32.mrf.mxu2 }
 0x2fc   :  { %v2154_v59 = vadd.f32 %v2153_v13, %v2065_v37  ;;  %v2242_v53 = vpop.f32.mrf.mxu3  ;;  %v1977_v22 = vpop.f32.mrf.mxu0  ;;  %v9131_v37 = vld [vmem:[#allocation63_spill] sm:$0xff] }
 0x2fd   :  { %v2066_v5 = vpop.f32.mrf.mxu1 }
 0x2fe   :  { %v6688_v17 = vadd.f32 %v2242_v53, %v2154_v59  ;;  %v2067_v60 = vadd.f32 %v2066_v5, %v1977_v22 }
 0x300   :  { %9126 = vst [vmem:[#allocation121_spill] sm:$0xff] %v6688_v17 }
 0x303   :  { %v2155_v38 = vpop.f32.mrf.mxu2 }
 0x304   :  { %v2156_v18 = vadd.f32 %v2155_v38, %v2067_v60  ;;  %v2244_v20 = vpop.f32.mrf.mxu3  ;;  %v1980_v19 = vpop.f32.mrf.mxu0 }
 0x305   :  { %v2069_v9 = vpop.f32.mrf.mxu1 }
 0x306   :  { %v6690_v40 = vadd.f32 %v2244_v20, %v2156_v18  ;;  %v2070_v41 = vadd.f32 %v2069_v9, %v1980_v19  ;;  %v5846_v9 = vld [vmem:[#allocation5 + $0x26c] sm:$0xf] }
 0x307   :  { %2019 = vmatmul.bf16.gmra.mxu0 %v9128_v26  ;;  %2108 = vmatmul.bf16.gmra.mxu1 %v9129_v56  ;;  %v5381_v26 = vld [vmem:[#allocation5 + $0x278] sm:$0xf0] }
 0x308   :  { %9127 = vst [vmem:[#allocation122_spill] sm:$0xff] %v6690_v40  ;;  %2197 = vmatmul.bf16.gmra.mxu2 %v9130_v7  ;;  %v5384_v36 = vor.u32 %v5846_v9, %v5381_v26  ;;  %v5509_v7 = vld [vmem:[#allocation5 + $0x378] sm:$0xf0]  ;;  %v5842_v26 = vld [vmem:[#allocation5 + $0x24c] sm:$0xf] }
 0x309   :  { %2286 = vmatmul.bf16.gmra.mxu3 %v9131_v37 }
 0x30a   :  { %2484 = vmatpush.bf16.msrb.mxu2 %v5384_v36  ;;  %v5109_v36 = vld [vmem:[#allocation5 + $0x58] sm:$0xf0] }
 0x30b   :  { %v2158_v13 = vpop.f32.mrf.mxu2 }
 0x30c   :  { %v2159_v59 = vadd.f32 %v2158_v13, %v2070_v41  ;;  %v2247_v53 = vpop.f32.mrf.mxu3  ;;  %v1982_v22 = vpop.f32.mrf.mxu0  ;;  %v5512_v13 = vor.u32 %v5878_v39, %v5509_v7  ;;  %v5493_v39 = vld [vmem:[#allocation5 + $0x358] sm:$0xf0]  ;;  %v5778_v7 = vld [vmem:[#allocation5 + $0x4c] sm:$0xf] }
 0x30d   :  { %v2071_v5 = vpop.f32.mrf.mxu1 }
 0x30e   :  { %v6696_v38 = vadd.f32 %v2247_v53, %v2159_v59  ;;  %v2072_v60 = vadd.f32 %v2071_v5, %v1982_v22  ;;  %v5253_v59 = vld [vmem:[#allocation5 + $0x178] sm:$0xf0]  ;;  %v9134_v53 = vld [vmem:[#allocation66_spill] sm:$0xff]  ;;  %v9135_v5 = vld [vmem:[#allocation67_spill] sm:$0xff]  ;;  %2573 = vmatpush.bf16.msrb.mxu3 %v5512_v13 }
 0x30f   :  { %v5256_v22 = vor.u32 %v5814_v43, %v5253_v59  ;;  %v5237_v43 = vld [vmem:[#allocation5 + $0x158] sm:$0xf0] }
 0x310   :  { %9132 = vst [vmem:[#allocation123_spill] sm:$0xff] %v6696_v38 }
 0x311   :  { %2395 = vmatpush.bf16.msrb.mxu1 %v5256_v22  ;;  %v5838_v22 = vld [vmem:[#allocation5 + $0x22c] sm:$0xf] }
 0x313   :  { %v2160_v10 = vpop.f32.mrf.mxu2 }
 0x314   :  { %v2161_v18 = vadd.f32 %v2160_v10, %v2072_v60  ;;  %v2249_v20 = vpop.f32.mrf.mxu3  ;;  %v1985_v19 = vpop.f32.mrf.mxu0  ;;  %v5128_v10 = vor.u32 %v5782_v57, %v5125_v14  ;;  %v9136_v60 = vld [vmem:[#allocation68_spill] sm:$0xff]  ;;  %v5810_v14 = vld [vmem:[#allocation5 + $0x14c] sm:$0xf] }
 0x315   :  { %v2074_v56 = vpop.f32.mrf.mxu1 }
 0x316   :  { %v6698_v37 = vadd.f32 %v2249_v20, %v2161_v18  ;;  %v2075_v41 = vadd.f32 %v2074_v56, %v1985_v19  ;;  %2306 = vmatpush.bf16.msrb.mxu0 %v5128_v10  ;;  %v5365_v18 = vld [vmem:[#allocation5 + $0x258] sm:$0xf0]  ;;  %v5874_v56 = vld [vmem:[#allocation5 + $0x34c] sm:$0xf]  ;;  %v5240_v10 = vor.u32 %v5810_v14, %v5237_v43 }
 0x317   :  { %2024 = vmatmul.bf16.gmra.mxu0 %v9134_v53  ;;  %2113 = vmatmul.bf16.gmra.mxu1 %v9135_v5  ;;  %v5368_v20 = vor.u32 %v5842_v26, %v5365_v18  ;;  %v9137_v19 = vld [vmem:[#allocation69_spill] sm:$0xff]  ;;  %v5496_v53 = vor.u32 %v5874_v56, %v5493_v39  ;;  %v5480_v39 = vor.u32 %v5870_v16, %v5477_v8  ;;  %v5866_v43 = vld [vmem:[#allocation5 + $0x30c] sm:$0xf] }
 0x318   :  { %9133 = vst [vmem:[#allocation124_spill] sm:$0xff] %v6698_v37  ;;  %2202 = vmatmul.bf16.gmra.mxu2 %v9136_v60  ;;  %v5112_v60 = vor.u32 %v5778_v7, %v5109_v36  ;;  %v5349_v5 = vld [vmem:[#allocation5 + $0x238] sm:$0xf0]  ;;  %2396 = vmatpush.bf16.msrb.mxu1 %v5240_v10  ;;  %v5834_v36 = vld [vmem:[#allocation5 + $0x20c] sm:$0xf] }
 0x319   :  { %2291 = vmatmul.bf16.gmra.mxu3 %v9137_v19  ;;  %2485 = vmatpush.bf16.msrb.mxu2 %v5368_v20  ;;  %v5352_v18 = vor.u32 %v5838_v22, %v5349_v5  ;;  %v5333_v14 = vld [vmem:[#allocation5 + $0x218] sm:$0xf0]  ;;  %v5770_v5 = vld [vmem:[#allocation5 + $0xc] sm:$0xf] }
 0x31a   :  { %2574 = vmatpush.bf16.msrb.mxu3 %v5496_v53  ;;  %2307 = vmatpush.bf16.msrb.mxu0 %v5112_v60  ;;  %v5336_v63 = vor.u32 %v5834_v36, %v5333_v14  ;;  %v5461_v53 = vld [vmem:[#allocation5 + $0x318] sm:$0xf0] }
 0x31b   :  { %v2163_v9 = vpop.f32.mrf.mxu2  ;;  %v5077_v22 = vld [vmem:[#allocation5 + $0x18] sm:$0xf0] }
 0x31c   :  { %v2164_v57 = vadd.f32 %v2163_v9, %v2075_v41  ;;  %v2252_v59 = vpop.f32.mrf.mxu3  ;;  %v1987_v13 = vpop.f32.mrf.mxu0  ;;  %v5093_v41 = vld [vmem:[#allocation5 + $0x38] sm:$0xf0]  ;;  %v5806_v9 = vld [vmem:[#allocation5 + $0x12c] sm:$0xf]  ;;  %v5080_v8 = vor.u32 %v5770_v5, %v5077_v22 }
 0x31d   :  { %v2076_v26 = vpop.f32.mrf.mxu1  ;;  %v5096_v20 = vor.u32 %v5774_v28, %v5093_v41  ;;  %v5224_v7 = vor.u32 %v5806_v9, %v5221_v30  ;;  %2486 = vmatpush.bf16.msrb.mxu2 %v5352_v18 }
 0x31e   :  { %v6704_v19 = vadd.f32 %v2252_v59, %v2164_v57  ;;  %v2077_v56 = vadd.f32 %v2076_v26, %v1987_v13  ;;  %2575 = vmatpush.bf16.msrb.mxu3 %v5480_v39  ;;  %v5464_v57 = vor.u32 %v5866_v43, %v5461_v53  ;;  %v5802_v59 = vld [vmem:[#allocation5 + $0x10c] sm:$0xf]  ;;  %v5205_v13 = vld [vmem:[#allocation5 + $0x118] sm:$0xf0] }
 0x31f   :  { %2308 = vmatpush.bf16.msrb.mxu0 %v5096_v20  ;;  %2397 = vmatpush.bf16.msrb.mxu1 %v5224_v7  ;;  %v5208_v16 = vor.u32 %v5802_v59, %v5205_v13  ;;  %v9142_v13 = vld [vmem:[#allocation15_spill] sm:$0xff] }
 0x320   :  { %9138 = vst [vmem:[#allocation125_spill] sm:$0xff] %v6704_v19 }
 0x321   :  { %2487 = vmatpush.bf16.msrb.mxu2 %v5336_v63 }
 0x322   :  { %2576 = vmatpush.bf16.msrb.mxu3 %v5464_v57 }
 0x323   :  { %v2165_v60 = vpop.f32.mrf.mxu2  ;;  %2309 = vmatpush.bf16.msrb.mxu0 %v5080_v8  ;;  %2398 = vmatpush.bf16.msrb.mxu1 %v5208_v16  ;;  %v9143_v8 = vld [vmem:[#allocation16_spill] sm:$0xff]  ;;  %v9144_v16 = vld [vmem:[#allocation17_spill] sm:$0xff] }
 0x324   :  { %v2166_v10 = vadd.f32 %v2165_v60, %v2077_v56  ;;  %v2254_v28 = vpop.f32.mrf.mxu3  ;;  %v1990_v30 = vpop.f32.mrf.mxu0  ;;  %v9145_v60 = vld [vmem:[#allocation18_spill] sm:$0xff] }
 0x325   :  { %v2079_v26 = vpop.f32.mrf.mxu1 }
 0x326   :  { %v6706_v18 = vadd.f32 %v2254_v28, %v2166_v10  ;;  %v2080_v41 = vadd.f32 %v2079_v26, %v1990_v30 }
 0x327   :  { %2029 = vmatmul.bf16.gmra.mxu0 %v6342_v21  ;;  %2118 = vmatmul.bf16.gmra.mxu1 %v6344_v23 }
 0x328   :  { %9139 = vst [vmem:[#allocation126_spill] sm:$0xff] %v6706_v18  ;;  %2207 = vmatmul.bf16.gmra.mxu2 %v6346_v31 }
 0x329   :  { %2296 = vmatmul.bf16.gmra.mxu3 %v6348_v48 }
 0x32b   :  { %v2168_v39 = vpop.f32.mrf.mxu2 }
 0x32c   :  { %v2169_v56 = vadd.f32 %v2168_v39, %v2080_v41  ;;  %v2257_v9 = vpop.f32.mrf.mxu3  ;;  %v1992_v20 = vpop.f32.mrf.mxu0 }
 0x32d   :  { %v2081_v63 = vpop.f32.mrf.mxu1 }
 0x32e   :  { %v6712_v7 = vadd.f32 %v2257_v9, %v2169_v56  ;;  %v2082_v36 = vadd.f32 %v2081_v63, %v1992_v20 }
 0x330   :  { %9140 = vst [vmem:[#allocation127_spill] sm:$0xff] %v6712_v7 }
 0x333   :  { %v2170_v14 = vpop.f32.mrf.mxu2 }
 0x334   :  { %v2171_v43 = vadd.f32 %v2170_v14, %v2082_v36  ;;  %v2259_v53 = vpop.f32.mrf.mxu3  ;;  %v1995_v5 = vpop.f32.mrf.mxu0 }
 0x335   :  { %v2084_v22 = vpop.f32.mrf.mxu1 }
 0x336   :  { %v6714_v57 = vadd.f32 %v2259_v53, %v2171_v43  ;;  %v2085_v59 = vadd.f32 %v2084_v22, %v1995_v5  ;;  %v9148_v5 = vld [vmem:[#allocation19_spill] sm:$0xff]  ;;  %v9149_v22 = vld [vmem:[#allocation20_spill] sm:$0xff] }
 0x337   :  { %2310 = vmatmul.bf16.vlgmr.msrb.gmra.mxu0 %v9142_v13  ;;  %2399 = vmatmul.bf16.vlgmr.msrb.gmra.mxu1 %v9143_v8 }
 0x338   :  { %9141 = vst [vmem:[#allocation128_spill] sm:$0xff] %v6714_v57  ;;  %2488 = vmatmul.bf16.vlgmr.msrb.gmra.mxu2 %v9144_v16 }
 0x339   :  { %2577 = vmatmul.bf16.vlgmr.msrb.gmra.mxu3 %v9145_v60 }
 0x33b   :  { %v2173_v10 = vpop.f32.mrf.mxu2 }
 0x33c   :  { %v2174_v28 = vadd.f32 %v2173_v10, %v2085_v59  ;;  %v2262_v30 = vpop.f32.mrf.mxu3  ;;  %v1997_v26 = vpop.f32.mrf.mxu0  ;;  %v9150_v59 = vld [vmem:[#allocation21_spill] sm:$0xff] }
 0x33d   :  { %v2086_v41 = vpop.f32.mrf.mxu1 }
 0x33e   :  { %v6720_v39 = vadd.f32 %v2262_v30, %v2174_v28  ;;  %v2087_v56 = vadd.f32 %v2086_v41, %v1997_v26 }
 0x340   :  { %9146 = vst [vmem:[#allocation15_spill] sm:$0xff] %v6720_v39 }
 0x343   :  { %v2175_v9 = vpop.f32.mrf.mxu2 }
 0x344   :  { %v2176_v20 = vadd.f32 %v2175_v9, %v2087_v56  ;;  %v2264_v63 = vpop.f32.mrf.mxu3  ;;  %v2000_v36 = vpop.f32.mrf.mxu0 }
 0x345   :  { %v2089_v14 = vpop.f32.mrf.mxu1 }
 0x346   :  { %v6722_v43 = vadd.f32 %v2264_v63, %v2176_v20  ;;  %v2090_v53 = vadd.f32 %v2089_v14, %v2000_v36  ;;  %v9153_v36 = vld [vmem:[#allocation22_spill] sm:$0xff]  ;;  %v9154_v14 = vld [vmem:[#allocation23_spill] sm:$0xff] }
 0x347   :  { %2315 = vmatmul.bf16.gmra.mxu0 %v6148_v12  ;;  %2404 = vmatmul.bf16.gmra.mxu1 %v9148_v5  ;;  %v9155_v5 = vld [vmem:[#allocation24_spill] sm:$0xff] }
 0x348   :  { %9147 = vst [vmem:[#allocation16_spill] sm:$0xff] %v6722_v43  ;;  %2493 = vmatmul.bf16.gmra.mxu2 %v9149_v22 }
 0x349   :  { %2582 = vmatmul.bf16.gmra.mxu3 %v9150_v59 }
 0x34b   :  { %v2178_v13 = vpop.f32.mrf.mxu2 }
 0x34c   :  { %v2002_v8 = vpop.f32.mrf.mxu0  ;;  %v2179_v16 = vadd.f32 %v2178_v13, %v2090_v53  ;;  %v2267_v60 = vpop.f32.mrf.mxu3  ;;  %v9156_v53 = vld [vmem:[#allocation25_spill] sm:$0xff] }
 0x34d   :  { %v2091_v10 = vpop.f32.mrf.mxu1 }
 0x34e   :  { %v2092_v28 = vadd.f32 %v2091_v10, %v2002_v8  ;;  %v6728_v30 = vadd.f32 %v2267_v60, %v2179_v16 }
 0x350   :  { %9151 = vst [vmem:[#allocation17_spill] sm:$0xff] %v6728_v30 }
 0x353   :  { %v2180_v26 = vpop.f32.mrf.mxu2 }
 0x354   :  { %v2005_v41 = vpop.f32.mrf.mxu0  ;;  %v2181_v56 = vadd.f32 %v2180_v26, %v2092_v28  ;;  %v2269_v9 = vpop.f32.mrf.mxu3 }
 0x355   :  { %v2094_v20 = vpop.f32.mrf.mxu1 }
 0x356   :  { %v2095_v12 = vadd.f32 %v2094_v20, %v2005_v41  ;;  %v6730_v63 = vadd.f32 %v2269_v9, %v2181_v56  ;;  %v2732_v41 = vadd.f32 %v6634_v6, %v6632_v58 }
 0x357   :  { %2320 = vmatmul.bf16.gmra.mxu0 %v9153_v36  ;;  %2409 = vmatmul.bf16.gmra.mxu1 %v9154_v14 }
 0x358   :  { %9152 = vst [vmem:[#allocation18_spill] sm:$0xff] %v6730_v63  ;;  %2498 = vmatmul.bf16.gmra.mxu2 %v9155_v5  ;;  %v2733_v14 = vadd.f32 %v2732_v41, %v6667_v4 }
 0x359   :  { %2587 = vmatmul.bf16.gmra.mxu3 %v9156_v53 }
 0x35b   :  { %v2183_v22 = vpop.f32.mrf.mxu2 }
 0x35c   :  { %v2007_v59 = vpop.f32.mrf.mxu0  ;;  %v2184_v13 = vadd.f32 %v2183_v22, %v2095_v12  ;;  %v2272_v8 = vpop.f32.mrf.mxu3  ;;  %v2734_v12 = vadd.f32 %v2733_v14, %v6670_v51 }
 0x35d   :  { %v2096_v16 = vpop.f32.mrf.mxu1 }
 0x35e   :  { %v2097_v60 = vadd.f32 %v2096_v16, %v2007_v59  ;;  %v6736_v10 = vadd.f32 %v2272_v8, %v2184_v13  ;;  %v2735_v53 = vadd.f32 %v2734_v12, %v6672_v29 }
 0x360   :  { %9157 = vst [vmem:[#allocation19_spill] sm:$0xff] %v6736_v10  ;;  %v2736_v13 = vadd.f32 %v2735_v53, %v6674_v15 }
 0x363   :  { %v2185_v28 = vpop.f32.mrf.mxu2 }
 0x364   :  { %v2010_v26 = vpop.f32.mrf.mxu0  ;;  %v2186_v56 = vadd.f32 %v2185_v28, %v2097_v60  ;;  %v2274_v9 = vpop.f32.mrf.mxu3 }
 0x365   :  { %v2099_v20 = vpop.f32.mrf.mxu1 }
 0x366   :  { %v2100_v36 = vadd.f32 %v2099_v20, %v2010_v26  ;;  %v6741_v5 = vadd.f32 %v2274_v9, %v2186_v56 }
 0x367   :  { %2325 = vmatmul.bf16.gmra.mxu0 %v6172_v49  ;;  %2414 = vmatmul.bf16.gmra.mxu1 %v6174_v50  ;;  %v2737_v49 = vadd.f32 %v2736_v13, %v6680_v42  ;;  %v5917_v42 = vld [vmem:[#allocation8 + $0xa0] sm:$0xff] }
 0x368   :  { %9158 = vst [vmem:[#allocation20_spill] sm:$0xff] %v6741_v5  ;;  %2503 = vmatmul.bf16.gmra.mxu2 %v6176_v54 }
 0x369   :  { %2592 = vmatmul.bf16.gmra.mxu3 %v6178_v55  ;;  %v2738_v50 = vadd.f32 %v2737_v49, %v6682_v61 }
 0x36b   :  { %v2188_v22 = vpop.f32.mrf.mxu2  ;;  %v2739_v54 = vadd.f32 %v2738_v50, %v6688_v17 }
 0x36c   :  { %v2012_v59 = vpop.f32.mrf.mxu0  ;;  %v2189_v8 = vadd.f32 %v2188_v22, %v2100_v36  ;;  %v2277_v16 = vpop.f32.mrf.mxu3 }
 0x36d   :  { %v2101_v60 = vpop.f32.mrf.mxu1  ;;  %v2740_v55 = vadd.f32 %v2739_v54, %v6690_v40 }
 0x36e   :  { %v2102_v28 = vadd.f32 %v2101_v60, %v2012_v59  ;;  %v6751_v26 = vadd.f32 %v2277_v16, %v2189_v8 }
 0x36f   :  { %v2741_v36 = vadd.f32 %v2740_v55, %v6696_v38 }
 0x370   :  { %9159 = vst [vmem:[#allocation21_spill] sm:$0xff] %v6751_v26 }
 0x371   :  { %v2742_v22 = vadd.f32 %v2741_v36, %v6698_v37 }
 0x373   :  { %v2190_v41 = vpop.f32.mrf.mxu2  ;;  %v2743_v59 = vadd.f32 %v2742_v22, %v6704_v19  ;;  %v5926_v19 = vld [vmem:[#allocation8 + $0xe8] sm:$0xff] }
 0x374   :  { %v2015_v56 = vpop.f32.mrf.mxu0  ;;  %v2191_v9 = vadd.f32 %v2190_v41, %v2102_v28  ;;  %v2279_v20 = vpop.f32.mrf.mxu3 }
 0x375   :  { %v2104_v14 = vpop.f32.mrf.mxu1  ;;  %v2744_v16 = vadd.f32 %v2743_v59, %v6706_v18  ;;  %v5918_v18 = vld [vmem:[#allocation8 + $0xa8] sm:$0xff] }
 0x376   :  { %v2105_v12 = vadd.f32 %v2104_v14, %v2015_v56  ;;  %v6757_v53 = vadd.f32 %v2279_v20, %v2191_v9 }
 0x377   :  { %2330 = vmatmul.bf16.gmra.mxu0 %v6184_v0  ;;  %2419 = vmatmul.bf16.gmra.mxu1 %v6186_v1  ;;  %v2745_v0 = vadd.f32 %v2744_v16, %v6712_v7 }
 0x378   :  { %9160 = vst [vmem:[#allocation22_spill] sm:$0xff] %v6757_v53  ;;  %2508 = vmatmul.bf16.gmra.mxu2 %v6188_v2 }
 0x379   :  { %2597 = vmatmul.bf16.gmra.mxu3 %v6190_v3  ;;  %v2746_v1 = vadd.f32 %v2745_v0, %v6714_v57 }
 0x37b   :  { %v2193_v13 = vpop.f32.mrf.mxu2  ;;  %v2747_v2 = vadd.f32 %v2746_v1, %v6720_v39 }
 0x37c   :  { %v2017_v8 = vpop.f32.mrf.mxu0  ;;  %v2194_v60 = vadd.f32 %v2193_v13, %v2105_v12  ;;  %v2282_v28 = vpop.f32.mrf.mxu3 }
 0x37d   :  { %v2106_v49 = vpop.f32.mrf.mxu1  ;;  %v2748_v3 = vadd.f32 %v2747_v2, %v6722_v43 }
 0x37e   :  { %v2107_v50 = vadd.f32 %v2106_v49, %v2017_v8  ;;  %v6767_v54 = vadd.f32 %v2282_v28, %v2194_v60 }
 0x37f   :  { %v2749_v12 = vadd.f32 %v2748_v3, %v6728_v30 }
 0x380   :  { %9161 = vst [vmem:[#allocation23_spill] sm:$0xff] %v6767_v54 }
 0x381   :  { %v2750_v22 = vadd.f32 %v2749_v12, %v6730_v63 }
 0x383   :  { %v2195_v41 = vpop.f32.mrf.mxu2  ;;  %v2751_v59 = vadd.f32 %v2750_v22, %v6736_v10 }
 0x384   :  { %v2020_v56 = vpop.f32.mrf.mxu0  ;;  %v2196_v55 = vadd.f32 %v2195_v41, %v2107_v50  ;;  %v2284_v9 = vpop.f32.mrf.mxu3 }
 0x385   :  { %v2109_v20 = vpop.f32.mrf.mxu1  ;;  %v2752_v16 = vadd.f32 %v2751_v59, %v6741_v5  ;;  %v5927_v5 = vld [vmem:[#allocation8 + $0xf0] sm:$0xff] }
 0x386   :  { %v2110_v14 = vadd.f32 %v2109_v20, %v2020_v56  ;;  %v6773_v36 = vadd.f32 %v2284_v9, %v2196_v55 }
 0x387   :  { %2335 = vmatmul.bf16.gmra.mxu0 %v6196_v32  ;;  %2424 = vmatmul.bf16.gmra.mxu1 %v6198_v33  ;;  %v2753_v32 = vadd.f32 %v2752_v16, %v6751_v26  ;;  %v5919_v26 = vld [vmem:[#allocation8 + $0xb0] sm:$0xff] }
 0x388   :  { %9162 = vst [vmem:[#allocation24_spill] sm:$0xff] %v6773_v36  ;;  %2513 = vmatmul.bf16.gmra.mxu2 %v6200_v34 }
 0x389   :  { %2602 = vmatmul.bf16.gmra.mxu3 %v6202_v35  ;;  %v2754_v33 = vadd.f32 %v2753_v32, %v6757_v53 }
 0x38b   :  { %v2198_v13 = vpop.f32.mrf.mxu2  ;;  %v2755_v34 = vadd.f32 %v2754_v33, %v6767_v54 }
 0x38c   :  { %v2022_v8 = vpop.f32.mrf.mxu0  ;;  %v2199_v60 = vadd.f32 %v2198_v13, %v2110_v14  ;;  %v2287_v28 = vpop.f32.mrf.mxu3 }
 0x38d   :  { %v2111_v49 = vpop.f32.mrf.mxu1  ;;  %v2756_v35 = vadd.f32 %v2755_v34, %v6773_v36  ;;  %v5928_v36 = vld [vmem:[#allocation8 + $0xf8] sm:$0xff] }
 0x38e   :  { %v2112_v50 = vadd.f32 %v2111_v49, %v2022_v8  ;;  %v6783_v0 = vadd.f32 %v2287_v28, %v2199_v60  ;;  %4276 = vmatpush.bf16.msra.mxu3 %v5928_v36 }
 0x390   :  { %v2757_v9 = vadd.f32 %v2756_v35, %v6783_v0 }
 0x392   :  { %4277 = vmatpush.bf16.msra.mxu3 %v5927_v5 }
 0x393   :  { %v2200_v1 = vpop.f32.mrf.mxu2 }
 0x394   :  { %v2025_v2 = vpop.f32.mrf.mxu0  ;;  %v2201_v41 = vadd.f32 %v2200_v1, %v2112_v50  ;;  %v2289_v56 = vpop.f32.mrf.mxu3 }
 0x395   :  { %v2114_v3 = vpop.f32.mrf.mxu1 }
 0x396   :  { %v2115_v55 = vadd.f32 %v2114_v3, %v2025_v2  ;;  %v6789_v20 = vadd.f32 %v2289_v56, %v2201_v41  ;;  %4278 = vmatpush.bf16.msra.mxu3 %v5926_v19 }
 0x397   :  { %2340 = vmatmul.bf16.gmra.mxu0 %v6208_v44  ;;  %2429 = vmatmul.bf16.gmra.mxu1 %v6210_v45 }
 0x398   :  { %v2758_v14 = vadd.f32 %v2757_v9, %v6789_v20  ;;  %2518 = vmatmul.bf16.gmra.mxu2 %v6212_v46 }
 0x399   :  { %2607 = vmatmul.bf16.gmra.mxu3 %v9019_v25 }
 0x39b   :  { %v2203_v12 = vpop.f32.mrf.mxu2 }
 0x39c   :  { %v2027_v22 = vpop.f32.mrf.mxu0  ;;  %v2204_v59 = vadd.f32 %v2203_v12, %v2115_v55  ;;  %v2292_v8 = vpop.f32.mrf.mxu3 }
 0x39d   :  { %v2116_v13 = vpop.f32.mrf.mxu1 }
 0x39e   :  { %v2117_v16 = vadd.f32 %v2116_v13, %v2027_v22  ;;  %v6796_v60 = vadd.f32 %v2292_v8, %v2204_v59  ;;  %v9164_v8 = vld [vmem:[#allocation34_spill] sm:$0xff] }
 0x3a0   :  { %v2759_v28 = vadd.f32 %v2758_v14, %v6796_v60 }
 0x3a3   :  { %v2205_v49 = vpop.f32.mrf.mxu2 }
 0x3a4   :  { %v2206_v44 = vadd.f32 %v2205_v49, %v2117_v16  ;;  %v2030_v50 = vpop.f32.mrf.mxu0  ;;  %v2294_v32 = vpop.f32.mrf.mxu3 }
 0x3a5   :  { %v2119_v45 = vpop.f32.mrf.mxu1 }
 0x3a6   :  { %v2120_v33 = vadd.f32 %v2119_v45, %v2030_v50  ;;  %v2295_v34 = vadd.f32 %v2294_v32, %v2206_v44 }
 0x3a7   :  { %2345 = vmatmul.bf16.gmra.mxu0 %v9020_v52  ;;  %2434 = vmatmul.bf16.gmra.mxu1 %v9021_v27 }
 0x3a8   :  { %v2760_v46 = vadd.f32 %v2759_v28, %v2295_v34  ;;  %2523 = vmatmul.bf16.gmra.mxu2 %v9094_v11 }
 0x3a9   :  { %2612 = vmatmul.bf16.gmra.mxu3 %v9095_v47  ;;  %v9163_v47 = vld [vmem:[#allocation33_spill] sm:$0xff] }
 0x3ab   :  { %v2208_v25 = vpop.f32.mrf.mxu2 }
 0x3ac   :  { %v2209_v1 = vadd.f32 %v2208_v25, %v2120_v33  ;;  %v2032_v2 = vpop.f32.mrf.mxu0  ;;  %v2297_v41 = vpop.f32.mrf.mxu3 }
 0x3ad   :  { %v2121_v35 = vpop.f32.mrf.mxu1 }
 0x3ae   :  { %v2122_v56 = vadd.f32 %v2121_v35, %v2032_v2  ;;  %v2298_v3 = vadd.f32 %v2297_v41, %v2209_v1 }
 0x3b0   :  { %v2761_v55 = vadd.f32 %v2760_v46, %v2298_v3 }
 0x3b3   :  { %v2210_v9 = vpop.f32.mrf.mxu2 }
 0x3b4   :  { %v2211_v14 = vadd.f32 %v2210_v9, %v2122_v56  ;;  %v2311_v12 = vpop.f32.mrf.mxu0  ;;  %v2299_v52 = vpop.f32.mrf.mxu3 }
 0x3b5   :  { %v2400_v22 = vpop.f32.mrf.mxu1 }
 0x3b6   :  { %v2401_v59 = vadd.f32 %v2400_v22, %v2311_v12  ;;  %v2300_v27 = vadd.f32 %v2299_v52, %v2211_v14  ;;  %v9167_v14 = vld [vmem:[#allocation36_spill] sm:$0xff]  ;;  %v9168_v12 = vld [vmem:[#allocation37_spill] sm:$0xff]  ;;  %v9169_v22 = vld [vmem:[#allocation38_spill] sm:$0xff] }
 0x3b7   :  { %2350 = vmatmul.bf16.gmra.mxu0 %v9096_v24  ;;  %2439 = vmatmul.bf16.gmra.mxu1 %v9097_v62  ;;  %v9170_v52 = vld [vmem:[#allocation28_spill] sm:$0xff] }
 0x3b8   :  { %v2762_v11 = vadd.f32 %v2761_v55, %v2300_v27  ;;  %2528 = vmatmul.bf16.gmra.mxu2 %v9163_v47 }
 0x3b9   :  { %2617 = vmatmul.bf16.gmra.mxu3 %v9164_v8 }
 0x3ba   :  { %v2763_v13 = vrot.slane %v2762_v11, 4 }
 0x3bb   :  { %v2489_v16 = vpop.f32.mrf.mxu2 }
 0x3bc   :  { %v2764_v28 = vadd.f32 %v2763_v13, %v2762_v11  ;;  %v2490_v49 = vadd.f32 %v2489_v16, %v2401_v59  ;;  %v2313_v44 = vpop.f32.mrf.mxu0  ;;  %v2578_v45 = vpop.f32.mrf.mxu3  ;;  %v9171_v11 = vld [vmem:[#allocation39_spill] sm:$0xff] }
 0x3bd   :  { %v2402_v50 = vpop.f32.mrf.mxu1 }
 0x3be   :  { %v2403_v32 = vadd.f32 %v2402_v50, %v2313_v44  ;;  %v2765_v33 = vrot.slane %v2764_v28, 2  ;;  %v6807_v46 = vadd.f32 %v2578_v45, %v2490_v49 }
 0x3c0   :  { %9165 = vst [vmem:[#allocation25_spill] sm:$0xff] %v6807_v46  ;;  %v2766_v25 = vadd.f32 %v2765_v33, %v2764_v28 }
 0x3c2   :  { %v2767_v24 = vrot.slane %v2766_v25, 1 }
 0x3c3   :  { %v2491_v1 = vpop.f32.mrf.mxu2 }
 0x3c4   :  { %v2492_v62 = vadd.f32 %v2491_v1, %v2403_v32  ;;  %v2316_v2 = vpop.f32.mrf.mxu0  ;;  %v2580_v41 = vpop.f32.mrf.mxu3  ;;  %v2768_v55 = vadd.f32 %v2767_v24, %v2766_v25  ;;  %v9178_v1 = vld [vmem:[#allocation42_spill] sm:$0xff] }
 0x3c5   :  { %v2405_v35 = vpop.f32.mrf.mxu1 }
 0x3c6   :  { %v2406_v56 = vadd.f32 %v2405_v35, %v2316_v2  ;;  %v6809_v9 = vadd.f32 %v2580_v41, %v2492_v62  ;;  %v6815_v59 = vmul.f32 %v9170_v52, %v2768_v55  ;;  %v9179_v2 = vld [vmem:[#allocation43_spill] sm:$0xff]  ;;  %v9180_v35 = vld [vmem:[#allocation44_spill] sm:$0xff]  ;;  %v9181_v41 = vld [vmem:[#allocation45_spill] sm:$0xff] }
 0x3c7   :  { %2355 = vmatmul.bf16.gmra.mxu0 %v9167_v14  ;;  %2444 = vmatmul.bf16.gmra.mxu1 %v9168_v12 }
 0x3c8   :  { %9166 = vst [vmem:[#allocation33_spill] sm:$0xff] %v6809_v9  ;;  %2533 = vmatmul.bf16.gmra.mxu2 %v9169_v22  ;;  %v6820_v28 = vsub.f32 %v6783_v0, %v6815_v59  ;;  %v6824_v49 = vsub.f32 %v6789_v20, %v6815_v59  ;;  %v6828_v44 = vsub.f32 %v6796_v60, %v6815_v59 }
 0x3c9   :  { %2622 = vmatmul.bf16.gmra.mxu3 %v9171_v11  ;;  %v6831_v50 = vsub.f32 %v2295_v34, %v6815_v59  ;;  %v6834_v45 = vsub.f32 %v2298_v3, %v6815_v59  ;;  %v6837_v32 = vsub.f32 %v2300_v27, %v6815_v59 }
 0x3ca   :  { %9172 = vst [vmem:[#allocation34_spill] sm:$0xff] %v6820_v28  ;;  %v5920_v28 = vld [vmem:[#allocation8 + $0xb8] sm:$0xff] }
 0x3cb   :  { %v2494_v47 = vpop.f32.mrf.mxu2  ;;  %9173 = vst [vmem:[#allocation36_spill] sm:$0xff] %v6824_v49  ;;  %4187 = vmatpush.bf16.msra.mxu2 %v5920_v28 }
 0x3cc   :  { %v2318_v13 = vpop.f32.mrf.mxu0  ;;  %v2583_v16 = vpop.f32.mrf.mxu3  ;;  %9174 = vst [vmem:[#allocation37_spill] sm:$0xff] %v6828_v44  ;;  %v2495_v20 = vadd.f32 %v2494_v47, %v2406_v56 }
 0x3cd   :  { %v2407_v8 = vpop.f32.mrf.mxu1  ;;  %9175 = vst [vmem:[#allocation38_spill] sm:$0xff] %v6831_v50 }
 0x3ce   :  { %9176 = vst [vmem:[#allocation39_spill] sm:$0xff] %v6834_v45  ;;  %v2408_v62 = vadd.f32 %v2407_v8, %v2318_v13  ;;  %v6842_v34 = vadd.f32 %v2583_v16, %v2495_v20  ;;  %v9198_v45 = vld [vmem:[#allocation66_spill] sm:$0xff] }
 0x3cf   :  { %9177 = vst [vmem:[#allocation129_spill] sm:$0xff] %v6837_v32  ;;  %4188 = vmatpush.bf16.msra.mxu2 %v5919_v26 }
 0x3d3   :  { %v2496_v33 = vpop.f32.mrf.mxu2  ;;  %4189 = vmatpush.bf16.msra.mxu2 %v5918_v18 }
 0x3d4   :  { %v2321_v0 = vpop.f32.mrf.mxu0  ;;  %v2585_v24 = vpop.f32.mrf.mxu3  ;;  %v2497_v3 = vadd.f32 %v2496_v33, %v2408_v62  ;;  %v9183_v33 = vld [vmem:[#allocation48_spill] sm:$0xff]  ;;  %v9184_v62 = vld [vmem:[#allocation49_spill] sm:$0xff] }
 0x3d5   :  { %v2410_v25 = vpop.f32.mrf.mxu1 }
 0x3d6   :  { %v2411_v60 = vadd.f32 %v2410_v25, %v2321_v0  ;;  %v6845_v55 = vadd.f32 %v2585_v24, %v2497_v3  ;;  %v9185_v24 = vld [vmem:[#allocation50_spill] sm:$0xff] }
 0x3d7   :  { %2360 = vmatmul.bf16.gmra.mxu0 %v9178_v1  ;;  %2449 = vmatmul.bf16.gmra.mxu1 %v9179_v2  ;;  %v9186_v2 = vld [vmem:[#allocation51_spill] sm:$0xff] }
 0x3d8   :  { %2538 = vmatmul.bf16.gmra.mxu2 %v9180_v35  ;;  %9182 = vst [vmem:[#allocation42_spill] sm:$0xff] %v6845_v55 }
 0x3d9   :  { %2627 = vmatmul.bf16.gmra.mxu3 %v9181_v41  ;;  %4190 = vmatpush.bf16.msra.mxu2 %v5917_v42 }
 0x3db   :  { %v2499_v27 = vpop.f32.mrf.mxu2 }
 0x3dc   :  { %v2500_v14 = vadd.f32 %v2499_v27, %v2411_v60  ;;  %v2323_v12 = vpop.f32.mrf.mxu0  ;;  %v2588_v11 = vpop.f32.mrf.mxu3 }
 0x3dd   :  { %v2412_v22 = vpop.f32.mrf.mxu1 }
 0x3de   :  { %v2413_v1 = vadd.f32 %v2412_v22, %v2323_v12  ;;  %v6847_v56 = vadd.f32 %v2588_v11, %v2500_v14 }
 0x3e3   :  { %v2501_v47 = vpop.f32.mrf.mxu2 }
 0x3e4   :  { %v2502_v13 = vadd.f32 %v2501_v47, %v2413_v1  ;;  %v2326_v8 = vpop.f32.mrf.mxu0  ;;  %v2590_v25 = vpop.f32.mrf.mxu3 }
 0x3e5   :  { %v2415_v0 = vpop.f32.mrf.mxu1 }
 0x3e6   :  { %v2416_v16 = vadd.f32 %v2415_v0, %v2326_v8  ;;  %v6849_v20 = vadd.f32 %v2590_v25, %v2502_v13  ;;  %v9188_v25 = vld [vmem:[#allocation54_spill] sm:$0xff] }
 0x3e7   :  { %2365 = vmatmul.bf16.gmra.mxu0 %v9183_v33  ;;  %2454 = vmatmul.bf16.gmra.mxu1 %v9184_v62  ;;  %v9189_v33 = vld [vmem:[#allocation55_spill] sm:$0xff]  ;;  %v9190_v62 = vld [vmem:[#allocation56_spill] sm:$0xff] }
 0x3e8   :  { %2543 = vmatmul.bf16.gmra.mxu2 %v9185_v24 }
 0x3e9   :  { %2632 = vmatmul.bf16.gmra.mxu3 %v9186_v2 }
 0x3eb   :  { %v2504_v60 = vpop.f32.mrf.mxu2 }
 0x3ec   :  { %v2505_v35 = vadd.f32 %v2504_v60, %v2416_v16  ;;  %v2328_v3 = vpop.f32.mrf.mxu0  ;;  %v2593_v27 = vpop.f32.mrf.mxu3  ;;  %v9191_v16 = vld [vmem:[#allocation57_spill] sm:$0xff] }
 0x3ed   :  { %v2417_v41 = vpop.f32.mrf.mxu1 }
 0x3ee   :  { %v2418_v14 = vadd.f32 %v2417_v41, %v2328_v3  ;;  %v6855_v12 = vadd.f32 %v2593_v27, %v2505_v35 }
 0x3f3   :  { %v2506_v22 = vpop.f32.mrf.mxu2 }
 0x3f4   :  { %v2507_v11 = vadd.f32 %v2506_v22, %v2418_v14  ;;  %v2331_v1 = vpop.f32.mrf.mxu0  ;;  %v2595_v13 = vpop.f32.mrf.mxu3 }
 0x3f5   :  { %v2420_v47 = vpop.f32.mrf.mxu1 }
 0x3f6   :  { %v2421_v8 = vadd.f32 %v2420_v47, %v2331_v1  ;;  %v6857_v0 = vadd.f32 %v2595_v13, %v2507_v11  ;;  %v9193_v47 = vld [vmem:[#allocation60_spill] sm:$0xff]  ;;  %v9194_v13 = vld [vmem:[#allocation61_spill] sm:$0xff] }
 0x3f7   :  { %2370 = vmatmul.bf16.gmra.mxu0 %v9188_v25  ;;  %2459 = vmatmul.bf16.gmra.mxu1 %v9189_v33  ;;  %v9195_v25 = vld [vmem:[#allocation62_spill] sm:$0xff] }
 0x3f8   :  { %9187 = vst [vmem:[#allocation43_spill] sm:$0xff] %v6857_v0  ;;  %2548 = vmatmul.bf16.gmra.mxu2 %v9190_v62 }
 0x3f9   :  { %2637 = vmatmul.bf16.gmra.mxu3 %v9191_v16 }
 0x3fb   :  { %v2509_v24 = vpop.f32.mrf.mxu2 }
 0x3fc   :  { %v2510_v2 = vadd.f32 %v2509_v24, %v2421_v8  ;;  %v6863_v60 = vpop.f32.mrf.mxu0  ;;  %v2598_v3 = vpop.f32.mrf.mxu3  ;;  %v9196_v8 = vld [vmem:[#allocation63_spill] sm:$0xff] }
 0x3fd   :  { %v6865_v35 = vpop.f32.mrf.mxu1 }
 0x3fe   :  { %v6867_v41 = vadd.f32 %v2598_v3, %v2510_v2 }
 0x400   :  { %9192 = vst [vmem:[#allocation44_spill] sm:$0xff] %v6867_v41 }
 0x403   :  { %v6869_v27 = vpop.f32.mrf.mxu2 }
 0x404   :  { %v2336_v14 = vpop.f32.mrf.mxu0  ;;  %v6871_v11 = vpop.f32.mrf.mxu3 }
 0x405   :  { %v2425_v22 = vpop.f32.mrf.mxu1 }
 0x406   :  { %v2426_v1 = vadd.f32 %v2425_v22, %v2336_v14 }
 0x407   :  { %2375 = vmatmul.bf16.gmra.mxu0 %v9193_v47  ;;  %2464 = vmatmul.bf16.gmra.mxu1 %v9194_v13 }
 0x408   :  { %2553 = vmatmul.bf16.gmra.mxu2 %v9195_v25  ;;  %v9199_v25 = vld [vmem:[#allocation67_spill] sm:$0xff] }
 0x409   :  { %2642 = vmatmul.bf16.gmra.mxu3 %v9196_v8  ;;  %v9200_v8 = vld [vmem:[#allocation68_spill] sm:$0xff] }
 0x40b   :  { %v2514_v33 = vpop.f32.mrf.mxu2 }
 0x40c   :  { %v2515_v62 = vadd.f32 %v2514_v33, %v2426_v1  ;;  %v6877_v16 = vpop.f32.mrf.mxu0  ;;  %v2603_v2 = vpop.f32.mrf.mxu3  ;;  %v9201_v1 = vld [vmem:[#allocation69_spill] sm:$0xff] }
 0x40d   :  { %v6879_v24 = vpop.f32.mrf.mxu1 }
 0x40e   :  { %v6881_v3 = vadd.f32 %v2603_v2, %v2515_v62  ;;  %v2428_v42 = vadd.f32 %v6879_v24, %v6877_v16  ;;  %v7012_v16 = vsub.f32 %v6634_v6, %v6815_v59 }
 0x410   :  { %9197 = vst [vmem:[#allocation45_spill] sm:$0xff] %v6881_v3 }
 0x411   :  { %9219 = vst [vmem:[#allocation68_spill] sm:$0xff] %v7012_v16 }
 0x413   :  { %v6883_v32 = vpop.f32.mrf.mxu2 }
 0x414   :  { %v2341_v14 = vpop.f32.mrf.mxu0  ;;  %v6885_v47 = vpop.f32.mrf.mxu3 }
 0x415   :  { %v2430_v22 = vpop.f32.mrf.mxu1 }
 0x416   :  { %v2431_v13 = vadd.f32 %v2430_v22, %v2341_v14  ;;  %v5904_v14 = vld [vmem:[#allocation8 + $0x38] sm:$0xff] }
 0x417   :  { %2380 = vmatmul.bf16.gmra.mxu0 %v9198_v45  ;;  %2469 = vmatmul.bf16.gmra.mxu1 %v9199_v25  ;;  %v5912_v22 = vld [vmem:[#allocation8 + $0x78] sm:$0xff] }
 0x418   :  { %2558 = vmatmul.bf16.gmra.mxu2 %v9200_v8  ;;  %4009 = vmatpush.bf16.msra.mxu0 %v5904_v14 }
 0x419   :  { %2647 = vmatmul.bf16.gmra.mxu3 %v9201_v1  ;;  %4098 = vmatpush.bf16.msra.mxu1 %v5912_v22 }
 0x41b   :  { %v2519_v33 = vpop.f32.mrf.mxu2 }
 0x41c   :  { %v2520_v50 = vadd.f32 %v2519_v33, %v2431_v13  ;;  %v6891_v44 = vpop.f32.mrf.mxu0  ;;  %v2608_v2 = vpop.f32.mrf.mxu3 }
 0x41d   :  { %v6893_v62 = vpop.f32.mrf.mxu1 }
 0x41e   :  { %v6895_v49 = vadd.f32 %v2608_v2, %v2520_v50 }
 0x423   :  { %v6897_v45 = vpop.f32.mrf.mxu2 }
 0x424   :  { %v2346_v25 = vpop.f32.mrf.mxu0  ;;  %v6899_v13 = vpop.f32.mrf.mxu3 }
 0x425   :  { %v2435_v8 = vpop.f32.mrf.mxu1 }
 0x426   :  { %v2436_v1 = vadd.f32 %v2435_v8, %v2346_v25 }
 0x427   :  { %2385 = vmatmul.bf16.gmra.mxu0 %v6342_v21  ;;  %2474 = vmatmul.bf16.gmra.mxu1 %v6344_v23 }
 0x428   :  { %2563 = vmatmul.bf16.gmra.mxu2 %v6346_v31 }
 0x429   :  { %2652 = vmatmul.bf16.gmra.mxu3 %v6348_v48 }
 0x42b   :  { %v2524_v50 = vpop.f32.mrf.mxu2 }
 0x42c   :  { %v2525_v28 = vadd.f32 %v2524_v50, %v2436_v1  ;;  %v6905_v36 = vpop.f32.mrf.mxu0  ;;  %v2613_v2 = vpop.f32.mrf.mxu3 }
 0x42d   :  { %v6907_v33 = vpop.f32.mrf.mxu1 }
 0x42e   :  { %v6909_v14 = vadd.f32 %v2613_v2, %v2525_v28  ;;  %v5903_v28 = vld [vmem:[#allocation8 + $0x30] sm:$0xff] }
 0x42f   :  { %v5911_v2 = vld [vmem:[#allocation8 + $0x70] sm:$0xff]  ;;  %4010 = vmatpush.bf16.msra.mxu0 %v5903_v28 }
 0x430   :  { %4099 = vmatpush.bf16.msra.mxu1 %v5911_v2 }
 0x433   :  { %v6911_v22 = vpop.f32.mrf.mxu2 }
 0x434   :  { %v2351_v25 = vpop.f32.mrf.mxu0  ;;  %v6913_v21 = vpop.f32.mrf.mxu3 }
 0x435   :  { %v2440_v8 = vpop.f32.mrf.mxu1 }
 0x436   :  { %v2441_v23 = vadd.f32 %v2440_v8, %v2351_v25 }
 0x43b   :  { %v2529_v54 = vpop.f32.mrf.mxu2 }
 0x43c   :  { %v2530_v31 = vadd.f32 %v2529_v54, %v2441_v23  ;;  %v6915_v53 = vpop.f32.mrf.mxu0  ;;  %v2618_v1 = vpop.f32.mrf.mxu3 }
 0x43d   :  { %v6917_v48 = vpop.f32.mrf.mxu1 }
 0x43e   :  { %v6919_v50 = vadd.f32 %v2618_v1, %v2530_v31 }
 0x443   :  { %v6921_v10 = vpop.f32.mrf.mxu2 }
 0x444   :  { %v2356_v63 = vpop.f32.mrf.mxu0  ;;  %v6923_v54 = vpop.f32.mrf.mxu3 }
 0x445   :  { %v2445_v30 = vpop.f32.mrf.mxu1 }
 0x446   :  { %v2446_v25 = vadd.f32 %v2445_v30, %v2356_v63 }
 0x44b   :  { %v2534_v8 = vpop.f32.mrf.mxu2 }
 0x44c   :  { %v2535_v23 = vadd.f32 %v2534_v8, %v2446_v25  ;;  %v6925_v52 = vpop.f32.mrf.mxu0  ;;  %v2623_v1 = vpop.f32.mrf.mxu3 }
 0x44d   :  { %v6927_v31 = vpop.f32.mrf.mxu1 }
 0x44e   :  { %v6929_v43 = vadd.f32 %v2623_v1, %v2535_v23  ;;  %v5902_v23 = vld [vmem:[#allocation8 + $0x28] sm:$0xff] }
 0x44f   :  { %v5910_v1 = vld [vmem:[#allocation8 + $0x68] sm:$0xff]  ;;  %4011 = vmatpush.bf16.msra.mxu0 %v5902_v23 }
 0x450   :  { %4100 = vmatpush.bf16.msra.mxu1 %v5910_v1  ;;  %v2769_v1 = vadd.f32 %v6809_v9, %v6807_v46  ;;  %v2423_v9 = vadd.f32 %v6865_v35, %v6863_v60  ;;  %v5909_v46 = vld [vmem:[#allocation8 + $0x60] sm:$0xff]  ;;  %v9212_v60 = vld [vmem:[#allocation29_spill] sm:$0xff]  ;;  %v9213_v35 = vld [vmem:[#allocation26_spill] sm:$0xff] }
 0x453   :  { %v6931_v39 = vpop.f32.mrf.mxu2 }
 0x454   :  { %v2361_v26 = vpop.f32.mrf.mxu0  ;;  %v6933_v5 = vpop.f32.mrf.mxu3  ;;  %4101 = vmatpush.bf16.msra.mxu1 %v5909_v46 }
 0x455   :  { %v2450_v57 = vpop.f32.mrf.mxu1 }
 0x456   :  { %v2451_v28 = vadd.f32 %v2450_v57, %v2361_v26 }
 0x45b   :  { %v2539_v2 = vpop.f32.mrf.mxu2 }
 0x45c   :  { %v6935_v7 = vpop.f32.mrf.mxu0  ;;  %v2540_v30 = vadd.f32 %v2539_v2, %v2451_v28  ;;  %v2628_v63 = vpop.f32.mrf.mxu3 }
 0x45d   :  { %v6937_v25 = vpop.f32.mrf.mxu1 }
 0x45e   :  { %v6939_v8 = vadd.f32 %v2628_v63, %v2540_v30 }
 0x460   :  { %9202 = vst [vmem:[#allocation48_spill] sm:$0xff] %v6939_v8 }
 0x463   :  { %v6941_v37 = vpop.f32.mrf.mxu2 }
 0x464   :  { %v6943_v38 = vpop.f32.mrf.mxu0  ;;  %v6945_v57 = vpop.f32.mrf.mxu3 }
 0x465   :  { %9203 = vst [vmem:[#allocation49_spill] sm:$0xff] %v6945_v57  ;;  %v6947_v26 = vpop.f32.mrf.mxu1  ;;  %v2770_v57 = vadd.f32 %v2769_v1, %v6842_v34 }
 0x46b   :  { %v6949_v28 = vpop.f32.mrf.mxu2 }
 0x46c   :  { %v6951_v2 = vpop.f32.mrf.mxu0  ;;  %v6953_v30 = vpop.f32.mrf.mxu3 }
 0x46d   :  { %9204 = vst [vmem:[#allocation50_spill] sm:$0xff] %v6953_v30  ;;  %v6955_v63 = vpop.f32.mrf.mxu1 }
 0x473   :  { %v6957_v18 = vpop.f32.mrf.mxu2 }
 0x474   :  { %9205 = vst [vmem:[#allocation51_spill] sm:$0xff] %v6957_v18  ;;  %v6959_v19 = vpop.f32.mrf.mxu0  ;;  %v6961_v40 = vpop.f32.mrf.mxu3  ;;  %v2771_v18 = vadd.f32 %v2770_v57, %v6845_v55 }
 0x475   :  { %9206 = vst [vmem:[#allocation54_spill] sm:$0xff] %v6959_v19  ;;  %v6963_v23 = vpop.f32.mrf.mxu1  ;;  %v5925_v19 = vld [vmem:[#allocation8 + $0xe0] sm:$0xff] }
 0x476   :  { %9207 = vst [vmem:[#allocation55_spill] sm:$0xff] %v6961_v40  ;;  %v5901_v40 = vld [vmem:[#allocation8 + $0x20] sm:$0xff]  ;;  %4279 = vmatpush.bf16.msra.mxu3 %v5925_v19  ;;  %v6995_v19 = vsub.f32 %v9213_v35, %v9212_v60  ;;  %v2433_v35 = vadd.f32 %v6893_v62, %v6891_v44 }
 0x477   :  { %9208 = vst [vmem:[#allocation56_spill] sm:$0xff] %v6963_v23  ;;  %v2772_v23 = vadd.f32 %v2771_v18, %v6847_v56  ;;  %4012 = vmatpush.bf16.msra.mxu0 %v5901_v40 }
 0x478   :  { %9214 = vst [vmem:[#allocation62_spill] sm:$0xff] %v6995_v19  ;;  %v2522_v44 = vadd.f32 %v6897_v45, %v2433_v35 }
 0x47b   :  { %v6967_v17 = vpop.f32.mrf.mxu2 }
 0x47c   :  { %v6969_v61 = vpop.f32.mrf.mxu0  ;;  %v6971_v8 = vpop.f32.mrf.mxu3 }
 0x47d   :  { %9209 = vst [vmem:[#allocation57_spill] sm:$0xff] %v6969_v61  ;;  %v6973_v30 = vpop.f32.mrf.mxu1  ;;  %v2773_v61 = vadd.f32 %v2772_v23, %v6849_v20  ;;  %v2517_v23 = vadd.f32 %v6883_v32, %v2428_v42 }
 0x47e   :  { %9210 = vst [vmem:[#allocation60_spill] sm:$0xff] %v6971_v8  ;;  %v2512_v8 = vadd.f32 %v6869_v27, %v2423_v9  ;;  %v9215_v9 = vld [vmem:[#allocation27_spill] sm:$0xff] }
 0x47f   :  { %9211 = vst [vmem:[#allocation61_spill] sm:$0xff] %v6973_v30  ;;  %v2774_v18 = vadd.f32 %v2773_v61, %v6855_v12  ;;  %v6999_v27 = vsub.f32 %v9215_v9, %v9212_v60  ;;  %v7008_v61 = vsub.f32 %v6632_v58, %v6815_v59  ;;  %v9220_v9 = vld [vmem:[#allocation85_spill] sm:$0xff]  ;;  %v2946_v58 = vmul.f32 %v6995_v19, %v6995_v19 }
 0x480   :  { %v7003_v46 = vadd.f32 %v6871_v11, %v2512_v8  ;;  %v9223_v11 = vld [vmem:[#allocation40_spill] sm:$0xff]  ;;  %v7031_v42 = vadd.f32 %v6885_v47, %v2517_v23  ;;  %v2438_v23 = vadd.f32 %v6907_v33, %v6905_v36  ;;  %v9227_v36 = vld [vmem:[#allocation41_spill] sm:$0xff] }
 0x481   :  { %9216 = vst [vmem:[#allocation63_spill] sm:$0xff] %v6999_v27  ;;  %v2775_v40 = vadd.f32 %v2774_v18, %v6857_v0  ;;  %v9221_v18 = vld [vmem:[#allocation35_spill] sm:$0xff]  ;;  %v7023_v32 = vsub.f32 %v9223_v11, %v9220_v9  ;;  %v2950_v6 = vmul.f32 %v6999_v27, %v6999_v27  ;;  %v2951_v11 = vmul.f32 %v7012_v16, %v7012_v16 }
 0x482   :  { %9217 = vst [vmem:[#allocation66_spill] sm:$0xff] %v7003_v46  ;;  %v7019_v0 = vsub.f32 %v9221_v18, %v9220_v9  ;;  %v2947_v18 = vmul.f32 %v7008_v61, %v7008_v61  ;;  %v7059_v16 = vsub.f32 %v6667_v4, %v6815_v59  ;;  %v7068_v33 = vsub.f32 %v9227_v36, %v9220_v9 }
 0x483   :  { %v6982_v30 = vpop.f32.mrf.mxu2  ;;  %9218 = vst [vmem:[#allocation67_spill] sm:$0xff] %v7008_v61  ;;  %v2776_v24 = vadd.f32 %v2775_v40, %v6867_v41  ;;  %v2949_v61 = vmul.f32 %v7023_v32, %v7023_v32 }
 0x484   :  { %v6984_v1 = vpop.f32.mrf.mxu0  ;;  %v6986_v57 = vpop.f32.mrf.mxu3  ;;  %9222 = vst [vmem:[#allocation69_spill] sm:$0xff] %v7019_v0  ;;  %v2945_v35 = vmul.f32 %v7019_v0, %v7019_v0  ;;  %v3147_v0 = vadd.f32 %v2951_v11, %v2947_v18 }
 0x485   :  { %v6988_v55 = vpop.f32.mrf.mxu1  ;;  %9224 = vst [vmem:[#allocation29_spill] sm:$0xff] %v7023_v32  ;;  %v2777_v8 = vadd.f32 %v2776_v24, %v7003_v46  ;;  %v9225_v24 = vld [vmem:[#allocation92_spill] sm:$0xff]  ;;  %v3110_v46 = vadd.f32 %v2950_v6, %v2946_v58 }
 0x486   :  { %v7048_v47 = vsub.f32 %v9225_v24, %v9212_v60  ;;  %9226 = vst [vmem:[#allocation26_spill] sm:$0xff] %v7059_v16  ;;  %v7063_v24 = vadd.f32 %v6899_v13, %v2522_v44  ;;  %v2443_v13 = vadd.f32 %v6917_v48, %v6915_v53  ;;  %v3073_v6 = vadd.f32 %v2949_v61, %v2945_v35  ;;  %v9231_v53 = vld [vmem:[#allocation46_spill] sm:$0xff] }
 0x487   :  { %v2778_v45 = vadd.f32 %v2777_v8, %v6881_v3  ;;  %v2527_v8 = vadd.f32 %v6911_v22, %v2438_v23  ;;  %v9228_v3 = vld [vmem:[#allocation93_spill] sm:$0xff]  ;;  %v7081_v22 = vsub.f32 %v6670_v51, %v6815_v59  ;;  %v2955_v44 = vmul.f32 %v7059_v16, %v7059_v16 }
 0x488   :  { %v7072_v32 = vsub.f32 %v9228_v3, %v9212_v60  ;;  %v2954_v4 = vmul.f32 %v7048_v47, %v7048_v47  ;;  %v7096_v48 = vsub.f32 %v9231_v53, %v9220_v9  ;;  %v2953_v51 = vmul.f32 %v7068_v33, %v7068_v33 }
 0x489   :  { %v2779_v41 = vadd.f32 %v2778_v45, %v7031_v42  ;;  %9230 = vst [vmem:[#allocation85_spill] sm:$0xff] %v7081_v22  ;;  %v7087_v11 = vadd.f32 %v6913_v21, %v2527_v8  ;;  %v2532_v45 = vadd.f32 %v6921_v10, %v2443_v13  ;;  %v3148_v61 = vadd.f32 %v3147_v0, %v2955_v44  ;;  %v9232_v21 = vld [vmem:[#allocation94_spill] sm:$0xff] }
 0x48a   :  { %9229 = vst [vmem:[#allocation27_spill] sm:$0xff] %v7072_v32  ;;  %v3111_v18 = vadd.f32 %v3110_v46, %v2954_v4  ;;  %v7106_v8 = vsub.f32 %v9232_v21, %v9212_v60  ;;  %v2958_v10 = vmul.f32 %v7072_v32, %v7072_v32  ;;  %v2448_v4 = vadd.f32 %v6927_v31, %v6925_v52 }
 0x48b   :  { %v7034_v62 = vpop.f32.mrf.mxu2  ;;  %v2780_v58 = vadd.f32 %v2779_v41, %v6895_v49  ;;  %v7115_v0 = vsub.f32 %v6672_v29, %v6815_v59  ;;  %v2959_v13 = vmul.f32 %v7081_v22, %v7081_v22  ;;  %v7121_v21 = vadd.f32 %v6923_v54, %v2532_v45  ;;  %v9237_v29 = vld [vmem:[#allocation95_spill] sm:$0xff] }
 0x48c   :  { %v7036_v40 = vpop.f32.mrf.mxu0  ;;  %v7042_v19 = vpop.f32.mrf.mxu3  ;;  %9233 = vst [vmem:[#allocation35_spill] sm:$0xff] %v7106_v8  ;;  %v3112_v44 = vadd.f32 %v3111_v18, %v2958_v10  ;;  %v2537_v16 = vadd.f32 %v6931_v39, %v2448_v4  ;;  %v2957_v52 = vmul.f32 %v7096_v48, %v7096_v48  ;;  %v7132_v31 = vsub.f32 %v9237_v29, %v9212_v60 }
 0x48d   :  { %v7044_v27 = vpop.f32.mrf.mxu1  ;;  %v2781_v3 = vadd.f32 %v2780_v58, %v7063_v24  ;;  %v3074_v58 = vadd.f32 %v3073_v6, %v2953_v51  ;;  %9234 = vst [vmem:[#allocation40_spill] sm:$0xff] %v7115_v0  ;;  %v3149_v6 = vadd.f32 %v3148_v61, %v2959_v13  ;;  %v2962_v18 = vmul.f32 %v7106_v8, %v7106_v8  ;;  %v9239_v51 = vld [vmem:[#allocation52_spill] sm:$0xff] }
 0x48e   :  { %9238 = vst [vmem:[#allocation41_spill] sm:$0xff] %v7132_v31  ;;  %v2453_v39 = vadd.f32 %v6937_v25, %v6935_v7  ;;  %v2456_v45 = vadd.f32 %v6947_v26, %v6943_v38  ;;  %v7143_v10 = vsub.f32 %v9239_v51, %v9220_v9  ;;  %v7147_v4 = vsub.f32 %v6674_v15, %v6815_v59  ;;  %v9242_v15 = vld [vmem:[#allocation96_spill] sm:$0xff] }
 0x48f   :  { %v2782_v36 = vadd.f32 %v2781_v3, %v6909_v14  ;;  %v9235_v3 = vld [vmem:[#allocation47_spill] sm:$0xff]  ;;  %v2963_v61 = vmul.f32 %v7115_v0, %v7115_v0  ;;  %v3113_v13 = vadd.f32 %v3112_v44, %v2962_v18  ;;  %v7153_v7 = vadd.f32 %v6933_v5, %v2537_v16 }
 0x490   :  { %v7126_v32 = vsub.f32 %v9235_v3, %v9220_v9  ;;  %9240 = vst [vmem:[#allocation93_spill] sm:$0xff] %v7143_v10  ;;  %v2542_v38 = vadd.f32 %v6941_v37, %v2453_v39  ;;  %v7164_v3 = vsub.f32 %v9242_v15, %v9212_v60  ;;  %v2966_v44 = vmul.f32 %v7132_v31, %v7132_v31  ;;  %v9245_v39 = vld [vmem:[#allocation56_spill] sm:$0xff]  ;;  %v9246_v15 = vld [vmem:[#allocation119_spill] sm:$0xff] }
 0x491   :  { %v2783_v53 = vadd.f32 %v2782_v36, %v7087_v11  ;;  %v3075_v36 = vadd.f32 %v3074_v58, %v2957_v52  ;;  %9241 = vst [vmem:[#allocation46_spill] sm:$0xff] %v7147_v4  ;;  %v3150_v52 = vadd.f32 %v3149_v6, %v2963_v61  ;;  %v2545_v16 = vadd.f32 %v6949_v28, %v2456_v45  ;;  %v9249_v28 = vld [vmem:[#allocation51_spill] sm:$0xff] }
 0x492   :  { %9236 = vst [vmem:[#allocation92_spill] sm:$0xff] %v7126_v32  ;;  %v2961_v58 = vmul.f32 %v7126_v32, %v7126_v32  ;;  %v2458_v18 = vadd.f32 %v6955_v63, %v6951_v2  ;;  %v7178_v8 = vsub.f32 %v9246_v15, %v6815_v59  ;;  %v2967_v6 = vmul.f32 %v7147_v4, %v7147_v4  ;;  %v9250_v2 = vld [vmem:[#allocation53_spill] sm:$0xff] }
 0x493   :  { %v7090_v41 = vpop.f32.mrf.mxu2  ;;  %v2784_v54 = vadd.f32 %v2783_v53, %v6919_v50  ;;  %9243 = vst [vmem:[#allocation94_spill] sm:$0xff] %v7164_v3  ;;  %v3114_v61 = vadd.f32 %v3113_v13, %v2966_v44  ;;  %v7189_v63 = vsub.f32 %v9250_v2, %v9220_v9  ;;  %v2970_v13 = vmul.f32 %v7164_v3, %v7164_v3  ;;  %v9253_v44 = vld [vmem:[#allocation48_spill] sm:$0xff]  ;;  %v9258_v4 = vld [vmem:[#allocation61_spill] sm:$0xff] }
 0x494   :  { %v7092_v23 = vpop.f32.mrf.mxu0  ;;  %v7100_v46 = vpop.f32.mrf.mxu3  ;;  %v3076_v0 = vadd.f32 %v3075_v36, %v2961_v58  ;;  %9247 = vst [vmem:[#allocation47_spill] sm:$0xff] %v7178_v8  ;;  %v2547_v45 = vadd.f32 %v9249_v28, %v2458_v18  ;;  %v2965_v36 = vmul.f32 %v7143_v10, %v7143_v10  ;;  %v9251_v58 = vld [vmem:[#allocation97_spill] sm:$0xff]  ;;  %v2971_v2 = vmul.f32 %v7178_v8, %v7178_v8 }
 0x495   :  { %v7102_v35 = vpop.f32.mrf.mxu1  ;;  %v2785_v53 = vadd.f32 %v2784_v54, %v7121_v21  ;;  %v9244_v54 = vld [vmem:[#allocation54_spill] sm:$0xff] }
 0x496   :  { %v2461_v51 = vadd.f32 %v9245_v39, %v9244_v54  ;;  %v7195_v54 = vsub.f32 %v9251_v58, %v9212_v60  ;;  %v3151_v39 = vadd.f32 %v3150_v52, %v2967_v6  ;;  %v9257_v58 = vld [vmem:[#allocation57_spill] sm:$0xff]  ;;  %v2466_v6 = vadd.f32 %v6988_v55, %v6984_v1 }
 0x497   :  { %v2786_v37 = vadd.f32 %v2785_v53, %v6929_v43  ;;  %v9248_v53 = vld [vmem:[#allocation49_spill] sm:$0xff]  ;;  %v2463_v52 = vadd.f32 %v9258_v4, %v9257_v58  ;;  %v3077_v3 = vadd.f32 %v3076_v0, %v2965_v36 }
 0x498   :  { %v7184_v32 = vadd.f32 %v9248_v53, %v2542_v38  ;;  %9252 = vst [vmem:[#allocation95_spill] sm:$0xff] %v7195_v54  ;;  %v2550_v18 = vadd.f32 %v6967_v17, %v2461_v51  ;;  %v9255_v53 = vld [vmem:[#allocation120_spill] sm:$0xff]  ;;  %v2969_v51 = vmul.f32 %v7189_v63, %v7189_v63  ;;  %v3152_v22 = vadd.f32 %v3151_v39, %v2971_v2  ;;  %v9262_v1 = vld [vmem:[#allocation121_spill] sm:$0xff] }
 0x499   :  { %v2787_v31 = vadd.f32 %v2786_v37, %v7153_v7  ;;  %v9254_v37 = vld [vmem:[#allocation50_spill] sm:$0xff]  ;;  %v7206_v28 = vsub.f32 %v9255_v53, %v6815_v59  ;;  %v2552_v4 = vadd.f32 %v6982_v30, %v2463_v52  ;;  %v2974_v55 = vmul.f32 %v7195_v54, %v7195_v54 }
 0x49a   :  { %v7201_v15 = vadd.f32 %v9254_v37, %v2545_v16  ;;  %v9259_v37 = vld [vmem:[#allocation55_spill] sm:$0xff]  ;;  %v9260_v53 = vld [vmem:[#allocation98_spill] sm:$0xff]  ;;  %v7229_v0 = vsub.f32 %v9262_v1, %v6815_v59  ;;  %v2555_v30 = vadd.f32 %v7034_v62, %v2466_v6  ;;  %v2468_v2 = vadd.f32 %v7044_v27, %v7036_v40 }
 0x49b   :  { %v7156_v25 = vpop.f32.mrf.mxu2  ;;  %v2788_v38 = vadd.f32 %v2787_v31, %v9253_v44  ;;  %9256 = vst [vmem:[#allocation52_spill] sm:$0xff] %v7206_v28  ;;  %v3115_v31 = vadd.f32 %v3114_v61, %v2970_v13  ;;  %v7216_v10 = vadd.f32 %v9259_v37, %v2547_v45  ;;  %v7222_v8 = vsub.f32 %v9260_v53, %v9212_v60  ;;  %v9264_v45 = vld [vmem:[#allocation60_spill] sm:$0xff]  ;;  %v9265_v37 = vld [vmem:[#allocation58_spill] sm:$0xff] }
 0x49c   :  { %v7158_v26 = vpop.f32.mrf.mxu0  ;;  %v7168_v29 = vpop.f32.mrf.mxu3  ;;  %9263 = vst [vmem:[#allocation54_spill] sm:$0xff] %v7229_v0  ;;  %v7233_v36 = vadd.f32 %v9264_v45, %v2550_v18  ;;  %v2975_v39 = vmul.f32 %v7206_v28, %v7206_v28  ;;  %v2471_v52 = vadd.f32 %v7102_v35, %v7092_v23  ;;  %v7244_v53 = vsub.f32 %v9265_v37, %v9220_v9  ;;  %v9266_v45 = vld [vmem:[#allocation99_spill] sm:$0xff]  ;;  %v9268_v23 = vld [vmem:[#allocation122_spill] sm:$0xff] }
 0x49d   :  { %v2472_v5 = vpop.f32.mrf.mxu1  ;;  %v2789_v16 = vadd.f32 %v2788_v38, %v7184_v32  ;;  %9261 = vst [vmem:[#allocation96_spill] sm:$0xff] %v7222_v8  ;;  %v3116_v18 = vadd.f32 %v3115_v31, %v2974_v55  ;;  %v7249_v54 = vsub.f32 %v9266_v45, %v9212_v60  ;;  %v7252_v62 = vadd.f32 %v6986_v57, %v2552_v4 }
 0x49e   :  { %v3153_v28 = vadd.f32 %v3152_v22, %v2975_v39  ;;  %v2557_v27 = vadd.f32 %v7090_v41, %v2468_v2  ;;  %v2978_v40 = vmul.f32 %v7222_v8, %v7222_v8  ;;  %v7259_v35 = vsub.f32 %v9268_v23, %v6815_v59 }
 0x49f   :  { %v2790_v61 = vadd.f32 %v2789_v16, %v7201_v15  ;;  %v3078_v16 = vadd.f32 %v3077_v3, %v2969_v51  ;;  %9267 = vst [vmem:[#allocation56_spill] sm:$0xff] %v7249_v54  ;;  %v2979_v3 = vmul.f32 %v7229_v0, %v7229_v0  ;;  %v7265_v31 = vadd.f32 %v7042_v19, %v2555_v30  ;;  %v9270_v51 = vld [vmem:[#allocation59_spill] sm:$0xff] }
 0x4a0   :  { %9269 = vst [vmem:[#allocation119_spill] sm:$0xff] %v7259_v35  ;;  %v2560_v57 = vadd.f32 %v7156_v25, %v2471_v52  ;;  %v2473_v22 = vadd.f32 %v2472_v5, %v7158_v26  ;;  %v7271_v4 = vsub.f32 %v9270_v51, %v9220_v9  ;;  %v2973_v55 = vmul.f32 %v7244_v53, %v7244_v53  ;;  %v9271_v26 = vld [vmem:[#allocation100_spill] sm:$0xff] }
 0x4a1   :  { %v2791_v1 = vadd.f32 %v2790_v61, %v7216_v10  ;;  %v3117_v61 = vadd.f32 %v3116_v18, %v2978_v40  ;;  %v3154_v2 = vadd.f32 %v3153_v28, %v2979_v3  ;;  %v7277_v19 = vadd.f32 %v7100_v46, %v2557_v27 }
 0x4a2   :  { %v3079_v52 = vadd.f32 %v3078_v16, %v2973_v55  ;;  %v7281_v5 = vsub.f32 %v9271_v26, %v9212_v60  ;;  %v2983_v28 = vmul.f32 %v7259_v35, %v7259_v35  ;;  %v2977_v27 = vmul.f32 %v7271_v4, %v7271_v4 }
 0x4a3   :  { %v2561_v17 = vpop.f32.mrf.mxu2  ;;  %v2792_v6 = vadd.f32 %v2791_v1, %v7233_v36  ;;  %v9275_v1 = vld [vmem:[#allocation64_spill] sm:$0xff] }
 0x4a4   :  { %v2650_v58 = vpop.f32.mrf.mxu3  ;;  %v2386_v13 = vpop.f32.mrf.mxu0  ;;  %v2562_v30 = vadd.f32 %v2561_v17, %v2473_v22  ;;  %9272 = vst [vmem:[#allocation49_spill] sm:$0xff] %v7281_v5  ;;  %v7293_v17 = vadd.f32 %v7168_v29, %v2560_v57  ;;  %v7297_v45 = vsub.f32 %v9275_v1, %v9220_v9  ;;  %v3080_v55 = vadd.f32 %v3079_v52, %v2977_v27  ;;  %v9277_v29 = vld [vmem:[#allocation101_spill] sm:$0xff] }
 0x4a5   :  { %v2475_v38 = vpop.f32.mrf.mxu1  ;;  %v2793_v37 = vadd.f32 %v2792_v6, %v7252_v62  ;;  %v3155_v6 = vadd.f32 %v3154_v2, %v2983_v28  ;;  %v7306_v57 = vsub.f32 %v9277_v29, %v9212_v60 }
 0x4a6   :  { %v2476_v41 = vadd.f32 %v2475_v38, %v2386_v13  ;;  %v2982_v13 = vmul.f32 %v7249_v54, %v7249_v54  ;;  %v9273_v38 = vld [vmem:[#allocation123_spill] sm:$0xff]  ;;  %9276 = vst [vmem:[#allocation53_spill] sm:$0xff] %v7297_v45  ;;  %v7302_v51 = vadd.f32 %v2650_v58, %v2562_v30  ;;  %v9281_v30 = vld [vmem:[#allocation65_spill] sm:$0xff] }
 0x4a7   :  { %v7287_v18 = vsub.f32 %v9273_v38, %v6815_v59  ;;  %v2794_v46 = vadd.f32 %v2793_v37, %v7265_v31  ;;  %9278 = vst [vmem:[#allocation97_spill] sm:$0xff] %v7306_v57  ;;  %v7321_v52 = vsub.f32 %v9281_v30, %v9220_v9 }
 0x4a8   :  { %v3118_v40 = vadd.f32 %v3117_v61, %v2982_v13  ;;  %v2981_v13 = vmul.f32 %v7297_v45, %v7297_v45 }
 0x4a9   :  { %9274 = vst [vmem:[#allocation51_spill] sm:$0xff] %v7287_v18  ;;  %v2795_v22 = vadd.f32 %v2794_v46, %v7277_v19  ;;  %v2987_v61 = vmul.f32 %v7287_v18, %v7287_v18 }
 0x4aa   :  { %9282 = vst [vmem:[#allocation50_spill] sm:$0xff] %v7321_v52  ;;  %v3081_v29 = vadd.f32 %v3080_v55, %v2981_v13  ;;  %v9287_v55 = vld [vmem:[#allocation70_spill] sm:$0xff] }
 0x4ab   :  { %v2564_v39 = vpop.f32.mrf.mxu2  ;;  %v2796_v2 = vadd.f32 %v2795_v22, %v7293_v17  ;;  %v3156_v46 = vadd.f32 %v3155_v6, %v2987_v61  ;;  %v7343_v61 = vsub.f32 %v9287_v55, %v9220_v9 }
 0x4ac   :  { %v2653_v25 = vpop.f32.mrf.mxu3  ;;  %v2565_v16 = vadd.f32 %v2564_v39, %v2476_v41  ;;  %v2388_v23 = vpop.f32.mrf.mxu0  ;;  %v2986_v41 = vmul.f32 %v7281_v5, %v7281_v5  ;;  %v9279_v39 = vld [vmem:[#allocation124_spill] sm:$0xff] }
 0x4ad   :  { %v2477_v3 = vpop.f32.mrf.mxu1  ;;  %v7312_v37 = vsub.f32 %v9279_v39, %v6815_v59  ;;  %v2797_v1 = vadd.f32 %v2796_v2, %v7302_v51  ;;  %v9283_v39 = vld [vmem:[#allocation102_spill] sm:$0xff]  ;;  %9288 = vst [vmem:[#allocation61_spill] sm:$0xff] %v7343_v61  ;;  %v2985_v2 = vmul.f32 %v7321_v52, %v7321_v52 }
 0x4ae   :  { %v7317_v26 = vadd.f32 %v2653_v25, %v2565_v16  ;;  %v2478_v58 = vadd.f32 %v2477_v3, %v2388_v23  ;;  %v3119_v38 = vadd.f32 %v3118_v40, %v2986_v41  ;;  %v7328_v22 = vsub.f32 %v9283_v39, %v9212_v60  ;;  %v9285_v23 = vld [vmem:[#allocation125_spill] sm:$0xff]  ;;  %v9289_v39 = vld [vmem:[#allocation103_spill] sm:$0xff] }
 0x4af   :  { %9280 = vst [vmem:[#allocation48_spill] sm:$0xff] %v7312_v37  ;;  %v2990_v25 = vmul.f32 %v7306_v57, %v7306_v57  ;;  %v7334_v3 = vsub.f32 %v9285_v23, %v6815_v59  ;;  %v2991_v40 = vmul.f32 %v7312_v37, %v7312_v37  ;;  %v7350_v23 = vsub.f32 %v9289_v39, %v9212_v60  ;;  %v9295_v39 = vld [vmem:[#allocation104_spill] sm:$0xff] }
 0x4b0   :  { %9284 = vst [vmem:[#allocation120_spill] sm:$0xff] %v7328_v22  ;;  %v2798_v6 = vadd.f32 %v2797_v1, %v7317_v26  ;;  %v2994_v1 = vmul.f32 %v7328_v22, %v7328_v22  ;;  %v7368_v22 = vsub.f32 %v9295_v39, %v9212_v60 }
 0x4b1   :  { %9286 = vst [vmem:[#allocation57_spill] sm:$0xff] %v7334_v3  ;;  %v3157_v30 = vadd.f32 %v3156_v46, %v2991_v40  ;;  %v2995_v55 = vmul.f32 %v7334_v3, %v7334_v3  ;;  %v9297_v3 = vld [vmem:[#allocation127_spill] sm:$0xff] }
 0x4b2   :  { %9290 = vst [vmem:[#allocation55_spill] sm:$0xff] %v7350_v23  ;;  %v7374_v18 = vsub.f32 %v9297_v3, %v6815_v59  ;;  %v3002_v3 = vmul.f32 %v7368_v22, %v7368_v22 }
 0x4b3   :  { %v2566_v28 = vpop.f32.mrf.mxu2  ;;  %v3158_v40 = vadd.f32 %v3157_v30, %v2995_v55  ;;  %9296 = vst [vmem:[#allocation60_spill] sm:$0xff] %v7368_v22  ;;  %v9311_v22 = vld [vmem:[#allocation74_spill] sm:$0xff] }
 0x4b4   :  { %v2567_v27 = vadd.f32 %v2566_v28, %v2478_v58  ;;  %v2655_v16 = vpop.f32.mrf.mxu3  ;;  %v3120_v58 = vadd.f32 %v3119_v38, %v2990_v25  ;;  %v3082_v28 = vadd.f32 %v3081_v29, %v2985_v2  ;;  %v9293_v38 = vld [vmem:[#allocation71_spill] sm:$0xff]  ;;  %v2989_v29 = vmul.f32 %v7343_v61, %v7343_v61  ;;  %9298 = vst [vmem:[#allocation58_spill] sm:$0xff] %v7374_v18 }
 0x4b5   :  { %v7362_v46 = vsub.f32 %v9293_v38, %v9220_v9 }
 0x4b6   :  { %v7339_v41 = vadd.f32 %v2655_v16, %v2567_v27  ;;  %v9291_v27 = vld [vmem:[#allocation126_spill] sm:$0xff]  ;;  %v3121_v25 = vadd.f32 %v3120_v58, %v2994_v1  ;;  %v3083_v2 = vadd.f32 %v3082_v28, %v2989_v29  ;;  %v9299_v58 = vld [vmem:[#allocation72_spill] sm:$0xff]  ;;  %v9301_v29 = vld [vmem:[#allocation105_spill] sm:$0xff] }
 0x4b7   :  { %v7356_v16 = vsub.f32 %v9291_v27, %v6815_v59  ;;  %9294 = vst [vmem:[#allocation121_spill] sm:$0xff] %v7362_v46  ;;  %v2998_v27 = vmul.f32 %v7350_v23, %v7350_v23  ;;  %v7380_v30 = vsub.f32 %v9299_v58, %v9220_v9  ;;  %v7386_v39 = vsub.f32 %v9301_v29, %v9212_v60  ;;  %v9309_v29 = vld [vmem:[#allocation15_spill] sm:$0xff] }
 0x4b8   :  { %v2799_v13 = vadd.f32 %v2798_v6, %v7339_v41  ;;  %v3003_v58 = vmul.f32 %v7374_v18, %v7374_v18  ;;  %v7410_v18 = vsub.f32 %v9309_v29, %v6815_v59 }
 0x4b9   :  { %9292 = vst [vmem:[#allocation98_spill] sm:$0xff] %v7356_v16  ;;  %v2999_v38 = vmul.f32 %v7356_v16, %v7356_v16  ;;  %v9303_v16 = vld [vmem:[#allocation128_spill] sm:$0xff] }
 0x4ba   :  { %v2800_v37 = vrot.slane %v2799_v13, 4  ;;  %9300 = vst [vmem:[#allocation99_spill] sm:$0xff] %v7380_v30  ;;  %v7392_v23 = vsub.f32 %v9303_v16, %v6815_v59  ;;  %v3006_v16 = vmul.f32 %v7386_v39, %v7386_v39 }
 0x4bb   :  { %v3159_v28 = vadd.f32 %v3158_v40, %v2999_v38  ;;  %9302 = vst [vmem:[#allocation122_spill] sm:$0xff] %v7386_v39  ;;  %v9307_v38 = vld [vmem:[#allocation106_spill] sm:$0xff] }
 0x4bc   :  { %v2801_v6 = vadd.f32 %v2800_v37, %v2799_v13  ;;  %v2993_v37 = vmul.f32 %v7362_v46, %v7362_v46  ;;  %v3122_v13 = vadd.f32 %v3121_v25, %v2998_v27  ;;  %9304 = vst [vmem:[#allocation59_spill] sm:$0xff] %v7392_v23  ;;  %v9305_v46 = vld [vmem:[#allocation73_spill] sm:$0xff] }
 0x4bd   :  { %v7398_v25 = vsub.f32 %v9305_v46, %v9220_v9  ;;  %9310 = vst [vmem:[#allocation64_spill] sm:$0xff] %v7410_v18  ;;  %v3007_v46 = vmul.f32 %v7392_v23, %v7392_v23  ;;  %v9315_v23 = vld [vmem:[#allocation16_spill] sm:$0xff] }
 0x4be   :  { %v2802_v57 = vrot.slane %v2801_v6, 2  ;;  %v3084_v55 = vadd.f32 %v3083_v2, %v2993_v37  ;;  %v3123_v40 = vadd.f32 %v3122_v13, %v3002_v3  ;;  %v7404_v37 = vsub.f32 %v9307_v38, %v9212_v60  ;;  %v9313_v38 = vld [vmem:[#allocation107_spill] sm:$0xff] }
 0x4bf   :  { %9306 = vst [vmem:[#allocation100_spill] sm:$0xff] %v7398_v25  ;;  %v7416_v13 = vsub.f32 %v9311_v22, %v9220_v9  ;;  %v7422_v39 = vsub.f32 %v9313_v38, %v9212_v60  ;;  %v3011_v22 = vmul.f32 %v7410_v18, %v7410_v18  ;;  %v9322_v18 = vld [vmem:[#allocation17_spill] sm:$0xff] }
 0x4c0   :  { %v2803_v1 = vadd.f32 %v2802_v57, %v2801_v6  ;;  %v2997_v57 = vmul.f32 %v7380_v30, %v7380_v30  ;;  %v3160_v6 = vadd.f32 %v3159_v28, %v3003_v58  ;;  %9308 = vst [vmem:[#allocation123_spill] sm:$0xff] %v7404_v37  ;;  %v3001_v28 = vmul.f32 %v7398_v25, %v7398_v25  ;;  %v9317_v25 = vld [vmem:[#allocation75_spill] sm:$0xff] }
 0x4c1   :  { %9312 = vst [vmem:[#allocation101_spill] sm:$0xff] %v7416_v13  ;;  %v3010_v29 = vmul.f32 %v7404_v37, %v7404_v37  ;;  %v7428_v30 = vsub.f32 %v9315_v23, %v6815_v59  ;;  %v3014_v38 = vmul.f32 %v7422_v39, %v7422_v39 }
 0x4c2   :  { %v2804_v2 = vrot.slane %v2803_v1, 1  ;;  %v3085_v27 = vadd.f32 %v3084_v55, %v2997_v57  ;;  %v3124_v55 = vadd.f32 %v3123_v40, %v3006_v16  ;;  %v3161_v3 = vadd.f32 %v3160_v6, %v3007_v46  ;;  %9314 = vst [vmem:[#allocation124_spill] sm:$0xff] %v7422_v39 }
 0x4c3   :  { %9316 = vst [vmem:[#allocation65_spill] sm:$0xff] %v7428_v30  ;;  %v7434_v40 = vsub.f32 %v9317_v25, %v9220_v9  ;;  %v7449_v25 = vsub.f32 %v9322_v18, %v6815_v59  ;;  %v3015_v37 = vmul.f32 %v7428_v30, %v7428_v30  ;;  %v9328_v30 = vld [vmem:[#allocation109_spill] sm:$0xff] }
 0x4c4   :  { %v2805_v58 = vadd.f32 %v2804_v2, %v2803_v1  ;;  %v3086_v57 = vadd.f32 %v3085_v27, %v3001_v28  ;;  %v3005_v1 = vmul.f32 %v7416_v13, %v7416_v13  ;;  %v3125_v6 = vadd.f32 %v3124_v55, %v3010_v29  ;;  %v9319_v27 = vld [vmem:[#allocation28_spill] sm:$0xff] }
 0x4c5   :  { %9318 = vst [vmem:[#allocation102_spill] sm:$0xff] %v7434_v40  ;;  %v3162_v2 = vadd.f32 %v3161_v3, %v3011_v22  ;;  %v9320_v28 = vld [vmem:[#allocation108_spill] sm:$0xff]  ;;  %v9326_v22 = vld [vmem:[#allocation25_spill] sm:$0xff]  ;;  %v7469_v13 = vsub.f32 %v9328_v30, %v9212_v60 }
 0x4c6   :  { %v7439_v16 = vmul.f32 %v9319_v27, %v2805_v58  ;;  %v3087_v46 = vadd.f32 %v3086_v57, %v3005_v1  ;;  %v7443_v23 = vsub.f32 %v9320_v28, %v9212_v60  ;;  %9323 = vst [vmem:[#allocation70_spill] sm:$0xff] %v7449_v25  ;;  %v9324_v55 = vld [vmem:[#allocation76_spill] sm:$0xff]  ;;  %v3009_v58 = vmul.f32 %v7434_v40, %v7434_v40  ;;  %v9327_v28 = vld [vmem:[#allocation33_spill] sm:$0xff]  ;;  %v9330_v40 = vld [vmem:[#allocation18_spill] sm:$0xff] }
 0x4c7   :  { %v7455_v3 = vsub.f32 %v9324_v55, %v9220_v9  ;;  %v3126_v57 = vadd.f32 %v3125_v6, %v3014_v38  ;;  %v3163_v29 = vadd.f32 %v3162_v2, %v3015_v37  ;;  %9329 = vst [vmem:[#allocation126_spill] sm:$0xff] %v7469_v13  ;;  %v7475_v6 = vsub.f32 %v9330_v40, %v6815_v59  ;;  %v9332_v2 = vld [vmem:[#allocation77_spill] sm:$0xff] }
 0x4c8   :  { %9321 = vst [vmem:[#allocation125_spill] sm:$0xff] %v7443_v23  ;;  %v7461_v1 = vsub.f32 %v9326_v22, %v7439_v16  ;;  %v7465_v18 = vsub.f32 %v9327_v28, %v7439_v16  ;;  %v3088_v39 = vadd.f32 %v3087_v46, %v3009_v58  ;;  %v3018_v55 = vmul.f32 %v7443_v23, %v7443_v23  ;;  %v9334_v23 = vld [vmem:[#allocation110_spill] sm:$0xff] }
 0x4c9   :  { %9325 = vst [vmem:[#allocation103_spill] sm:$0xff] %v7455_v3  ;;  %v3019_v37 = vmul.f32 %v7449_v25, %v7449_v25  ;;  %v7481_v38 = vsub.f32 %v9332_v2, %v9220_v9  ;;  %v3013_v46 = vmul.f32 %v7455_v3, %v7455_v3  ;;  %v7487_v22 = vsub.f32 %v6842_v34, %v7439_v16 }
 0x4ca   :  { %9331 = vst [vmem:[#allocation71_spill] sm:$0xff] %v7475_v6  ;;  %v3127_v58 = vadd.f32 %v3126_v57, %v3018_v55  ;;  %v2948_v40 = vmul.f32 %v7461_v1, %v7461_v1  ;;  %v2952_v28 = vmul.f32 %v7465_v18, %v7465_v18  ;;  %v7495_v2 = vsub.f32 %v9334_v23, %v9212_v60  ;;  %v9336_v57 = vld [vmem:[#allocation19_spill] sm:$0xff]  ;;  %v9338_v55 = vld [vmem:[#allocation42_spill] sm:$0xff] }
 0x4cb   :  { %9333 = vst [vmem:[#allocation104_spill] sm:$0xff] %v7481_v38  ;;  %v3164_v30 = vadd.f32 %v3163_v29, %v3019_v37  ;;  %v3089_v25 = vadd.f32 %v3088_v39, %v3013_v46  ;;  %v3022_v3 = vmul.f32 %v7469_v13, %v7469_v13  ;;  %v7501_v29 = vsub.f32 %v9336_v57, %v6815_v59  ;;  %v9339_v39 = vld [vmem:[#allocation78_spill] sm:$0xff] }
 0x4cc   :  { %9335 = vst [vmem:[#allocation127_spill] sm:$0xff] %v7495_v2  ;;  %v3023_v34 = vmul.f32 %v7475_v6, %v7475_v6  ;;  %v7507_v37 = vsub.f32 %v9338_v55, %v7439_v16  ;;  %v7511_v46 = vsub.f32 %v9339_v39, %v9220_v9  ;;  %v3017_v23 = vmul.f32 %v7481_v38, %v7481_v38  ;;  %v9341_v55 = vld [vmem:[#allocation111_spill] sm:$0xff]  ;;  %v9343_v38 = vld [vmem:[#allocation20_spill] sm:$0xff] }
 0x4cd   :  { %9337 = vst [vmem:[#allocation72_spill] sm:$0xff] %v7501_v29  ;;  %v3128_v61 = vadd.f32 %v3127_v58, %v3022_v3  ;;  %v7517_v57 = vsub.f32 %v6847_v56, %v7439_v16  ;;  %v2956_v6 = vmul.f32 %v7487_v22, %v7487_v22  ;;  %v3184_v5 = vadd.f32 %v2952_v28, %v2948_v40  ;;  %v9345_v40 = vld [vmem:[#allocation79_spill] sm:$0xff] }
 0x4ce   :  { %9340 = vst [vmem:[#allocation105_spill] sm:$0xff] %v7511_v46  ;;  %v3165_v13 = vadd.f32 %v3164_v30, %v3023_v34  ;;  %v3090_v52 = vadd.f32 %v3089_v25, %v3017_v23  ;;  %v7523_v35 = vsub.f32 %v9341_v55, %v9212_v60  ;;  %v3026_v39 = vmul.f32 %v7495_v2, %v7495_v2 }
 0x4cf   :  { %v7529_v3 = vsub.f32 %v9343_v38, %v6815_v59  ;;  %v3027_v56 = vmul.f32 %v7501_v29, %v7501_v29  ;;  %v7535_v58 = vsub.f32 %v6849_v20, %v7439_v16  ;;  %v2960_v25 = vmul.f32 %v7507_v37, %v7507_v37 }
 0x4d0   :  { %9342 = vst [vmem:[#allocation128_spill] sm:$0xff] %v7523_v35  ;;  %v3185_v30 = vadd.f32 %v3184_v5, %v2956_v6  ;;  %v7541_v28 = vsub.f32 %v9345_v40, %v9220_v9  ;;  %v3021_v34 = vmul.f32 %v7511_v46, %v7511_v46  ;;  %v3129_v38 = vadd.f32 %v3128_v61, %v3026_v39  ;;  %v9347_v5 = vld [vmem:[#allocation112_spill] sm:$0xff]  ;;  %v9349_v46 = vld [vmem:[#allocation21_spill] sm:$0xff] }
 0x4d1   :  { %9344 = vst [vmem:[#allocation73_spill] sm:$0xff] %v7529_v3  ;;  %v3166_v23 = vadd.f32 %v3165_v13, %v3027_v56  ;;  %v7547_v55 = vsub.f32 %v6855_v12, %v7439_v16  ;;  %v2964_v20 = vmul.f32 %v7517_v57, %v7517_v57  ;;  %v7553_v6 = vsub.f32 %v9347_v5, %v9212_v60  ;;  %v9351_v13 = vld [vmem:[#allocation43_spill] sm:$0xff] }
 0x4d2   :  { %9346 = vst [vmem:[#allocation106_spill] sm:$0xff] %v7541_v28  ;;  %v3186_v29 = vadd.f32 %v3185_v30, %v2960_v25  ;;  %v3091_v2 = vadd.f32 %v3090_v52, %v3021_v34  ;;  %v3030_v40 = vmul.f32 %v7523_v35, %v7523_v35  ;;  %v7559_v61 = vsub.f32 %v9349_v46, %v6815_v59  ;;  %v9352_v25 = vld [vmem:[#allocation80_spill] sm:$0xff] }
 0x4d3   :  { %9348 = vst [vmem:[#allocation15_spill] sm:$0xff] %v7553_v6  ;;  %v3031_v12 = vmul.f32 %v7529_v3, %v7529_v3  ;;  %v7565_v39 = vsub.f32 %v9351_v13, %v7439_v16  ;;  %v2968_v52 = vmul.f32 %v7535_v58, %v7535_v58  ;;  %v7571_v30 = vsub.f32 %v9352_v25, %v9220_v9  ;;  %v9354_v35 = vld [vmem:[#allocation44_spill] sm:$0xff] }
 0x4d4   :  { %9350 = vst [vmem:[#allocation74_spill] sm:$0xff] %v7559_v61  ;;  %v3187_v56 = vadd.f32 %v3186_v29, %v2964_v20  ;;  %v3025_v34 = vmul.f32 %v7541_v28, %v7541_v28  ;;  %v3130_v46 = vadd.f32 %v3129_v38, %v3030_v40  ;;  %v7577_v3 = vsub.f32 %v9354_v35, %v7439_v16  ;;  %v9355_v29 = vld [vmem:[#allocation113_spill] sm:$0xff]  ;;  %v9357_v28 = vld [vmem:[#allocation22_spill] sm:$0xff] }
 0x4d5   :  { %9353 = vst [vmem:[#allocation107_spill] sm:$0xff] %v7571_v30  ;;  %v3167_v5 = vadd.f32 %v3166_v23, %v3031_v12  ;;  %v2972_v13 = vmul.f32 %v7547_v55, %v7547_v55  ;;  %v7583_v20 = vsub.f32 %v9355_v29, %v9212_v60  ;;  %v3034_v25 = vmul.f32 %v7553_v6, %v7553_v6  ;;  %v9359_v23 = vld [vmem:[#allocation66_spill] sm:$0xff]  ;;  %v9362_v6 = vld [vmem:[#allocation45_spill] sm:$0xff] }
 0x4d6   :  { %v3188_v0 = vadd.f32 %v3187_v56, %v2968_v52  ;;  %v3092_v54 = vadd.f32 %v3091_v2, %v3025_v34  ;;  %v7589_v38 = vsub.f32 %v9357_v28, %v6815_v59  ;;  %v3035_v35 = vmul.f32 %v7559_v61, %v7559_v61  ;;  %v9360_v52 = vld [vmem:[#allocation81_spill] sm:$0xff] }
 0x4d7   :  { %9356 = vst [vmem:[#allocation16_spill] sm:$0xff] %v7583_v20  ;;  %v7595_v40 = vsub.f32 %v9359_v23, %v7439_v16  ;;  %v2976_v2 = vmul.f32 %v7565_v39, %v7565_v39  ;;  %v7601_v56 = vsub.f32 %v9360_v52, %v9220_v9  ;;  %v3029_v34 = vmul.f32 %v7571_v30, %v7571_v30  ;;  %v9364_v30 = vld [vmem:[#allocation23_spill] sm:$0xff] }
 0x4d8   :  { %9358 = vst [vmem:[#allocation75_spill] sm:$0xff] %v7589_v38  ;;  %v3189_v12 = vadd.f32 %v3188_v0, %v2972_v13  ;;  %v3131_v28 = vadd.f32 %v3130_v46, %v3034_v25  ;;  %v3168_v29 = vadd.f32 %v3167_v5, %v3035_v35  ;;  %v7607_v61 = vsub.f32 %v9362_v6, %v7439_v16  ;;  %v9363_v0 = vld [vmem:[#allocation114_spill] sm:$0xff] }
 0x4d9   :  { %9361 = vst [vmem:[#allocation108_spill] sm:$0xff] %v7601_v56  ;;  %v2980_v23 = vmul.f32 %v7577_v3, %v7577_v3  ;;  %v3093_v8 = vadd.f32 %v3092_v54, %v3029_v34  ;;  %v7613_v13 = vsub.f32 %v9363_v0, %v9212_v60  ;;  %v3038_v52 = vmul.f32 %v7583_v20, %v7583_v20  ;;  %v9366_v35 = vld [vmem:[#allocation82_spill] sm:$0xff] }
 0x4da   :  { %v3190_v45 = vadd.f32 %v3189_v12, %v2976_v2  ;;  %v7619_v46 = vsub.f32 %v9364_v30, %v6815_v59  ;;  %v3039_v6 = vmul.f32 %v7589_v38, %v7589_v38  ;;  %v7625_v5 = vsub.f32 %v7031_v42, %v7439_v16 }
 0x4db   :  { %v2984_v54 = vmul.f32 %v7595_v40, %v7595_v40  ;;  %v7631_v2 = vsub.f32 %v9366_v35, %v9220_v9  ;;  %v3033_v12 = vmul.f32 %v7601_v56, %v7601_v56  ;;  %v3132_v30 = vadd.f32 %v3131_v28, %v3038_v52  ;;  %v9369_v56 = vld [vmem:[#allocation24_spill] sm:$0xff] }
 0x4dc   :  { %9365 = vst [vmem:[#allocation17_spill] sm:$0xff] %v7619_v46  ;;  %v3191_v25 = vadd.f32 %v3190_v45, %v2980_v23  ;;  %v3169_v34 = vadd.f32 %v3168_v29, %v3039_v6  ;;  %v7637_v0 = vsub.f32 %v6895_v49, %v7439_v16  ;;  %v2988_v42 = vmul.f32 %v7607_v61, %v7607_v61  ;;  %v9367_v45 = vld [vmem:[#allocation115_spill] sm:$0xff] }
 0x4dd   :  { %v3094_v20 = vadd.f32 %v3093_v8, %v3033_v12  ;;  %v7643_v23 = vsub.f32 %v9367_v45, %v9212_v60  ;;  %v3042_v35 = vmul.f32 %v7613_v13, %v7613_v13  ;;  %v7649_v28 = vsub.f32 %v9369_v56, %v6815_v59  ;;  %v9371_v60 = vld [vmem:[#allocation83_spill] sm:$0xff] }
 0x4de   :  { %v3192_v38 = vadd.f32 %v3191_v25, %v2984_v54  ;;  %v3043_v49 = vmul.f32 %v7619_v46, %v7619_v46  ;;  %v7655_v29 = vsub.f32 %v7063_v24, %v7439_v16  ;;  %v2992_v8 = vmul.f32 %v7625_v5, %v7625_v5  ;;  %v9379_v46 = vld [vmem:[#allocation37_spill] sm:$0xff] }
 0x4df   :  { %9368 = vst [vmem:[#allocation76_spill] sm:$0xff] %v7643_v23  ;;  %v7661_v6 = vsub.f32 %v9371_v60, %v9220_v9  ;;  %v3037_v54 = vmul.f32 %v7631_v2, %v7631_v2  ;;  %v3133_v59 = vadd.f32 %v3132_v30, %v3042_v35  ;;  %v7667_v25 = vsub.f32 %v6909_v14, %v7439_v16 }
 0x4e0   :  { %9370 = vst [vmem:[#allocation25_spill] sm:$0xff] %v7649_v28  ;;  %v3193_v52 = vadd.f32 %v3192_v38, %v2988_v42  ;;  %v3170_v56 = vadd.f32 %v3169_v34, %v3043_v49  ;;  %v2996_v24 = vmul.f32 %v7637_v0, %v7637_v0  ;;  %v3046_v38 = vmul.f32 %v7643_v23, %v7643_v23  ;;  %v9372_v34 = vld [vmem:[#allocation84_spill] sm:$0xff]  ;;  %v9373_v23 = vld [vmem:[#allocation30_spill] sm:$0xff] }
 0x4e1   :  { %v3095_v45 = vadd.f32 %v3094_v20, %v3037_v54  ;;  %v3047_v42 = vmul.f32 %v7649_v28, %v7649_v28  ;;  %v7677_v60 = vsub.f32 %v7087_v11, %v7439_v16  ;;  %v3000_v30 = vmul.f32 %v7655_v29, %v7655_v29 }
 0x4e2   :  { %v3194_v12 = vadd.f32 %v3193_v52, %v2992_v8  ;;  %v7683_v35 = vsub.f32 %v9372_v34, %v9220_v9  ;;  %v3041_v20 = vmul.f32 %v7661_v6, %v7661_v6  ;;  %v3134_v49 = vadd.f32 %v3133_v59, %v3046_v38 }
 0x4e3   :  { %v3171_v8 = vadd.f32 %v3170_v56, %v3047_v42  ;;  %v7689_v52 = vsub.f32 %v6919_v50, %v7439_v16  ;;  %v3004_v11 = vmul.f32 %v7667_v25, %v7667_v25  ;;  %v7699_v34 = vsub.f32 %v7121_v21, %v7439_v16  ;;  %v9375_v21 = vld [vmem:[#allocation31_spill] sm:$0xff] }
 0x4e4   :  { %v3195_v14 = vadd.f32 %v3194_v12, %v2996_v24  ;;  %v3096_v28 = vadd.f32 %v3095_v45, %v3041_v20  ;;  %v3050_v24 = vmul.f32 %v9373_v23, %v9373_v23  ;;  %v9374_v12 = vld [vmem:[#allocation34_spill] sm:$0xff]  ;;  %v3008_v59 = vmul.f32 %v7677_v60, %v7677_v60  ;;  %v9376_v23 = vld [vmem:[#allocation36_spill] sm:$0xff] }
 0x4e5   :  { %v3051_v9 = vmul.f32 %v9374_v12, %v9374_v12  ;;  %v3045_v56 = vmul.f32 %v7683_v35, %v7683_v35  ;;  %v7707_v45 = vsub.f32 %v6929_v43, %v7439_v16  ;;  %v3054_v12 = vmul.f32 %v9375_v21, %v9375_v21 }
 0x4e6   :  { %v3196_v54 = vadd.f32 %v3195_v14, %v3000_v30  ;;  %v3135_v38 = vadd.f32 %v3134_v49, %v3050_v24  ;;  %v3012_v30 = vmul.f32 %v7689_v52, %v7689_v52  ;;  %v3016_v49 = vmul.f32 %v7699_v34, %v7699_v34 }
 0x4e7   :  { %v3172_v42 = vadd.f32 %v3171_v8, %v3051_v9  ;;  %v3097_v20 = vadd.f32 %v3096_v28, %v3045_v56  ;;  %v9377_v8 = vld [vmem:[#allocation86_spill] sm:$0xff]  ;;  %v7725_v28 = vsub.f32 %v9253_v44, %v7439_v16 }
 0x4e8   :  { %v3197_v50 = vadd.f32 %v3196_v54, %v3004_v11  ;;  %v3055_v11 = vmul.f32 %v9376_v23, %v9376_v23  ;;  %v7717_v54 = vsub.f32 %v7153_v7, %v7439_v16  ;;  %v3049_v24 = vmul.f32 %v9377_v8, %v9377_v8  ;;  %v9378_v7 = vld [vmem:[#allocation32_spill] sm:$0xff]  ;;  %v9382_v8 = vld [vmem:[#allocation38_spill] sm:$0xff] }
 0x4e9   :  { %v3136_v9 = vadd.f32 %v3135_v38, %v3054_v12  ;;  %v3058_v21 = vmul.f32 %v9378_v7, %v9378_v7  ;;  %v9380_v38 = vld [vmem:[#allocation87_spill] sm:$0xff] }
 0x4ea   :  { %v3198_v14 = vadd.f32 %v3197_v50, %v3008_v59  ;;  %v3173_v59 = vadd.f32 %v3172_v42, %v3055_v11  ;;  %v3020_v50 = vmul.f32 %v7707_v45, %v7707_v45  ;;  %v3098_v23 = vadd.f32 %v3097_v20, %v3049_v24 }
 0x4eb   :  { %v3024_v12 = vmul.f32 %v7717_v54, %v7717_v54  ;;  %v3053_v42 = vmul.f32 %v9380_v38, %v9380_v38  ;;  %v3137_v11 = vadd.f32 %v3136_v9, %v3058_v21  ;;  %v7743_v20 = vsub.f32 %v7201_v15, %v7439_v16  ;;  %v9383_v9 = vld [vmem:[#allocation88_spill] sm:$0xff]  ;;  %v9386_v38 = vld [vmem:[#allocation39_spill] sm:$0xff] }
 0x4ec   :  { %v3199_v43 = vadd.f32 %v3198_v14, %v3012_v30  ;;  %v3059_v30 = vmul.f32 %v9379_v46, %v9379_v46  ;;  %v7735_v14 = vsub.f32 %v7184_v32, %v7439_v16  ;;  %v9381_v32 = vld [vmem:[#allocation116_spill] sm:$0xff] }
 0x4ed   :  { %v3099_v46 = vadd.f32 %v3098_v23, %v3053_v42  ;;  %v3062_v7 = vmul.f32 %v9381_v32, %v9381_v32  ;;  %v7761_v23 = vsub.f32 %v7233_v36, %v7439_v16 }
 0x4ee   :  { %v3200_v56 = vadd.f32 %v3199_v43, %v3016_v49  ;;  %v3174_v49 = vadd.f32 %v3173_v59, %v3059_v30  ;;  %v3028_v43 = vmul.f32 %v7725_v28, %v7725_v28  ;;  %v3032_v21 = vmul.f32 %v7735_v14, %v7735_v14 }
 0x4ef   :  { %v3057_v59 = vmul.f32 %v9383_v9, %v9383_v9  ;;  %v3138_v30 = vadd.f32 %v3137_v11, %v3062_v7  ;;  %9384 = vst [vmem:[#allocation33_spill] sm:$0xff] %v7761_v23  ;;  %v9388_v11 = vld [vmem:[#allocation89_spill] sm:$0xff] }
 0x4f0   :  { %v3201_v44 = vadd.f32 %v3200_v56, %v3020_v50  ;;  %v3063_v50 = vmul.f32 %v9382_v8, %v9382_v8  ;;  %v7753_v56 = vsub.f32 %v7216_v10, %v7439_v16  ;;  %v9385_v10 = vld [vmem:[#allocation117_spill] sm:$0xff] }
 0x4f1   :  { %v3100_v8 = vadd.f32 %v3099_v46, %v3057_v59  ;;  %v3066_v32 = vmul.f32 %v9385_v10, %v9385_v10  ;;  %v7779_v46 = vsub.f32 %v7265_v31, %v7439_v16  ;;  %v9391_v9 = vld [vmem:[#allocation129_spill] sm:$0xff] }
 0x4f2   :  { %v3202_v24 = vadd.f32 %v3201_v44, %v3024_v12  ;;  %v3175_v12 = vadd.f32 %v3174_v49, %v3063_v50  ;;  %v3036_v44 = vmul.f32 %v7743_v20, %v7743_v20  ;;  %v3040_v7 = vmul.f32 %v7753_v56, %v7753_v56 }
 0x4f3   :  { %v3061_v49 = vmul.f32 %v9388_v11, %v9388_v11  ;;  %v3139_v50 = vadd.f32 %v3138_v30, %v3066_v32  ;;  %9389 = vst [vmem:[#allocation18_spill] sm:$0xff] %v7779_v46  ;;  %v9393_v30 = vld [vmem:[#allocation90_spill] sm:$0xff] }
 0x4f4   :  { %v3203_v15 = vadd.f32 %v3202_v24, %v3028_v43  ;;  %v3067_v43 = vmul.f32 %v9386_v38, %v9386_v38  ;;  %v7771_v24 = vsub.f32 %v7252_v62, %v7439_v16  ;;  %v9390_v62 = vld [vmem:[#allocation118_spill] sm:$0xff] }
 0x4f5   :  { %v3101_v38 = vadd.f32 %v3100_v8, %v3061_v49  ;;  %v3070_v10 = vmul.f32 %v9390_v62, %v9390_v62  ;;  %v7797_v8 = vsub.f32 %v7293_v17, %v7439_v16  ;;  %v9396_v62 = vld [vmem:[#allocation91_spill] sm:$0xff]  ;;  %v7811_v17 = vsub.f32 %v7317_v26, %v7439_v16 }
 0x4f6   :  { %v3204_v42 = vadd.f32 %v3203_v15, %v3032_v21  ;;  %9387 = vst [vmem:[#allocation109_spill] sm:$0xff] %v7771_v24  ;;  %v3176_v21 = vadd.f32 %v3175_v12, %v3067_v43  ;;  %v3044_v15 = vmul.f32 %v7761_v23, %v7761_v23  ;;  %v3048_v32 = vmul.f32 %v7771_v24, %v7771_v24 }
 0x4f7   :  { %v3065_v12 = vmul.f32 %v9393_v30, %v9393_v30  ;;  %v3140_v43 = vadd.f32 %v3139_v50, %v3070_v10  ;;  %9394 = vst [vmem:[#allocation110_spill] sm:$0xff] %v7797_v8  ;;  %v3069_v10 = vmul.f32 %v9396_v62, %v9396_v62  ;;  %v3068_v62 = vmul.f32 %v7811_v17, %v7811_v17 }
 0x4f8   :  { %v3205_v36 = vadd.f32 %v3204_v42, %v3036_v44  ;;  %v3071_v44 = vmul.f32 %v9391_v9, %v9391_v9  ;;  %v7789_v42 = vsub.f32 %v7277_v19, %v7439_v16  ;;  %v7803_v19 = vsub.f32 %v7302_v51, %v7439_v16  ;;  %9397 = vst [vmem:[#allocation42_spill] sm:$0xff] %v7811_v17 }
 0x4f9   :  { %v3102_v9 = vadd.f32 %v3101_v38, %v3065_v12  ;;  %v3141_v50 = vrot.slane %v3140_v43, 4  ;;  %v3060_v38 = vmul.f32 %v7797_v8, %v7797_v8  ;;  %v7817_v51 = vsub.f32 %v7339_v41, %v7439_v16 }
 0x4fa   :  { %v3206_v59 = vadd.f32 %v3205_v36, %v3040_v7  ;;  %9392 = vst [vmem:[#allocation77_spill] sm:$0xff] %v7789_v42  ;;  %v3177_v7 = vadd.f32 %v3176_v21, %v3071_v44  ;;  %v3052_v36 = vmul.f32 %v7779_v46, %v7779_v46 }
 0x4fb   :  { %9395 = vst [vmem:[#allocation19_spill] sm:$0xff] %v7803_v19  ;;  %v3072_v8 = vmul.f32 %v7817_v51, %v7817_v51 }
 0x4fc   :  { %v3207_v31 = vadd.f32 %v3206_v59, %v3044_v15  ;;  %v3056_v15 = vmul.f32 %v7789_v42, %v7789_v42  ;;  %v3178_v21 = vrot.slane %v3177_v7, 4  ;;  %9398 = vst [vmem:[#allocation78_spill] sm:$0xff] %v7817_v51 }
 0x4fe   :  { %v3208_v49 = vadd.f32 %v3207_v31, %v3048_v32  ;;  %v3103_v32 = vadd.f32 %v3102_v9, %v3069_v10  ;;  %v3064_v31 = vmul.f32 %v7803_v19, %v7803_v19 }
 0x500   :  { %v3209_v59 = vadd.f32 %v3208_v49, %v3052_v36  ;;  %v3142_v36 = vadd.f32 %v3141_v50, %v3140_v43  ;;  %v3179_v49 = vadd.f32 %v3178_v21, %v3177_v7  ;;  %v3104_v30 = vrot.slane %v3103_v32, 4 }
 0x502   :  { %v3210_v44 = vadd.f32 %v3209_v59, %v3056_v15  ;;  %v3143_v9 = vrot.slane %v3142_v36, 2  ;;  %v3180_v59 = vrot.slane %v3179_v49, 2  ;;  %v3105_v41 = vadd.f32 %v3104_v30, %v3103_v32 }
 0x504   :  { %v3211_v12 = vadd.f32 %v3210_v44, %v3060_v38  ;;  %v3144_v11 = vadd.f32 %v3143_v9, %v3142_v36  ;;  %v3181_v42 = vadd.f32 %v3180_v59, %v3179_v49  ;;  %v3106_v38 = vrot.slane %v3105_v41, 2  ;;  %v5916_v59 = vld [vmem:[#allocation8 + $0x98] sm:$0xff] }
 0x505   :  { %4191 = vmatpush.bf16.msra.mxu2 %v5916_v59  ;;  %v5898_v59 = vld [vmem:[#allocation8 + $0x8] sm:$0xff] }
 0x506   :  { %v3212_v26 = vadd.f32 %v3211_v12, %v3064_v31  ;;  %v3145_v7 = vrot.slane %v3144_v11, 1  ;;  %v3182_v50 = vrot.slane %v3181_v42, 1  ;;  %v3107_v44 = vadd.f32 %v3106_v38, %v3105_v41  ;;  %v5900_v41 = vld [vmem:[#allocation8 + $0x18] sm:$0xff] }
 0x507   :  { %v5908_v38 = vld [vmem:[#allocation8 + $0x58] sm:$0xff]  ;;  %4013 = vmatpush.bf16.msra.mxu0 %v5900_v41 }
 0x508   :  { %v3213_v15 = vadd.f32 %v3212_v26, %v3068_v62  ;;  %v3146_v12 = vadd.f32 %v3145_v7, %v3144_v11  ;;  %v3183_v17 = vadd.f32 %v3182_v50, %v3181_v42  ;;  %v3108_v51 = vrot.slane %v3107_v44, 1  ;;  %4102 = vmatpush.bf16.msra.mxu1 %v5908_v38 }
 0x50a   :  { %v3214_v10 = vadd.f32 %v3213_v15, %v3072_v8  ;;  %v3222_v8 = vmul.f32 %v3146_v12, %v9319_v27  ;;  %v3223_v30 = vmul.f32 %v3183_v17, %v9319_v27  ;;  %v3109_v32 = vadd.f32 %v3108_v51, %v3107_v44  ;;  %v5923_v44 = vld [vmem:[#allocation8 + $0xd0] sm:$0xff] }
 0x50c   :  { %v3215_v16 = vrot.slane %v3214_v10, 4  ;;  %v7830_v49 = vadd.f32 1e-05, %v3222_v8  ;;  %v7832_v26 = vadd.f32 1e-05, %v3223_v30  ;;  %v5907_v8 = vld [vmem:[#allocation8 + $0x50] sm:$0xff] }
 0x50d   :  { %4103 = vmatpush.bf16.msra.mxu1 %v5907_v8 }
 0x50e   :  { %v3216_v19 = vadd.f32 %v3215_v16, %v3214_v10  ;;  %v5924_v10 = vld [vmem:[#allocation8 + $0xd8] sm:$0xff]  ;;  %vm3246_vm5 = vweird.f32 %v7830_v49  ;;  %vm3256_vm8 = vweird.f32 %v7832_v26 }
 0x50f   :  { %4280 = vmatpush.bf16.msra.mxu3 %v5924_v10  ;;  %v5906_v10 = vld [vmem:[#allocation8 + $0x48] sm:$0xff] }
 0x510   :  { %v3217_v43 = vrot.slane %v3216_v19, 2 }
 0x511   :  { %4104 = vmatpush.bf16.msra.mxu1 %v5906_v10 }
 0x512   :  { %v3218_v21 = vadd.f32 %v3217_v43, %v3216_v19  ;;  %v3221_v19 = vmul.f32 %v3109_v32, %v9319_v27 }
 0x513   :  { %4281 = vmatpush.bf16.msra.mxu3 %v5923_v44 }
 0x514   :  { %v3219_v31 = vrot.slane %v3218_v21, 1  ;;  %v7838_v11 = vadd.f32 1e-05, %v3221_v19  ;;  %v5914_v19 = vld [vmem:[#allocation8 + $0x88] sm:$0xff] }
 0x516   :  { %v3220_v46 = vadd.f32 %v3219_v31, %v3218_v21  ;;  %v5915_v21 = vld [vmem:[#allocation8 + $0x90] sm:$0xff]  ;;  %vm3236_vm12 = vweird.f32 %v7838_v11 }
 0x517   :  { %v5899_v31 = vld [vmem:[#allocation8 + $0x10] sm:$0xff]  ;;  %4192 = vmatpush.bf16.msra.mxu2 %v5915_v21  ;;  %v5897_v21 = vld [vmem:[#allocation8] sm:$0xff] }
 0x518   :  { %v3224_v62 = vmul.f32 %v3220_v46, %v9319_v27  ;;  %4014 = vmatpush.bf16.msra.mxu0 %v5899_v31  ;;  %v5921_v27 = vld [vmem:[#allocation8 + $0xc0] sm:$0xff] }
 0x51a   :  { %v7828_v36 = vadd.f32 1e-05, %v3224_v62 }
 0x51b   :  { %4193 = vmatpush.bf16.msra.mxu2 %v5914_v19 }
 0x51c   :  { %5944 = vrsqrt.f32 %v7828_v36  ;;  %4015 = vmatpush.bf16.msra.mxu0 %v5898_v59  ;;  %vm3266_vm4 = vweird.f32 %v7828_v36 }
 0x51d   :  { %5946 = vrsqrt.f32 %v7830_v49 }
 0x51e   :  { %5948 = vrsqrt.f32 %v7832_v26 }
 0x51f   :  { %5950 = vrsqrt.f32 %v7838_v11 }
 0x520   :  { %4016 = vmatpush.bf16.msra.mxu0 %v5897_v21 }
 0x522   :  { %v7840_v46 = vpop.eup %5944 }
 0x523   :  { %v7842_v42 = vpop.eup %5946  ;;  %v3261_v51 = vmul.f32 %v7840_v46, %v7828_v36  ;;  %vm3267_vm1 = vweird.f32 %v7840_v46 }
 0x524   :  { %v7844_v17 = vpop.eup %5948  ;;  %v3241_v15 = vmul.f32 %v7842_v42, %v7830_v49  ;;  %vm3247_vm2 = vweird.f32 %v7842_v42  ;;  %vm3268_vm6 = vmor %vm3266_vm4, %vm3267_vm1 }
 0x525   :  { %v3251_v9 = vmul.f32 %v7844_v17, %v7832_v26  ;;  %v3262_v16 = vmul.f32 %v7840_v46, %v3261_v51  ;;  %v7854_v43 = vpop.eup %5950  ;;  %v5922_v51 = vld [vmem:[#allocation8 + $0xc8] sm:$0xff]  ;;  %vm3257_vm3 = vweird.f32 %v7844_v17  ;;  %vm3248_vm7 = vmor %vm3246_vm5, %vm3247_vm2 }
 0x526   :  { %v3242_v7 = vmul.f32 %v7842_v42, %v3241_v15  ;;  %v3231_v12 = vmul.f32 %v7854_v43, %v7838_v11  ;;  %4282 = vmatpush.bf16.msra.mxu3 %v5922_v51  ;;  %vm3258_vm9 = vmor %vm3256_vm8, %vm3257_vm3  ;;  %vm3237_vm10 = vweird.f32 %v7854_v43 }
 0x527   :  { %v3252_v50 = vmul.f32 %v7844_v17, %v3251_v9  ;;  %v3263_v62 = vmul.f32 0.5, %v3262_v16  ;;  %v5913_v16 = vld [vmem:[#allocation8 + $0x80] sm:$0xff]  ;;  %vm3238_vm14 = vmor %vm3236_vm12, %vm3237_vm10 }
 0x528   :  { %v3243_v30 = vmul.f32 0.5, %v3242_v7  ;;  %v3232_v15 = vmul.f32 %v7854_v43, %v3231_v12  ;;  %4194 = vmatpush.bf16.msra.mxu2 %v5913_v16 }
 0x529   :  { %v3253_v32 = vmul.f32 0.5, %v3252_v50  ;;  %v3264_v9 = vsub.f32 1.5, %v3263_v62  ;;  %v5905_v50 = vld [vmem:[#allocation8 + $0x40] sm:$0xff] }
 0x52a   :  { %v3244_v41 = vsub.f32 1.5, %v3243_v30  ;;  %v3233_v44 = vmul.f32 0.5, %v3232_v15  ;;  %4283 = vmatpush.bf16.msra.mxu3 %v5921_v27  ;;  %4105 = vmatpush.bf16.msra.mxu1 %v5905_v50  ;;  %v9400_v50 = vld [vmem:[#allocation62_spill] sm:$0xff] }
 0x52b   :  { %v3254_v38 = vsub.f32 1.5, %v3253_v32  ;;  %v3265_v7 = vmul.f32 %v7840_v46, %v3264_v9  ;;  %v3423_v9 = vld [vmem:[#allocation7 + $0x1] ss:$2 sm:$0xf] }
 0x52c   :  { %v3245_v31 = vmul.f32 %v7842_v42, %v3244_v41  ;;  %v3234_v62 = vsub.f32 1.5, %v3233_v44  ;;  %v7885_v11 = vperm.slane %v3423_v9, 0  ;;  %v7887_v16 = vperm.slane %v3423_v9, 1  ;;  %v9399_v44 = vld [vmem:[#allocation69_spill] sm:$0xff] }
 0x52d   :  { %v3255_v12 = vmul.f32 %v7844_v17, %v3254_v38  ;;  %v3269_v8 = vsel %vm3268_vm6, %v7840_v46, %v3265_v7  ;;  %v7889_v21 = vperm.slane %v3423_v9, 2 }
 0x52e   :  { %v3249_v30 = vsel %vm3248_vm7, %v7842_v42, %v3245_v31  ;;  %v3276_v19 = vrot.slane %v3269_v8, 5  ;;  %v3235_v36 = vmul.f32 %v7854_v43, %v3234_v62  ;;  %v3225_v42 = vld [vmem:[#allocation7] ss:$2 sm:$0xf] }
 0x52f   :  { %v3259_v32 = vsel %vm3258_vm9, %v7844_v17, %v3255_v12  ;;  %v3274_v27 = vrot.slane %v3249_v30, 7  ;;  %v9401_v12 = vld [vmem:[#allocation67_spill] sm:$0xff]  ;;  %v9402_v30 = vld [vmem:[#allocation29_spill] sm:$0xff] }
 0x530   :  { %v3275_v49 = vrot.slane %v3259_v32, 6  ;;  %v3239_v46 = vsel %vm3238_vm14, %v7854_v43, %v3235_v36  ;;  %v7891_v43 = vperm.slane %v3423_v9, 3 }
 0x531   :  { %v3278_v51 = vsel %vm3277_vm13, %v3239_v46, %v3274_v27  ;;  %v9404_v27 = vld [vmem:[#allocation68_spill] sm:$0xff] }
 0x532   :  { %v3280_v26 = vsel %vm3279_vm11, %v3275_v49, %v3276_v19  ;;  %v9403_v19 = vld [vmem:[#allocation63_spill] sm:$0xff] }
 0x533   :  { %v3282_v15 = vsel %vm3281_vm15, %v3278_v51, %v3280_v26 }
 0x534   :  { %v3284_v17 = vmul.f32 %v3282_v15, %v3225_v42 }
 0x536   :  { %v7877_v59 = vperm.slane %v3284_v17, 0  ;;  %v7879_v10 = vperm.slane %v3284_v17, 1  ;;  %v7881_v41 = vperm.slane %v3284_v17, 2  ;;  %v7883_v38 = vperm.slane %v3284_v17, 3 }
 0x538   :  { %v3294_v7 = vmul.f32 %v7877_v59, %v9399_v44  ;;  %v3295_v31 = vmul.f32 %v7879_v10, %v9400_v50  ;;  %v3296_v62 = vmul.f32 %v7881_v41, %v9401_v12  ;;  %v3297_v8 = vmul.f32 %v7883_v38, %v7461_v1 }
 0x539   :  { %v3298_v32 = vmul.f32 %v7877_v59, %v9402_v30  ;;  %v3299_v36 = vmul.f32 %v7879_v10, %v9403_v19  ;;  %v3300_v49 = vmul.f32 %v7881_v41, %v9404_v27  ;;  %v3301_v26 = vmul.f32 %v7883_v38, %v7465_v18 }
 0x53a   :  { %v3433_v46 = vadd.f32 %v7885_v11, %v3294_v7  ;;  %v3434_v51 = vadd.f32 %v7887_v16, %v3295_v31  ;;  %v3435_v42 = vadd.f32 %v7889_v21, %v3296_v62  ;;  %v3436_v1 = vadd.f32 %v7891_v43, %v3297_v8 }
 0x53b   :  { %v3437_v15 = vadd.f32 %v7885_v11, %v3298_v32  ;;  %v3438_v17 = vadd.f32 %v7887_v16, %v3299_v36  ;;  %v3439_v9 = vadd.f32 %v7889_v21, %v3300_v49  ;;  %v3440_v44 = vadd.f32 %v7891_v43, %v3301_v26  ;;  %v9405_v26 = vld [vmem:[#allocation27_spill] sm:$0xff] }
 0x53c   :  { %v3561_v50 = vmax.f32 %v3433_v46, 0.0  ;;  %v3562_v12 = vmax.f32 %v3434_v51, 0.0  ;;  %v3563_v30 = vmax.f32 %v3435_v42, 0.0  ;;  %v3564_v18 = vmax.f32 %v3436_v1, 0.0  ;;  %v9406_v51 = vld [vmem:[#allocation26_spill] sm:$0xff] }
 0x53d   :  { %v3565_v19 = vmax.f32 %v3437_v15, 0.0  ;;  %v3566_v7 = vmax.f32 %v3438_v17, 0.0  ;;  %v3567_v27 = vmax.f32 %v3439_v9, 0.0  ;;  %v3568_v31 = vmax.f32 %v3440_v44, 0.0 }
 0x53e   :  { %v3302_v32 = vmul.f32 %v7877_v59, %v7068_v33  ;;  %v3303_v36 = vmul.f32 %v7879_v10, %v7048_v47  ;;  %v3306_v49 = vmul.f32 %v7877_v59, %v7096_v48  ;;  %v3307_v46 = vmul.f32 %v7879_v10, %v9405_v26 }
 0x53f   :  { %v3689_v24 = vpack.c.bf16 %v3565_v19, %v3561_v50  ;;  %v3690_v62 = vpack.c.bf16 %v3566_v7, %v3562_v12  ;;  %v3691_v23 = vpack.c.bf16 %v3567_v27, %v3563_v30  ;;  %v3692_v8 = vpack.c.bf16 %v3568_v31, %v3564_v18 }
 0x540   :  { %v3304_v42 = vmul.f32 %v7881_v41, %v9406_v51  ;;  %v3309_v33 = vmul.f32 %v7883_v38, %v7507_v37  ;;  %v3441_v47 = vadd.f32 %v7885_v11, %v3302_v32  ;;  %v3445_v15 = vadd.f32 %v7885_v11, %v3306_v49  ;;  %v9408_v49 = vld [vmem:[#allocation92_spill] sm:$0xff] }
 0x541   :  { %4017 = vmatmul.bf16.vlgmr.msra.gmra.mxu0 %v3689_v24  ;;  %4106 = vmatmul.bf16.vlgmr.msra.gmra.mxu1 %v3690_v62  ;;  %v3305_v24 = vmul.f32 %v7883_v38, %v7487_v22  ;;  %v3442_v48 = vadd.f32 %v7887_v16, %v3303_v36  ;;  %v3446_v17 = vadd.f32 %v7887_v16, %v3307_v46  ;;  %v9409_v46 = vld [vmem:[#allocation35_spill] sm:$0xff] }
 0x542   :  { %4195 = vmatmul.bf16.vlgmr.msra.gmra.mxu2 %v3691_v23  ;;  %4284 = vmatmul.bf16.vlgmr.msra.gmra.mxu3 %v3692_v8  ;;  %v9407_v23 = vld [vmem:[#allocation85_spill] sm:$0xff]  ;;  %v3443_v9 = vadd.f32 %v7889_v21, %v3304_v42  ;;  %v3448_v50 = vadd.f32 %v7891_v43, %v3309_v33  ;;  %v3569_v12 = vmax.f32 %v3441_v47, 0.0  ;;  %v3573_v30 = vmax.f32 %v3445_v15, 0.0  ;;  %v9412_v33 = vld [vmem:[#allocation40_spill] sm:$0xff] }
 0x543   :  { %v3308_v1 = vmul.f32 %v7881_v41, %v9407_v23  ;;  %v3444_v22 = vadd.f32 %v7891_v43, %v3305_v24  ;;  %v3570_v18 = vmax.f32 %v3442_v48, 0.0  ;;  %v3574_v37 = vmax.f32 %v3446_v17, 0.0  ;;  %v9410_v42 = vld [vmem:[#allocation93_spill] sm:$0xff]  ;;  %v9413_v48 = vld [vmem:[#allocation46_spill] sm:$0xff] }
 0x544   :  { %v3571_v19 = vmax.f32 %v3443_v9, 0.0  ;;  %v3576_v31 = vmax.f32 %v3448_v50, 0.0  ;;  %v3693_v62 = vpack.c.bf16 %v3573_v30, %v3569_v12  ;;  %v3310_v26 = vmul.f32 %v7877_v59, %v9408_v49  ;;  %v9411_v23 = vld [vmem:[#allocation41_spill] sm:$0xff] }
 0x545   :  { %v3447_v44 = vadd.f32 %v7889_v21, %v3308_v1  ;;  %v3572_v27 = vmax.f32 %v3444_v22, 0.0  ;;  %v3694_v8 = vpack.c.bf16 %v3574_v37, %v3570_v18  ;;  %v3311_v51 = vmul.f32 %v7879_v10, %v9409_v46 }
 0x546   :  { %v3314_v24 = vmul.f32 %v7877_v59, %v9410_v42  ;;  %v3315_v1 = vmul.f32 %v7879_v10, %v9411_v23  ;;  %v3312_v47 = vmul.f32 %v7881_v41, %v9412_v33  ;;  %v3313_v15 = vmul.f32 %v7883_v38, %v7517_v57  ;;  %v9414_v42 = vld [vmem:[#allocation94_spill] sm:$0xff] }
 0x547   :  { %v3575_v7 = vmax.f32 %v3447_v44, 0.0  ;;  %v3696_v36 = vpack.c.bf16 %v3576_v31, %v3572_v27  ;;  %v3316_v17 = vmul.f32 %v7881_v41, %v9413_v48  ;;  %v3317_v9 = vmul.f32 %v7883_v38, %v7535_v58 }
 0x548   :  { %v3449_v44 = vadd.f32 %v7885_v11, %v3310_v26  ;;  %v3453_v22 = vadd.f32 %v7885_v11, %v3314_v24  ;;  %v3450_v50 = vadd.f32 %v7887_v16, %v3311_v51  ;;  %v3454_v12 = vadd.f32 %v7887_v16, %v3315_v1  ;;  %v9415_v1 = vld [vmem:[#allocation95_spill] sm:$0xff] }
 0x549   :  { %v3695_v32 = vpack.c.bf16 %v3575_v7, %v3571_v19  ;;  %v3451_v30 = vadd.f32 %v7889_v21, %v3312_v47  ;;  %v3455_v18 = vadd.f32 %v7889_v21, %v3316_v17  ;;  %v3452_v57 = vadd.f32 %v7891_v43, %v3313_v15  ;;  %v9416_v47 = vld [vmem:[#allocation47_spill] sm:$0xff]  ;;  %v9417_v17 = vld [vmem:[#allocation52_spill] sm:$0xff] }
 0x54a   :  { %v3456_v37 = vadd.f32 %v7891_v43, %v3317_v9  ;;  %v3577_v19 = vmax.f32 %v3449_v44, 0.0  ;;  %v3581_v7 = vmax.f32 %v3453_v22, 0.0  ;;  %v3578_v27 = vmax.f32 %v3450_v50, 0.0 }
 0x54b   :  { %v3582_v58 = vmax.f32 %v3454_v12, 0.0  ;;  %v3579_v31 = vmax.f32 %v3451_v30, 0.0  ;;  %v3318_v51 = vmul.f32 %v7877_v59, %v7189_v63  ;;  %v3319_v24 = vmul.f32 %v7879_v10, %v9414_v42 }
 0x54c   :  { %v3322_v23 = vmul.f32 %v7877_v59, %v7244_v53  ;;  %v3323_v33 = vmul.f32 %v7879_v10, %v9415_v1  ;;  %v3320_v15 = vmul.f32 %v7881_v41, %v9416_v47  ;;  %v3321_v48 = vmul.f32 %v7883_v38, %v7547_v55  ;;  %v9421_v1 = vld [vmem:[#allocation54_spill] sm:$0xff] }
 0x54d   :  { %v3698_v49 = vpack.c.bf16 %v3582_v58, %v3578_v27  ;;  %v3324_v9 = vmul.f32 %v7881_v41, %v9417_v17  ;;  %v3325_v63 = vmul.f32 %v7883_v38, %v7565_v39  ;;  %v3457_v44 = vadd.f32 %v7885_v11, %v3318_v51  ;;  %v9419_v51 = vld [vmem:[#allocation53_spill] sm:$0xff] }
 0x54e   :  { %v3461_v22 = vadd.f32 %v7885_v11, %v3322_v23  ;;  %v3458_v53 = vadd.f32 %v7887_v16, %v3319_v24  ;;  %v3462_v50 = vadd.f32 %v7887_v16, %v3323_v33  ;;  %v3459_v12 = vadd.f32 %v7889_v21, %v3320_v15  ;;  %v9420_v24 = vld [vmem:[#allocation56_spill] sm:$0xff]  ;;  %v9422_v15 = vld [vmem:[#allocation119_spill] sm:$0xff] }
 0x54f   :  { %v3463_v30 = vadd.f32 %v7889_v21, %v3324_v9  ;;  %v3460_v55 = vadd.f32 %v7891_v43, %v3321_v48  ;;  %v3330_v42 = vmul.f32 %v7877_v59, %v9419_v51  ;;  %v3331_v23 = vmul.f32 %v7879_v10, %v9420_v24  ;;  %v9427_v51 = vld [vmem:[#allocation51_spill] sm:$0xff] }
 0x550   :  { %v3590_v39 = vmax.f32 %v3462_v50, 0.0  ;;  %v3328_v33 = vmul.f32 %v7881_v41, %v9421_v1  ;;  %v3329_v47 = vmul.f32 %v7883_v38, %v7577_v3  ;;  %v3332_v48 = vmul.f32 %v7881_v41, %v9422_v15 }
 0x551   :  { %4022 = vmatmul.bf16.gmra.mxu0 %v3693_v62  ;;  %4111 = vmatmul.bf16.gmra.mxu1 %v3694_v8  ;;  %v3583_v62 = vmax.f32 %v3455_v18, 0.0  ;;  %v3580_v8 = vmax.f32 %v3452_v57, 0.0  ;;  %v3464_v18 = vadd.f32 %v7891_v43, %v3325_v63  ;;  %v3585_v57 = vmax.f32 %v3457_v44, 0.0 }
 0x552   :  { %4200 = vmatmul.bf16.gmra.mxu2 %v3695_v32  ;;  %4289 = vmatmul.bf16.gmra.mxu3 %v3696_v36  ;;  %v3584_v32 = vmax.f32 %v3456_v37, 0.0  ;;  %v3697_v36 = vpack.c.bf16 %v3581_v7, %v3577_v19  ;;  %v3589_v37 = vmax.f32 %v3461_v22, 0.0  ;;  %v3586_v19 = vmax.f32 %v3458_v53, 0.0 }
 0x553   :  { %v3699_v26 = vpack.c.bf16 %v3583_v62, %v3579_v31  ;;  %v3587_v7 = vmax.f32 %v3459_v12, 0.0  ;;  %v3591_v27 = vmax.f32 %v3463_v30, 0.0  ;;  %v3588_v58 = vmax.f32 %v3460_v55, 0.0 }
 0x554   :  { %v3700_v46 = vpack.c.bf16 %v3584_v32, %v3580_v8  ;;  %v3592_v31 = vmax.f32 %v3464_v18, 0.0  ;;  %v3701_v62 = vpack.c.bf16 %v3589_v37, %v3585_v57  ;;  %v3702_v8 = vpack.c.bf16 %v3590_v39, %v3586_v19 }
 0x555   :  { %v3703_v32 = vpack.c.bf16 %v3591_v27, %v3587_v7  ;;  %v3469_v9 = vadd.f32 %v7885_v11, %v3330_v42  ;;  %v3470_v44 = vadd.f32 %v7887_v16, %v3331_v23  ;;  %v3467_v22 = vadd.f32 %v7889_v21, %v3328_v33  ;;  %v9428_v23 = vld [vmem:[#allocation48_spill] sm:$0xff] }
 0x556   :  { %v3471_v53 = vadd.f32 %v7889_v21, %v3332_v48  ;;  %v3468_v3 = vadd.f32 %v7891_v43, %v3329_v47  ;;  %v3336_v42 = vmul.f32 %v7881_v41, %v9427_v51  ;;  %v3337_v24 = vmul.f32 %v7883_v38, %v7607_v61 }
 0x557   :  { %v3597_v30 = vmax.f32 %v3469_v9, 0.0  ;;  %v3595_v18 = vmax.f32 %v3467_v22, 0.0  ;;  %v3340_v1 = vmul.f32 %v7881_v41, %v9428_v23  ;;  %v3341_v33 = vmul.f32 %v7883_v38, %v7625_v5 }
 0x558   :  { %v3599_v57 = vmax.f32 %v3471_v53, 0.0  ;;  %v3596_v37 = vmax.f32 %v3468_v3, 0.0  ;;  %v3476_v61 = vadd.f32 %v7891_v43, %v3337_v24 }
 0x559   :  { %v3479_v9 = vadd.f32 %v7889_v21, %v3340_v1 }
 0x55a   :  { %v3707_v27 = vpack.c.bf16 %v3599_v57, %v3595_v18 }
 0x561   :  { %4027 = vmatmul.bf16.gmra.mxu0 %v3697_v36  ;;  %4116 = vmatmul.bf16.gmra.mxu1 %v3698_v49  ;;  %v3704_v36 = vpack.c.bf16 %v3592_v31, %v3588_v58  ;;  %v3326_v49 = vmul.f32 %v7877_v59, %v7271_v4  ;;  %v3333_v4 = vmul.f32 %v7883_v38, %v7595_v40  ;;  %v3598_v40 = vmax.f32 %v3470_v44, 0.0  ;;  %v9423_v31 = vld [vmem:[#allocation50_spill] sm:$0xff] }
 0x562   :  { %4205 = vmatmul.bf16.gmra.mxu2 %v3699_v26  ;;  %4294 = vmatmul.bf16.gmra.mxu3 %v3700_v46  ;;  %v9418_v26 = vld [vmem:[#allocation96_spill] sm:$0xff] }
 0x563   :  { %v3327_v46 = vmul.f32 %v7879_v10, %v9418_v26  ;;  %v3465_v17 = vadd.f32 %v7885_v11, %v3326_v49  ;;  %v3472_v50 = vadd.f32 %v7891_v43, %v3333_v4  ;;  %v9426_v26 = vld [vmem:[#allocation97_spill] sm:$0xff] }
 0x565   :  { %v3466_v63 = vadd.f32 %v7887_v16, %v3327_v46  ;;  %v3593_v12 = vmax.f32 %v3465_v17, 0.0  ;;  %v3600_v19 = vmax.f32 %v3472_v50, 0.0  ;;  %v3339_v46 = vmul.f32 %v7879_v10, %v9426_v26 }
 0x566   :  { %v3475_v17 = vadd.f32 %v7889_v21, %v3336_v42  ;;  %v3607_v50 = vmax.f32 %v3479_v9, 0.0 }
 0x567   :  { %v3594_v55 = vmax.f32 %v3466_v63, 0.0  ;;  %v3705_v39 = vpack.c.bf16 %v3597_v30, %v3593_v12  ;;  %v3708_v58 = vpack.c.bf16 %v3600_v19, %v3596_v37  ;;  %v3478_v4 = vadd.f32 %v7887_v16, %v3339_v46  ;;  %v9429_v37 = vld [vmem:[#allocation121_spill] sm:$0xff] }
 0x568   :  { %v3480_v63 = vadd.f32 %v7891_v43, %v3341_v33  ;;  %v3603_v3 = vmax.f32 %v3475_v17, 0.0  ;;  %v3604_v12 = vmax.f32 %v3476_v61, 0.0  ;;  %v3342_v19 = vmul.f32 %v7877_v59, %v9429_v37  ;;  %v9439_v37 = vld [vmem:[#allocation58_spill] sm:$0xff] }
 0x569   :  { %v3706_v7 = vpack.c.bf16 %v3598_v40, %v3594_v55  ;;  %v3606_v5 = vmax.f32 %v3478_v4, 0.0  ;;  %v3349_v46 = vmul.f32 %v7883_v38, %v7655_v29 }
 0x56a   :  { %v3608_v30 = vmax.f32 %v3480_v63, 0.0  ;;  %v3711_v18 = vpack.c.bf16 %v3607_v50, %v3603_v3  ;;  %v3481_v51 = vadd.f32 %v7885_v11, %v3342_v19  ;;  %v9435_v3 = vld [vmem:[#allocation100_spill] sm:$0xff]  ;;  %v3352_v19 = vmul.f32 %v7881_v41, %v9439_v37 }
 0x56b   :  { %v3350_v50 = vmul.f32 %v7877_v59, %v9435_v3  ;;  %v3361_v3 = vmul.f32 %v7883_v38, %v7689_v52 }
 0x56c   :  { %v3712_v57 = vpack.c.bf16 %v3608_v30, %v3604_v12  ;;  %v9436_v12 = vld [vmem:[#allocation60_spill] sm:$0xff] }
 0x56d   :  { %v3351_v30 = vmul.f32 %v7879_v10, %v9436_v12  ;;  %v3500_v52 = vadd.f32 %v7891_v43, %v3361_v3 }
 0x571   :  { %4032 = vmatmul.bf16.gmra.mxu0 %v3701_v62  ;;  %4121 = vmatmul.bf16.gmra.mxu1 %v3702_v8  ;;  %v3334_v62 = vmul.f32 %v7877_v59, %v9423_v31  ;;  %v9424_v8 = vld [vmem:[#allocation49_spill] sm:$0xff]  ;;  %v9432_v31 = vld [vmem:[#allocation55_spill] sm:$0xff] }
 0x572   :  { %4210 = vmatmul.bf16.gmra.mxu2 %v3703_v32  ;;  %4299 = vmatmul.bf16.gmra.mxu3 %v3704_v36  ;;  %v3335_v32 = vmul.f32 %v7879_v10, %v9424_v8  ;;  %v9425_v36 = vld [vmem:[#allocation61_spill] sm:$0xff] }
 0x573   :  { %v3338_v49 = vmul.f32 %v7877_v59, %v9425_v36  ;;  %v3473_v47 = vadd.f32 %v7885_v11, %v3334_v62  ;;  %v3347_v62 = vmul.f32 %v7879_v10, %v9432_v31  ;;  %v9433_v8 = vld [vmem:[#allocation57_spill] sm:$0xff]  ;;  %v3345_v36 = vmul.f32 %v7883_v38, %v7637_v0 }
 0x574   :  { %v3474_v48 = vadd.f32 %v7887_v16, %v3335_v32  ;;  %v3344_v32 = vmul.f32 %v7881_v41, %v9433_v8  ;;  %v3489_v31 = vadd.f32 %v7885_v11, %v3350_v50  ;;  %v3490_v8 = vadd.f32 %v7887_v16, %v3351_v30  ;;  %v9446_v50 = vld [vmem:[#allocation65_spill] sm:$0xff] }
 0x575   :  { %v3477_v15 = vadd.f32 %v7885_v11, %v3338_v49  ;;  %v3601_v44 = vmax.f32 %v3473_v47, 0.0  ;;  %v9434_v49 = vld [vmem:[#allocation98_spill] sm:$0xff]  ;;  %v3486_v23 = vadd.f32 %v7887_v16, %v3347_v62  ;;  %v3484_v0 = vadd.f32 %v7891_v43, %v3345_v36 }
 0x576   :  { %v3602_v53 = vmax.f32 %v3474_v48, 0.0  ;;  %v3348_v26 = vmul.f32 %v7881_v41, %v9434_v49  ;;  %v3483_v1 = vadd.f32 %v7889_v21, %v3344_v32  ;;  %v3488_v47 = vadd.f32 %v7891_v43, %v3349_v46 }
 0x577   :  { %v3605_v22 = vmax.f32 %v3477_v15, 0.0  ;;  %v3609_v15 = vmax.f32 %v3481_v51, 0.0  ;;  %v3614_v29 = vmax.f32 %v3486_v23, 0.0  ;;  %v3612_v61 = vmax.f32 %v3484_v0, 0.0 }
 0x578   :  { %v3710_v40 = vpack.c.bf16 %v3606_v5, %v3602_v53  ;;  %v3487_v33 = vadd.f32 %v7889_v21, %v3348_v26  ;;  %v3611_v17 = vmax.f32 %v3483_v1, 0.0  ;;  %v3616_v63 = vmax.f32 %v3488_v47, 0.0 }
 0x579   :  { %v3709_v55 = vpack.c.bf16 %v3605_v22, %v3601_v44  ;;  %v3491_v36 = vadd.f32 %v7889_v21, %v3352_v19  ;;  %v3617_v46 = vmax.f32 %v3489_v31, 0.0  ;;  %v3364_v12 = vmul.f32 %v7881_v41, %v9446_v50 }
 0x57a   :  { %v3615_v9 = vmax.f32 %v3487_v33, 0.0  ;;  %v3716_v5 = vpack.c.bf16 %v3616_v63, %v3612_v61  ;;  %v9443_v61 = vld [vmem:[#allocation103_spill] sm:$0xff]  ;;  %v3365_v30 = vmul.f32 %v7883_v38, %v7699_v34 }
 0x57b   :  { %v3362_v63 = vmul.f32 %v7877_v59, %v9443_v61  ;;  %v3503_v19 = vadd.f32 %v7889_v21, %v3364_v12  ;;  %v3373_v61 = vmul.f32 %v7883_v38, %v7717_v54 }
 0x57c   :  { %v3715_v53 = vpack.c.bf16 %v3615_v9, %v3611_v17  ;;  %v9442_v17 = vld [vmem:[#allocation123_spill] sm:$0xff] }
 0x57d   :  { %v3359_v9 = vmul.f32 %v7879_v10, %v9442_v17  ;;  %v9452_v17 = vld [vmem:[#allocation71_spill] sm:$0xff] }
 0x581   :  { %4037 = vmatmul.bf16.gmra.mxu0 %v3705_v39  ;;  %4126 = vmatmul.bf16.gmra.mxu1 %v3706_v7  ;;  %v9430_v39 = vld [vmem:[#allocation120_spill] sm:$0xff] }
 0x582   :  { %4215 = vmatmul.bf16.gmra.mxu2 %v3707_v27  ;;  %4304 = vmatmul.bf16.gmra.mxu3 %v3708_v58  ;;  %v3343_v7 = vmul.f32 %v7879_v10, %v9430_v39  ;;  %v9431_v27 = vld [vmem:[#allocation99_spill] sm:$0xff]  ;;  %v3353_v39 = vmul.f32 %v7883_v38, %v7667_v25 }
 0x583   :  { %v3346_v58 = vmul.f32 %v7877_v59, %v9431_v27 }
 0x584   :  { %v3482_v24 = vadd.f32 %v7887_v16, %v3343_v7  ;;  %v9440_v7 = vld [vmem:[#allocation59_spill] sm:$0xff]  ;;  %v3492_v25 = vadd.f32 %v7891_v43, %v3353_v39  ;;  %v3504_v39 = vadd.f32 %v7891_v43, %v3365_v30 }
 0x585   :  { %v3485_v42 = vadd.f32 %v7885_v11, %v3346_v58  ;;  %v3356_v27 = vmul.f32 %v7881_v41, %v9440_v7  ;;  %v3357_v58 = vmul.f32 %v7883_v38, %v7677_v60 }
 0x586   :  { %v3610_v4 = vmax.f32 %v3482_v24, 0.0  ;;  %v3619_v24 = vmax.f32 %v3491_v36, 0.0  ;;  %v3620_v1 = vmax.f32 %v3492_v25, 0.0 }
 0x587   :  { %v3613_v48 = vmax.f32 %v3485_v42, 0.0  ;;  %v3495_v49 = vadd.f32 %v7889_v21, %v3356_v27  ;;  %v3496_v26 = vadd.f32 %v7891_v43, %v3357_v58  ;;  %v3618_v42 = vmax.f32 %v3490_v8, 0.0 }
 0x588   :  { %v3714_v22 = vpack.c.bf16 %v3614_v29, %v3610_v4  ;;  %v9441_v4 = vld [vmem:[#allocation102_spill] sm:$0xff]  ;;  %v3628_v8 = vmax.f32 %v3500_v52, 0.0 }
 0x589   :  { %v3713_v44 = vpack.c.bf16 %v3613_v48, %v3609_v15  ;;  %v3623_v23 = vmax.f32 %v3495_v49, 0.0  ;;  %v3624_v33 = vmax.f32 %v3496_v26, 0.0  ;;  %v3358_v29 = vmul.f32 %v7877_v59, %v9441_v4 }
 0x58b   :  { %v3719_v15 = vpack.c.bf16 %v3623_v23, %v3619_v24  ;;  %v3720_v48 = vpack.c.bf16 %v3624_v33, %v3620_v1  ;;  %v9448_v23 = vld [vmem:[#allocation105_spill] sm:$0xff] }
 0x58c   :  { %v3370_v1 = vmul.f32 %v7877_v59, %v9448_v23  ;;  %v9449_v33 = vld [vmem:[#allocation125_spill] sm:$0xff]  ;;  %v9454_v23 = vld [vmem:[#allocation107_spill] sm:$0xff] }
 0x58e   :  { %v3509_v50 = vadd.f32 %v7885_v11, %v3370_v1  ;;  %v3378_v1 = vmul.f32 %v7877_v59, %v9454_v23  ;;  %v3386_v23 = vmul.f32 %v7877_v59, %v7631_v2  ;;  %v3389_v2 = vmul.f32 %v7883_v38, %v7753_v56 }
 0x591   :  { %4042 = vmatmul.bf16.gmra.mxu0 %v3709_v55  ;;  %4131 = vmatmul.bf16.gmra.mxu1 %v3710_v40  ;;  %v9437_v55 = vld [vmem:[#allocation101_spill] sm:$0xff] }
 0x592   :  { %4220 = vmatmul.bf16.gmra.mxu2 %v3711_v18  ;;  %4309 = vmatmul.bf16.gmra.mxu3 %v3712_v57  ;;  %v3354_v40 = vmul.f32 %v7877_v59, %v9437_v55  ;;  %v9438_v18 = vld [vmem:[#allocation122_spill] sm:$0xff]  ;;  %v3497_v55 = vadd.f32 %v7885_v11, %v3358_v29  ;;  %v3369_v29 = vmul.f32 %v7883_v38, %v7707_v45 }
 0x593   :  { %v3355_v57 = vmul.f32 %v7879_v10, %v9438_v18  ;;  %v3498_v18 = vadd.f32 %v7887_v16, %v3359_v9  ;;  %v3372_v9 = vmul.f32 %v7881_v41, %v9452_v17  ;;  %v9458_v17 = vld [vmem:[#allocation73_spill] sm:$0xff] }
 0x594   :  { %v3493_v62 = vadd.f32 %v7885_v11, %v3354_v40  ;;  %v3501_v40 = vadd.f32 %v7885_v11, %v3362_v63  ;;  %v3625_v7 = vmax.f32 %v3497_v55, 0.0 }
 0x595   :  { %v3494_v32 = vadd.f32 %v7887_v16, %v3355_v57  ;;  %v3626_v58 = vmax.f32 %v3498_v18, 0.0  ;;  %v3511_v54 = vadd.f32 %v7889_v21, %v3372_v9  ;;  %v3508_v18 = vadd.f32 %v7891_v43, %v3369_v29 }
 0x596   :  { %v3621_v51 = vmax.f32 %v3493_v62, 0.0  ;;  %v3629_v27 = vmax.f32 %v3501_v40, 0.0  ;;  %v3631_v62 = vmax.f32 %v3503_v19, 0.0  ;;  %v3637_v19 = vmax.f32 %v3509_v50, 0.0 }
 0x597   :  { %v3622_v60 = vmax.f32 %v3494_v32, 0.0  ;;  %v3632_v32 = vmax.f32 %v3504_v39, 0.0  ;;  %v3377_v29 = vmul.f32 %v7883_v38, %v7725_v28  ;;  %v3380_v9 = vmul.f32 %v7881_v41, %v9458_v17 }
 0x598   :  { %v3717_v0 = vpack.c.bf16 %v3621_v51, %v3617_v46  ;;  %v3721_v26 = vpack.c.bf16 %v3629_v27, %v3625_v7  ;;  %v3639_v27 = vmax.f32 %v3511_v54, 0.0  ;;  %v3517_v50 = vadd.f32 %v7885_v11, %v3378_v1  ;;  %v9460_v1 = vld [vmem:[#allocation15_spill] sm:$0xff] }
 0x599   :  { %v3718_v47 = vpack.c.bf16 %v3622_v60, %v3618_v42  ;;  %v3724_v42 = vpack.c.bf16 %v3632_v32, %v3628_v8  ;;  %v9447_v60 = vld [vmem:[#allocation104_spill] sm:$0xff]  ;;  %v3516_v54 = vadd.f32 %v7891_v43, %v3377_v29  ;;  %v9463_v29 = vld [vmem:[#allocation75_spill] sm:$0xff] }
 0x59a   :  { %v3366_v24 = vmul.f32 %v7877_v59, %v9447_v60  ;;  %v9453_v60 = vld [vmem:[#allocation106_spill] sm:$0xff]  ;;  %v3388_v17 = vmul.f32 %v7881_v41, %v9463_v29 }
 0x59c   :  { %v3505_v3 = vadd.f32 %v7885_v11, %v3366_v24  ;;  %v3374_v24 = vmul.f32 %v7877_v59, %v9453_v60  ;;  %v9459_v60 = vld [vmem:[#allocation108_spill] sm:$0xff]  ;;  %v3527_v56 = vadd.f32 %v7889_v21, %v3388_v17 }
 0x5a1   :  { %4047 = vmatmul.bf16.gmra.mxu0 %v3713_v44  ;;  %4136 = vmatmul.bf16.gmra.mxu1 %v3714_v22  ;;  %v9444_v44 = vld [vmem:[#allocation124_spill] sm:$0xff] }
 0x5a2   :  { %4225 = vmatmul.bf16.gmra.mxu2 %v3715_v53  ;;  %4314 = vmatmul.bf16.gmra.mxu3 %v3716_v5  ;;  %v3363_v22 = vmul.f32 %v7879_v10, %v9444_v44  ;;  %v9445_v53 = vld [vmem:[#allocation64_spill] sm:$0xff] }
 0x5a3   :  { %v3360_v5 = vmul.f32 %v7881_v41, %v9445_v53 }
 0x5a4   :  { %v3502_v57 = vadd.f32 %v7887_v16, %v3363_v22 }
 0x5a5   :  { %v3499_v37 = vadd.f32 %v7889_v21, %v3360_v5 }
 0x5a6   :  { %v3630_v34 = vmax.f32 %v3502_v57, 0.0  ;;  %v3512_v57 = vadd.f32 %v7891_v43, %v3373_v61  ;;  %v3381_v61 = vmul.f32 %v7883_v38, %v7735_v14  ;;  %v3519_v14 = vadd.f32 %v7889_v21, %v3380_v9 }
 0x5a7   :  { %v3627_v31 = vmax.f32 %v3499_v37, 0.0  ;;  %v3633_v37 = vmax.f32 %v3505_v3, 0.0  ;;  %v3513_v3 = vadd.f32 %v7885_v11, %v3374_v24  ;;  %v3382_v24 = vmul.f32 %v7877_v59, %v9459_v60 }
 0x5a8   :  { %v3722_v46 = vpack.c.bf16 %v3630_v34, %v3626_v58  ;;  %v3636_v58 = vmax.f32 %v3508_v18, 0.0  ;;  %v3640_v34 = vmax.f32 %v3512_v57, 0.0  ;;  %v3520_v18 = vadd.f32 %v7891_v43, %v3381_v61 }
 0x5a9   :  { %v3723_v51 = vpack.c.bf16 %v3631_v62, %v3627_v31  ;;  %v3641_v57 = vmax.f32 %v3513_v3, 0.0  ;;  %v3391_v60 = vmul.f32 %v7879_v10, %v7613_v13 }
 0x5b1   :  { %4052 = vmatmul.bf16.gmra.mxu0 %v3717_v0  ;;  %4141 = vmatmul.bf16.gmra.mxu1 %v3718_v47  ;;  %v3367_v0 = vmul.f32 %v7879_v10, %v9449_v33  ;;  %v9450_v47 = vld [vmem:[#allocation70_spill] sm:$0xff]  ;;  %v9455_v33 = vld [vmem:[#allocation127_spill] sm:$0xff] }
 0x5b2   :  { %4230 = vmatmul.bf16.gmra.mxu2 %v3719_v15  ;;  %4319 = vmatmul.bf16.gmra.mxu3 %v3720_v48  ;;  %v3368_v15 = vmul.f32 %v7881_v41, %v9450_v47  ;;  %v9451_v48 = vld [vmem:[#allocation126_spill] sm:$0xff]  ;;  %v9456_v47 = vld [vmem:[#allocation72_spill] sm:$0xff] }
 0x5b3   :  { %v3371_v4 = vmul.f32 %v7879_v10, %v9451_v48  ;;  %v3506_v30 = vadd.f32 %v7887_v16, %v3367_v0  ;;  %v3375_v0 = vmul.f32 %v7879_v10, %v9455_v33  ;;  %v9457_v48 = vld [vmem:[#allocation128_spill] sm:$0xff]  ;;  %v3383_v33 = vmul.f32 %v7879_v10, %v9460_v1 }
 0x5b4   :  { %v3507_v55 = vadd.f32 %v7889_v21, %v3368_v15  ;;  %v3376_v15 = vmul.f32 %v7881_v41, %v9456_v47  ;;  %v9465_v1 = vld [vmem:[#allocation76_spill] sm:$0xff] }
 0x5b5   :  { %v3510_v45 = vadd.f32 %v7887_v16, %v3371_v4  ;;  %v3634_v52 = vmax.f32 %v3506_v30, 0.0  ;;  %v3379_v4 = vmul.f32 %v7879_v10, %v9457_v48  ;;  %v3514_v30 = vadd.f32 %v7887_v16, %v3375_v0  ;;  %v9461_v0 = vld [vmem:[#allocation74_spill] sm:$0xff] }
 0x5b6   :  { %v3635_v7 = vmax.f32 %v3507_v55, 0.0  ;;  %v3384_v47 = vmul.f32 %v7881_v41, %v9461_v0  ;;  %v9466_v0 = vld [vmem:[#allocation33_spill] sm:$0xff] }
 0x5b7   :  { %v3638_v39 = vmax.f32 %v3510_v45, 0.0  ;;  %v3518_v28 = vadd.f32 %v7887_v16, %v3379_v4  ;;  %v3515_v45 = vadd.f32 %v7889_v21, %v3376_v15  ;;  %v9462_v15 = vld [vmem:[#allocation16_spill] sm:$0xff]  ;;  %v3385_v4 = vmul.f32 %v7883_v38, %v7743_v20 }
 0x5b8   :  { %v3387_v48 = vmul.f32 %v7879_v10, %v9462_v15  ;;  %v9467_v15 = vld [vmem:[#allocation25_spill] sm:$0xff] }
 0x5ba   :  { %v3526_v20 = vadd.f32 %v7887_v16, %v3387_v48  ;;  %v9468_v48 = vld [vmem:[#allocation109_spill] sm:$0xff] }
 0x5be   :  { %v4018_v36 = vpop.f32.mrf.mxu0  ;;  %v4107_v49 = vpop.f32.mrf.mxu1 }
 0x5bf   :  { %v4108_v25 = vadd.f32 %v4107_v49, %v4018_v36 }
 0x5c1   :  { %4057 = vmatmul.bf16.gmra.mxu0 %v3721_v26  ;;  %4146 = vmatmul.bf16.gmra.mxu1 %v3722_v46  ;;  %v3726_v26 = vpack.c.bf16 %v3638_v39, %v3634_v52  ;;  %v3646_v52 = vmax.f32 %v3518_v28, 0.0  ;;  %v3643_v39 = vmax.f32 %v3515_v45, 0.0  ;;  %v3524_v28 = vadd.f32 %v7891_v43, %v3385_v4 }
 0x5c2   :  { %4235 = vmatmul.bf16.gmra.mxu2 %v3723_v51  ;;  %4324 = vmatmul.bf16.gmra.mxu3 %v3724_v42  ;;  %v3727_v51 = vpack.c.bf16 %v3639_v27, %v3635_v7  ;;  %v3728_v42 = vpack.c.bf16 %v3640_v34, %v3636_v58  ;;  %v3647_v7 = vmax.f32 %v3519_v14, 0.0  ;;  %v3644_v27 = vmax.f32 %v3516_v54, 0.0 }
 0x5c3   :  { %v3648_v58 = vmax.f32 %v3520_v18, 0.0  ;;  %v3528_v45 = vadd.f32 %v7891_v43, %v3389_v2 }
 0x5c5   :  { %v4196_v63 = vpop.f32.mrf.mxu2  ;;  %v4285_v44 = vpop.f32.mrf.mxu3 }
 0x5c6   :  { %v4197_v22 = vadd.f32 %v4196_v63, %v4108_v25  ;;  %v4020_v53 = vpop.f32.mrf.mxu0  ;;  %v4109_v5 = vpop.f32.mrf.mxu1  ;;  %v3725_v25 = vpack.c.bf16 %v3637_v19, %v3633_v37  ;;  %v3645_v37 = vmax.f32 %v3517_v50, 0.0  ;;  %v3642_v19 = vmax.f32 %v3514_v30, 0.0 }
 0x5c7   :  { %v4110_v12 = vadd.f32 %v4109_v5, %v4020_v53  ;;  %v3522_v50 = vadd.f32 %v7887_v16, %v3383_v33  ;;  %v3395_v33 = vmul.f32 %v7879_v10, %v9465_v1  ;;  %v9473_v1 = vld [vmem:[#allocation31_spill] sm:$0xff] }
 0x5c8   :  { %v8130_v40 = vadd.f32 %v4285_v44, %v4197_v22 }
 0x5c9   :  { %v3650_v18 = vmax.f32 %v3522_v50, 0.0 }
 0x5cd   :  { %v4198_v31 = vpop.f32.mrf.mxu2  ;;  %v4287_v62 = vpop.f32.mrf.mxu3 }
 0x5ce   :  { %v4199_v8 = vadd.f32 %v4198_v31, %v4110_v12  ;;  %v4023_v32 = vpop.f32.mrf.mxu0  ;;  %v4112_v36 = vpop.f32.mrf.mxu1 }
 0x5cf   :  { %v4113_v49 = vadd.f32 %v4112_v36, %v4023_v32 }
 0x5d0   :  { %v8135_v46 = vadd.f32 %v4287_v62, %v4199_v8 }
 0x5d1   :  { %4062 = vmatmul.bf16.gmra.mxu0 %v3725_v25  ;;  %4151 = vmatmul.bf16.gmra.mxu1 %v3726_v26  ;;  %v3730_v25 = vpack.c.bf16 %v3646_v52, %v3642_v19  ;;  %v3655_v19 = vmax.f32 %v3527_v56, 0.0  ;;  %v3652_v52 = vmax.f32 %v3524_v28, 0.0 }
 0x5d2   :  { %4240 = vmatmul.bf16.gmra.mxu2 %v3727_v51  ;;  %4329 = vmatmul.bf16.gmra.mxu3 %v3728_v42  ;;  %v3731_v51 = vpack.c.bf16 %v3647_v7, %v3643_v39  ;;  %v3732_v42 = vpack.c.bf16 %v3648_v58, %v3644_v27  ;;  %v3656_v39 = vmax.f32 %v3528_v45, 0.0 }
 0x5d5   :  { %v4201_v63 = vpop.f32.mrf.mxu2  ;;  %v4290_v44 = vpop.f32.mrf.mxu3 }
 0x5d6   :  { %v4202_v22 = vadd.f32 %v4201_v63, %v4113_v49  ;;  %v4025_v53 = vpop.f32.mrf.mxu0  ;;  %v4114_v5 = vpop.f32.mrf.mxu1  ;;  %v3729_v49 = vpack.c.bf16 %v3645_v37, %v3641_v57  ;;  %v3654_v57 = vmax.f32 %v3526_v20, 0.0 }
 0x5d7   :  { %v4115_v12 = vadd.f32 %v4114_v5, %v4025_v53  ;;  %v3521_v53 = vadd.f32 %v7885_v11, %v3382_v24  ;;  %v3525_v5 = vadd.f32 %v7885_v11, %v3386_v23  ;;  %v9464_v24 = vld [vmem:[#allocation17_spill] sm:$0xff] }
 0x5d8   :  { %v8158_v55 = vadd.f32 %v4290_v44, %v4202_v22  ;;  %v3392_v23 = vmul.f32 %v7881_v41, %v9464_v24  ;;  %v9472_v24 = vld [vmem:[#allocation34_spill] sm:$0xff] }
 0x5d9   :  { %v3649_v14 = vmax.f32 %v3521_v53, 0.0  ;;  %v3653_v54 = vmax.f32 %v3525_v5, 0.0 }
 0x5da   :  { %v3531_v53 = vadd.f32 %v7889_v21, %v3392_v23  ;;  %v3400_v23 = vmul.f32 %v7881_v41, %v9472_v24  ;;  %v9479_v24 = vld [vmem:[#allocation32_spill] sm:$0xff] }
 0x5dd   :  { %v4203_v34 = vpop.f32.mrf.mxu2  ;;  %v4292_v31 = vpop.f32.mrf.mxu3 }
 0x5de   :  { %v4204_v62 = vadd.f32 %v4203_v34, %v4115_v12  ;;  %v4028_v8 = vpop.f32.mrf.mxu0  ;;  %v4117_v32 = vpop.f32.mrf.mxu1  ;;  %v3523_v12 = vadd.f32 %v7889_v21, %v3384_v47  ;;  %v3393_v47 = vmul.f32 %v7883_v38, %v9466_v0  ;;  %v9474_v0 = vld [vmem:[#allocation18_spill] sm:$0xff] }
 0x5df   :  { %v4118_v36 = vadd.f32 %v4117_v32, %v4028_v8  ;;  %v3733_v8 = vpack.c.bf16 %v3653_v54, %v3649_v14  ;;  %v3734_v32 = vpack.c.bf16 %v3654_v57, %v3650_v18  ;;  %v3659_v14 = vmax.f32 %v3531_v53, 0.0 }
 0x5e0   :  { %v8163_v26 = vadd.f32 %v4292_v31, %v4204_v62  ;;  %v3651_v37 = vmax.f32 %v3523_v12, 0.0  ;;  %v3532_v50 = vadd.f32 %v7891_v43, %v3393_v47  ;;  %v3401_v47 = vmul.f32 %v7883_v38, %v9474_v0  ;;  %v9481_v0 = vld [vmem:[#allocation116_spill] sm:$0xff] }
 0x5e1   :  { %4067 = vmatmul.bf16.gmra.mxu0 %v3729_v49  ;;  %4156 = vmatmul.bf16.gmra.mxu1 %v3730_v25  ;;  %v3736_v25 = vpack.c.bf16 %v3656_v39, %v3652_v52  ;;  %v3539_v53 = vadd.f32 %v7889_v21, %v3400_v23  ;;  %v3407_v23 = vmul.f32 %v7879_v10, %v9479_v24  ;;  %v9486_v24 = vld [vmem:[#allocation90_spill] sm:$0xff] }
 0x5e2   :  { %4245 = vmatmul.bf16.gmra.mxu2 %v3731_v51  ;;  %4334 = vmatmul.bf16.gmra.mxu3 %v3732_v42  ;;  %v3735_v49 = vpack.c.bf16 %v3655_v19, %v3651_v37  ;;  %v3390_v51 = vmul.f32 %v7877_v59, %v7661_v6  ;;  %v3394_v42 = vmul.f32 %v7877_v59, %v7683_v35  ;;  %v3660_v18 = vmax.f32 %v3532_v50, 0.0 }
 0x5e3   :  { %v3396_v6 = vmul.f32 %v7881_v41, %v9467_v15  ;;  %v3397_v35 = vmul.f32 %v7883_v38, %v9468_v48  ;;  %v9475_v15 = vld [vmem:[#allocation36_spill] sm:$0xff]  ;;  %v9476_v48 = vld [vmem:[#allocation77_spill] sm:$0xff] }
 0x5e5   :  { %v4206_v9 = vpop.f32.mrf.mxu2  ;;  %v4295_v61 = vpop.f32.mrf.mxu3  ;;  %v3536_v20 = vadd.f32 %v7891_v43, %v3397_v35  ;;  %v3405_v35 = vmul.f32 %v7883_v38, %v9476_v48  ;;  %v9483_v48 = vld [vmem:[#allocation38_spill] sm:$0xff] }
 0x5e6   :  { %v4207_v63 = vadd.f32 %v4206_v9, %v4118_v36  ;;  %v4030_v44 = vpop.f32.mrf.mxu0  ;;  %v4119_v22 = vpop.f32.mrf.mxu1  ;;  %v3529_v9 = vadd.f32 %v7885_v11, %v3390_v51 }
 0x5e7   :  { %v4120_v3 = vadd.f32 %v4119_v22, %v4030_v44  ;;  %v3530_v44 = vadd.f32 %v7887_v16, %v3391_v60  ;;  %v3534_v22 = vadd.f32 %v7887_v16, %v3395_v33  ;;  %v3664_v57 = vmax.f32 %v3536_v20, 0.0 }
 0x5e8   :  { %v8186_v30 = vadd.f32 %v4295_v61, %v4207_v63  ;;  %v3533_v61 = vadd.f32 %v7885_v11, %v3394_v42  ;;  %v3657_v12 = vmax.f32 %v3529_v9, 0.0  ;;  %v9471_v42 = vld [vmem:[#allocation30_spill] sm:$0xff]  ;;  %v3403_v33 = vmul.f32 %v7879_v10, %v9473_v1  ;;  %v9480_v1 = vld [vmem:[#allocation37_spill] sm:$0xff] }
 0x5e9   :  { %v3658_v28 = vmax.f32 %v3530_v44, 0.0  ;;  %v3662_v45 = vmax.f32 %v3534_v22, 0.0  ;;  %v3399_v60 = vmul.f32 %v7879_v10, %v9471_v42  ;;  %v3540_v20 = vadd.f32 %v7891_v43, %v3401_v47  ;;  %v9478_v42 = vld [vmem:[#allocation89_spill] sm:$0xff] }
 0x5ea   :  { %v3661_v56 = vmax.f32 %v3533_v61, 0.0  ;;  %v3542_v22 = vadd.f32 %v7887_v16, %v3403_v33  ;;  %v3408_v33 = vmul.f32 %v7881_v41, %v9480_v1  ;;  %v3411_v47 = vmul.f32 %v7879_v10, %v9481_v0  ;;  %v9487_v1 = vld [vmem:[#allocation91_spill] sm:$0xff]  ;;  %v9488_v0 = vld [vmem:[#allocation117_spill] sm:$0xff] }
 0x5eb   :  { %v3538_v44 = vadd.f32 %v7887_v16, %v3399_v60  ;;  %v3410_v60 = vmul.f32 %v7877_v59, %v9478_v42 }
 0x5ed   :  { %v4208_v7 = vpop.f32.mrf.mxu2  ;;  %v4297_v27 = vpop.f32.mrf.mxu3 }
 0x5ee   :  { %v4209_v58 = vadd.f32 %v4208_v7, %v4120_v3  ;;  %v4033_v34 = vpop.f32.mrf.mxu0  ;;  %v4122_v31 = vpop.f32.mrf.mxu1  ;;  %v3535_v3 = vadd.f32 %v7889_v21, %v3396_v6  ;;  %v3404_v6 = vmul.f32 %v7881_v41, %v9475_v15  ;;  %v9482_v15 = vld [vmem:[#allocation110_spill] sm:$0xff] }
 0x5ef   :  { %v4123_v62 = vadd.f32 %v4122_v31, %v4033_v34  ;;  %v3738_v34 = vpack.c.bf16 %v3662_v45, %v3658_v28  ;;  %v3666_v45 = vmax.f32 %v3538_v44, 0.0  ;;  %v3549_v44 = vadd.f32 %v7885_v11, %v3410_v60 }
 0x5f0   :  { %v8191_v36 = vadd.f32 %v4297_v27, %v4209_v58  ;;  %v3663_v54 = vmax.f32 %v3535_v3, 0.0  ;;  %v3737_v58 = vpack.c.bf16 %v3661_v56, %v3657_v12  ;;  %v3543_v50 = vadd.f32 %v7889_v21, %v3404_v6 }
 0x5f1   :  { %4072 = vmatmul.bf16.gmra.mxu0 %v3733_v8  ;;  %4161 = vmatmul.bf16.gmra.mxu1 %v3734_v32  ;;  %v3740_v8 = vpack.c.bf16 %v3664_v57, %v3660_v18  ;;  %v9469_v32 = vld [vmem:[#allocation86_spill] sm:$0xff]  ;;  %v3544_v12 = vadd.f32 %v7891_v43, %v3405_v35  ;;  %v3668_v57 = vmax.f32 %v3540_v20, 0.0  ;;  %v3409_v6 = vmul.f32 %v7883_v38, %v9482_v15  ;;  %v9489_v15 = vld [vmem:[#allocation39_spill] sm:$0xff] }
 0x5f2   :  { %4250 = vmatmul.bf16.gmra.mxu2 %v3735_v49  ;;  %4339 = vmatmul.bf16.gmra.mxu3 %v3736_v25  ;;  %v3398_v49 = vmul.f32 %v7877_v59, %v9469_v32  ;;  %v9470_v25 = vld [vmem:[#allocation87_spill] sm:$0xff]  ;;  %v3671_v18 = vmax.f32 %v3543_v50, 0.0  ;;  %v3412_v35 = vmul.f32 %v7881_v41, %v9483_v48  ;;  %v3550_v50 = vadd.f32 %v7887_v16, %v3411_v47  ;;  %v9490_v48 = vld [vmem:[#allocation118_spill] sm:$0xff] }
 0x5f3   :  { %v3402_v51 = vmul.f32 %v7877_v59, %v9470_v25  ;;  %v9477_v25 = vld [vmem:[#allocation88_spill] sm:$0xff]  ;;  %v3547_v20 = vadd.f32 %v7889_v21, %v3408_v33  ;;  %v3418_v33 = vmul.f32 %v7877_v59, %v9487_v1  ;;  %v3415_v47 = vmul.f32 %v7879_v10, %v9488_v0 }
 0x5f4   :  { %v3537_v9 = vadd.f32 %v7885_v11, %v3398_v49 }
 0x5f5   :  { %v4211_v4 = vpop.f32.mrf.mxu2  ;;  %v4300_v29 = vpop.f32.mrf.mxu3  ;;  %v3541_v61 = vadd.f32 %v7885_v11, %v3402_v51  ;;  %v3406_v51 = vmul.f32 %v7877_v59, %v9477_v25 }
 0x5f6   :  { %v4212_v17 = vadd.f32 %v4211_v4, %v4123_v62  ;;  %v4035_v2 = vpop.f32.mrf.mxu0  ;;  %v4124_v13 = vpop.f32.mrf.mxu1  ;;  %v3739_v62 = vpack.c.bf16 %v3663_v54, %v3659_v14  ;;  %v3665_v56 = vmax.f32 %v3537_v9, 0.0  ;;  %v3670_v14 = vmax.f32 %v3542_v22, 0.0 }
 0x5f7   :  { %v4125_v63 = vadd.f32 %v4124_v13, %v4035_v2  ;;  %v3669_v28 = vmax.f32 %v3541_v61, 0.0  ;;  %v3667_v54 = vmax.f32 %v3539_v53, 0.0  ;;  %v3546_v53 = vadd.f32 %v7887_v16, %v3407_v23 }
 0x5f8   :  { %v8214_v5 = vadd.f32 %v4300_v29, %v4212_v17  ;;  %v3414_v23 = vmul.f32 %v7877_v59, %v9486_v24 }
 0x5f9   :  { %v3743_v32 = vpack.c.bf16 %v3671_v18, %v3667_v54  ;;  %v3677_v54 = vmax.f32 %v3549_v44, 0.0  ;;  %v3674_v18 = vmax.f32 %v3546_v53, 0.0 }
 0x5fa   :  { %v3553_v53 = vadd.f32 %v7885_v11, %v3414_v23 }
 0x5fd   :  { %v4213_v37 = vpop.f32.mrf.mxu2  ;;  %v4302_v19 = vpop.f32.mrf.mxu3 }
 0x5fe   :  { %v4214_v52 = vadd.f32 %v4213_v37, %v4125_v63  ;;  %v4038_v39 = vpop.f32.mrf.mxu0  ;;  %v4127_v7 = vpop.f32.mrf.mxu1  ;;  %v3672_v37 = vmax.f32 %v3544_v12, 0.0 }
 0x5ff   :  { %v4128_v27 = vadd.f32 %v4127_v7, %v4038_v39 }
 0x600   :  { %v8219_v31 = vadd.f32 %v4302_v19, %v4214_v52  ;;  %v3744_v49 = vpack.c.bf16 %v3672_v37, %v3668_v57  ;;  %v3678_v57 = vmax.f32 %v3550_v50, 0.0  ;;  %v3675_v37 = vmax.f32 %v3547_v20, 0.0 }
 0x601   :  { %4077 = vmatmul.bf16.gmra.mxu0 %v3737_v58  ;;  %4166 = vmatmul.bf16.gmra.mxu1 %v3738_v34  ;;  %v3741_v34 = vpack.c.bf16 %v3669_v28, %v3665_v56  ;;  %v3551_v56 = vadd.f32 %v7889_v21, %v3412_v35  ;;  %v3548_v28 = vadd.f32 %v7891_v43, %v3409_v6 }
 0x602   :  { %4255 = vmatmul.bf16.gmra.mxu2 %v3739_v62  ;;  %4344 = vmatmul.bf16.gmra.mxu3 %v3740_v8  ;;  %v3742_v62 = vpack.c.bf16 %v3670_v14, %v3666_v45  ;;  %v3746_v25 = vpack.c.bf16 %v3678_v57, %v3674_v18  ;;  %v3416_v6 = vmul.f32 %v7881_v41, %v9489_v15 }
 0x603   :  { %v3419_v35 = vmul.f32 %v7879_v10, %v9490_v48  ;;  %v3557_v50 = vadd.f32 %v7885_v11, %v3418_v33  ;;  %v3554_v10 = vadd.f32 %v7887_v16, %v3415_v47 }
 0x605   :  { %v4216_v4 = vpop.f32.mrf.mxu2  ;;  %v4305_v29 = vpop.f32.mrf.mxu3  ;;  %v3685_v18 = vmax.f32 %v3557_v50, 0.0  ;;  %v3682_v57 = vmax.f32 %v3554_v10, 0.0 }
 0x606   :  { %v4217_v17 = vadd.f32 %v4216_v4, %v4128_v27  ;;  %v4040_v2 = vpop.f32.mrf.mxu0  ;;  %v4129_v13 = vpop.f32.mrf.mxu1  ;;  %v9484_v4 = vld [vmem:[#allocation19_spill] sm:$0xff] }
 0x607   :  { %v4130_v63 = vadd.f32 %v4129_v13, %v4040_v2 }
 0x608   :  { %v8242_v3 = vadd.f32 %v4305_v29, %v4217_v17  ;;  %v3413_v29 = vmul.f32 %v7883_v38, %v9484_v4  ;;  %v9491_v4 = vld [vmem:[#allocation78_spill] sm:$0xff] }
 0x60a   :  { %v3552_v45 = vadd.f32 %v7891_v43, %v3413_v29  ;;  %v3421_v29 = vmul.f32 %v7883_v38, %v9491_v4 }
 0x60d   :  { %v4218_v19 = vpop.f32.mrf.mxu2  ;;  %v4307_v52 = vpop.f32.mrf.mxu3 }
 0x60e   :  { %v4219_v39 = vadd.f32 %v4218_v19, %v4130_v63  ;;  %v4043_v7 = vpop.f32.mrf.mxu0  ;;  %v4132_v27 = vpop.f32.mrf.mxu1  ;;  %v3545_v63 = vadd.f32 %v7885_v11, %v3406_v51  ;;  %v3679_v19 = vmax.f32 %v3551_v56, 0.0  ;;  %v3558_v56 = vadd.f32 %v7887_v16, %v3419_v35 }
 0x60f   :  { %v4133_v58 = vadd.f32 %v4132_v27, %v4043_v7 }
 0x610   :  { %v8247_v8 = vadd.f32 %v4307_v52, %v4219_v39  ;;  %v3673_v14 = vmax.f32 %v3545_v63, 0.0  ;;  %v3676_v52 = vmax.f32 %v3548_v28, 0.0  ;;  %v3680_v39 = vmax.f32 %v3552_v45, 0.0 }
 0x611   :  { %4082 = vmatmul.bf16.gmra.mxu0 %v3741_v34  ;;  %4171 = vmatmul.bf16.gmra.mxu1 %v3742_v62  ;;  %v3747_v42 = vpack.c.bf16 %v3679_v19, %v3675_v37  ;;  %v3555_v28 = vadd.f32 %v7889_v21, %v3416_v6  ;;  %v3686_v37 = vmax.f32 %v3558_v56, 0.0 }
 0x612   :  { %4260 = vmatmul.bf16.gmra.mxu2 %v3743_v32  ;;  %4349 = vmatmul.bf16.gmra.mxu3 %v3744_v49  ;;  %v3745_v49 = vpack.c.bf16 %v3677_v54, %v3673_v14  ;;  %v3748_v60 = vpack.c.bf16 %v3680_v39, %v3676_v52  ;;  %v3560_v14 = vadd.f32 %v7891_v43, %v3421_v29  ;;  %v3681_v54 = vmax.f32 %v3553_v53, 0.0 }
 0x613   :  { %v3683_v11 = vmax.f32 %v3555_v28, 0.0 }
 0x614   :  { %v3688_v39 = vmax.f32 %v3560_v14, 0.0 }
 0x615   :  { %v4221_v17 = vpop.f32.mrf.mxu2  ;;  %v4310_v2 = vpop.f32.mrf.mxu3 }
 0x616   :  { %v4222_v13 = vadd.f32 %v4221_v17, %v4133_v58  ;;  %v4045_v9 = vpop.f32.mrf.mxu0  ;;  %v4134_v61 = vpop.f32.mrf.mxu1  ;;  %v9492_v17 = vld [vmem:[#allocation42_spill] sm:$0xff] }
 0x617   :  { %v4135_v22 = vadd.f32 %v4134_v61, %v4045_v9 }
 0x618   :  { %v8270_v12 = vadd.f32 %v4310_v2, %v4222_v13  ;;  %v3417_v2 = vmul.f32 %v7883_v38, %v9492_v17  ;;  %v9493_v13 = vld [vmem:[#allocation129_spill] sm:$0xff] }
 0x619   :  { %v3420_v59 = vmul.f32 %v7881_v41, %v9493_v13 }
 0x61a   :  { %v3556_v45 = vadd.f32 %v7891_v43, %v3417_v2 }
 0x61b   :  { %v3559_v41 = vadd.f32 %v7889_v21, %v3420_v59  ;;  %v3750_v21 = vpack.c.bf16 %v3686_v37, %v3682_v57 }
 0x61c   :  { %v3684_v52 = vmax.f32 %v3556_v45, 0.0 }
 0x61d   :  { %v4223_v7 = vpop.f32.mrf.mxu2  ;;  %v4312_v27 = vpop.f32.mrf.mxu3  ;;  %v3687_v19 = vmax.f32 %v3559_v41, 0.0 }
 0x61e   :  { %v4224_v58 = vadd.f32 %v4223_v7, %v4135_v22  ;;  %v4048_v34 = vpop.f32.mrf.mxu0  ;;  %v4137_v62 = vpop.f32.mrf.mxu1  ;;  %v3752_v43 = vpack.c.bf16 %v3688_v39, %v3684_v52 }
 0x61f   :  { %v4138_v32 = vadd.f32 %v4137_v62, %v4048_v34 }
 0x620   :  { %v8275_v51 = vadd.f32 %v4312_v27, %v4224_v58 }
 0x621   :  { %4087 = vmatmul.bf16.gmra.mxu0 %v3745_v49  ;;  %4176 = vmatmul.bf16.gmra.mxu1 %v3746_v25  ;;  %v3751_v25 = vpack.c.bf16 %v3687_v19, %v3683_v11 }
 0x622   :  { %9485 = vst [vmem:[#allocation111_spill] sm:$0xff] %v8275_v51  ;;  %4265 = vmatmul.bf16.gmra.mxu2 %v3747_v42  ;;  %4354 = vmatmul.bf16.gmra.mxu3 %v3748_v60 }
 0x625   :  { %v4226_v9 = vpop.f32.mrf.mxu2  ;;  %v4315_v61 = vpop.f32.mrf.mxu3 }
 0x626   :  { %v4227_v63 = vadd.f32 %v4226_v9, %v4138_v32  ;;  %v4050_v44 = vpop.f32.mrf.mxu0  ;;  %v4139_v22 = vpop.f32.mrf.mxu1  ;;  %v3749_v32 = vpack.c.bf16 %v3685_v18, %v3681_v54 }
 0x627   :  { %v4140_v20 = vadd.f32 %v4139_v22, %v4050_v44 }
 0x628   :  { %v8298_v38 = vadd.f32 %v4315_v61, %v4227_v63 }
 0x62a   :  { %9494 = vst [vmem:[#allocation20_spill] sm:$0xff] %v8298_v38 }
 0x62d   :  { %v4228_v7 = vpop.f32.mrf.mxu2  ;;  %v4317_v16 = vpop.f32.mrf.mxu3 }
 0x62e   :  { %v4229_v27 = vadd.f32 %v4228_v7, %v4140_v20  ;;  %v4053_v58 = vpop.f32.mrf.mxu0  ;;  %v4142_v34 = vpop.f32.mrf.mxu1 }
 0x62f   :  { %v4143_v62 = vadd.f32 %v4142_v34, %v4053_v58 }
 0x630   :  { %v8303_v49 = vadd.f32 %v4317_v16, %v4229_v27 }
 0x631   :  { %4092 = vmatmul.bf16.gmra.mxu0 %v3749_v32  ;;  %4181 = vmatmul.bf16.gmra.mxu1 %v3750_v21 }
 0x632   :  { %9495 = vst [vmem:[#allocation79_spill] sm:$0xff] %v8303_v49  ;;  %4270 = vmatmul.bf16.gmra.mxu2 %v3751_v25  ;;  %4359 = vmatmul.bf16.gmra.mxu3 %v3752_v43 }
 0x635   :  { %v4231_v42 = vpop.f32.mrf.mxu2  ;;  %v4320_v60 = vpop.f32.mrf.mxu3 }
 0x636   :  { %v4232_v24 = vadd.f32 %v4231_v42, %v4143_v62  ;;  %v4055_v23 = vpop.f32.mrf.mxu0  ;;  %v4144_v1 = vpop.f32.mrf.mxu1 }
 0x637   :  { %v4145_v33 = vadd.f32 %v4144_v1, %v4055_v23 }
 0x638   :  { %v8305_v0 = vadd.f32 %v4320_v60, %v4232_v24 }
 0x63d   :  { %v4233_v47 = vpop.f32.mrf.mxu2  ;;  %v4322_v15 = vpop.f32.mrf.mxu3 }
 0x63e   :  { %v4234_v6 = vadd.f32 %v4233_v47, %v4145_v33  ;;  %v4058_v48 = vpop.f32.mrf.mxu0  ;;  %v4147_v35 = vpop.f32.mrf.mxu1 }
 0x63f   :  { %v4148_v4 = vadd.f32 %v4147_v35, %v4058_v48 }
 0x640   :  { %v8307_v29 = vadd.f32 %v4322_v15, %v4234_v6 }
 0x642   :  { %9496 = vst [vmem:[#allocation112_spill] sm:$0xff] %v8307_v29 }
 0x645   :  { %v4236_v17 = vpop.f32.mrf.mxu2  ;;  %v4325_v2 = vpop.f32.mrf.mxu3 }
 0x646   :  { %v4237_v13 = vadd.f32 %v4236_v17, %v4148_v4  ;;  %v4060_v59 = vpop.f32.mrf.mxu0  ;;  %v4149_v9 = vpop.f32.mrf.mxu1  ;;  %v4536_v17 = vadd.f32 %v8135_v46, %v8130_v40 }
 0x647   :  { %v4150_v61 = vadd.f32 %v4149_v9, %v4060_v59 }
 0x648   :  { %v8309_v63 = vadd.f32 %v4325_v2, %v4237_v13  ;;  %v4537_v59 = vadd.f32 %v4536_v17, %v8158_v55 }
 0x64a   :  { %v4538_v9 = vadd.f32 %v4537_v59, %v8163_v26 }
 0x64d   :  { %v4238_v44 = vpop.f32.mrf.mxu2  ;;  %v4327_v22 = vpop.f32.mrf.mxu3 }
 0x64e   :  { %v4239_v53 = vadd.f32 %v4238_v44, %v4150_v61  ;;  %v4063_v50 = vpop.f32.mrf.mxu0  ;;  %v4152_v20 = vpop.f32.mrf.mxu1  ;;  %v4539_v61 = vadd.f32 %v4538_v9, %v8186_v30 }
 0x64f   :  { %v4153_v10 = vadd.f32 %v4152_v20, %v4063_v50 }
 0x650   :  { %v8311_v56 = vadd.f32 %v4327_v22, %v4239_v53  ;;  %v4540_v53 = vadd.f32 %v4539_v61, %v8191_v36 }
 0x655   :  { %v4241_v28 = vpop.f32.mrf.mxu2  ;;  %v4330_v41 = vpop.f32.mrf.mxu3 }
 0x656   :  { %v4242_v45 = vadd.f32 %v4241_v28, %v4153_v10  ;;  %v4065_v14 = vpop.f32.mrf.mxu0  ;;  %v4154_v54 = vpop.f32.mrf.mxu1  ;;  %v4541_v10 = vadd.f32 %v4540_v53, %v8214_v5 }
 0x657   :  { %v4155_v18 = vadd.f32 %v4154_v54, %v4065_v14 }
 0x658   :  { %v8313_v57 = vadd.f32 %v4330_v41, %v4242_v45  ;;  %v4542_v28 = vadd.f32 %v4541_v10, %v8219_v31 }
 0x65a   :  { %v4543_v41 = vadd.f32 %v4542_v28, %v8242_v3 }
 0x65c   :  { %v4544_v54 = vadd.f32 %v4543_v41, %v8247_v8 }
 0x65d   :  { %v4243_v37 = vpop.f32.mrf.mxu2  ;;  %v4332_v11 = vpop.f32.mrf.mxu3 }
 0x65e   :  { %v4244_v19 = vadd.f32 %v4243_v37, %v4155_v18  ;;  %v4068_v52 = vpop.f32.mrf.mxu0  ;;  %v4157_v39 = vpop.f32.mrf.mxu1 }
 0x65f   :  { %v4158_v7 = vadd.f32 %v4157_v39, %v4068_v52 }
 0x660   :  { %v8315_v16 = vadd.f32 %v4332_v11, %v4244_v19  ;;  %v4545_v11 = vadd.f32 %v4544_v54, %v8270_v12 }
 0x662   :  { %v4546_v19 = vadd.f32 %v4545_v11, %v8275_v51 }
 0x664   :  { %v4547_v52 = vadd.f32 %v4546_v19, %v8298_v38 }
 0x665   :  { %v4246_v27 = vpop.f32.mrf.mxu2  ;;  %v4335_v58 = vpop.f32.mrf.mxu3 }
 0x666   :  { %v4247_v34 = vadd.f32 %v4246_v27, %v4158_v7  ;;  %v4070_v62 = vpop.f32.mrf.mxu0  ;;  %v4159_v32 = vpop.f32.mrf.mxu1  ;;  %v4548_v27 = vadd.f32 %v4547_v52, %v8303_v49 }
 0x667   :  { %v4160_v61 = vadd.f32 %v4159_v32, %v4070_v62 }
 0x668   :  { %v8317_v21 = vadd.f32 %v4335_v58, %v4247_v34  ;;  %v4549_v17 = vadd.f32 %v4548_v27, %v8305_v0 }
 0x66a   :  { %v4550_v59 = vadd.f32 %v4549_v17, %v8307_v29 }
 0x66c   :  { %v4551_v9 = vadd.f32 %v4550_v59, %v8309_v63 }
 0x66d   :  { %v4248_v25 = vpop.f32.mrf.mxu2  ;;  %v4337_v43 = vpop.f32.mrf.mxu3 }
 0x66e   :  { %v4073_v42 = vpop.f32.mrf.mxu0  ;;  %v4162_v60 = vpop.f32.mrf.mxu1  ;;  %v4552_v28 = vadd.f32 %v4551_v9, %v8311_v56  ;;  %v4249_v41 = vadd.f32 %v4248_v25, %v4160_v61 }
 0x66f   :  { %v4163_v54 = vadd.f32 %v4162_v60, %v4073_v42 }
 0x670   :  { %v4553_v38 = vadd.f32 %v4552_v28, %v8313_v57  ;;  %v8339_v27 = vadd.f32 %v4337_v43, %v4249_v41 }
 0x672   :  { %v4554_v51 = vadd.f32 %v4553_v38, %v8315_v16 }
 0x674   :  { %v4555_v62 = vadd.f32 %v4554_v51, %v8317_v21 }
 0x675   :  { %v4251_v24 = vpop.f32.mrf.mxu2  ;;  %v4340_v23 = vpop.f32.mrf.mxu3 }
 0x676   :  { %v4075_v1 = vpop.f32.mrf.mxu0  ;;  %v4164_v33 = vpop.f32.mrf.mxu1  ;;  %v4252_v52 = vadd.f32 %v4251_v24, %v4163_v54  ;;  %v4556_v60 = vadd.f32 %v4555_v62, %v8339_v27 }
 0x677   :  { %v4165_v49 = vadd.f32 %v4164_v33, %v4075_v1 }
 0x678   :  { %v8342_v32 = vadd.f32 %v4340_v23, %v4252_v52 }
 0x67a   :  { %v4557_v43 = vadd.f32 %v4556_v60, %v8342_v32 }
 0x67d   :  { %v4253_v47 = vpop.f32.mrf.mxu2  ;;  %v4342_v15 = vpop.f32.mrf.mxu3 }
 0x67e   :  { %v4078_v6 = vpop.f32.mrf.mxu0  ;;  %v4167_v48 = vpop.f32.mrf.mxu1  ;;  %v4254_v17 = vadd.f32 %v4253_v47, %v4165_v49 }
 0x67f   :  { %v4168_v29 = vadd.f32 %v4167_v48, %v4078_v6 }
 0x680   :  { %v8345_v61 = vadd.f32 %v4342_v15, %v4254_v17 }
 0x682   :  { %v4558_v23 = vadd.f32 %v4557_v43, %v8345_v61 }
 0x685   :  { %v4256_v35 = vpop.f32.mrf.mxu2  ;;  %v4345_v4 = vpop.f32.mrf.mxu3 }
 0x686   :  { %v4080_v2 = vpop.f32.mrf.mxu0  ;;  %v4169_v13 = vpop.f32.mrf.mxu1  ;;  %v4257_v59 = vadd.f32 %v4256_v35, %v4168_v29 }
 0x687   :  { %v4170_v9 = vadd.f32 %v4169_v13, %v4080_v2 }
 0x688   :  { %v8348_v49 = vadd.f32 %v4345_v4, %v4257_v59 }
 0x68a   :  { %v4559_v35 = vadd.f32 %v4558_v23, %v8348_v49 }
 0x68d   :  { %v4258_v44 = vpop.f32.mrf.mxu2  ;;  %v4347_v22 = vpop.f32.mrf.mxu3 }
 0x68e   :  { %v4083_v50 = vpop.f32.mrf.mxu0  ;;  %v4172_v20 = vpop.f32.mrf.mxu1  ;;  %v4259_v24 = vadd.f32 %v4258_v44, %v4170_v9 }
 0x68f   :  { %v4173_v1 = vadd.f32 %v4172_v20, %v4083_v50 }
 0x690   :  { %v8351_v29 = vadd.f32 %v4347_v22, %v4259_v24 }
 0x692   :  { %v4560_v20 = vadd.f32 %v4559_v35, %v8351_v29 }
 0x695   :  { %v4261_v45 = vpop.f32.mrf.mxu2  ;;  %v4350_v14 = vpop.f32.mrf.mxu3 }
 0x696   :  { %v4085_v18 = vpop.f32.mrf.mxu0  ;;  %v4174_v37 = vpop.f32.mrf.mxu1  ;;  %v4262_v47 = vadd.f32 %v4261_v45, %v4173_v1  ;;  %v9497_v1 = vld [vmem:[#allocation28_spill] sm:$0xff] }
 0x697   :  { %v4175_v51 = vadd.f32 %v4174_v37, %v4085_v18 }
 0x698   :  { %v8354_v15 = vadd.f32 %v4350_v14, %v4262_v47 }
 0x69a   :  { %v4561_v37 = vadd.f32 %v4560_v20, %v8354_v15 }
 0x69d   :  { %v4263_v39 = vpop.f32.mrf.mxu2  ;;  %v4352_v7 = vpop.f32.mrf.mxu3 }
 0x69e   :  { %v4088_v58 = vpop.f32.mrf.mxu0  ;;  %v4177_v34 = vpop.f32.mrf.mxu1  ;;  %v4264_v6 = vadd.f32 %v4263_v39, %v4175_v51 }
 0x69f   :  { %v4178_v48 = vadd.f32 %v4177_v34, %v4088_v58 }
 0x6a0   :  { %v8357_v4 = vadd.f32 %v4352_v7, %v4264_v6 }
 0x6a2   :  { %v4562_v14 = vadd.f32 %v4561_v37, %v8357_v4 }
 0x6a5   :  { %v4266_v53 = vpop.f32.mrf.mxu2  ;;  %v4355_v10 = vpop.f32.mrf.mxu3 }
 0x6a6   :  { %v4090_v11 = vpop.f32.mrf.mxu0  ;;  %v4179_v19 = vpop.f32.mrf.mxu1  ;;  %v4267_v2 = vadd.f32 %v4266_v53, %v4178_v48 }
 0x6a7   :  { %v4180_v13 = vadd.f32 %v4179_v19, %v4090_v11 }
 0x6a8   :  { %v8360_v22 = vadd.f32 %v4355_v10, %v4267_v2 }
 0x6aa   :  { %v4563_v53 = vadd.f32 %v4562_v14, %v8360_v22 }
 0x6ad   :  { %v4268_v25 = vpop.f32.mrf.mxu2  ;;  %v4357_v42 = vpop.f32.mrf.mxu3 }
 0x6ae   :  { %v4093_v33 = vpop.f32.mrf.mxu0  ;;  %v4182_v38 = vpop.f32.mrf.mxu1  ;;  %v4269_v45 = vadd.f32 %v4268_v25, %v4180_v13 }
 0x6af   :  { %v4183_v18 = vadd.f32 %v4182_v38, %v4093_v33 }
 0x6b0   :  { %v8363_v28 = vadd.f32 %v4357_v42, %v4269_v45 }
 0x6b2   :  { %v4564_v11 = vadd.f32 %v4563_v53, %v8363_v28 }
 0x6b5   :  { %v4271_v44 = vpop.f32.mrf.mxu2  ;;  %v4360_v50 = vpop.f32.mrf.mxu3 }
 0x6b6   :  { %v4272_v39 = vadd.f32 %v4271_v44, %v4183_v18  ;;  %v4095_v58 = vpop.f32.mrf.mxu0  ;;  %v4184_v34 = vpop.f32.mrf.mxu1 }
 0x6b7   :  { %v4185_v54 = vadd.f32 %v4184_v34, %v4095_v58  ;;  %v9498_v34 = vld [vmem:[#allocation111_spill] sm:$0xff] }
 0x6b8   :  { %v8366_v41 = vadd.f32 %v4360_v50, %v4272_v39 }
 0x6ba   :  { %v4565_v10 = vadd.f32 %v4564_v11, %v8366_v41 }
 0x6bd   :  { %v4273_v7 = vpop.f32.mrf.mxu2  ;;  %v4362_v52 = vpop.f32.mrf.mxu3 }
 0x6be   :  { %v4274_v19 = vadd.f32 %v4273_v7, %v4185_v54  ;;  %v9499_v54 = vld [vmem:[#allocation20_spill] sm:$0xff] }
 0x6c0   :  { %v8370_v17 = vadd.f32 %v4362_v52, %v4274_v19  ;;  %v9500_v19 = vld [vmem:[#allocation79_spill] sm:$0xff] }
 0x6c2   :  { %v4566_v62 = vadd.f32 %v4565_v10, %v8370_v17 }
 0x6c4   :  { %v4567_v59 = vrot.slane %v4566_v62, 4 }
 0x6c6   :  { %v4568_v9 = vadd.f32 %v4567_v59, %v4566_v62 }
 0x6c8   :  { %v4569_v25 = vrot.slane %v4568_v9, 2 }
 0x6ca   :  { %v4570_v42 = vadd.f32 %v4569_v25, %v4568_v9 }
 0x6cc   :  { %v4571_v60 = vrot.slane %v4570_v42, 1 }
 0x6ce   :  { %v4572_v24 = vadd.f32 %v4571_v60, %v4570_v42  ;;  %v9501_v42 = vld [vmem:[#allocation112_spill] sm:$0xff] }
 0x6d0   :  { %v8374_v33 = vmul.f32 %v4572_v24, %v9497_v1 }
 0x6d2   :  { %v8378_v38 = vsub.f32 %v8130_v40, %v8374_v33  ;;  %v8382_v43 = vsub.f32 %v8135_v46, %v8374_v33  ;;  %v8386_v47 = vsub.f32 %v8158_v55, %v8374_v33  ;;  %v8394_v6 = vsub.f32 %v8163_v26, %v8374_v33 }
 0x6d3   :  { %v8398_v40 = vsub.f32 %v8186_v30, %v8374_v33  ;;  %v8404_v55 = vsub.f32 %v8191_v36, %v8374_v33  ;;  %v8410_v26 = vsub.f32 %v8214_v5, %v8374_v33  ;;  %v8416_v44 = vsub.f32 %v8219_v31, %v8374_v33 }
 0x6d4   :  { %v4606_v51 = vmul.f32 %v8378_v38, %v8378_v38  ;;  %v4607_v23 = vmul.f32 %v8382_v43, %v8382_v43  ;;  %v4608_v46 = vmul.f32 %v8386_v47, %v8386_v47  ;;  %v4609_v35 = vmul.f32 %v8394_v6, %v8394_v6 }
 0x6d5   :  { %v4610_v30 = vmul.f32 %v8398_v40, %v8398_v40  ;;  %v4611_v36 = vmul.f32 %v8404_v55, %v8404_v55  ;;  %v8422_v20 = vsub.f32 %v8242_v3, %v8374_v33  ;;  %v4612_v5 = vmul.f32 %v8410_v26, %v8410_v26 }
 0x6d6   :  { %v4638_v48 = vadd.f32 %v4607_v23, %v4606_v51  ;;  %v8428_v18 = vsub.f32 %v8247_v8, %v8374_v33  ;;  %v4613_v31 = vmul.f32 %v8416_v44, %v8416_v44  ;;  %v8434_v39 = vsub.f32 %v8270_v12, %v8374_v33 }
 0x6d7   :  { %v4614_v3 = vmul.f32 %v8422_v20, %v8422_v20  ;;  %v8440_v14 = vsub.f32 %v9498_v34, %v8374_v33  ;;  %v8446_v7 = vsub.f32 %v9499_v54, %v8374_v33  ;;  %v8452_v52 = vsub.f32 %v9500_v19, %v8374_v33 }
 0x6d8   :  { %v4639_v2 = vadd.f32 %v4638_v48, %v4608_v46  ;;  %v4615_v8 = vmul.f32 %v8428_v18, %v8428_v18  ;;  %v4616_v12 = vmul.f32 %v8434_v39, %v8434_v39  ;;  %v8458_v59 = vsub.f32 %v8305_v0, %v8374_v33 }
 0x6d9   :  { %v4617_v10 = vmul.f32 %v8440_v14, %v8440_v14  ;;  %v4618_v9 = vmul.f32 %v8446_v7, %v8446_v7  ;;  %v8464_v60 = vsub.f32 %v9501_v42, %v8374_v33  ;;  %v4619_v24 = vmul.f32 %v8452_v52, %v8452_v52 }
 0x6da   :  { %v4640_v13 = vadd.f32 %v4639_v2, %v4609_v35  ;;  %v8470_v23 = vsub.f32 %v8309_v63, %v8374_v33  ;;  %v4620_v0 = vmul.f32 %v8458_v59, %v8458_v59  ;;  %v8476_v48 = vsub.f32 %v8311_v56, %v8374_v33 }
 0x6db   :  { %v4621_v35 = vmul.f32 %v8464_v60, %v8464_v60  ;;  %v8512_v34 = vsub.f32 %v8345_v61, %v8374_v33  ;;  %v8530_v19 = vsub.f32 %v8354_v15, %v8374_v33 }
 0x6dc   :  { %v4641_v50 = vadd.f32 %v4640_v13, %v4610_v30  ;;  %v8482_v30 = vsub.f32 %v8313_v57, %v8374_v33  ;;  %v4622_v63 = vmul.f32 %v8470_v23, %v8470_v23  ;;  %v4623_v56 = vmul.f32 %v8476_v48, %v8476_v48 }
 0x6dd   :  { %v4629_v61 = vmul.f32 %v8512_v34, %v8512_v34  ;;  %v4632_v15 = vmul.f32 %v8530_v19, %v8530_v19 }
 0x6de   :  { %v4642_v45 = vadd.f32 %v4641_v50, %v4611_v36  ;;  %v8488_v36 = vsub.f32 %v8315_v16, %v8374_v33  ;;  %v4624_v57 = vmul.f32 %v8482_v30, %v8482_v30 }
 0x6e0   :  { %v4643_v37 = vadd.f32 %v4642_v45, %v4612_v5  ;;  %v8494_v5 = vsub.f32 %v8317_v21, %v8374_v33  ;;  %v4625_v16 = vmul.f32 %v8488_v36, %v8488_v36 }
 0x6e2   :  { %v4644_v58 = vadd.f32 %v4643_v37, %v4613_v31  ;;  %v8500_v31 = vsub.f32 %v8339_v27, %v8374_v33  ;;  %v4626_v21 = vmul.f32 %v8494_v5, %v8494_v5 }
 0x6e4   :  { %v4645_v53 = vadd.f32 %v4644_v58, %v4614_v3  ;;  %v8506_v3 = vsub.f32 %v8342_v32, %v8374_v33  ;;  %v4627_v27 = vmul.f32 %v8500_v31, %v8500_v31 }
 0x6e6   :  { %v4646_v11 = vadd.f32 %v4645_v53, %v4615_v8  ;;  %v8518_v53 = vsub.f32 %v8348_v49, %v8374_v33  ;;  %v4628_v32 = vmul.f32 %v8506_v3, %v8506_v3 }
 0x6e8   :  { %v4647_v62 = vadd.f32 %v4646_v11, %v4616_v12  ;;  %v8524_v12 = vsub.f32 %v8351_v29, %v8374_v33  ;;  %v4630_v49 = vmul.f32 %v8518_v53, %v8518_v53 }
 0x6ea   :  { %v4648_v25 = vadd.f32 %v4647_v62, %v4617_v10  ;;  %v8536_v62 = vsub.f32 %v8357_v4, %v8374_v33  ;;  %v4631_v29 = vmul.f32 %v8524_v12, %v8524_v12 }
 0x6ec   :  { %v4649_v51 = vadd.f32 %v4648_v25, %v4618_v9  ;;  %v8542_v25 = vsub.f32 %v8360_v22, %v8374_v33  ;;  %v4633_v4 = vmul.f32 %v8536_v62, %v8536_v62 }
 0x6ee   :  { %v4650_v46 = vadd.f32 %v4649_v51, %v4619_v24  ;;  %v8548_v24 = vsub.f32 %v8363_v28, %v8374_v33  ;;  %v4634_v22 = vmul.f32 %v8542_v25, %v8542_v25 }
 0x6f0   :  { %v4651_v2 = vadd.f32 %v4650_v46, %v4620_v0  ;;  %v8554_v0 = vsub.f32 %v8366_v41, %v8374_v33 }
 0x6f2   :  { %v4652_v13 = vadd.f32 %v4651_v2, %v4621_v35  ;;  %v4605_v35 = vsub.f32 %v8370_v17, %v8374_v33  ;;  %v4635_v2 = vmul.f32 %v8548_v24, %v8548_v24 }
 0x6f4   :  { %v4653_v50 = vadd.f32 %v4652_v13, %v4622_v63  ;;  %v4636_v63 = vmul.f32 %v8554_v0, %v8554_v0 }
 0x6f6   :  { %v4654_v45 = vadd.f32 %v4653_v50, %v4623_v56  ;;  %v4637_v56 = vmul.f32 %v4605_v35, %v4605_v35 }
 0x6f8   :  { %v4655_v37 = vadd.f32 %v4654_v45, %v4624_v57 }
 0x6fa   :  { %v4656_v58 = vadd.f32 %v4655_v37, %v4625_v16 }
 0x6fc   :  { %v4657_v8 = vadd.f32 %v4656_v58, %v4626_v21 }
 0x6fe   :  { %v4658_v54 = vadd.f32 %v4657_v8, %v4627_v27 }
 0x700   :  { %v4659_v11 = vadd.f32 %v4658_v54, %v4628_v32 }
 0x702   :  { %v4660_v10 = vadd.f32 %v4659_v11, %v4629_v61  ;;  %v4676_v11 = vld [vmem:[%s8677_s4] sm:$0x1] }
 0x704   :  { %v4661_v9 = vadd.f32 %v4660_v10, %v4630_v49 }
 0x706   :  { %v4662_v42 = vadd.f32 %v4661_v9, %v4631_v29 }
 0x708   :  { %v4663_v51 = vadd.f32 %v4662_v42, %v4632_v15 }
 0x70a   :  { %v4664_v46 = vadd.f32 %v4663_v51, %v4633_v4 }
 0x70c   :  { %v4665_v28 = vadd.f32 %v4664_v46, %v4634_v22 }
 0x70e   :  { %v4666_v13 = vadd.f32 %v4665_v28, %v4635_v2 }
 0x710   :  { %v4667_v50 = vadd.f32 %v4666_v13, %v4636_v63 }
 0x712   :  { %v4668_v57 = vadd.f32 %v4667_v50, %v4637_v56 }
 0x714   :  { %v4669_v41 = vrot.slane %v4668_v57, 4 }
 0x716   :  { %v4670_v45 = vadd.f32 %v4669_v41, %v4668_v57 }
 0x718   :  { %v4671_v16 = vrot.slane %v4670_v45, 2 }
 0x71a   :  { %v4672_v37 = vadd.f32 %v4671_v16, %v4670_v45 }
 0x71c   :  { %v4673_v21 = vrot.slane %v4672_v37, 1 }
 0x71e   :  { %v4674_v58 = vadd.f32 %v4673_v21, %v4672_v37 }
 0x720   :  { %v4675_v27 = vmul.f32 %v4674_v58, %v9497_v1  ;;  %v8571_v1 = vld [vmem:[%s8677_s4 + $0x1] ss:$0 sm:$0xff]  ;;  %s6091_s4 = smov [#allocation10]  }
 0x721   :  { %s4792_s17 = sshll.u32 %s6091_s4, 4  ;;  %s4793_s17 = int_to_ptr.vmem [resolvable:$true] %s4792_s17 }
 0x722   :  { %v4677_v17 = vadd.f32 1e-05, %v4675_v27 }
 0x724   :  { %5952 = vrsqrt.f32 %v4677_v17  ;;  %vm4684_vm1 = vweird.f32 %v4677_v17 }
 0x72a   :  { %v5953_v33 = vpop.eup %5952 }
 0x72b   :  { %v4679_v8 = vmul.f32 %v5953_v33, %v4677_v17  ;;  %vm4685_vm0 = vweird.f32 %v5953_v33 }
 0x72c   :  { %vm4686_vm2 = vmor %vm4684_vm1, %vm4685_vm0 }
 0x72d   :  { %v4680_v32 = vmul.f32 %v5953_v33, %v4679_v8 }
 0x72f   :  { %v4681_v54 = vmul.f32 0.5, %v4680_v32 }
 0x731   :  { %v4682_v61 = vsub.f32 1.5, %v4681_v54 }
 0x733   :  { %v4683_v49 = vmul.f32 %v5953_v33, %v4682_v61 }
 0x735   :  { %v4687_v10 = vsel %vm4686_vm2, %v5953_v33, %v4683_v49 }
 0x736   :  { %v4688_v29 = vmul.f32 %v4687_v10, %v4676_v11 }
 0x738   :  { %v8573_v9 = vperm.slane %v4688_v29, 0 }
 0x73a   :  { %v4721_v15 = vmul.f32 %v8573_v9, %v4605_v35  ;;  %v4690_v4 = vmul.f32 %v8573_v9, %v8378_v38  ;;  %v4691_v51 = vmul.f32 %v8573_v9, %v8382_v43  ;;  %v4692_v22 = vmul.f32 %v8573_v9, %v8386_v47 }
 0x73b   :  { %v4693_v46 = vmul.f32 %v8573_v9, %v8394_v6  ;;  %v4694_v2 = vmul.f32 %v8573_v9, %v8398_v40  ;;  %v4695_v35 = vmul.f32 %v8573_v9, %v8404_v55  ;;  %v4696_v28 = vmul.f32 %v8573_v9, %v8410_v26 }
 0x73c   :  { %v4755_v42 = vadd.f32 %v8571_v1, %v4721_v15  ;;  %v4724_v38 = vadd.f32 %v8571_v1, %v4690_v4  ;;  %v4725_v63 = vadd.f32 %v8571_v1, %v4691_v51  ;;  %v4726_v43 = vadd.f32 %v8571_v1, %v4692_v22 }
 0x73d   :  { %v4697_v47 = vmul.f32 %v8573_v9, %v8416_v44  ;;  %v4727_v6 = vadd.f32 %v8571_v1, %v4693_v46  ;;  %v4698_v40 = vmul.f32 %v8573_v9, %v8422_v20  ;;  %v4728_v13 = vadd.f32 %v8571_v1, %v4694_v2 }
 0x73e   :  { %4787 = vst [vmem:[#allocation10 + $0xf8] sm:$0xff] %v4755_v42  ;;  %v4699_v55 = vmul.f32 %v8573_v9, %v8428_v18  ;;  %v4729_v26 = vadd.f32 %v8571_v1, %v4695_v35  ;;  %v4700_v56 = vmul.f32 %v8573_v9, %v8434_v39  ;;  %v4730_v50 = vadd.f32 %v8571_v1, %v4696_v28 }
 0x73f   :  { %4756 = vst [vmem:[#allocation10] sm:$0xff] %v4724_v38  ;;  %v4701_v44 = vmul.f32 %v8573_v9, %v8440_v14  ;;  %v4731_v20 = vadd.f32 %v8571_v1, %v4697_v47  ;;  %v4702_v57 = vmul.f32 %v8573_v9, %v8446_v7  ;;  %v4732_v18 = vadd.f32 %v8571_v1, %v4698_v40 }
 0x740   :  { %4757 = vst [vmem:[#allocation10 + $0x8] sm:$0xff] %v4725_v63  ;;  %v4703_v41 = vmul.f32 %v8573_v9, %v8452_v52  ;;  %v4733_v39 = vadd.f32 %v8571_v1, %v4699_v55  ;;  %v4704_v45 = vmul.f32 %v8573_v9, %v8458_v59  ;;  %v4734_v14 = vadd.f32 %v8571_v1, %v4700_v56 }
 0x741   :  { %4758 = vst [vmem:[#allocation10 + $0x10] sm:$0xff] %v4726_v43  ;;  %v4705_v16 = vmul.f32 %v8573_v9, %v8464_v60  ;;  %v4735_v7 = vadd.f32 %v8571_v1, %v4701_v44  ;;  %v4706_v37 = vmul.f32 %v8573_v9, %v8470_v23  ;;  %v4736_v52 = vadd.f32 %v8571_v1, %v4702_v57 }
 0x742   :  { %4759 = vst [vmem:[#allocation10 + $0x18] sm:$0xff] %v4727_v6  ;;  %v4707_v21 = vmul.f32 %v8573_v9, %v8476_v48  ;;  %v4737_v59 = vadd.f32 %v8571_v1, %v4703_v41  ;;  %v4708_v58 = vmul.f32 %v8573_v9, %v8482_v30  ;;  %v4738_v60 = vadd.f32 %v8571_v1, %v4704_v45 }
 0x743   :  { %4760 = vst [vmem:[#allocation10 + $0x20] sm:$0xff] %v4728_v13  ;;  %v4709_v27 = vmul.f32 %v8573_v9, %v8488_v36  ;;  %v4739_v23 = vadd.f32 %v8571_v1, %v4705_v16  ;;  %v4710_v17 = vmul.f32 %v8573_v9, %v8494_v5  ;;  %v4740_v48 = vadd.f32 %v8571_v1, %v4706_v37 }
 0x744   :  { %4761 = vst [vmem:[#allocation10 + $0x28] sm:$0xff] %v4729_v26  ;;  %v4711_v33 = vmul.f32 %v8573_v9, %v8500_v31  ;;  %v4741_v30 = vadd.f32 %v8571_v1, %v4707_v21  ;;  %v4712_v8 = vmul.f32 %v8573_v9, %v8506_v3  ;;  %v4742_v36 = vadd.f32 %v8571_v1, %v4708_v58 }
 0x745   :  { %4762 = vst [vmem:[#allocation10 + $0x30] sm:$0xff] %v4730_v50  ;;  %v4713_v32 = vmul.f32 %v8573_v9, %v8512_v34  ;;  %v4743_v5 = vadd.f32 %v8571_v1, %v4709_v27  ;;  %v4714_v54 = vmul.f32 %v8573_v9, %v8518_v53  ;;  %v4744_v31 = vadd.f32 %v8571_v1, %v4710_v17 }
 0x746   :  { %4763 = vst [vmem:[#allocation10 + $0x38] sm:$0xff] %v4731_v20  ;;  %v4715_v61 = vmul.f32 %v8573_v9, %v8524_v12  ;;  %v4745_v3 = vadd.f32 %v8571_v1, %v4711_v33  ;;  %v4716_v11 = vmul.f32 %v8573_v9, %v8530_v19  ;;  %v4746_v34 = vadd.f32 %v8571_v1, %v4712_v8 }
 0x747   :  { %4764 = vst [vmem:[#allocation10 + $0x40] sm:$0xff] %v4732_v18  ;;  %v4717_v49 = vmul.f32 %v8573_v9, %v8536_v62  ;;  %v4747_v53 = vadd.f32 %v8571_v1, %v4713_v32  ;;  %v4718_v10 = vmul.f32 %v8573_v9, %v8542_v25  ;;  %v4748_v12 = vadd.f32 %v8571_v1, %v4714_v54 }
 0x748   :  { %4765 = vst [vmem:[#allocation10 + $0x48] sm:$0xff] %v4733_v39  ;;  %v4719_v29 = vmul.f32 %v8573_v9, %v8548_v24  ;;  %v4749_v19 = vadd.f32 %v8571_v1, %v4715_v61  ;;  %v4720_v15 = vmul.f32 %v8573_v9, %v8554_v0  ;;  %v4750_v62 = vadd.f32 %v8571_v1, %v4716_v11 }
 0x749   :  { %4766 = vst [vmem:[#allocation10 + $0x50] sm:$0xff] %v4734_v14  ;;  %v4751_v42 = vadd.f32 %v8571_v1, %v4717_v49  ;;  %v4752_v25 = vadd.f32 %v8571_v1, %v4718_v10 }
 0x74a   :  { %4767 = vst [vmem:[#allocation10 + $0x58] sm:$0xff] %v4735_v7  ;;  %v4753_v24 = vadd.f32 %v8571_v1, %v4719_v29  ;;  %v4754_v0 = vadd.f32 %v8571_v1, %v4720_v15 }
 0x74b   :  { %4768 = vst [vmem:[#allocation10 + $0x60] sm:$0xff] %v4736_v52 }
 0x74c   :  { %4769 = vst [vmem:[#allocation10 + $0x68] sm:$0xff] %v4737_v59 }
 0x74d   :  { %4770 = vst [vmem:[#allocation10 + $0x70] sm:$0xff] %v4738_v60 }
 0x74e   :  { %4771 = vst [vmem:[#allocation10 + $0x78] sm:$0xff] %v4739_v23 }
 0x74f   :  { %4772 = vst [vmem:[#allocation10 + $0x80] sm:$0xff] %v4740_v48 }
 0x750   :  { %4773 = vst [vmem:[#allocation10 + $0x88] sm:$0xff] %v4741_v30 }
 0x751   :  { %4774 = vst [vmem:[#allocation10 + $0x90] sm:$0xff] %v4742_v36 }
 0x752   :  { %4775 = vst [vmem:[#allocation10 + $0x98] sm:$0xff] %v4743_v5 }
 0x753   :  { %4776 = vst [vmem:[#allocation10 + $0xa0] sm:$0xff] %v4744_v31 }
 0x754   :  { %4777 = vst [vmem:[#allocation10 + $0xa8] sm:$0xff] %v4745_v3 }
 0x755   :  { %4778 = vst [vmem:[#allocation10 + $0xb0] sm:$0xff] %v4746_v34 }
 0x756   :  { %4779 = vst [vmem:[#allocation10 + $0xb8] sm:$0xff] %v4747_v53 }
 0x757   :  { %4780 = vst [vmem:[#allocation10 + $0xc0] sm:$0xff] %v4748_v12 }
 0x758   :  { %4781 = vst [vmem:[#allocation10 + $0xc8] sm:$0xff] %v4749_v19 }
 0x759   :  { %4782 = vst [vmem:[#allocation10 + $0xd0] sm:$0xff] %v4750_v62 }
 0x75a   :  { %4783 = vst [vmem:[#allocation10 + $0xd8] sm:$0xff] %v4751_v42 }
 0x75b   :  { %4784 = vst [vmem:[#allocation10 + $0xe0] sm:$0xff] %v4752_v25 }
 0x75c   :  { %4785 = vst [vmem:[#allocation10 + $0xe8] sm:$0xff] %v4753_v24 }
 0x75d   :  { %4786 = vst [vmem:[#allocation10 + $0xf0] sm:$0xff] %v4754_v0 }
 0x75e   :  { %4800 = dma.vmem_to_hbm [thread:$0]  %s4793_s17, 4096, %s4795_s20, [#allocation4], %s6092_s21, %s6092_s21, %s6093_s22  }
 0x75f   :  { %6080 = dma.done.wait [#allocation4], 4096  }
 0x760   :  { %6081 = vsyncadd [#allocation4], 4294963200 }
 0x761   :  { %4805 = vsyncpa [#allocation3], 1 }
 0x762   :  { %4806 = vsyncpa [#allocation6], 1 }
 0x763   :  { %4807 = vsyncpa [#allocation9], 1 }
 0x764   :  { %4808 = vsyncpa [#allocation4], 1 }

</bundles_post_ra>
